<compile_context>
chip_gen: v5e
topology: v5e:2x2
jax: 0.10.0
libtpu: 0.0.40
codegen_flags: <defaults>
</compile_context>

<pallas_src>
import functools
import math

import jax
import jax.numpy as jnp
from jax.experimental import pallas as pl
from jax.experimental.pallas import tpu as pltpu

_LANE = 128
_EPS = 1e-5


# ------------------------------ in-kernel helpers ----------------------------

def _normalize(x):
    """LayerNorm normalization (no affine) over the last dim, eps=1e-5."""
    mu = jnp.mean(x, axis=-1, keepdims=True)
    xc = x - mu
    var = jnp.mean(xc * xc, axis=-1, keepdims=True)
    return xc * jax.lax.rsqrt(var + _EPS)


def _ln(x, g, b):
    """Full LayerNorm (normalization + affine); g/b are (1, D) rows."""
    return _normalize(x) * g + b


def _erf_poly(x):
    # Abramowitz & Stegun 7.1.26 (|err| < 1.5e-7): exp + polynomial only,
    # guaranteed to lower in Mosaic.  Used only if lax.erf has no lowering.
    p = 0.3275911
    a1, a2, a3, a4, a5 = (0.254829592, -0.284496736, 1.421413741,
                          -1.453152027, 1.061405429)
    ax = jnp.abs(x)
    t = 1.0 / (1.0 + p * ax)
    y = 1.0 - ((((a5 * t + a4) * t + a3) * t + a2) * t + a1) * t * jnp.exp(-ax * ax)
    return jnp.where(x >= 0, y, -y)


def _gelu_exact(x, use_lax_erf):
    erf = jax.lax.erf if use_lax_erf else _erf_poly
    return 0.5 * x * (1.0 + erf(x * (1.0 / math.sqrt(2.0))))


def _multihead_attention(q, k, v, ctx_ref, wo, bo, out_g, out_b, *, n_heads):
    """q,k,v: (N, Lq/Lk, D) already projected.  Returns norm_out(o_proj(attn))."""
    N, Lq, D = q.shape
    dk = D // n_heads
    scale = 1.0 / math.sqrt(dk)
    for h in range(n_heads):                       # static unroll, batched over N
        sl = slice(h * dk, (h + 1) * dk)
        s = jnp.einsum('nqd,nkd->nqk', q[:, :, sl], k[:, :, sl],
                       preferred_element_type=jnp.float32) * scale
        s_max = jnp.max(s, axis=-1, keepdims=True)
        e = jnp.exp(s - s_max)
        attn = e / (jnp.sum(e, axis=-1, keepdims=True) + 1e-9)   # exact division
        attn = jnp.clip(attn, 1e-9, 1.0)                         # FullAttention clamp
        ctx_ref[:, :, sl] = jnp.einsum('nqk,nkd->nqd', attn, v[:, :, sl],
                                       preferred_element_type=jnp.float32)
    ctx = ctx_ref[...]                             # (N, Lq, D) merged heads
    wo_b = jnp.broadcast_to(wo, (N,) + wo.shape)
    out = jnp.einsum('nqv,nvd->nqd', ctx, wo_b,
                     preferred_element_type=jnp.float32) + bo
    return _ln(out, out_g, out_b)


# --------------------------- erf-in-kernel capability -------------------------

def _erf_probe_kernel(x_ref, o_ref):
    o_ref[...] = jax.lax.erf(x_ref[...])


def erf_lowers_in_pallas():
    """Probe whether lax.erf has a Mosaic lowering (exact GELU in-kernel)."""
    try:
        y = pl.pallas_call(
            _erf_probe_kernel,
            out_shape=jax.ShapeDtypeStruct((8, _LANE), jnp.float32),
        )(jnp.zeros((8, _LANE), jnp.float32))
        jax.block_until_ready(y)
        return True
    except Exception:
        return False


# ----------------------- fused TransformerLayer kernel ------------------------

def _transformer_layer_kernel(*refs, n_heads, with_embed, use_lax_erf):
    if with_embed:
        (x_ref, pe_ref, in_ln_ref, ln_ref, wqkv_ref, bqkv_ref, wo_ref, bo_ref,
         w1_ref, b1_ref, w2_ref, b2_ref, o_ref, ctx_ref) = refs
    else:
        (x_ref, ln_ref, wqkv_ref, bqkv_ref, wo_ref, bo_ref,
         w1_ref, b1_ref, w2_ref, b2_ref, o_ref, ctx_ref) = refs

    x = x_ref[...]                                           # (N, L, D)
    if with_embed:
        # clamp(token embedding) + positional encoding + input LayerNorm
        x = jnp.clip(x, -100.0, 100.0) + pe_ref[...]
        x = _ln(x, in_ln_ref[0:1], in_ln_ref[1:2])

    N, L, D = x.shape
    ln = ln_ref[...]                                         # (4, D)

    # ---- self attention: norm_q/k/v affines folded into wqkv -> shared LHS ----
    xhat = _normalize(x)
    wqkv_b = jnp.broadcast_to(wqkv_ref[...], (N, D, 3 * D))
    qkv = jnp.einsum('nld,ndf->nlf', xhat, wqkv_b,
                     preferred_element_type=jnp.float32) + bqkv_ref[...]
    attn_out = _multihead_attention(
        qkv[:, :, 0:D], qkv[:, :, D:2 * D], qkv[:, :, 2 * D:3 * D],
        ctx_ref, wo_ref[...], bo_ref[...], ln[0:1], ln[1:2], n_heads=n_heads)
    x = x + attn_out                                         # residual

    # ---- feed-forward: norm1 affine folded into w1 ----
    d_ff = w1_ref.shape[-1]
    h = jnp.einsum('nld,ndf->nlf', _normalize(x),
                   jnp.broadcast_to(w1_ref[...], (N, D, d_ff)),
                   preferred_element_type=jnp.float32) + b1_ref[...]
    h = _gelu_exact(h, use_lax_erf)
    ff = jnp.einsum('nlf,nfd->nld', h,
                    jnp.broadcast_to(w2_ref[...], (N, d_ff, D)),
                    preferred_element_type=jnp.float32) + b2_ref[...]
    out = _ln(ff + x, ln[2:3], ln[3:4])
    o_ref[...] = jnp.clip(out, -100.0, 100.0)                # post-layer clamp


def transformer_layer(p, x, *, n_heads, use_lax_erf, embed=None):
    """One fused TransformerLayer call.  x: (N, L, D).  embed=(pe_tiled, in_ln)
    fuses the clamp + positional-encoding + input_norm prologue (local layer 0)."""
    N, L, D = x.shape
    d_ff = p["w1"].shape[1]

    def full(shape):
        return pl.BlockSpec(shape, lambda i, _s=shape: (0,) * len(_s))

    in_specs = [full((N, L, D))]
    args = [x]
    if embed is not None:
        pe_tiled, in_ln = embed
        in_specs += [full((N, L, D)), full((2, D))]
        args += [pe_tiled, in_ln]
    in_specs += [full((4, D)), full((D, 3 * D)), full((1, 3 * D)),
                 full((D, D)), full((1, D)),
                 full((D, d_ff)), full((1, d_ff)),
                 full((d_ff, D)), full((1, D))]
    args += [p["ln"], p["wqkv"], p["bqkv"], p["wo"], p["bo"],
             p["w1"], p["b1"], p["w2"], p["b2"]]

    kernel = functools.partial(_transformer_layer_kernel, n_heads=n_heads,
                               with_embed=embed is not None,
                               use_lax_erf=use_lax_erf)
    return pl.pallas_call(
        kernel,
        out_shape=jax.ShapeDtypeStruct((N, L, D), jnp.float32),
        grid=(1,),
        in_specs=in_specs,
        out_specs=full((N, L, D)),
        scratch_shapes=[pltpu.VMEM((N, L, D), jnp.float32)],
        compiler_params=pltpu.CompilerParams(dimension_semantics=("arbitrary",)),
    )(*args)


# --------------------------- fused pooling kernel -----------------------------

def _pooling_kernel(x_ref, pre_ln_ref, q_ref, ln_ref, wqkv_ref, bqkv_ref,
                    wo_ref, bo_ref, o_ref, ctx_ref, *, n_heads):
    x = x_ref[...]                                           # (N, L, D)
    N, L, D = x.shape
    pre = pre_ln_ref[...]                                    # (4, D)
    x = _ln(x, pre[0:1], pre[1:2])                           # local_norm
    x = _ln(x, pre[2:3], pre[3:4])                           # PoolingLayer.norm

    wqkv = wqkv_ref[...]
    bqkv = bqkv_ref[...]
    ln = ln_ref[...]                                         # (2, D) out-norm

    # learned query shared by every block (norm_q affine folded into wq)
    q_raw = jnp.broadcast_to(q_ref[...], (N, 1, D))
    qp = jnp.einsum('nld,ndf->nlf', _normalize(q_raw),
                    jnp.broadcast_to(wqkv[:, 0:D], (N, D, D)),
                    preferred_element_type=jnp.float32) + bqkv[:, 0:D]
    # keys == values: one shared normalized LHS, one (D, 2D) projection
    kv = jnp.einsum('nld,ndf->nlf', _normalize(x),
                    jnp.broadcast_to(wqkv[:, D:3 * D], (N, D, 2 * D)),
                    preferred_element_type=jnp.float32) + bqkv[:, D:3 * D]
    pooled = _multihead_attention(qp, kv[:, :, 0:D], kv[:, :, D:2 * D],
                                  ctx_ref, wo_ref[...], bo_ref[...],
                                  ln[0:1], ln[1:2], n_heads=n_heads)
    o_ref[...] = jnp.clip(pooled, -100.0, 100.0)             # post-pooling clamp


def pooling_layer(p, pre_ln, x, *, n_heads):
    N, L, D = x.shape

    def full(shape):
        return pl.BlockSpec(shape, lambda i, _s=shape: (0,) * len(_s))

    return pl.pallas_call(
        functools.partial(_pooling_kernel, n_heads=n_heads),
        out_shape=jax.ShapeDtypeStruct((N, 1, D), jnp.float32),
        grid=(1,),
        in_specs=[full((N, L, D)), full((4, D)), full((1, 1, D)), full((2, D)),
                  full((D, 3 * D)), full((1, 3 * D)), full((D, D)), full((1, D))],
        out_specs=full((N, 1, D)),
        scratch_shapes=[pltpu.VMEM((N, 1, D), jnp.float32)],
        compiler_params=pltpu.CompilerParams(dimension_semantics=("arbitrary",)),
    )(x, pre_ln, p["query"], p["ln"], p["wqkv"], p["bqkv"], p["wo"], p["bo"])


# -------------------------------- logits kernel -------------------------------

def _logits_kernel(x_ref, w_ref, b_ref, o_ref):
    # output_norm affine folded into w/b -> just normalize, project, clamp.
    xhat = _normalize(x_ref[...])                            # (R, D)
    logits = jnp.dot(xhat, w_ref[...],
                     preferred_element_type=jnp.float32) + b_ref[...]
    o_ref[...] = jnp.clip(logits, -100.0, 100.0)             # lane-dense (R, Vp)


def output_logits(pooled2d, out_w, out_b):
    R, D = pooled2d.shape
    Vp = out_w.shape[1]

    def full(shape):
        return pl.BlockSpec(shape, lambda i, _s=shape: (0,) * len(_s))

    return pl.pallas_call(
        _logits_kernel,
        out_shape=jax.ShapeDtypeStruct((R, Vp), jnp.float32),
        grid=(1,),
        in_specs=[full((R, D)), full((D, Vp)), full((1, Vp))],
        out_specs=full((R, Vp)),
        compiler_params=pltpu.CompilerParams(dimension_semantics=("arbitrary",)),
    )(pooled2d, out_w, out_b)


# --------------------------------- model glue ---------------------------------

def hierarchical_transformer_fwd(params, tokens, *, n_heads, block_size,
                                 use_lax_erf):
    # TODO(synk): pad_mask / attention-mask path not implemented; forward is
    # exercised with pad_mask=None (the PyTorch code builds no mask then).
    B, S0 = tokens.shape
    pad = (-S0) % block_size
    if pad:
        tokens = jnp.pad(tokens, ((0, 0), (0, pad)), constant_values=0)
    S = S0 + pad
    nb = S // block_size
    V, D = params["tok_emb"].shape
    N = B * nb
    assert params["local_layers"], "expects >=1 local layer (embed prologue host)"

    # Token-embedding gather stays in XLA; the rest runs in 5 fused kernels.
    x = params["tok_emb"][tokens].reshape(N, block_size, D)
    pe = jnp.broadcast_to(params["pe"][:S].reshape(1, nb, block_size, D),
                          (B, nb, block_size, D)).reshape(N, block_size, D)

    # local layers (layer 0 fuses clamp + PE + input_norm prologue)
    x = transformer_layer(params["local_layers"][0], x, n_heads=n_heads,
                          use_lax_erf=use_lax_erf,
                          embed=(pe, params["in_ln"]))
    for lp in params["local_layers"][1:]:
        x = transformer_layer(lp, x, n_heads=n_heads, use_lax_erf=use_lax_erf)

    # local_norm + pooling.norm + pooling attention + clamp, fused
    pooled = pooling_layer(params["pooling"], params["mid_ln"], x,
                           n_heads=n_heads)
    pooled = pooled.reshape(B, nb, D)

    for gp in params["global_layers"]:
        pooled = transformer_layer(gp, pooled, n_heads=n_heads,
                                   use_lax_erf=use_lax_erf)

    # output_norm + vocab projection + clamp in one batched matmul
    logits = output_logits(pooled.reshape(B * nb, D),
                           params["out_w"], params["out_b"])
    logits = jnp.broadcast_to(logits.reshape(B, nb, 1, -1),
                              (B, nb, block_size, logits.shape[-1]))
    logits = logits.reshape(B, S, -1)
    return logits[:, :S0, :V]


# ------------------------- deterministic parameter init -----------------------

def _xavier(key, fan_in, fan_out, gain):
    bound = gain * math.sqrt(6.0 / (fan_in + fan_out))
    return jax.random.uniform(key, (fan_in, fan_out), jnp.float32, -bound, bound)


def _fold_ln(gamma, beta, w, b):
    """Fold  (xhat*gamma + beta) @ W + b   into   xhat @ W' + b'."""
    w_f = w * gamma[:, None]
    b_f = b + (beta @ w)[None, :]
    return w_f, b_f


def init_attention_params(key, d_model):
    ks = jax.random.split(key, 4)
    g = 1.0 / math.sqrt(2.0)
    wq = _xavier(ks[0], d_model, d_model, g)
    wk = _xavier(ks[1], d_model, d_model, g)
    wv = _xavier(ks[2], d_model, d_model, g)
    wo = _xavier(ks[3], d_model, d_model, g)
    ones = jnp.ones((d_model,), jnp.float32)
    zeros = jnp.zeros((d_model,), jnp.float32)
    zb = jnp.zeros((1, d_model), jnp.float32)
    wq, bq = _fold_ln(ones, zeros, wq, zb)        # norm_q affine folded
    wk, bk = _fold_ln(ones, zeros, wk, zb)        # norm_k affine folded
    wv, bv = _fold_ln(ones, zeros, wv, zb)        # norm_v affine folded
    return dict(wqkv=jnp.concatenate([wq, wk, wv], axis=1),     # (D, 3D)
                bqkv=jnp.concatenate([bq, bk, bv], axis=1),     # (1, 3D)
                wo=wo, bo=zb,
                out_g=ones[None], out_b=zeros[None])            # norm_out (explicit)


def init_transformer_layer(key, d_model, d_ff):
    k_attn, k1, k2 = jax.random.split(key, 3)
    attn = init_attention_params(k_attn, d_model)
    g = 1.0 / math.sqrt(2.0)
    ones = jnp.ones((d_model,), jnp.float32)
    zeros = jnp.zeros((d_model,), jnp.float32)
    w1 = _xavier(k1, d_model, d_ff, g)
    w2 = _xavier(k2, d_ff, d_model, g)
    w1, b1 = _fold_ln(ones, zeros, w1, jnp.zeros((1, d_ff), jnp.float32))  # norm1 folded
    return dict(
        ln=jnp.concatenate([attn["out_g"], attn["out_b"],
                            ones[None], zeros[None]], axis=0),   # attn-out + ffn norm2
        wqkv=attn["wqkv"], bqkv=attn["bqkv"], wo=attn["wo"], bo=attn["bo"],
        w1=w1, b1=b1, w2=w2, b2=jnp.zeros((1, d_model), jnp.float32),
    )


def init_pooling(key, d_model):
    k1, k2 = jax.random.split(key)
    attn = init_attention_params(k2, d_model)
    return dict(query=jax.random.normal(k1, (1, 1, d_model), jnp.float32) * 0.02,
                ln=jnp.concatenate([attn["out_g"], attn["out_b"]], axis=0),
                wqkv=attn["wqkv"], bqkv=attn["bqkv"],
                wo=attn["wo"], bo=attn["bo"])


def make_positional_encoding(max_len, d_model):
    position = jnp.arange(max_len, dtype=jnp.float32)[:, None]
    div_term = jnp.exp(jnp.arange(0, d_model, 2, dtype=jnp.float32)
                       * (-math.log(10000.0) / d_model))
    pe = jnp.zeros((max_len, d_model), jnp.float32)
    pe = pe.at[:, 0::2].set(jnp.sin(position * div_term))
    pe = pe.at[:, 1::2].set(jnp.cos(position * div_term))
    return pe


def init_params(key, vocab_size, d_model, d_ff, n_local, n_global, max_len):
    keys = jax.random.split(key, 3 + n_local + n_global)
    ones = jnp.ones((d_model,), jnp.float32)
    zeros = jnp.zeros((d_model,), jnp.float32)
    vp = ((vocab_size + _LANE - 1) // _LANE) * _LANE        # pad vocab to 128 lanes
    out_w = jax.random.normal(keys[1], (d_model, vocab_size), jnp.float32) * 0.02
    out_w = jnp.pad(out_w, ((0, 0), (0, vp - vocab_size)))
    out_w, out_b = _fold_ln(ones, zeros, out_w,
                            jnp.zeros((1, vp), jnp.float32))    # output_norm folded
    return dict(
        tok_emb=jax.random.normal(keys[0], (vocab_size, d_model), jnp.float32) * 0.02,
        pe=make_positional_encoding(max_len, d_model),
        in_ln=jnp.concatenate([ones[None], zeros[None]], axis=0),          # input_norm
        mid_ln=jnp.concatenate([ones[None], zeros[None],
                                ones[None], zeros[None]], axis=0),         # local+pool norms
        out_w=out_w, out_b=out_b,
        pooling=init_pooling(keys[2], d_model),
        local_layers=[init_transformer_layer(keys[3 + i], d_model, d_ff)
                      for i in range(n_local)],
        global_layers=[init_transformer_layer(keys[3 + n_local + i], d_model, d_ff)
                       for i in range(n_global)],
    )


# ------------------------------------ main ------------------------------------

if __name__ == "__main__":
    vocab_size, d_model, d_ff, n_heads = 50, 32, 64, 4
    n_local_layers, n_global_layers, block_size = 2, 1, 8
    batch, seq_len = 2, 16

    key = jax.random.PRNGKey(0)
    pkey, dkey = jax.random.split(key)
    params = init_params(pkey, vocab_size, d_model, d_ff,
                         n_local_layers, n_global_layers, max_len=128)
    tokens = jax.random.randint(dkey, (batch, seq_len), 0, vocab_size,
                                dtype=jnp.int32)

    use_lax_erf = erf_lowers_in_pallas()           # probed outside jit
    fwd = jax.jit(functools.partial(hierarchical_transformer_fwd,
                                    n_heads=n_heads, block_size=block_size,
                                    use_lax_erf=use_lax_erf))
    logits = fwd(params, tokens)
    jax.block_until_ready(logits)
    assert logits.shape == (batch, seq_len, vocab_size)
    assert bool(jnp.all(jnp.isfinite(logits)))
    print("KERNEL_OK")
</pallas_src>

<mosaic_0001>
module attributes {stable_mosaic.version = 11 : i64} {
  func.func @_erf_probe_kernel(%arg0: memref<8x128xf32, #tpu.memory_space<vmem>>, %arg1: memref<8x128xf32, #tpu.memory_space<vmem>>) attributes {dimension_semantics = [], scalar_prefetch = 0 : i64, scratch_operands = 0 : i64, tpu.core_type = #tpu.core_type<tc>} {
    %c0 = arith.constant 0 : index
    %c0_0 = arith.constant 0 : index
    %0 = vector.load %arg0[%c0, %c0_0] : memref<8x128xf32, #tpu.memory_space<vmem>>, vector<8x128xf32>
    %1 = math.erf %0 : vector<8x128xf32>
    %c0_1 = arith.constant 0 : index
    %c0_2 = arith.constant 0 : index
    %2 = vector.load %arg1[%c0_1, %c0_2] : memref<8x128xf32, #tpu.memory_space<vmem>>, vector<8x128xf32>
    tpu.vector_store %arg1[%c0_1, %c0_2], %1 {strides = array<i32>} : memref<8x128xf32, #tpu.memory_space<vmem>>, vector<8x128xf32>,
    return
  }
}

module attributes {stable_mosaic.version = 11 : i64} {
  func.func @_transformer_layer_kernel(%arg0: i32, %arg1: memref<4x8x32xf32, #tpu.memory_space<vmem>>, %arg2: memref<4x8x32xf32, #tpu.memory_space<vmem>>, %arg3: memref<2x32xf32, #tpu.memory_space<vmem>>, %arg4: memref<4x32xf32, #tpu.memory_space<vmem>>, %arg5: memref<32x96xf32, #tpu.memory_space<vmem>>, %arg6: memref<1x96xf32, #tpu.memory_space<vmem>>, %arg7: memref<32x32xf32, #tpu.memory_space<vmem>>, %arg8: memref<1x32xf32, #tpu.memory_space<vmem>>, %arg9: memref<32x64xf32, #tpu.memory_space<vmem>>, %arg10: memref<1x64xf32, #tpu.memory_space<vmem>>, %arg11: memref<64x32xf32, #tpu.memory_space<vmem>>, %arg12: memref<1x32xf32, #tpu.memory_space<vmem>>, %arg13: memref<4x8x32xf32, #tpu.memory_space<vmem>>, %arg14: memref<4x8x32xf32, #tpu.memory_space<vmem>>) attributes {dimension_semantics = [#tpu.dimension_semantics<arbitrary>], iteration_bounds = array<i64: 1>, scalar_prefetch = 0 : i64, scratch_operands = 1 : i64, tpu.core_type = #tpu.core_type<tc>, window_params = [{pipeline_mode = #tpu.pipeline_mode<synchronous>, transform_indices = @transform_0, window_bounds = array<i64: 4, 8, 32>}, {pipeline_mode = #tpu.pipeline_mode<synchronous>, transform_indices = @transform_1, window_bounds = array<i64: 4, 8, 32>}, {pipeline_mode = #tpu.pipeline_mode<synchronous>, transform_indices = @transform_2, window_bounds = array<i64: 2, 32>}, {pipeline_mode = #tpu.pipeline_mode<synchronous>, transform_indices = @transform_3, window_bounds = array<i64: 4, 32>}, {pipeline_mode = #tpu.pipeline_mode<synchronous>, transform_indices = @transform_4, window_bounds = array<i64: 32, 96>}, {pipeline_mode = #tpu.pipeline_mode<synchronous>, transform_indices = @transform_5, window_bounds = array<i64: 1, 96>}, {pipeline_mode = #tpu.pipeline_mode<synchronous>, transform_indices = @transform_6, window_bounds = array<i64: 32, 32>}, {pipeline_mode = #tpu.pipeline_mode<synchronous>, transform_indices = @transform_7, window_bounds = array<i64: 1, 32>}, {pipeline_mode = #tpu.pipeline_mode<synchronous>, transform_indices = @transform_8, window_bounds = array<i64: 32, 64>}, {pipeline_mode = #tpu.pipeline_mode<synchronous>, transform_indices = @transform_9, window_bounds = array<i64: 1, 64>}, {pipeline_mode = #tpu.pipeline_mode<synchronous>, transform_indices = @transform_10, window_bounds = array<i64: 64, 32>}, {pipeline_mode = #tpu.pipeline_mode<synchronous>, transform_indices = @transform_11, window_bounds = array<i64: 1, 32>}, {pipeline_mode = #tpu.pipeline_mode<synchronous>, transform_indices = @transform_12, window_bounds = array<i64: 4, 8, 32>}]} {
    %c0 = arith.constant 0 : index
    %c0_0 = arith.constant 0 : index
    %c0_1 = arith.constant 0 : index
    %0 = vector.load %arg1[%c0, %c0_0, %c0_1] : memref<4x8x32xf32, #tpu.memory_space<vmem>>, vector<4x8x32xf32>
    %cst = arith.constant -1.000000e+02 : f32
    %cst_2 = arith.constant 1.000000e+02 : f32
    %1 = vector.broadcast %cst : f32 to vector<4x8x32xf32>
    %2 = arith.maximumf %1, %0 : vector<4x8x32xf32>
    %3 = vector.broadcast %cst_2 : f32 to vector<4x8x32xf32>
    %4 = arith.minimumf %3, %2 : vector<4x8x32xf32>
    %c0_3 = arith.constant 0 : index
    %c0_4 = arith.constant 0 : index
    %c0_5 = arith.constant 0 : index
    %5 = vector.load %arg2[%c0_3, %c0_4, %c0_5] : memref<4x8x32xf32, #tpu.memory_space<vmem>>, vector<4x8x32xf32>
    %6 = arith.addf %4, %5 : vector<4x8x32xf32>
    %c0_6 = arith.constant 0 : index
    %c0_7 = arith.constant 0 : index
    %7 = vector.load %arg3[%c0_6, %c0_7] : memref<2x32xf32, #tpu.memory_space<vmem>>, vector<1x32xf32>
    %c1 = arith.constant 1 : index
    %c0_8 = arith.constant 0 : index
    %8 = vector.load %arg3[%c1, %c0_8] : memref<2x32xf32, #tpu.memory_space<vmem>>, vector<1x32xf32>
    %cst_9 = arith.constant dense<0.000000e+00> : vector<4x8xf32>
    %9 = vector.multi_reduction <add>, %6, %cst_9 [2] : vector<4x8x32xf32> to vector<4x8xf32>
    %10 = vector.shape_cast %9 : vector<4x8xf32> to vector<4x8x1xf32>
    %cst_10 = arith.constant 3.200000e+01 : f32
    %11 = vector.broadcast %cst_10 : f32 to vector<4x8x1xf32>
    %12 = arith.divf %10, %11 : vector<4x8x1xf32>
    %13 = vector.broadcast %12 : vector<4x8x1xf32> to vector<4x8x32xf32>
    %14 = arith.subf %6, %13 : vector<4x8x32xf32>
    %15 = arith.mulf %14, %14 : vector<4x8x32xf32>
    %cst_11 = arith.constant dense<0.000000e+00> : vector<4x8xf32>
    %16 = vector.multi_reduction <add>, %15, %cst_11 [2] : vector<4x8x32xf32> to vector<4x8xf32>
    %17 = vector.shape_cast %16 : vector<4x8xf32> to vector<4x8x1xf32>
    %cst_12 = arith.constant 3.200000e+01 : f32
    %18 = vector.broadcast %cst_12 : f32 to vector<4x8x1xf32>
    %19 = arith.divf %17, %18 : vector<4x8x1xf32>
    %cst_13 = arith.constant 9.99999974E-6 : f32
    %20 = vector.broadcast %cst_13 : f32 to vector<4x8x1xf32>
    %21 = arith.addf %19, %20 : vector<4x8x1xf32>
    %22 = math.rsqrt %21 : vector<4x8x1xf32>
    %23 = vector.broadcast %22 : vector<4x8x1xf32> to vector<4x8x32xf32>
    %24 = arith.mulf %14, %23 : vector<4x8x32xf32>
    %25 = vector.shape_cast %7 : vector<1x32xf32> to vector<1x1x32xf32>
    %26 = vector.broadcast %25 : vector<1x1x32xf32> to vector<4x8x32xf32>
    %27 = arith.mulf %24, %26 : vector<4x8x32xf32>
    %28 = vector.shape_cast %8 : vector<1x32xf32> to vector<1x1x32xf32>
    %29 = vector.broadcast %28 : vector<1x1x32xf32> to vector<4x8x32xf32>
    %30 = arith.addf %27, %29 : vector<4x8x32xf32>
    %c0_14 = arith.constant 0 : index
    %c0_15 = arith.constant 0 : index
    %31 = vector.load %arg4[%c0_14, %c0_15] : memref<4x32xf32, #tpu.memory_space<vmem>>, vector<4x32xf32>
    %cst_16 = arith.constant dense<0.000000e+00> : vector<4x8xf32>
    %32 = vector.multi_reduction <add>, %30, %cst_16 [2] : vector<4x8x32xf32> to vector<4x8xf32>
    %33 = vector.shape_cast %32 : vector<4x8xf32> to vector<4x8x1xf32>
    %cst_17 = arith.constant 3.200000e+01 : f32
    %34 = vector.broadcast %cst_17 : f32 to vector<4x8x1xf32>
    %35 = arith.divf %33, %34 : vector<4x8x1xf32>
    %36 = vector.broadcast %35 : vector<4x8x1xf32> to vector<4x8x32xf32>
    %37 = arith.subf %30, %36 : vector<4x8x32xf32>
    %38 = arith.mulf %37, %37 : vector<4x8x32xf32>
    %cst_18 = arith.constant dense<0.000000e+00> : vector<4x8xf32>
    %39 = vector.multi_reduction <add>, %38, %cst_18 [2] : vector<4x8x32xf32> to vector<4x8xf32>
    %40 = vector.shape_cast %39 : vector<4x8xf32> to vector<4x8x1xf32>
    %cst_19 = arith.constant 3.200000e+01 : f32
    %41 = vector.broadcast %cst_19 : f32 to vector<4x8x1xf32>
    %42 = arith.divf %40, %41 : vector<4x8x1xf32>
    %cst_20 = arith.constant 9.99999974E-6 : f32
    %43 = vector.broadcast %cst_20 : f32 to vector<4x8x1xf32>
    %44 = arith.addf %42, %43 : vector<4x8x1xf32>
    %45 = math.rsqrt %44 : vector<4x8x1xf32>
    %46 = vector.broadcast %45 : vector<4x8x1xf32> to vector<4x8x32xf32>
    %47 = arith.mulf %37, %46 : vector<4x8x32xf32>
    %c0_21 = arith.constant 0 : index
    %c0_22 = arith.constant 0 : index
    %48 = vector.load %arg5[%c0_21, %c0_22] : memref<32x96xf32, #tpu.memory_space<vmem>>, vector<32x96xf32>
    %49 = vector.shape_cast %48 : vector<32x96xf32> to vector<1x32x96xf32>
    %50 = vector.broadcast %49 : vector<1x32x96xf32> to vector<4x32x96xf32>
    "tpu.trace_start"() <{level = 10 : i32, message = "nld,ndf->nlf"}> : () -> ()
    %cst_23 = arith.constant dense<0.000000e+00> : vector<4x8x96xf32>
    %51 = tpu.matmul %47, %50, %cst_23 {dimension_numbers = #tpu.dot_dimension_numbers<[2], [1], [1], [2], [0, 0, 0, 1, 1, 2], [0], [0]>} : vector<4x8x32xf32>, vector<4x32x96xf32>, vector<4x8x96xf32> -> vector<4x8x96xf32>
    "tpu.trace_stop"() : () -> ()
    %c0_24 = arith.constant 0 : index
    %c0_25 = arith.constant 0 : index
    %52 = vector.load %arg6[%c0_24, %c0_25] : memref<1x96xf32, #tpu.memory_space<vmem>>, vector<1x96xf32>
    %53 = vector.shape_cast %52 : vector<1x96xf32> to vector<1x1x96xf32>
    %54 = vector.broadcast %53 : vector<1x1x96xf32> to vector<4x8x96xf32>
    %55 = arith.addf %51, %54 : vector<4x8x96xf32>
    %56 = vector.extract_strided_slice %55 {offsets = [0, 0, 0], sizes = [4, 8, 32], strides = [1, 1, 1]} : vector<4x8x96xf32> to vector<4x8x32xf32>
    %57 = vector.extract_strided_slice %55 {offsets = [0, 0, 32], sizes = [4, 8, 32], strides = [1, 1, 1]} : vector<4x8x96xf32> to vector<4x8x32xf32>
    %58 = vector.extract_strided_slice %55 {offsets = [0, 0, 64], sizes = [4, 8, 32], strides = [1, 1, 1]} : vector<4x8x96xf32> to vector<4x8x32xf32>
    %c0_26 = arith.constant 0 : index
    %c0_27 = arith.constant 0 : index
    %59 = vector.load %arg7[%c0_26, %c0_27] : memref<32x32xf32, #tpu.memory_space<vmem>>, vector<32x32xf32>
    %c0_28 = arith.constant 0 : index
    %c0_29 = arith.constant 0 : index
    %60 = vector.load %arg8[%c0_28, %c0_29] : memref<1x32xf32, #tpu.memory_space<vmem>>, vector<1x32xf32>
    %61 = vector.extract_strided_slice %31 {offsets = [0, 0], sizes = [1, 32], strides = [1, 1]} : vector<4x32xf32> to vector<1x32xf32>
    %62 = vector.extract_strided_slice %31 {offsets = [1, 0], sizes = [1, 32], strides = [1, 1]} : vector<4x32xf32> to vector<1x32xf32>
    %63 = vector.extract_strided_slice %56 {offsets = [0, 0, 0], sizes = [4, 8, 8], strides = [1, 1, 1]} : vector<4x8x32xf32> to vector<4x8x8xf32>
    %64 = vector.extract_strided_slice %57 {offsets = [0, 0, 0], sizes = [4, 8, 8], strides = [1, 1, 1]} : vector<4x8x32xf32> to vector<4x8x8xf32>
    "tpu.trace_start"() <{level = 10 : i32, message = "nqd,nkd->nqk"}> : () -> ()
    %cst_30 = arith.constant dense<0.000000e+00> : vector<4x8x8xf32>
    %65 = tpu.matmul %63, %64, %cst_30 {dimension_numbers = #tpu.dot_dimension_numbers<[2], [2], [1], [1], [0, 0, 0, 1, 1, 1], [0], [0]>} : vector<4x8x8xf32>, vector<4x8x8xf32>, vector<4x8x8xf32> -> vector<4x8x8xf32>
    "tpu.trace_stop"() : () -> ()
    %cst_31 = arith.constant 0.353553385 : f32
    %66 = vector.broadcast %cst_31 : f32 to vector<4x8x8xf32>
    %67 = arith.mulf %65, %66 : vector<4x8x8xf32>
    %cst_32 = arith.constant dense<0xFF800000> : vector<4x8xf32>
    %68 = vector.multi_reduction <maximumf>, %67, %cst_32 [2] : vector<4x8x8xf32> to vector<4x8xf32>
    %69 = vector.shape_cast %68 : vector<4x8xf32> to vector<4x8x1xf32>
    %70 = vector.broadcast %69 : vector<4x8x1xf32> to vector<4x8x8xf32>
    %71 = arith.subf %67, %70 : vector<4x8x8xf32>
    %72 = math.exp %71 : vector<4x8x8xf32>
    %cst_33 = arith.constant dense<0.000000e+00> : vector<4x8xf32>
    %73 = vector.multi_reduction <add>, %72, %cst_33 [2] : vector<4x8x8xf32> to vector<4x8xf32>
    %74 = vector.shape_cast %73 : vector<4x8xf32> to vector<4x8x1xf32>
    %cst_34 = arith.constant 9.99999971E-10 : f32
    %75 = vector.broadcast %cst_34 : f32 to vector<4x8x1xf32>
    %76 = arith.addf %74, %75 : vector<4x8x1xf32>
    %77 = vector.broadcast %76 : vector<4x8x1xf32> to vector<4x8x8xf32>
    %78 = arith.divf %72, %77 : vector<4x8x8xf32>
    %cst_35 = arith.constant 9.99999971E-10 : f32
    %cst_36 = arith.constant 1.000000e+00 : f32
    %79 = vector.broadcast %cst_35 : f32 to vector<4x8x8xf32>
    %80 = arith.maximumf %79, %78 : vector<4x8x8xf32>
    %81 = vector.broadcast %cst_36 : f32 to vector<4x8x8xf32>
    %82 = arith.minimumf %81, %80 : vector<4x8x8xf32>
    %83 = vector.extract_strided_slice %58 {offsets = [0, 0, 0], sizes = [4, 8, 8], strides = [1, 1, 1]} : vector<4x8x32xf32> to vector<4x8x8xf32>
    "tpu.trace_start"() <{level = 10 : i32, message = "nqk,nkd->nqd"}> : () -> ()
    %cst_37 = arith.constant dense<0.000000e+00> : vector<4x8x8xf32>
    %84 = tpu.matmul %82, %83, %cst_37 {dimension_numbers = #tpu.dot_dimension_numbers<[2], [1], [1], [2], [0, 0, 0, 1, 1, 2], [0], [0]>} : vector<4x8x8xf32>, vector<4x8x8xf32>, vector<4x8x8xf32> -> vector<4x8x8xf32>
    "tpu.trace_stop"() : () -> ()
    %c0_38 = arith.constant 0 : index
    %c0_39 = arith.constant 0 : index
    %c0_40 = arith.constant 0 : index
    %85 = vector.load %arg14[%c0_38, %c0_39, %c0_40] : memref<4x8x32xf32, #tpu.memory_space<vmem>>, vector<4x8x8xf32>
    tpu.vector_store %arg14[%c0_38, %c0_39, %c0_40], %84 {strides = array<i32>} : memref<4x8x32xf32, #tpu.memory_space<vmem>>, vector<4x8x8xf32>,
    %86 = vector.extract_strided_slice %56 {offsets = [0, 0, 8], sizes = [4, 8, 8], strides = [1, 1, 1]} : vector<4x8x32xf32> to vector<4x8x8xf32>
    %87 = vector.extract_strided_slice %57 {offsets = [0, 0, 8], sizes = [4, 8, 8], strides = [1, 1, 1]} : vector<4x8x32xf32> to vector<4x8x8xf32>
    "tpu.trace_start"() <{level = 10 : i32, message = "nqd,nkd->nqk"}> : () -> ()
    %cst_41 = arith.constant dense<0.000000e+00> : vector<4x8x8xf32>
    %88 = tpu.matmul %86, %87, %cst_41 {dimension_numbers = #tpu.dot_dimension_numbers<[2], [2], [1], [1], [0, 0, 0, 1, 1, 1], [0], [0]>} : vector<4x8x8xf32>, vector<4x8x8xf32>, vector<4x8x8xf32> -> vector<4x8x8xf32>
    "tpu.trace_stop"() : () -> ()
    %cst_42 = arith.constant 0.353553385 : f32
    %89 = vector.broadcast %cst_42 : f32 to vector<4x8x8xf32>
    %90 = arith.mulf %88, %89 : vector<4x8x8xf32>
    %cst_43 = arith.constant dense<0xFF800000> : vector<4x8xf32>
    %91 = vector.multi_reduction <maximumf>, %90, %cst_43 [2] : vector<4x8x8xf32> to vector<4x8xf32>
    %92 = vector.shape_cast %91 : vector<4x8xf32> to vector<4x8x1xf32>
    %93 = vector.broadcast %92 : vector<4x8x1xf32> to vector<4x8x8xf32>
    %94 = arith.subf %90, %93 : vector<4x8x8xf32>
    %95 = math.exp %94 : vector<4x8x8xf32>
    %cst_44 = arith.constant dense<0.000000e+00> : vector<4x8xf32>
    %96 = vector.multi_reduction <add>, %95, %cst_44 [2] : vector<4x8x8xf32> to vector<4x8xf32>
    %97 = vector.shape_cast %96 : vector<4x8xf32> to vector<4x8x1xf32>
    %cst_45 = arith.constant 9.99999971E-10 : f32
    %98 = vector.broadcast %cst_45 : f32 to vector<4x8x1xf32>
    %99 = arith.addf %97, %98 : vector<4x8x1xf32>
    %100 = vector.broadcast %99 : vector<4x8x1xf32> to vector<4x8x8xf32>
    %101 = arith.divf %95, %100 : vector<4x8x8xf32>
    %cst_46 = arith.constant 9.99999971E-10 : f32
    %cst_47 = arith.constant 1.000000e+00 : f32
    %102 = vector.broadcast %cst_46 : f32 to vector<4x8x8xf32>
    %103 = arith.maximumf %102, %101 : vector<4x8x8xf32>
    %104 = vector.broadcast %cst_47 : f32 to vector<4x8x8xf32>
    %105 = arith.minimumf %104, %103 : vector<4x8x8xf32>
    %106 = vector.extract_strided_slice %58 {offsets = [0, 0, 8], sizes = [4, 8, 8], strides = [1, 1, 1]} : vector<4x8x32xf32> to vector<4x8x8xf32>
    "tpu.trace_start"() <{level = 10 : i32, message = "nqk,nkd->nqd"}> : () -> ()
    %cst_48 = arith.constant dense<0.000000e+00> : vector<4x8x8xf32>
    %107 = tpu.matmul %105, %106, %cst_48 {dimension_numbers = #tpu.dot_dimension_numbers<[2], [1], [1], [2], [0, 0, 0, 1, 1, 2], [0], [0]>} : vector<4x8x8xf32>, vector<4x8x8xf32>, vector<4x8x8xf32> -> vector<4x8x8xf32>
    "tpu.trace_stop"() : () -> ()
    %c0_49 = arith.constant 0 : index
    %c0_50 = arith.constant 0 : index
    %c8 = arith.constant 8 : index
    %108 = vector.load %arg14[%c0_49, %c0_50, %c8] : memref<4x8x32xf32, #tpu.memory_space<vmem>>, vector<4x8x8xf32>
    tpu.vector_store %arg14[%c0_49, %c0_50, %c8], %107 {strides = array<i32>} : memref<4x8x32xf32, #tpu.memory_space<vmem>>, vector<4x8x8xf32>,
    %109 = vector.extract_strided_slice %56 {offsets = [0, 0, 16], sizes = [4, 8, 8], strides = [1, 1, 1]} : vector<4x8x32xf32> to vector<4x8x8xf32>
    %110 = vector.extract_strided_slice %57 {offsets = [0, 0, 16], sizes = [4, 8, 8], strides = [1, 1, 1]} : vector<4x8x32xf32> to vector<4x8x8xf32>
    "tpu.trace_start"() <{level = 10 : i32, message = "nqd,nkd->nqk"}> : () -> ()
    %cst_51 = arith.constant dense<0.000000e+00> : vector<4x8x8xf32>
    %111 = tpu.matmul %109, %110, %cst_51 {dimension_numbers = #tpu.dot_dimension_numbers<[2], [2], [1], [1], [0, 0, 0, 1, 1, 1], [0], [0]>} : vector<4x8x8xf32>, vector<4x8x8xf32>, vector<4x8x8xf32> -> vector<4x8x8xf32>
    "tpu.trace_stop"() : () -> ()
    %cst_52 = arith.constant 0.353553385 : f32
    %112 = vector.broadcast %cst_52 : f32 to vector<4x8x8xf32>
    %113 = arith.mulf %111, %112 : vector<4x8x8xf32>
    %cst_53 = arith.constant dense<0xFF800000> : vector<4x8xf32>
    %114 = vector.multi_reduction <maximumf>, %113, %cst_53 [2] : vector<4x8x8xf32> to vector<4x8xf32>
    %115 = vector.shape_cast %114 : vector<4x8xf32> to vector<4x8x1xf32>
    %116 = vector.broadcast %115 : vector<4x8x1xf32> to vector<4x8x8xf32>
    %117 = arith.subf %113, %116 : vector<4x8x8xf32>
    %118 = math.exp %117 : vector<4x8x8xf32>
    %cst_54 = arith.constant dense<0.000000e+00> : vector<4x8xf32>
    %119 = vector.multi_reduction <add>, %118, %cst_54 [2] : vector<4x8x8xf32> to vector<4x8xf32>
    %120 = vector.shape_cast %119 : vector<4x8xf32> to vector<4x8x1xf32>
    %cst_55 = arith.constant 9.99999971E-10 : f32
    %121 = vector.broadcast %cst_55 : f32 to vector<4x8x1xf32>
    %122 = arith.addf %120, %121 : vector<4x8x1xf32>
    %123 = vector.broadcast %122 : vector<4x8x1xf32> to vector<4x8x8xf32>
    %124 = arith.divf %118, %123 : vector<4x8x8xf32>
    %cst_56 = arith.constant 9.99999971E-10 : f32
    %cst_57 = arith.constant 1.000000e+00 : f32
    %125 = vector.broadcast %cst_56 : f32 to vector<4x8x8xf32>
    %126 = arith.maximumf %125, %124 : vector<4x8x8xf32>
    %127 = vector.broadcast %cst_57 : f32 to vector<4x8x8xf32>
    %128 = arith.minimumf %127, %126 : vector<4x8x8xf32>
    %129 = vector.extract_strided_slice %58 {offsets = [0, 0, 16], sizes = [4, 8, 8], strides = [1, 1, 1]} : vector<4x8x32xf32> to vector<4x8x8xf32>
    "tpu.trace_start"() <{level = 10 : i32, message = "nqk,nkd->nqd"}> : () -> ()
    %cst_58 = arith.constant dense<0.000000e+00> : vector<4x8x8xf32>
    %130 = tpu.matmul %128, %129, %cst_58 {dimension_numbers = #tpu.dot_dimension_numbers<[2], [1], [1], [2], [0, 0, 0, 1, 1, 2], [0], [0]>} : vector<4x8x8xf32>, vector<4x8x8xf32>, vector<4x8x8xf32> -> vector<4x8x8xf32>
    "tpu.trace_stop"() : () -> ()
    %c0_59 = arith.constant 0 : index
    %c0_60 = arith.constant 0 : index
    %c16 = arith.constant 16 : index
    %131 = vector.load %arg14[%c0_59, %c0_60, %c16] : memref<4x8x32xf32, #tpu.memory_space<vmem>>, vector<4x8x8xf32>
    tpu.vector_store %arg14[%c0_59, %c0_60, %c16], %130 {strides = array<i32>} : memref<4x8x32xf32, #tpu.memory_space<vmem>>, vector<4x8x8xf32>,
    %132 = vector.extract_strided_slice %56 {offsets = [0, 0, 24], sizes = [4, 8, 8], strides = [1, 1, 1]} : vector<4x8x32xf32> to vector<4x8x8xf32>
    %133 = vector.extract_strided_slice %57 {offsets = [0, 0, 24], sizes = [4, 8, 8], strides = [1, 1, 1]} : vector<4x8x32xf32> to vector<4x8x8xf32>
    "tpu.trace_start"() <{level = 10 : i32, message = "nqd,nkd->nqk"}> : () -> ()
    %cst_61 = arith.constant dense<0.000000e+00> : vector<4x8x8xf32>
    %134 = tpu.matmul %132, %133, %cst_61 {dimension_numbers = #tpu.dot_dimension_numbers<[2], [2], [1], [1], [0, 0, 0, 1, 1, 1], [0], [0]>} : vector<4x8x8xf32>, vector<4x8x8xf32>, vector<4x8x8xf32> -> vector<4x8x8xf32>
    "tpu.trace_stop"() : () -> ()
    %cst_62 = arith.constant 0.353553385 : f32
    %135 = vector.broadcast %cst_62 : f32 to vector<4x8x8xf32>
    %136 = arith.mulf %134, %135 : vector<4x8x8xf32>
    %cst_63 = arith.constant dense<0xFF800000> : vector<4x8xf32>
    %137 = vector.multi_reduction <maximumf>, %136, %cst_63 [2] : vector<4x8x8xf32> to vector<4x8xf32>
    %138 = vector.shape_cast %137 : vector<4x8xf32> to vector<4x8x1xf32>
    %139 = vector.broadcast %138 : vector<4x8x1xf32> to vector<4x8x8xf32>
    %140 = arith.subf %136, %139 : vector<4x8x8xf32>
    %141 = math.exp %140 : vector<4x8x8xf32>
    %cst_64 = arith.constant dense<0.000000e+00> : vector<4x8xf32>
    %142 = vector.multi_reduction <add>, %141, %cst_64 [2] : vector<4x8x8xf32> to vector<4x8xf32>
    %143 = vector.shape_cast %142 : vector<4x8xf32> to vector<4x8x1xf32>
    %cst_65 = arith.constant 9.99999971E-10 : f32
    %144 = vector.broadcast %cst_65 : f32 to vector<4x8x1xf32>
    %145 = arith.addf %143, %144 : vector<4x8x1xf32>
    %146 = vector.broadcast %145 : vector<4x8x1xf32> to vector<4x8x8xf32>
    %147 = arith.divf %141, %146 : vector<4x8x8xf32>
    %cst_66 = arith.constant 9.99999971E-10 : f32
    %cst_67 = arith.constant 1.000000e+00 : f32
    %148 = vector.broadcast %cst_66 : f32 to vector<4x8x8xf32>
    %149 = arith.maximumf %148, %147 : vector<4x8x8xf32>
    %150 = vector.broadcast %cst_67 : f32 to vector<4x8x8xf32>
    %151 = arith.minimumf %150, %149 : vector<4x8x8xf32>
    %152 = vector.extract_strided_slice %58 {offsets = [0, 0, 24], sizes = [4, 8, 8], strides = [1, 1, 1]} : vector<4x8x32xf32> to vector<4x8x8xf32>
    "tpu.trace_start"() <{level = 10 : i32, message = "nqk,nkd->nqd"}> : () -> ()
    %cst_68 = arith.constant dense<0.000000e+00> : vector<4x8x8xf32>
    %153 = tpu.matmul %151, %152, %cst_68 {dimension_numbers = #tpu.dot_dimension_numbers<[2], [1], [1], [2], [0, 0, 0, 1, 1, 2], [0], [0]>} : vector<4x8x8xf32>, vector<4x8x8xf32>, vector<4x8x8xf32> -> vector<4x8x8xf32>
    "tpu.trace_stop"() : () -> ()
    %c0_69 = arith.constant 0 : index
    %c0_70 = arith.constant 0 : index
    %c24 = arith.constant 24 : index
    %154 = vector.load %arg14[%c0_69, %c0_70, %c24] : memref<4x8x32xf32, #tpu.memory_space<vmem>>, vector<4x8x8xf32>
    tpu.vector_store %arg14[%c0_69, %c0_70, %c24], %153 {strides = array<i32>} : memref<4x8x32xf32, #tpu.memory_space<vmem>>, vector<4x8x8xf32>,
    %c0_71 = arith.constant 0 : index
    %c0_72 = arith.constant 0 : index
    %c0_73 = arith.constant 0 : index
    %155 = vector.load %arg14[%c0_71, %c0_72, %c0_73] : memref<4x8x32xf32, #tpu.memory_space<vmem>>, vector<4x8x32xf32>
    %156 = vector.shape_cast %59 : vector<32x32xf32> to vector<1x32x32xf32>
    %157 = vector.broadcast %156 : vector<1x32x32xf32> to vector<4x32x32xf32>
    "tpu.trace_start"() <{level = 10 : i32, message = "nqv,nvd->nqd"}> : () -> ()
    %cst_74 = arith.constant dense<0.000000e+00> : vector<4x8x32xf32>
    %158 = tpu.matmul %155, %157, %cst_74 {dimension_numbers = #tpu.dot_dimension_numbers<[2], [1], [1], [2], [0, 0, 0, 1, 1, 2], [0], [0]>} : vector<4x8x32xf32>, vector<4x32x32xf32>, vector<4x8x32xf32> -> vector<4x8x32xf32>
    "tpu.trace_stop"() : () -> ()
    %159 = vector.shape_cast %60 : vector<1x32xf32> to vector<1x1x32xf32>
    %160 = vector.broadcast %159 : vector<1x1x32xf32> to vector<4x8x32xf32>
    %161 = arith.addf %158, %160 : vector<4x8x32xf32>
    %cst_75 = arith.constant dense<0.000000e+00> : vector<4x8xf32>
    %162 = vector.multi_reduction <add>, %161, %cst_75 [2] : vector<4x8x32xf32> to vector<4x8xf32>
    %163 = vector.shape_cast %162 : vector<4x8xf32> to vector<4x8x1xf32>
    %cst_76 = arith.constant 3.200000e+01 : f32
    %164 = vector.broadcast %cst_76 : f32 to vector<4x8x1xf32>
    %165 = arith.divf %163, %164 : vector<4x8x1xf32>
    %166 = vector.broadcast %165 : vector<4x8x1xf32> to vector<4x8x32xf32>
    %167 = arith.subf %161, %166 : vector<4x8x32xf32>
    %168 = arith.mulf %167, %167 : vector<4x8x32xf32>
    %cst_77 = arith.constant dense<0.000000e+00> : vector<4x8xf32>
    %169 = vector.multi_reduction <add>, %168, %cst_77 [2] : vector<4x8x32xf32> to vector<4x8xf32>
    %170 = vector.shape_cast %169 : vector<4x8xf32> to vector<4x8x1xf32>
    %cst_78 = arith.constant 3.200000e+01 : f32
    %171 = vector.broadcast %cst_78 : f32 to vector<4x8x1xf32>
    %172 = arith.divf %170, %171 : vector<4x8x1xf32>
    %cst_79 = arith.constant 9.99999974E-6 : f32
    %173 = vector.broadcast %cst_79 : f32 to vector<4x8x1xf32>
    %174 = arith.addf %172, %173 : vector<4x8x1xf32>
    %175 = math.rsqrt %174 : vector<4x8x1xf32>
    %176 = vector.broadcast %175 : vector<4x8x1xf32> to vector<4x8x32xf32>
    %177 = arith.mulf %167, %176 : vector<4x8x32xf32>
    %178 = vector.shape_cast %61 : vector<1x32xf32> to vector<1x1x32xf32>
    %179 = vector.broadcast %178 : vector<1x1x32xf32> to vector<4x8x32xf32>
    %180 = arith.mulf %177, %179 : vector<4x8x32xf32>
    %181 = vector.shape_cast %62 : vector<1x32xf32> to vector<1x1x32xf32>
    %182 = vector.broadcast %181 : vector<1x1x32xf32> to vector<4x8x32xf32>
    %183 = arith.addf %180, %182 : vector<4x8x32xf32>
    %184 = arith.addf %30, %183 : vector<4x8x32xf32>
    %cst_80 = arith.constant dense<0.000000e+00> : vector<4x8xf32>
    %185 = vector.multi_reduction <add>, %184, %cst_80 [2] : vector<4x8x32xf32> to vector<4x8xf32>
    %186 = vector.shape_cast %185 : vector<4x8xf32> to vector<4x8x1xf32>
    %cst_81 = arith.constant 3.200000e+01 : f32
    %187 = vector.broadcast %cst_81 : f32 to vector<4x8x1xf32>
    %188 = arith.divf %186, %187 : vector<4x8x1xf32>
    %189 = vector.broadcast %188 : vector<4x8x1xf32> to vector<4x8x32xf32>
    %190 = arith.subf %184, %189 : vector<4x8x32xf32>
    %191 = arith.mulf %190, %190 : vector<4x8x32xf32>
    %cst_82 = arith.constant dense<0.000000e+00> : vector<4x8xf32>
    %192 = vector.multi_reduction <add>, %191, %cst_82 [2] : vector<4x8x32xf32> to vector<4x8xf32>
    %193 = vector.shape_cast %192 : vector<4x8xf32> to vector<4x8x1xf32>
    %cst_83 = arith.constant 3.200000e+01 : f32
    %194 = vector.broadcast %cst_83 : f32 to vector<4x8x1xf32>
    %195 = arith.divf %193, %194 : vector<4x8x1xf32>
    %cst_84 = arith.constant 9.99999974E-6 : f32
    %196 = vector.broadcast %cst_84 : f32 to vector<4x8x1xf32>
    %197 = arith.addf %195, %196 : vector<4x8x1xf32>
    %198 = math.rsqrt %197 : vector<4x8x1xf32>
    %199 = vector.broadcast %198 : vector<4x8x1xf32> to vector<4x8x32xf32>
    %200 = arith.mulf %190, %199 : vector<4x8x32xf32>
    %c0_85 = arith.constant 0 : index
    %c0_86 = arith.constant 0 : index
    %201 = vector.load %arg9[%c0_85, %c0_86] : memref<32x64xf32, #tpu.memory_space<vmem>>, vector<32x64xf32>
    %202 = vector.shape_cast %201 : vector<32x64xf32> to vector<1x32x64xf32>
    %203 = vector.broadcast %202 : vector<1x32x64xf32> to vector<4x32x64xf32>
    "tpu.trace_start"() <{level = 10 : i32, message = "nld,ndf->nlf"}> : () -> ()
    %cst_87 = arith.constant dense<0.000000e+00> : vector<4x8x64xf32>
    %204 = tpu.matmul %200, %203, %cst_87 {dimension_numbers = #tpu.dot_dimension_numbers<[2], [1], [1], [2], [0, 0, 0, 1, 1, 2], [0], [0]>} : vector<4x8x32xf32>, vector<4x32x64xf32>, vector<4x8x64xf32> -> vector<4x8x64xf32>
    "tpu.trace_stop"() : () -> ()
    %c0_88 = arith.constant 0 : index
    %c0_89 = arith.constant 0 : index
    %205 = vector.load %arg10[%c0_88, %c0_89] : memref<1x64xf32, #tpu.memory_space<vmem>>, vector<1x64xf32>
    %206 = vector.shape_cast %205 : vector<1x64xf32> to vector<1x1x64xf32>
    %207 = vector.broadcast %206 : vector<1x1x64xf32> to vector<4x8x64xf32>
    %208 = arith.addf %204, %207 : vector<4x8x64xf32>
    %cst_90 = arith.constant 5.000000e-01 : f32
    %209 = vector.broadcast %cst_90 : f32 to vector<4x8x64xf32>
    %210 = arith.mulf %209, %208 : vector<4x8x64xf32>
    %cst_91 = arith.constant 0.707106769 : f32
    %211 = vector.broadcast %cst_91 : f32 to vector<4x8x64xf32>
    %212 = arith.mulf %208, %211 : vector<4x8x64xf32>
    %213 = math.absf %212 : vector<4x8x64xf32>
    %cst_92 = arith.constant 0.327591091 : f32
    %214 = vector.broadcast %cst_92 : f32 to vector<4x8x64xf32>
    %215 = arith.mulf %214, %213 : vector<4x8x64xf32>
    %cst_93 = arith.constant 1.000000e+00 : f32
    %216 = vector.broadcast %cst_93 : f32 to vector<4x8x64xf32>
    %217 = arith.addf %216, %215 : vector<4x8x64xf32>
    %cst_94 = arith.constant 1.000000e+00 : f32
    %218 = vector.broadcast %cst_94 : f32 to vector<4x8x64xf32>
    %219 = arith.divf %218, %217 : vector<4x8x64xf32>
    %cst_95 = arith.constant 1.06140542 : f32
    %220 = vector.broadcast %cst_95 : f32 to vector<4x8x64xf32>
    %221 = arith.mulf %220, %219 : vector<4x8x64xf32>
    %cst_96 = arith.constant -1.45315206 : f32
    %222 = vector.broadcast %cst_96 : f32 to vector<4x8x64xf32>
    %223 = arith.addf %221, %222 : vector<4x8x64xf32>
    %224 = arith.mulf %223, %219 : vector<4x8x64xf32>
    %cst_97 = arith.constant 1.42141378 : f32
    %225 = vector.broadcast %cst_97 : f32 to vector<4x8x64xf32>
    %226 = arith.addf %224, %225 : vector<4x8x64xf32>
    %227 = arith.mulf %226, %219 : vector<4x8x64xf32>
    %cst_98 = arith.constant -0.284496725 : f32
    %228 = vector.broadcast %cst_98 : f32 to vector<4x8x64xf32>
    %229 = arith.addf %227, %228 : vector<4x8x64xf32>
    %230 = arith.mulf %229, %219 : vector<4x8x64xf32>
    %cst_99 = arith.constant 0.254829586 : f32
    %231 = vector.broadcast %cst_99 : f32 to vector<4x8x64xf32>
    %232 = arith.addf %230, %231 : vector<4x8x64xf32>
    %233 = arith.mulf %232, %219 : vector<4x8x64xf32>
    %cst_100 = arith.constant 0.000000e+00 : f32
    %234 = vector.broadcast %cst_100 : f32 to vector<4x8x64xf32>
    %235 = arith.subf %234, %213 : vector<4x8x64xf32>
    %236 = arith.mulf %235, %213 : vector<4x8x64xf32>
    %237 = math.exp %236 : vector<4x8x64xf32>
    %238 = arith.mulf %233, %237 : vector<4x8x64xf32>
    %cst_101 = arith.constant 1.000000e+00 : f32
    %239 = vector.broadcast %cst_101 : f32 to vector<4x8x64xf32>
    %240 = arith.subf %239, %238 : vector<4x8x64xf32>
    %cst_102 = arith.constant 0.000000e+00 : f32
    %241 = vector.broadcast %cst_102 : f32 to vector<4x8x64xf32>
    %242 = arith.cmpf oge, %212, %241 : vector<4x8x64xf32>
    %cst_103 = arith.constant 0.000000e+00 : f32
    %243 = vector.broadcast %cst_103 : f32 to vector<4x8x64xf32>
    %244 = arith.subf %243, %240 : vector<4x8x64xf32>
    %245 = arith.select %242, %240, %244 : vector<4x8x64xi1>, vector<4x8x64xf32>
    %cst_104 = arith.constant 1.000000e+00 : f32
    %246 = vector.broadcast %cst_104 : f32 to vector<4x8x64xf32>
    %247 = arith.addf %246, %245 : vector<4x8x64xf32>
    %248 = arith.mulf %210, %247 : vector<4x8x64xf32>
    %c0_105 = arith.constant 0 : index
    %c0_106 = arith.constant 0 : index
    %249 = vector.load %arg11[%c0_105, %c0_106] : memref<64x32xf32, #tpu.memory_space<vmem>>, vector<64x32xf32>
    %250 = vector.shape_cast %249 : vector<64x32xf32> to vector<1x64x32xf32>
    %251 = vector.broadcast %250 : vector<1x64x32xf32> to vector<4x64x32xf32>
    "tpu.trace_start"() <{level = 10 : i32, message = "nlf,nfd->nld"}> : () -> ()
    %cst_107 = arith.constant dense<0.000000e+00> : vector<4x8x32xf32>
    %252 = tpu.matmul %248, %251, %cst_107 {dimension_numbers = #tpu.dot_dimension_numbers<[2], [1], [1], [2], [0, 0, 0, 1, 1, 2], [0], [0]>} : vector<4x8x64xf32>, vector<4x64x32xf32>, vector<4x8x32xf32> -> vector<4x8x32xf32>
    "tpu.trace_stop"() : () -> ()
    %c0_108 = arith.constant 0 : index
    %c0_109 = arith.constant 0 : index
    %253 = vector.load %arg12[%c0_108, %c0_109] : memref<1x32xf32, #tpu.memory_space<vmem>>, vector<1x32xf32>
    %254 = vector.shape_cast %253 : vector<1x32xf32> to vector<1x1x32xf32>
    %255 = vector.broadcast %254 : vector<1x1x32xf32> to vector<4x8x32xf32>
    %256 = arith.addf %252, %255 : vector<4x8x32xf32>
    %257 = arith.addf %256, %184 : vector<4x8x32xf32>
    %258 = vector.extract_strided_slice %31 {offsets = [2, 0], sizes = [1, 32], strides = [1, 1]} : vector<4x32xf32> to vector<1x32xf32>
    %259 = vector.extract_strided_slice %31 {offsets = [3, 0], sizes = [1, 32], strides = [1, 1]} : vector<4x32xf32> to vector<1x32xf32>
    %cst_110 = arith.constant dense<0.000000e+00> : vector<4x8xf32>
    %260 = vector.multi_reduction <add>, %257, %cst_110 [2] : vector<4x8x32xf32> to vector<4x8xf32>
    %261 = vector.shape_cast %260 : vector<4x8xf32> to vector<4x8x1xf32>
    %cst_111 = arith.constant 3.200000e+01 : f32
    %262 = vector.broadcast %cst_111 : f32 to vector<4x8x1xf32>
    %263 = arith.divf %261, %262 : vector<4x8x1xf32>
    %264 = vector.broadcast %263 : vector<4x8x1xf32> to vector<4x8x32xf32>
    %265 = arith.subf %257, %264 : vector<4x8x32xf32>
    %266 = arith.mulf %265, %265 : vector<4x8x32xf32>
    %cst_112 = arith.constant dense<0.000000e+00> : vector<4x8xf32>
    %267 = vector.multi_reduction <add>, %266, %cst_112 [2] : vector<4x8x32xf32> to vector<4x8xf32>
    %268 = vector.shape_cast %267 : vector<4x8xf32> to vector<4x8x1xf32>
    %cst_113 = arith.constant 3.200000e+01 : f32
    %269 = vector.broadcast %cst_113 : f32 to vector<4x8x1xf32>
    %270 = arith.divf %268, %269 : vector<4x8x1xf32>
    %cst_114 = arith.constant 9.99999974E-6 : f32
    %271 = vector.broadcast %cst_114 : f32 to vector<4x8x1xf32>
    %272 = arith.addf %270, %271 : vector<4x8x1xf32>
    %273 = math.rsqrt %272 : vector<4x8x1xf32>
    %274 = vector.broadcast %273 : vector<4x8x1xf32> to vector<4x8x32xf32>
    %275 = arith.mulf %265, %274 : vector<4x8x32xf32>
    %276 = vector.shape_cast %258 : vector<1x32xf32> to vector<1x1x32xf32>
    %277 = vector.broadcast %276 : vector<1x1x32xf32> to vector<4x8x32xf32>
    %278 = arith.mulf %275, %277 : vector<4x8x32xf32>
    %279 = vector.shape_cast %259 : vector<1x32xf32> to vector<1x1x32xf32>
    %280 = vector.broadcast %279 : vector<1x1x32xf32> to vector<4x8x32xf32>
    %281 = arith.addf %278, %280 : vector<4x8x32xf32>
    %cst_115 = arith.constant -1.000000e+02 : f32
    %cst_116 = arith.constant 1.000000e+02 : f32
    %282 = vector.broadcast %cst_115 : f32 to vector<4x8x32xf32>
    %283 = arith.maximumf %282, %281 : vector<4x8x32xf32>
    %284 = vector.broadcast %cst_116 : f32 to vector<4x8x32xf32>
    %285 = arith.minimumf %284, %283 : vector<4x8x32xf32>
    %c0_117 = arith.constant 0 : index
    %c0_118 = arith.constant 0 : index
    %c0_119 = arith.constant 0 : index
    %286 = vector.load %arg13[%c0_117, %c0_118, %c0_119] : memref<4x8x32xf32, #tpu.memory_space<vmem>>, vector<4x8x32xf32>
    tpu.vector_store %arg13[%c0_117, %c0_118, %c0_119], %285 {strides = array<i32>} : memref<4x8x32xf32, #tpu.memory_space<vmem>>, vector<4x8x32xf32>,
    return
  }
  func.func @transform_0(%arg0: i32) -> (i32, i32, i32) {
    %c0_i32 = arith.constant 0 : i32
    %c0_i32_0 = arith.constant 0 : i32
    %c0_i32_1 = arith.constant 0 : i32
    %c0_i32_2 = arith.constant 0 : i32
    return %c0_i32, %c0_i32_0, %c0_i32_1 : i32, i32, i32
  }
  func.func @transform_1(%arg0: i32) -> (i32, i32, i32) {
    %c0_i32 = arith.constant 0 : i32
    %c0_i32_0 = arith.constant 0 : i32
    %c0_i32_1 = arith.constant 0 : i32
    %c0_i32_2 = arith.constant 0 : i32
    return %c0_i32, %c0_i32_0, %c0_i32_1 : i32, i32, i32
  }
  func.func @transform_2(%arg0: i32) -> (i32, i32) {
    %c0_i32 = arith.constant 0 : i32
    %c0_i32_0 = arith.constant 0 : i32
    %c0_i32_1 = arith.constant 0 : i32
    return %c0_i32, %c0_i32_0 : i32, i32
  }
  func.func @transform_3(%arg0: i32) -> (i32, i32) {
    %c0_i32 = arith.constant 0 : i32
    %c0_i32_0 = arith.constant 0 : i32
    %c0_i32_1 = arith.constant 0 : i32
    return %c0_i32, %c0_i32_0 : i32, i32
  }
  func.func @transform_4(%arg0: i32) -> (i32, i32) {
    %c0_i32 = arith.constant 0 : i32
    %c0_i32_0 = arith.constant 0 : i32
    %c0_i32_1 = arith.constant 0 : i32
    return %c0_i32, %c0_i32_0 : i32, i32
  }
  func.func @transform_5(%arg0: i32) -> (i32, i32) {
    %c0_i32 = arith.constant 0 : i32
    %c0_i32_0 = arith.constant 0 : i32
    %c0_i32_1 = arith.constant 0 : i32
    return %c0_i32, %c0_i32_0 : i32, i32
  }
  func.func @transform_6(%arg0: i32) -> (i32, i32) {
    %c0_i32 = arith.constant 0 : i32
    %c0_i32_0 = arith.constant 0 : i32
    %c0_i32_1 = arith.constant 0 : i32
    return %c0_i32, %c0_i32_0 : i32, i32
  }
  func.func @transform_7(%arg0: i32) -> (i32, i32) {
    %c0_i32 = arith.constant 0 : i32
    %c0_i32_0 = arith.constant 0 : i32
    %c0_i32_1 = arith.constant 0 : i32
    return %c0_i32, %c0_i32_0 : i32, i32
  }
  func.func @transform_8(%arg0: i32) -> (i32, i32) {
    %c0_i32 = arith.constant 0 : i32
    %c0_i32_0 = arith.constant 0 : i32
    %c0_i32_1 = arith.constant 0 : i32
    return %c0_i32, %c0_i32_0 : i32, i32
  }
  func.func @transform_9(%arg0: i32) -> (i32, i32) {
    %c0_i32 = arith.constant 0 : i32
    %c0_i32_0 = arith.constant 0 : i32
    %c0_i32_1 = arith.constant 0 : i32
    return %c0_i32, %c0_i32_0 : i32, i32
  }
  func.func @transform_10(%arg0: i32) -> (i32, i32) {
    %c0_i32 = arith.constant 0 : i32
    %c0_i32_0 = arith.constant 0 : i32
    %c0_i32_1 = arith.constant 0 : i32
    return %c0_i32, %c0_i32_0 : i32, i32
  }
  func.func @transform_11(%arg0: i32) -> (i32, i32) {
    %c0_i32 = arith.constant 0 : i32
    %c0_i32_0 = arith.constant 0 : i32
    %c0_i32_1 = arith.constant 0 : i32
    return %c0_i32, %c0_i32_0 : i32, i32
  }
  func.func @transform_12(%arg0: i32) -> (i32, i32, i32) {
    %c0_i32 = arith.constant 0 : i32
    %c0_i32_0 = arith.constant 0 : i32
    %c0_i32_1 = arith.constant 0 : i32
    %c0_i32_2 = arith.constant 0 : i32
    return %c0_i32, %c0_i32_0, %c0_i32_1 : i32, i32, i32
  }
}

module attributes {stable_mosaic.version = 11 : i64} {
  func.func @_transformer_layer_kernel(%arg0: i32, %arg1: memref<4x8x32xf32, #tpu.memory_space<vmem>>, %arg2: memref<4x32xf32, #tpu.memory_space<vmem>>, %arg3: memref<32x96xf32, #tpu.memory_space<vmem>>, %arg4: memref<1x96xf32, #tpu.memory_space<vmem>>, %arg5: memref<32x32xf32, #tpu.memory_space<vmem>>, %arg6: memref<1x32xf32, #tpu.memory_space<vmem>>, %arg7: memref<32x64xf32, #tpu.memory_space<vmem>>, %arg8: memref<1x64xf32, #tpu.memory_space<vmem>>, %arg9: memref<64x32xf32, #tpu.memory_space<vmem>>, %arg10: memref<1x32xf32, #tpu.memory_space<vmem>>, %arg11: memref<4x8x32xf32, #tpu.memory_space<vmem>>, %arg12: memref<4x8x32xf32, #tpu.memory_space<vmem>>) attributes {dimension_semantics = [#tpu.dimension_semantics<arbitrary>], iteration_bounds = array<i64: 1>, scalar_prefetch = 0 : i64, scratch_operands = 1 : i64, tpu.core_type = #tpu.core_type<tc>, window_params = [{pipeline_mode = #tpu.pipeline_mode<synchronous>, transform_indices = @transform_0, window_bounds = array<i64: 4, 8, 32>}, {pipeline_mode = #tpu.pipeline_mode<synchronous>, transform_indices = @transform_1, window_bounds = array<i64: 4, 32>}, {pipeline_mode = #tpu.pipeline_mode<synchronous>, transform_indices = @transform_2, window_bounds = array<i64: 32, 96>}, {pipeline_mode = #tpu.pipeline_mode<synchronous>, transform_indices = @transform_3, window_bounds = array<i64: 1, 96>}, {pipeline_mode = #tpu.pipeline_mode<synchronous>, transform_indices = @transform_4, window_bounds = array<i64: 32, 32>}, {pipeline_mode = #tpu.pipeline_mode<synchronous>, transform_indices = @transform_5, window_bounds = array<i64: 1, 32>}, {pipeline_mode = #tpu.pipeline_mode<synchronous>, transform_indices = @transform_6, window_bounds = array<i64: 32, 64>}, {pipeline_mode = #tpu.pipeline_mode<synchronous>, transform_indices = @transform_7, window_bounds = array<i64: 1, 64>}, {pipeline_mode = #tpu.pipeline_mode<synchronous>, transform_indices = @transform_8, window_bounds = array<i64: 64, 32>}, {pipeline_mode = #tpu.pipeline_mode<synchronous>, transform_indices = @transform_9, window_bounds = array<i64: 1, 32>}, {pipeline_mode = #tpu.pipeline_mode<synchronous>, transform_indices = @transform_10, window_bounds = array<i64: 4, 8, 32>}]} {
    %c0 = arith.constant 0 : index
    %c0_0 = arith.constant 0 : index
    %c0_1 = arith.constant 0 : index
    %0 = vector.load %arg1[%c0, %c0_0, %c0_1] : memref<4x8x32xf32, #tpu.memory_space<vmem>>, vector<4x8x32xf32>
    %c0_2 = arith.constant 0 : index
    %c0_3 = arith.constant 0 : index
    %1 = vector.load %arg2[%c0_2, %c0_3] : memref<4x32xf32, #tpu.memory_space<vmem>>, vector<4x32xf32>
    %cst = arith.constant dense<0.000000e+00> : vector<4x8xf32>
    %2 = vector.multi_reduction <add>, %0, %cst [2] : vector<4x8x32xf32> to vector<4x8xf32>
    %3 = vector.shape_cast %2 : vector<4x8xf32> to vector<4x8x1xf32>
    %cst_4 = arith.constant 3.200000e+01 : f32
    %4 = vector.broadcast %cst_4 : f32 to vector<4x8x1xf32>
    %5 = arith.divf %3, %4 : vector<4x8x1xf32>
    %6 = vector.broadcast %5 : vector<4x8x1xf32> to vector<4x8x32xf32>
    %7 = arith.subf %0, %6 : vector<4x8x32xf32>
    %8 = arith.mulf %7, %7 : vector<4x8x32xf32>
    %cst_5 = arith.constant dense<0.000000e+00> : vector<4x8xf32>
    %9 = vector.multi_reduction <add>, %8, %cst_5 [2] : vector<4x8x32xf32> to vector<4x8xf32>
    %10 = vector.shape_cast %9 : vector<4x8xf32> to vector<4x8x1xf32>
    %cst_6 = arith.constant 3.200000e+01 : f32
    %11 = vector.broadcast %cst_6 : f32 to vector<4x8x1xf32>
    %12 = arith.divf %10, %11 : vector<4x8x1xf32>
    %cst_7 = arith.constant 9.99999974E-6 : f32
    %13 = vector.broadcast %cst_7 : f32 to vector<4x8x1xf32>
    %14 = arith.addf %12, %13 : vector<4x8x1xf32>
    %15 = math.rsqrt %14 : vector<4x8x1xf32>
    %16 = vector.broadcast %15 : vector<4x8x1xf32> to vector<4x8x32xf32>
    %17 = arith.mulf %7, %16 : vector<4x8x32xf32>
    %c0_8 = arith.constant 0 : index
    %c0_9 = arith.constant 0 : index
    %18 = vector.load %arg3[%c0_8, %c0_9] : memref<32x96xf32, #tpu.memory_space<vmem>>, vector<32x96xf32>
    %19 = vector.shape_cast %18 : vector<32x96xf32> to vector<1x32x96xf32>
    %20 = vector.broadcast %19 : vector<1x32x96xf32> to vector<4x32x96xf32>
    "tpu.trace_start"() <{level = 10 : i32, message = "nld,ndf->nlf"}> : () -> ()
    %cst_10 = arith.constant dense<0.000000e+00> : vector<4x8x96xf32>
    %21 = tpu.matmul %17, %20, %cst_10 {dimension_numbers = #tpu.dot_dimension_numbers<[2], [1], [1], [2], [0, 0, 0, 1, 1, 2], [0], [0]>} : vector<4x8x32xf32>, vector<4x32x96xf32>, vector<4x8x96xf32> -> vector<4x8x96xf32>
    "tpu.trace_stop"() : () -> ()
    %c0_11 = arith.constant 0 : index
    %c0_12 = arith.constant 0 : index
    %22 = vector.load %arg4[%c0_11, %c0_12] : memref<1x96xf32, #tpu.memory_space<vmem>>, vector<1x96xf32>
    %23 = vector.shape_cast %22 : vector<1x96xf32> to vector<1x1x96xf32>
    %24 = vector.broadcast %23 : vector<1x1x96xf32> to vector<4x8x96xf32>
    %25 = arith.addf %21, %24 : vector<4x8x96xf32>
    %26 = vector.extract_strided_slice %25 {offsets = [0, 0, 0], sizes = [4, 8, 32], strides = [1, 1, 1]} : vector<4x8x96xf32> to vector<4x8x32xf32>
    %27 = vector.extract_strided_slice %25 {offsets = [0, 0, 32], sizes = [4, 8, 32], strides = [1, 1, 1]} : vector<4x8x96xf32> to vector<4x8x32xf32>
    %28 = vector.extract_strided_slice %25 {offsets = [0, 0, 64], sizes = [4, 8, 32], strides = [1, 1, 1]} : vector<4x8x96xf32> to vector<4x8x32xf32>
    %c0_13 = arith.constant 0 : index
    %c0_14 = arith.constant 0 : index
    %29 = vector.load %arg5[%c0_13, %c0_14] : memref<32x32xf32, #tpu.memory_space<vmem>>, vector<32x32xf32>
    %c0_15 = arith.constant 0 : index
    %c0_16 = arith.constant 0 : index
    %30 = vector.load %arg6[%c0_15, %c0_16] : memref<1x32xf32, #tpu.memory_space<vmem>>, vector<1x32xf32>
    %31 = vector.extract_strided_slice %1 {offsets = [0, 0], sizes = [1, 32], strides = [1, 1]} : vector<4x32xf32> to vector<1x32xf32>
    %32 = vector.extract_strided_slice %1 {offsets = [1, 0], sizes = [1, 32], strides = [1, 1]} : vector<4x32xf32> to vector<1x32xf32>
    %33 = vector.extract_strided_slice %26 {offsets = [0, 0, 0], sizes = [4, 8, 8], strides = [1, 1, 1]} : vector<4x8x32xf32> to vector<4x8x8xf32>
    %34 = vector.extract_strided_slice %27 {offsets = [0, 0, 0], sizes = [4, 8, 8], strides = [1, 1, 1]} : vector<4x8x32xf32> to vector<4x8x8xf32>
    "tpu.trace_start"() <{level = 10 : i32, message = "nqd,nkd->nqk"}> : () -> ()
    %cst_17 = arith.constant dense<0.000000e+00> : vector<4x8x8xf32>
    %35 = tpu.matmul %33, %34, %cst_17 {dimension_numbers = #tpu.dot_dimension_numbers<[2], [2], [1], [1], [0, 0, 0, 1, 1, 1], [0], [0]>} : vector<4x8x8xf32>, vector<4x8x8xf32>, vector<4x8x8xf32> -> vector<4x8x8xf32>
    "tpu.trace_stop"() : () -> ()
    %cst_18 = arith.constant 0.353553385 : f32
    %36 = vector.broadcast %cst_18 : f32 to vector<4x8x8xf32>
    %37 = arith.mulf %35, %36 : vector<4x8x8xf32>
    %cst_19 = arith.constant dense<0xFF800000> : vector<4x8xf32>
    %38 = vector.multi_reduction <maximumf>, %37, %cst_19 [2] : vector<4x8x8xf32> to vector<4x8xf32>
    %39 = vector.shape_cast %38 : vector<4x8xf32> to vector<4x8x1xf32>
    %40 = vector.broadcast %39 : vector<4x8x1xf32> to vector<4x8x8xf32>
    %41 = arith.subf %37, %40 : vector<4x8x8xf32>
    %42 = math.exp %41 : vector<4x8x8xf32>
    %cst_20 = arith.constant dense<0.000000e+00> : vector<4x8xf32>
    %43 = vector.multi_reduction <add>, %42, %cst_20 [2] : vector<4x8x8xf32> to vector<4x8xf32>
    %44 = vector.shape_cast %43 : vector<4x8xf32> to vector<4x8x1xf32>
    %cst_21 = arith.constant 9.99999971E-10 : f32
    %45 = vector.broadcast %cst_21 : f32 to vector<4x8x1xf32>
    %46 = arith.addf %44, %45 : vector<4x8x1xf32>
    %47 = vector.broadcast %46 : vector<4x8x1xf32> to vector<4x8x8xf32>
    %48 = arith.divf %42, %47 : vector<4x8x8xf32>
    %cst_22 = arith.constant 9.99999971E-10 : f32
    %cst_23 = arith.constant 1.000000e+00 : f32
    %49 = vector.broadcast %cst_22 : f32 to vector<4x8x8xf32>
    %50 = arith.maximumf %49, %48 : vector<4x8x8xf32>
    %51 = vector.broadcast %cst_23 : f32 to vector<4x8x8xf32>
    %52 = arith.minimumf %51, %50 : vector<4x8x8xf32>
    %53 = vector.extract_strided_slice %28 {offsets = [0, 0, 0], sizes = [4, 8, 8], strides = [1, 1, 1]} : vector<4x8x32xf32> to vector<4x8x8xf32>
    "tpu.trace_start"() <{level = 10 : i32, message = "nqk,nkd->nqd"}> : () -> ()
    %cst_24 = arith.constant dense<0.000000e+00> : vector<4x8x8xf32>
    %54 = tpu.matmul %52, %53, %cst_24 {dimension_numbers = #tpu.dot_dimension_numbers<[2], [1], [1], [2], [0, 0, 0, 1, 1, 2], [0], [0]>} : vector<4x8x8xf32>, vector<4x8x8xf32>, vector<4x8x8xf32> -> vector<4x8x8xf32>
    "tpu.trace_stop"() : () -> ()
    %c0_25 = arith.constant 0 : index
    %c0_26 = arith.constant 0 : index
    %c0_27 = arith.constant 0 : index
    %55 = vector.load %arg12[%c0_25, %c0_26, %c0_27] : memref<4x8x32xf32, #tpu.memory_space<vmem>>, vector<4x8x8xf32>
    tpu.vector_store %arg12[%c0_25, %c0_26, %c0_27], %54 {strides = array<i32>} : memref<4x8x32xf32, #tpu.memory_space<vmem>>, vector<4x8x8xf32>,
    %56 = vector.extract_strided_slice %26 {offsets = [0, 0, 8], sizes = [4, 8, 8], strides = [1, 1, 1]} : vector<4x8x32xf32> to vector<4x8x8xf32>
    %57 = vector.extract_strided_slice %27 {offsets = [0, 0, 8], sizes = [4, 8, 8], strides = [1, 1, 1]} : vector<4x8x32xf32> to vector<4x8x8xf32>
    "tpu.trace_start"() <{level = 10 : i32, message = "nqd,nkd->nqk"}> : () -> ()
    %cst_28 = arith.constant dense<0.000000e+00> : vector<4x8x8xf32>
    %58 = tpu.matmul %56, %57, %cst_28 {dimension_numbers = #tpu.dot_dimension_numbers<[2], [2], [1], [1], [0, 0, 0, 1, 1, 1], [0], [0]>} : vector<4x8x8xf32>, vector<4x8x8xf32>, vector<4x8x8xf32> -> vector<4x8x8xf32>
    "tpu.trace_stop"() : () -> ()
    %cst_29 = arith.constant 0.353553385 : f32
    %59 = vector.broadcast %cst_29 : f32 to vector<4x8x8xf32>
    %60 = arith.mulf %58, %59 : vector<4x8x8xf32>
    %cst_30 = arith.constant dense<0xFF800000> : vector<4x8xf32>
    %61 = vector.multi_reduction <maximumf>, %60, %cst_30 [2] : vector<4x8x8xf32> to vector<4x8xf32>
    %62 = vector.shape_cast %61 : vector<4x8xf32> to vector<4x8x1xf32>
    %63 = vector.broadcast %62 : vector<4x8x1xf32> to vector<4x8x8xf32>
    %64 = arith.subf %60, %63 : vector<4x8x8xf32>
    %65 = math.exp %64 : vector<4x8x8xf32>
    %cst_31 = arith.constant dense<0.000000e+00> : vector<4x8xf32>
    %66 = vector.multi_reduction <add>, %65, %cst_31 [2] : vector<4x8x8xf32> to vector<4x8xf32>
    %67 = vector.shape_cast %66 : vector<4x8xf32> to vector<4x8x1xf32>
    %cst_32 = arith.constant 9.99999971E-10 : f32
    %68 = vector.broadcast %cst_32 : f32 to vector<4x8x1xf32>
    %69 = arith.addf %67, %68 : vector<4x8x1xf32>
    %70 = vector.broadcast %69 : vector<4x8x1xf32> to vector<4x8x8xf32>
    %71 = arith.divf %65, %70 : vector<4x8x8xf32>
    %cst_33 = arith.constant 9.99999971E-10 : f32
    %cst_34 = arith.constant 1.000000e+00 : f32
    %72 = vector.broadcast %cst_33 : f32 to vector<4x8x8xf32>
    %73 = arith.maximumf %72, %71 : vector<4x8x8xf32>
    %74 = vector.broadcast %cst_34 : f32 to vector<4x8x8xf32>
    %75 = arith.minimumf %74, %73 : vector<4x8x8xf32>
    %76 = vector.extract_strided_slice %28 {offsets = [0, 0, 8], sizes = [4, 8, 8], strides = [1, 1, 1]} : vector<4x8x32xf32> to vector<4x8x8xf32>
    "tpu.trace_start"() <{level = 10 : i32, message = "nqk,nkd->nqd"}> : () -> ()
    %cst_35 = arith.constant dense<0.000000e+00> : vector<4x8x8xf32>
    %77 = tpu.matmul %75, %76, %cst_35 {dimension_numbers = #tpu.dot_dimension_numbers<[2], [1], [1], [2], [0, 0, 0, 1, 1, 2], [0], [0]>} : vector<4x8x8xf32>, vector<4x8x8xf32>, vector<4x8x8xf32> -> vector<4x8x8xf32>
    "tpu.trace_stop"() : () -> ()
    %c0_36 = arith.constant 0 : index
    %c0_37 = arith.constant 0 : index
    %c8 = arith.constant 8 : index
    %78 = vector.load %arg12[%c0_36, %c0_37, %c8] : memref<4x8x32xf32, #tpu.memory_space<vmem>>, vector<4x8x8xf32>
    tpu.vector_store %arg12[%c0_36, %c0_37, %c8], %77 {strides = array<i32>} : memref<4x8x32xf32, #tpu.memory_space<vmem>>, vector<4x8x8xf32>,
    %79 = vector.extract_strided_slice %26 {offsets = [0, 0, 16], sizes = [4, 8, 8], strides = [1, 1, 1]} : vector<4x8x32xf32> to vector<4x8x8xf32>
    %80 = vector.extract_strided_slice %27 {offsets = [0, 0, 16], sizes = [4, 8, 8], strides = [1, 1, 1]} : vector<4x8x32xf32> to vector<4x8x8xf32>
    "tpu.trace_start"() <{level = 10 : i32, message = "nqd,nkd->nqk"}> : () -> ()
    %cst_38 = arith.constant dense<0.000000e+00> : vector<4x8x8xf32>
    %81 = tpu.matmul %79, %80, %cst_38 {dimension_numbers = #tpu.dot_dimension_numbers<[2], [2], [1], [1], [0, 0, 0, 1, 1, 1], [0], [0]>} : vector<4x8x8xf32>, vector<4x8x8xf32>, vector<4x8x8xf32> -> vector<4x8x8xf32>
    "tpu.trace_stop"() : () -> ()
    %cst_39 = arith.constant 0.353553385 : f32
    %82 = vector.broadcast %cst_39 : f32 to vector<4x8x8xf32>
    %83 = arith.mulf %81, %82 : vector<4x8x8xf32>
    %cst_40 = arith.constant dense<0xFF800000> : vector<4x8xf32>
    %84 = vector.multi_reduction <maximumf>, %83, %cst_40 [2] : vector<4x8x8xf32> to vector<4x8xf32>
    %85 = vector.shape_cast %84 : vector<4x8xf32> to vector<4x8x1xf32>
    %86 = vector.broadcast %85 : vector<4x8x1xf32> to vector<4x8x8xf32>
    %87 = arith.subf %83, %86 : vector<4x8x8xf32>
    %88 = math.exp %87 : vector<4x8x8xf32>
    %cst_41 = arith.constant dense<0.000000e+00> : vector<4x8xf32>
    %89 = vector.multi_reduction <add>, %88, %cst_41 [2] : vector<4x8x8xf32> to vector<4x8xf32>
    %90 = vector.shape_cast %89 : vector<4x8xf32> to vector<4x8x1xf32>
    %cst_42 = arith.constant 9.99999971E-10 : f32
    %91 = vector.broadcast %cst_42 : f32 to vector<4x8x1xf32>
    %92 = arith.addf %90, %91 : vector<4x8x1xf32>
    %93 = vector.broadcast %92 : vector<4x8x1xf32> to vector<4x8x8xf32>
    %94 = arith.divf %88, %93 : vector<4x8x8xf32>
    %cst_43 = arith.constant 9.99999971E-10 : f32
    %cst_44 = arith.constant 1.000000e+00 : f32
    %95 = vector.broadcast %cst_43 : f32 to vector<4x8x8xf32>
    %96 = arith.maximumf %95, %94 : vector<4x8x8xf32>
    %97 = vector.broadcast %cst_44 : f32 to vector<4x8x8xf32>
    %98 = arith.minimumf %97, %96 : vector<4x8x8xf32>
    %99 = vector.extract_strided_slice %28 {offsets = [0, 0, 16], sizes = [4, 8, 8], strides = [1, 1, 1]} : vector<4x8x32xf32> to vector<4x8x8xf32>
    "tpu.trace_start"() <{level = 10 : i32, message = "nqk,nkd->nqd"}> : () -> ()
    %cst_45 = arith.constant dense<0.000000e+00> : vector<4x8x8xf32>
    %100 = tpu.matmul %98, %99, %cst_45 {dimension_numbers = #tpu.dot_dimension_numbers<[2], [1], [1], [2], [0, 0, 0, 1, 1, 2], [0], [0]>} : vector<4x8x8xf32>, vector<4x8x8xf32>, vector<4x8x8xf32> -> vector<4x8x8xf32>
    "tpu.trace_stop"() : () -> ()
    %c0_46 = arith.constant 0 : index
    %c0_47 = arith.constant 0 : index
    %c16 = arith.constant 16 : index
    %101 = vector.load %arg12[%c0_46, %c0_47, %c16] : memref<4x8x32xf32, #tpu.memory_space<vmem>>, vector<4x8x8xf32>
    tpu.vector_store %arg12[%c0_46, %c0_47, %c16], %100 {strides = array<i32>} : memref<4x8x32xf32, #tpu.memory_space<vmem>>, vector<4x8x8xf32>,
    %102 = vector.extract_strided_slice %26 {offsets = [0, 0, 24], sizes = [4, 8, 8], strides = [1, 1, 1]} : vector<4x8x32xf32> to vector<4x8x8xf32>
    %103 = vector.extract_strided_slice %27 {offsets = [0, 0, 24], sizes = [4, 8, 8], strides = [1, 1, 1]} : vector<4x8x32xf32> to vector<4x8x8xf32>
    "tpu.trace_start"() <{level = 10 : i32, message = "nqd,nkd->nqk"}> : () -> ()
    %cst_48 = arith.constant dense<0.000000e+00> : vector<4x8x8xf32>
    %104 = tpu.matmul %102, %103, %cst_48 {dimension_numbers = #tpu.dot_dimension_numbers<[2], [2], [1], [1], [0, 0, 0, 1, 1, 1], [0], [0]>} : vector<4x8x8xf32>, vector<4x8x8xf32>, vector<4x8x8xf32> -> vector<4x8x8xf32>
    "tpu.trace_stop"() : () -> ()
    %cst_49 = arith.constant 0.353553385 : f32
    %105 = vector.broadcast %cst_49 : f32 to vector<4x8x8xf32>
    %106 = arith.mulf %104, %105 : vector<4x8x8xf32>
    %cst_50 = arith.constant dense<0xFF800000> : vector<4x8xf32>
    %107 = vector.multi_reduction <maximumf>, %106, %cst_50 [2] : vector<4x8x8xf32> to vector<4x8xf32>
    %108 = vector.shape_cast %107 : vector<4x8xf32> to vector<4x8x1xf32>
    %109 = vector.broadcast %108 : vector<4x8x1xf32> to vector<4x8x8xf32>
    %110 = arith.subf %106, %109 : vector<4x8x8xf32>
    %111 = math.exp %110 : vector<4x8x8xf32>
    %cst_51 = arith.constant dense<0.000000e+00> : vector<4x8xf32>
    %112 = vector.multi_reduction <add>, %111, %cst_51 [2] : vector<4x8x8xf32> to vector<4x8xf32>
    %113 = vector.shape_cast %112 : vector<4x8xf32> to vector<4x8x1xf32>
    %cst_52 = arith.constant 9.99999971E-10 : f32
    %114 = vector.broadcast %cst_52 : f32 to vector<4x8x1xf32>
    %115 = arith.addf %113, %114 : vector<4x8x1xf32>
    %116 = vector.broadcast %115 : vector<4x8x1xf32> to vector<4x8x8xf32>
    %117 = arith.divf %111, %116 : vector<4x8x8xf32>
    %cst_53 = arith.constant 9.99999971E-10 : f32
    %cst_54 = arith.constant 1.000000e+00 : f32
    %118 = vector.broadcast %cst_53 : f32 to vector<4x8x8xf32>
    %119 = arith.maximumf %118, %117 : vector<4x8x8xf32>
    %120 = vector.broadcast %cst_54 : f32 to vector<4x8x8xf32>
    %121 = arith.minimumf %120, %119 : vector<4x8x8xf32>
    %122 = vector.extract_strided_slice %28 {offsets = [0, 0, 24], sizes = [4, 8, 8], strides = [1, 1, 1]} : vector<4x8x32xf32> to vector<4x8x8xf32>
    "tpu.trace_start"() <{level = 10 : i32, message = "nqk,nkd->nqd"}> : () -> ()
    %cst_55 = arith.constant dense<0.000000e+00> : vector<4x8x8xf32>
    %123 = tpu.matmul %121, %122, %cst_55 {dimension_numbers = #tpu.dot_dimension_numbers<[2], [1], [1], [2], [0, 0, 0, 1, 1, 2], [0], [0]>} : vector<4x8x8xf32>, vector<4x8x8xf32>, vector<4x8x8xf32> -> vector<4x8x8xf32>
    "tpu.trace_stop"() : () -> ()
    %c0_56 = arith.constant 0 : index
    %c0_57 = arith.constant 0 : index
    %c24 = arith.constant 24 : index
    %124 = vector.load %arg12[%c0_56, %c0_57, %c24] : memref<4x8x32xf32, #tpu.memory_space<vmem>>, vector<4x8x8xf32>
    tpu.vector_store %arg12[%c0_56, %c0_57, %c24], %123 {strides = array<i32>} : memref<4x8x32xf32, #tpu.memory_space<vmem>>, vector<4x8x8xf32>,
    %c0_58 = arith.constant 0 : index
    %c0_59 = arith.constant 0 : index
    %c0_60 = arith.constant 0 : index
    %125 = vector.load %arg12[%c0_58, %c0_59, %c0_60] : memref<4x8x32xf32, #tpu.memory_space<vmem>>, vector<4x8x32xf32>
    %126 = vector.shape_cast %29 : vector<32x32xf32> to vector<1x32x32xf32>
    %127 = vector.broadcast %126 : vector<1x32x32xf32> to vector<4x32x32xf32>
    "tpu.trace_start"() <{level = 10 : i32, message = "nqv,nvd->nqd"}> : () -> ()
    %cst_61 = arith.constant dense<0.000000e+00> : vector<4x8x32xf32>
    %128 = tpu.matmul %125, %127, %cst_61 {dimension_numbers = #tpu.dot_dimension_numbers<[2], [1], [1], [2], [0, 0, 0, 1, 1, 2], [0], [0]>} : vector<4x8x32xf32>, vector<4x32x32xf32>, vector<4x8x32xf32> -> vector<4x8x32xf32>
    "tpu.trace_stop"() : () -> ()
    %129 = vector.shape_cast %30 : vector<1x32xf32> to vector<1x1x32xf32>
    %130 = vector.broadcast %129 : vector<1x1x32xf32> to vector<4x8x32xf32>
    %131 = arith.addf %128, %130 : vector<4x8x32xf32>
    %cst_62 = arith.constant dense<0.000000e+00> : vector<4x8xf32>
    %132 = vector.multi_reduction <add>, %131, %cst_62 [2] : vector<4x8x32xf32> to vector<4x8xf32>
    %133 = vector.shape_cast %132 : vector<4x8xf32> to vector<4x8x1xf32>
    %cst_63 = arith.constant 3.200000e+01 : f32
    %134 = vector.broadcast %cst_63 : f32 to vector<4x8x1xf32>
    %135 = arith.divf %133, %134 : vector<4x8x1xf32>
    %136 = vector.broadcast %135 : vector<4x8x1xf32> to vector<4x8x32xf32>
    %137 = arith.subf %131, %136 : vector<4x8x32xf32>
    %138 = arith.mulf %137, %137 : vector<4x8x32xf32>
    %cst_64 = arith.constant dense<0.000000e+00> : vector<4x8xf32>
    %139 = vector.multi_reduction <add>, %138, %cst_64 [2] : vector<4x8x32xf32> to vector<4x8xf32>
    %140 = vector.shape_cast %139 : vector<4x8xf32> to vector<4x8x1xf32>
    %cst_65 = arith.constant 3.200000e+01 : f32
    %141 = vector.broadcast %cst_65 : f32 to vector<4x8x1xf32>
    %142 = arith.divf %140, %141 : vector<4x8x1xf32>
    %cst_66 = arith.constant 9.99999974E-6 : f32
    %143 = vector.broadcast %cst_66 : f32 to vector<4x8x1xf32>
    %144 = arith.addf %142, %143 : vector<4x8x1xf32>
    %145 = math.rsqrt %144 : vector<4x8x1xf32>
    %146 = vector.broadcast %145 : vector<4x8x1xf32> to vector<4x8x32xf32>
    %147 = arith.mulf %137, %146 : vector<4x8x32xf32>
    %148 = vector.shape_cast %31 : vector<1x32xf32> to vector<1x1x32xf32>
    %149 = vector.broadcast %148 : vector<1x1x32xf32> to vector<4x8x32xf32>
    %150 = arith.mulf %147, %149 : vector<4x8x32xf32>
    %151 = vector.shape_cast %32 : vector<1x32xf32> to vector<1x1x32xf32>
    %152 = vector.broadcast %151 : vector<1x1x32xf32> to vector<4x8x32xf32>
    %153 = arith.addf %150, %152 : vector<4x8x32xf32>
    %154 = arith.addf %0, %153 : vector<4x8x32xf32>
    %cst_67 = arith.constant dense<0.000000e+00> : vector<4x8xf32>
    %155 = vector.multi_reduction <add>, %154, %cst_67 [2] : vector<4x8x32xf32> to vector<4x8xf32>
    %156 = vector.shape_cast %155 : vector<4x8xf32> to vector<4x8x1xf32>
    %cst_68 = arith.constant 3.200000e+01 : f32
    %157 = vector.broadcast %cst_68 : f32 to vector<4x8x1xf32>
    %158 = arith.divf %156, %157 : vector<4x8x1xf32>
    %159 = vector.broadcast %158 : vector<4x8x1xf32> to vector<4x8x32xf32>
    %160 = arith.subf %154, %159 : vector<4x8x32xf32>
    %161 = arith.mulf %160, %160 : vector<4x8x32xf32>
    %cst_69 = arith.constant dense<0.000000e+00> : vector<4x8xf32>
    %162 = vector.multi_reduction <add>, %161, %cst_69 [2] : vector<4x8x32xf32> to vector<4x8xf32>
    %163 = vector.shape_cast %162 : vector<4x8xf32> to vector<4x8x1xf32>
    %cst_70 = arith.constant 3.200000e+01 : f32
    %164 = vector.broadcast %cst_70 : f32 to vector<4x8x1xf32>
    %165 = arith.divf %163, %164 : vector<4x8x1xf32>
    %cst_71 = arith.constant 9.99999974E-6 : f32
    %166 = vector.broadcast %cst_71 : f32 to vector<4x8x1xf32>
    %167 = arith.addf %165, %166 : vector<4x8x1xf32>
    %168 = math.rsqrt %167 : vector<4x8x1xf32>
    %169 = vector.broadcast %168 : vector<4x8x1xf32> to vector<4x8x32xf32>
    %170 = arith.mulf %160, %169 : vector<4x8x32xf32>
    %c0_72 = arith.constant 0 : index
    %c0_73 = arith.constant 0 : index
    %171 = vector.load %arg7[%c0_72, %c0_73] : memref<32x64xf32, #tpu.memory_space<vmem>>, vector<32x64xf32>
    %172 = vector.shape_cast %171 : vector<32x64xf32> to vector<1x32x64xf32>
    %173 = vector.broadcast %172 : vector<1x32x64xf32> to vector<4x32x64xf32>
    "tpu.trace_start"() <{level = 10 : i32, message = "nld,ndf->nlf"}> : () -> ()
    %cst_74 = arith.constant dense<0.000000e+00> : vector<4x8x64xf32>
    %174 = tpu.matmul %170, %173, %cst_74 {dimension_numbers = #tpu.dot_dimension_numbers<[2], [1], [1], [2], [0, 0, 0, 1, 1, 2], [0], [0]>} : vector<4x8x32xf32>, vector<4x32x64xf32>, vector<4x8x64xf32> -> vector<4x8x64xf32>
    "tpu.trace_stop"() : () -> ()
    %c0_75 = arith.constant 0 : index
    %c0_76 = arith.constant 0 : index
    %175 = vector.load %arg8[%c0_75, %c0_76] : memref<1x64xf32, #tpu.memory_space<vmem>>, vector<1x64xf32>
    %176 = vector.shape_cast %175 : vector<1x64xf32> to vector<1x1x64xf32>
    %177 = vector.broadcast %176 : vector<1x1x64xf32> to vector<4x8x64xf32>
    %178 = arith.addf %174, %177 : vector<4x8x64xf32>
    %cst_77 = arith.constant 5.000000e-01 : f32
    %179 = vector.broadcast %cst_77 : f32 to vector<4x8x64xf32>
    %180 = arith.mulf %179, %178 : vector<4x8x64xf32>
    %cst_78 = arith.constant 0.707106769 : f32
    %181 = vector.broadcast %cst_78 : f32 to vector<4x8x64xf32>
    %182 = arith.mulf %178, %181 : vector<4x8x64xf32>
    %183 = math.absf %182 : vector<4x8x64xf32>
    %cst_79 = arith.constant 0.327591091 : f32
    %184 = vector.broadcast %cst_79 : f32 to vector<4x8x64xf32>
    %185 = arith.mulf %184, %183 : vector<4x8x64xf32>
    %cst_80 = arith.constant 1.000000e+00 : f32
    %186 = vector.broadcast %cst_80 : f32 to vector<4x8x64xf32>
    %187 = arith.addf %186, %185 : vector<4x8x64xf32>
    %cst_81 = arith.constant 1.000000e+00 : f32
    %188 = vector.broadcast %cst_81 : f32 to vector<4x8x64xf32>
    %189 = arith.divf %188, %187 : vector<4x8x64xf32>
    %cst_82 = arith.constant 1.06140542 : f32
    %190 = vector.broadcast %cst_82 : f32 to vector<4x8x64xf32>
    %191 = arith.mulf %190, %189 : vector<4x8x64xf32>
    %cst_83 = arith.constant -1.45315206 : f32
    %192 = vector.broadcast %cst_83 : f32 to vector<4x8x64xf32>
    %193 = arith.addf %191, %192 : vector<4x8x64xf32>
    %194 = arith.mulf %193, %189 : vector<4x8x64xf32>
    %cst_84 = arith.constant 1.42141378 : f32
    %195 = vector.broadcast %cst_84 : f32 to vector<4x8x64xf32>
    %196 = arith.addf %194, %195 : vector<4x8x64xf32>
    %197 = arith.mulf %196, %189 : vector<4x8x64xf32>
    %cst_85 = arith.constant -0.284496725 : f32
    %198 = vector.broadcast %cst_85 : f32 to vector<4x8x64xf32>
    %199 = arith.addf %197, %198 : vector<4x8x64xf32>
    %200 = arith.mulf %199, %189 : vector<4x8x64xf32>
    %cst_86 = arith.constant 0.254829586 : f32
    %201 = vector.broadcast %cst_86 : f32 to vector<4x8x64xf32>
    %202 = arith.addf %200, %201 : vector<4x8x64xf32>
    %203 = arith.mulf %202, %189 : vector<4x8x64xf32>
    %cst_87 = arith.constant 0.000000e+00 : f32
    %204 = vector.broadcast %cst_87 : f32 to vector<4x8x64xf32>
    %205 = arith.subf %204, %183 : vector<4x8x64xf32>
    %206 = arith.mulf %205, %183 : vector<4x8x64xf32>
    %207 = math.exp %206 : vector<4x8x64xf32>
    %208 = arith.mulf %203, %207 : vector<4x8x64xf32>
    %cst_88 = arith.constant 1.000000e+00 : f32
    %209 = vector.broadcast %cst_88 : f32 to vector<4x8x64xf32>
    %210 = arith.subf %209, %208 : vector<4x8x64xf32>
    %cst_89 = arith.constant 0.000000e+00 : f32
    %211 = vector.broadcast %cst_89 : f32 to vector<4x8x64xf32>
    %212 = arith.cmpf oge, %182, %211 : vector<4x8x64xf32>
    %cst_90 = arith.constant 0.000000e+00 : f32
    %213 = vector.broadcast %cst_90 : f32 to vector<4x8x64xf32>
    %214 = arith.subf %213, %210 : vector<4x8x64xf32>
    %215 = arith.select %212, %210, %214 : vector<4x8x64xi1>, vector<4x8x64xf32>
    %cst_91 = arith.constant 1.000000e+00 : f32
    %216 = vector.broadcast %cst_91 : f32 to vector<4x8x64xf32>
    %217 = arith.addf %216, %215 : vector<4x8x64xf32>
    %218 = arith.mulf %180, %217 : vector<4x8x64xf32>
    %c0_92 = arith.constant 0 : index
    %c0_93 = arith.constant 0 : index
    %219 = vector.load %arg9[%c0_92, %c0_93] : memref<64x32xf32, #tpu.memory_space<vmem>>, vector<64x32xf32>
    %220 = vector.shape_cast %219 : vector<64x32xf32> to vector<1x64x32xf32>
    %221 = vector.broadcast %220 : vector<1x64x32xf32> to vector<4x64x32xf32>
    "tpu.trace_start"() <{level = 10 : i32, message = "nlf,nfd->nld"}> : () -> ()
    %cst_94 = arith.constant dense<0.000000e+00> : vector<4x8x32xf32>
    %222 = tpu.matmul %218, %221, %cst_94 {dimension_numbers = #tpu.dot_dimension_numbers<[2], [1], [1], [2], [0, 0, 0, 1, 1, 2], [0], [0]>} : vector<4x8x64xf32>, vector<4x64x32xf32>, vector<4x8x32xf32> -> vector<4x8x32xf32>
    "tpu.trace_stop"() : () -> ()
    %c0_95 = arith.constant 0 : index
    %c0_96 = arith.constant 0 : index
    %223 = vector.load %arg10[%c0_95, %c0_96] : memref<1x32xf32, #tpu.memory_space<vmem>>, vector<1x32xf32>
    %224 = vector.shape_cast %223 : vector<1x32xf32> to vector<1x1x32xf32>
    %225 = vector.broadcast %224 : vector<1x1x32xf32> to vector<4x8x32xf32>
    %226 = arith.addf %222, %225 : vector<4x8x32xf32>
    %227 = arith.addf %226, %154 : vector<4x8x32xf32>
    %228 = vector.extract_strided_slice %1 {offsets = [2, 0], sizes = [1, 32], strides = [1, 1]} : vector<4x32xf32> to vector<1x32xf32>
    %229 = vector.extract_strided_slice %1 {offsets = [3, 0], sizes = [1, 32], strides = [1, 1]} : vector<4x32xf32> to vector<1x32xf32>
    %cst_97 = arith.constant dense<0.000000e+00> : vector<4x8xf32>
    %230 = vector.multi_reduction <add>, %227, %cst_97 [2] : vector<4x8x32xf32> to vector<4x8xf32>
    %231 = vector.shape_cast %230 : vector<4x8xf32> to vector<4x8x1xf32>
    %cst_98 = arith.constant 3.200000e+01 : f32
    %232 = vector.broadcast %cst_98 : f32 to vector<4x8x1xf32>
    %233 = arith.divf %231, %232 : vector<4x8x1xf32>
    %234 = vector.broadcast %233 : vector<4x8x1xf32> to vector<4x8x32xf32>
    %235 = arith.subf %227, %234 : vector<4x8x32xf32>
    %236 = arith.mulf %235, %235 : vector<4x8x32xf32>
    %cst_99 = arith.constant dense<0.000000e+00> : vector<4x8xf32>
    %237 = vector.multi_reduction <add>, %236, %cst_99 [2] : vector<4x8x32xf32> to vector<4x8xf32>
    %238 = vector.shape_cast %237 : vector<4x8xf32> to vector<4x8x1xf32>
    %cst_100 = arith.constant 3.200000e+01 : f32
    %239 = vector.broadcast %cst_100 : f32 to vector<4x8x1xf32>
    %240 = arith.divf %238, %239 : vector<4x8x1xf32>
    %cst_101 = arith.constant 9.99999974E-6 : f32
    %241 = vector.broadcast %cst_101 : f32 to vector<4x8x1xf32>
    %242 = arith.addf %240, %241 : vector<4x8x1xf32>
    %243 = math.rsqrt %242 : vector<4x8x1xf32>
    %244 = vector.broadcast %243 : vector<4x8x1xf32> to vector<4x8x32xf32>
    %245 = arith.mulf %235, %244 : vector<4x8x32xf32>
    %246 = vector.shape_cast %228 : vector<1x32xf32> to vector<1x1x32xf32>
    %247 = vector.broadcast %246 : vector<1x1x32xf32> to vector<4x8x32xf32>
    %248 = arith.mulf %245, %247 : vector<4x8x32xf32>
    %249 = vector.shape_cast %229 : vector<1x32xf32> to vector<1x1x32xf32>
    %250 = vector.broadcast %249 : vector<1x1x32xf32> to vector<4x8x32xf32>
    %251 = arith.addf %248, %250 : vector<4x8x32xf32>
    %cst_102 = arith.constant -1.000000e+02 : f32
    %cst_103 = arith.constant 1.000000e+02 : f32
    %252 = vector.broadcast %cst_102 : f32 to vector<4x8x32xf32>
    %253 = arith.maximumf %252, %251 : vector<4x8x32xf32>
    %254 = vector.broadcast %cst_103 : f32 to vector<4x8x32xf32>
    %255 = arith.minimumf %254, %253 : vector<4x8x32xf32>
    %c0_104 = arith.constant 0 : index
    %c0_105 = arith.constant 0 : index
    %c0_106 = arith.constant 0 : index
    %256 = vector.load %arg11[%c0_104, %c0_105, %c0_106] : memref<4x8x32xf32, #tpu.memory_space<vmem>>, vector<4x8x32xf32>
    tpu.vector_store %arg11[%c0_104, %c0_105, %c0_106], %255 {strides = array<i32>} : memref<4x8x32xf32, #tpu.memory_space<vmem>>, vector<4x8x32xf32>,
    return
  }
  func.func @transform_0(%arg0: i32) -> (i32, i32, i32) {
    %c0_i32 = arith.constant 0 : i32
    %c0_i32_0 = arith.constant 0 : i32
    %c0_i32_1 = arith.constant 0 : i32
    %c0_i32_2 = arith.constant 0 : i32
    return %c0_i32, %c0_i32_0, %c0_i32_1 : i32, i32, i32
  }
  func.func @transform_1(%arg0: i32) -> (i32, i32) {
    %c0_i32 = arith.constant 0 : i32
    %c0_i32_0 = arith.constant 0 : i32
    %c0_i32_1 = arith.constant 0 : i32
    return %c0_i32, %c0_i32_0 : i32, i32
  }
  func.func @transform_2(%arg0: i32) -> (i32, i32) {
    %c0_i32 = arith.constant 0 : i32
    %c0_i32_0 = arith.constant 0 : i32
    %c0_i32_1 = arith.constant 0 : i32
    return %c0_i32, %c0_i32_0 : i32, i32
  }
  func.func @transform_3(%arg0: i32) -> (i32, i32) {
    %c0_i32 = arith.constant 0 : i32
    %c0_i32_0 = arith.constant 0 : i32
    %c0_i32_1 = arith.constant 0 : i32
    return %c0_i32, %c0_i32_0 : i32, i32
  }
  func.func @transform_4(%arg0: i32) -> (i32, i32) {
    %c0_i32 = arith.constant 0 : i32
    %c0_i32_0 = arith.constant 0 : i32
    %c0_i32_1 = arith.constant 0 : i32
    return %c0_i32, %c0_i32_0 : i32, i32
  }
  func.func @transform_5(%arg0: i32) -> (i32, i32) {
    %c0_i32 = arith.constant 0 : i32
    %c0_i32_0 = arith.constant 0 : i32
    %c0_i32_1 = arith.constant 0 : i32
    return %c0_i32, %c0_i32_0 : i32, i32
  }
  func.func @transform_6(%arg0: i32) -> (i32, i32) {
    %c0_i32 = arith.constant 0 : i32
    %c0_i32_0 = arith.constant 0 : i32
    %c0_i32_1 = arith.constant 0 : i32
    return %c0_i32, %c0_i32_0 : i32, i32
  }
  func.func @transform_7(%arg0: i32) -> (i32, i32) {
    %c0_i32 = arith.constant 0 : i32
    %c0_i32_0 = arith.constant 0 : i32
    %c0_i32_1 = arith.constant 0 : i32
    return %c0_i32, %c0_i32_0 : i32, i32
  }
  func.func @transform_8(%arg0: i32) -> (i32, i32) {
    %c0_i32 = arith.constant 0 : i32
    %c0_i32_0 = arith.constant 0 : i32
    %c0_i32_1 = arith.constant 0 : i32
    return %c0_i32, %c0_i32_0 : i32, i32
  }
  func.func @transform_9(%arg0: i32) -> (i32, i32) {
    %c0_i32 = arith.constant 0 : i32
    %c0_i32_0 = arith.constant 0 : i32
    %c0_i32_1 = arith.constant 0 : i32
    return %c0_i32, %c0_i32_0 : i32, i32
  }
  func.func @transform_10(%arg0: i32) -> (i32, i32, i32) {
    %c0_i32 = arith.constant 0 : i32
    %c0_i32_0 = arith.constant 0 : i32
    %c0_i32_1 = arith.constant 0 : i32
    %c0_i32_2 = arith.constant 0 : i32
    return %c0_i32, %c0_i32_0, %c0_i32_1 : i32, i32, i32
  }
}

module attributes {stable_mosaic.version = 11 : i64} {
  func.func @_pooling_kernel(%arg0: i32, %arg1: memref<4x8x32xf32, #tpu.memory_space<vmem>>, %arg2: memref<4x32xf32, #tpu.memory_space<vmem>>, %arg3: memref<1x1x32xf32, #tpu.memory_space<vmem>>, %arg4: memref<2x32xf32, #tpu.memory_space<vmem>>, %arg5: memref<32x96xf32, #tpu.memory_space<vmem>>, %arg6: memref<1x96xf32, #tpu.memory_space<vmem>>, %arg7: memref<32x32xf32, #tpu.memory_space<vmem>>, %arg8: memref<1x32xf32, #tpu.memory_space<vmem>>, %arg9: memref<4x1x32xf32, #tpu.memory_space<vmem>>, %arg10: memref<4x1x32xf32, #tpu.memory_space<vmem>>) attributes {dimension_semantics = [#tpu.dimension_semantics<arbitrary>], iteration_bounds = array<i64: 1>, scalar_prefetch = 0 : i64, scratch_operands = 1 : i64, tpu.core_type = #tpu.core_type<tc>, window_params = [{pipeline_mode = #tpu.pipeline_mode<synchronous>, transform_indices = @transform_0, window_bounds = array<i64: 4, 8, 32>}, {pipeline_mode = #tpu.pipeline_mode<synchronous>, transform_indices = @transform_1, window_bounds = array<i64: 4, 32>}, {pipeline_mode = #tpu.pipeline_mode<synchronous>, transform_indices = @transform_2, window_bounds = array<i64: 1, 1, 32>}, {pipeline_mode = #tpu.pipeline_mode<synchronous>, transform_indices = @transform_3, window_bounds = array<i64: 2, 32>}, {pipeline_mode = #tpu.pipeline_mode<synchronous>, transform_indices = @transform_4, window_bounds = array<i64: 32, 96>}, {pipeline_mode = #tpu.pipeline_mode<synchronous>, transform_indices = @transform_5, window_bounds = array<i64: 1, 96>}, {pipeline_mode = #tpu.pipeline_mode<synchronous>, transform_indices = @transform_6, window_bounds = array<i64: 32, 32>}, {pipeline_mode = #tpu.pipeline_mode<synchronous>, transform_indices = @transform_7, window_bounds = array<i64: 1, 32>}, {pipeline_mode = #tpu.pipeline_mode<synchronous>, transform_indices = @transform_8, window_bounds = array<i64: 4, 1, 32>}]} {
    %c0 = arith.constant 0 : index
    %c0_0 = arith.constant 0 : index
    %c0_1 = arith.constant 0 : index
    %0 = vector.load %arg1[%c0, %c0_0, %c0_1] : memref<4x8x32xf32, #tpu.memory_space<vmem>>, vector<4x8x32xf32>
    %c0_2 = arith.constant 0 : index
    %c0_3 = arith.constant 0 : index
    %1 = vector.load %arg2[%c0_2, %c0_3] : memref<4x32xf32, #tpu.memory_space<vmem>>, vector<4x32xf32>
    %2 = vector.extract_strided_slice %1 {offsets = [0, 0], sizes = [1, 32], strides = [1, 1]} : vector<4x32xf32> to vector<1x32xf32>
    %3 = vector.extract_strided_slice %1 {offsets = [1, 0], sizes = [1, 32], strides = [1, 1]} : vector<4x32xf32> to vector<1x32xf32>
    %cst = arith.constant dense<0.000000e+00> : vector<4x8xf32>
    %4 = vector.multi_reduction <add>, %0, %cst [2] : vector<4x8x32xf32> to vector<4x8xf32>
    %5 = vector.shape_cast %4 : vector<4x8xf32> to vector<4x8x1xf32>
    %cst_4 = arith.constant 3.200000e+01 : f32
    %6 = vector.broadcast %cst_4 : f32 to vector<4x8x1xf32>
    %7 = arith.divf %5, %6 : vector<4x8x1xf32>
    %8 = vector.broadcast %7 : vector<4x8x1xf32> to vector<4x8x32xf32>
    %9 = arith.subf %0, %8 : vector<4x8x32xf32>
    %10 = arith.mulf %9, %9 : vector<4x8x32xf32>
    %cst_5 = arith.constant dense<0.000000e+00> : vector<4x8xf32>
    %11 = vector.multi_reduction <add>, %10, %cst_5 [2] : vector<4x8x32xf32> to vector<4x8xf32>
    %12 = vector.shape_cast %11 : vector<4x8xf32> to vector<4x8x1xf32>
    %cst_6 = arith.constant 3.200000e+01 : f32
    %13 = vector.broadcast %cst_6 : f32 to vector<4x8x1xf32>
    %14 = arith.divf %12, %13 : vector<4x8x1xf32>
    %cst_7 = arith.constant 9.99999974E-6 : f32
    %15 = vector.broadcast %cst_7 : f32 to vector<4x8x1xf32>
    %16 = arith.addf %14, %15 : vector<4x8x1xf32>
    %17 = math.rsqrt %16 : vector<4x8x1xf32>
    %18 = vector.broadcast %17 : vector<4x8x1xf32> to vector<4x8x32xf32>
    %19 = arith.mulf %9, %18 : vector<4x8x32xf32>
    %20 = vector.shape_cast %2 : vector<1x32xf32> to vector<1x1x32xf32>
    %21 = vector.broadcast %20 : vector<1x1x32xf32> to vector<4x8x32xf32>
    %22 = arith.mulf %19, %21 : vector<4x8x32xf32>
    %23 = vector.shape_cast %3 : vector<1x32xf32> to vector<1x1x32xf32>
    %24 = vector.broadcast %23 : vector<1x1x32xf32> to vector<4x8x32xf32>
    %25 = arith.addf %22, %24 : vector<4x8x32xf32>
    %26 = vector.extract_strided_slice %1 {offsets = [2, 0], sizes = [1, 32], strides = [1, 1]} : vector<4x32xf32> to vector<1x32xf32>
    %27 = vector.extract_strided_slice %1 {offsets = [3, 0], sizes = [1, 32], strides = [1, 1]} : vector<4x32xf32> to vector<1x32xf32>
    %cst_8 = arith.constant dense<0.000000e+00> : vector<4x8xf32>
    %28 = vector.multi_reduction <add>, %25, %cst_8 [2] : vector<4x8x32xf32> to vector<4x8xf32>
    %29 = vector.shape_cast %28 : vector<4x8xf32> to vector<4x8x1xf32>
    %cst_9 = arith.constant 3.200000e+01 : f32
    %30 = vector.broadcast %cst_9 : f32 to vector<4x8x1xf32>
    %31 = arith.divf %29, %30 : vector<4x8x1xf32>
    %32 = vector.broadcast %31 : vector<4x8x1xf32> to vector<4x8x32xf32>
    %33 = arith.subf %25, %32 : vector<4x8x32xf32>
    %34 = arith.mulf %33, %33 : vector<4x8x32xf32>
    %cst_10 = arith.constant dense<0.000000e+00> : vector<4x8xf32>
    %35 = vector.multi_reduction <add>, %34, %cst_10 [2] : vector<4x8x32xf32> to vector<4x8xf32>
    %36 = vector.shape_cast %35 : vector<4x8xf32> to vector<4x8x1xf32>
    %cst_11 = arith.constant 3.200000e+01 : f32
    %37 = vector.broadcast %cst_11 : f32 to vector<4x8x1xf32>
    %38 = arith.divf %36, %37 : vector<4x8x1xf32>
    %cst_12 = arith.constant 9.99999974E-6 : f32
    %39 = vector.broadcast %cst_12 : f32 to vector<4x8x1xf32>
    %40 = arith.addf %38, %39 : vector<4x8x1xf32>
    %41 = math.rsqrt %40 : vector<4x8x1xf32>
    %42 = vector.broadcast %41 : vector<4x8x1xf32> to vector<4x8x32xf32>
    %43 = arith.mulf %33, %42 : vector<4x8x32xf32>
    %44 = vector.shape_cast %26 : vector<1x32xf32> to vector<1x1x32xf32>
    %45 = vector.broadcast %44 : vector<1x1x32xf32> to vector<4x8x32xf32>
    %46 = arith.mulf %43, %45 : vector<4x8x32xf32>
    %47 = vector.shape_cast %27 : vector<1x32xf32> to vector<1x1x32xf32>
    %48 = vector.broadcast %47 : vector<1x1x32xf32> to vector<4x8x32xf32>
    %49 = arith.addf %46, %48 : vector<4x8x32xf32>
    %c0_13 = arith.constant 0 : index
    %c0_14 = arith.constant 0 : index
    %50 = vector.load %arg5[%c0_13, %c0_14] : memref<32x96xf32, #tpu.memory_space<vmem>>, vector<32x96xf32>
    %c0_15 = arith.constant 0 : index
    %c0_16 = arith.constant 0 : index
    %51 = vector.load %arg6[%c0_15, %c0_16] : memref<1x96xf32, #tpu.memory_space<vmem>>, vector<1x96xf32>
    %c0_17 = arith.constant 0 : index
    %c0_18 = arith.constant 0 : index
    %52 = vector.load %arg4[%c0_17, %c0_18] : memref<2x32xf32, #tpu.memory_space<vmem>>, vector<2x32xf32>
    %c0_19 = arith.constant 0 : index
    %c0_20 = arith.constant 0 : index
    %c0_21 = arith.constant 0 : index
    %53 = vector.load %arg3[%c0_19, %c0_20, %c0_21] : memref<1x1x32xf32, #tpu.memory_space<vmem>>, vector<1x1x32xf32>
    %54 = vector.shape_cast %53 : vector<1x1x32xf32> to vector<1x1x32xf32>
    %55 = vector.broadcast %54 : vector<1x1x32xf32> to vector<4x1x32xf32>
    %cst_22 = arith.constant dense<0.000000e+00> : vector<4x1xf32>
    %56 = vector.multi_reduction <add>, %55, %cst_22 [2] : vector<4x1x32xf32> to vector<4x1xf32>
    %57 = vector.shape_cast %56 : vector<4x1xf32> to vector<4x1x1xf32>
    %cst_23 = arith.constant 3.200000e+01 : f32
    %58 = vector.broadcast %cst_23 : f32 to vector<4x1x1xf32>
    %59 = arith.divf %57, %58 : vector<4x1x1xf32>
    %60 = vector.broadcast %59 : vector<4x1x1xf32> to vector<4x1x32xf32>
    %61 = arith.subf %55, %60 : vector<4x1x32xf32>
    %62 = arith.mulf %61, %61 : vector<4x1x32xf32>
    %cst_24 = arith.constant dense<0.000000e+00> : vector<4x1xf32>
    %63 = vector.multi_reduction <add>, %62, %cst_24 [2] : vector<4x1x32xf32> to vector<4x1xf32>
    %64 = vector.shape_cast %63 : vector<4x1xf32> to vector<4x1x1xf32>
    %cst_25 = arith.constant 3.200000e+01 : f32
    %65 = vector.broadcast %cst_25 : f32 to vector<4x1x1xf32>
    %66 = arith.divf %64, %65 : vector<4x1x1xf32>
    %cst_26 = arith.constant 9.99999974E-6 : f32
    %67 = vector.broadcast %cst_26 : f32 to vector<4x1x1xf32>
    %68 = arith.addf %66, %67 : vector<4x1x1xf32>
    %69 = math.rsqrt %68 : vector<4x1x1xf32>
    %70 = vector.broadcast %69 : vector<4x1x1xf32> to vector<4x1x32xf32>
    %71 = arith.mulf %61, %70 : vector<4x1x32xf32>
    %72 = vector.extract_strided_slice %50 {offsets = [0, 0], sizes = [32, 32], strides = [1, 1]} : vector<32x96xf32> to vector<32x32xf32>
    %73 = vector.shape_cast %72 : vector<32x32xf32> to vector<1x32x32xf32>
    %74 = vector.broadcast %73 : vector<1x32x32xf32> to vector<4x32x32xf32>
    "tpu.trace_start"() <{level = 10 : i32, message = "nld,ndf->nlf"}> : () -> ()
    %cst_27 = arith.constant dense<0.000000e+00> : vector<4x1x32xf32>
    %75 = tpu.matmul %71, %74, %cst_27 {dimension_numbers = #tpu.dot_dimension_numbers<[2], [1], [1], [2], [0, 0, 0, 1, 1, 2], [0], [0]>} : vector<4x1x32xf32>, vector<4x32x32xf32>, vector<4x1x32xf32> -> vector<4x1x32xf32>
    "tpu.trace_stop"() : () -> ()
    %76 = vector.extract_strided_slice %51 {offsets = [0, 0], sizes = [1, 32], strides = [1, 1]} : vector<1x96xf32> to vector<1x32xf32>
    %77 = vector.shape_cast %76 : vector<1x32xf32> to vector<1x1x32xf32>
    %78 = vector.broadcast %77 : vector<1x1x32xf32> to vector<4x1x32xf32>
    %79 = arith.addf %75, %78 : vector<4x1x32xf32>
    %cst_28 = arith.constant dense<0.000000e+00> : vector<4x8xf32>
    %80 = vector.multi_reduction <add>, %49, %cst_28 [2] : vector<4x8x32xf32> to vector<4x8xf32>
    %81 = vector.shape_cast %80 : vector<4x8xf32> to vector<4x8x1xf32>
    %cst_29 = arith.constant 3.200000e+01 : f32
    %82 = vector.broadcast %cst_29 : f32 to vector<4x8x1xf32>
    %83 = arith.divf %81, %82 : vector<4x8x1xf32>
    %84 = vector.broadcast %83 : vector<4x8x1xf32> to vector<4x8x32xf32>
    %85 = arith.subf %49, %84 : vector<4x8x32xf32>
    %86 = arith.mulf %85, %85 : vector<4x8x32xf32>
    %cst_30 = arith.constant dense<0.000000e+00> : vector<4x8xf32>
    %87 = vector.multi_reduction <add>, %86, %cst_30 [2] : vector<4x8x32xf32> to vector<4x8xf32>
    %88 = vector.shape_cast %87 : vector<4x8xf32> to vector<4x8x1xf32>
    %cst_31 = arith.constant 3.200000e+01 : f32
    %89 = vector.broadcast %cst_31 : f32 to vector<4x8x1xf32>
    %90 = arith.divf %88, %89 : vector<4x8x1xf32>
    %cst_32 = arith.constant 9.99999974E-6 : f32
    %91 = vector.broadcast %cst_32 : f32 to vector<4x8x1xf32>
    %92 = arith.addf %90, %91 : vector<4x8x1xf32>
    %93 = math.rsqrt %92 : vector<4x8x1xf32>
    %94 = vector.broadcast %93 : vector<4x8x1xf32> to vector<4x8x32xf32>
    %95 = arith.mulf %85, %94 : vector<4x8x32xf32>
    %96 = vector.extract_strided_slice %50 {offsets = [0, 32], sizes = [32, 64], strides = [1, 1]} : vector<32x96xf32> to vector<32x64xf32>
    %97 = vector.shape_cast %96 : vector<32x64xf32> to vector<1x32x64xf32>
    %98 = vector.broadcast %97 : vector<1x32x64xf32> to vector<4x32x64xf32>
    "tpu.trace_start"() <{level = 10 : i32, message = "nld,ndf->nlf"}> : () -> ()
    %cst_33 = arith.constant dense<0.000000e+00> : vector<4x8x64xf32>
    %99 = tpu.matmul %95, %98, %cst_33 {dimension_numbers = #tpu.dot_dimension_numbers<[2], [1], [1], [2], [0, 0, 0, 1, 1, 2], [0], [0]>} : vector<4x8x32xf32>, vector<4x32x64xf32>, vector<4x8x64xf32> -> vector<4x8x64xf32>
    "tpu.trace_stop"() : () -> ()
    %100 = vector.extract_strided_slice %51 {offsets = [0, 32], sizes = [1, 64], strides = [1, 1]} : vector<1x96xf32> to vector<1x64xf32>
    %101 = vector.shape_cast %100 : vector<1x64xf32> to vector<1x1x64xf32>
    %102 = vector.broadcast %101 : vector<1x1x64xf32> to vector<4x8x64xf32>
    %103 = arith.addf %99, %102 : vector<4x8x64xf32>
    %104 = vector.extract_strided_slice %103 {offsets = [0, 0, 0], sizes = [4, 8, 32], strides = [1, 1, 1]} : vector<4x8x64xf32> to vector<4x8x32xf32>
    %105 = vector.extract_strided_slice %103 {offsets = [0, 0, 32], sizes = [4, 8, 32], strides = [1, 1, 1]} : vector<4x8x64xf32> to vector<4x8x32xf32>
    %c0_34 = arith.constant 0 : index
    %c0_35 = arith.constant 0 : index
    %106 = vector.load %arg7[%c0_34, %c0_35] : memref<32x32xf32, #tpu.memory_space<vmem>>, vector<32x32xf32>
    %c0_36 = arith.constant 0 : index
    %c0_37 = arith.constant 0 : index
    %107 = vector.load %arg8[%c0_36, %c0_37] : memref<1x32xf32, #tpu.memory_space<vmem>>, vector<1x32xf32>
    %108 = vector.extract_strided_slice %52 {offsets = [0, 0], sizes = [1, 32], strides = [1, 1]} : vector<2x32xf32> to vector<1x32xf32>
    %109 = vector.extract_strided_slice %52 {offsets = [1, 0], sizes = [1, 32], strides = [1, 1]} : vector<2x32xf32> to vector<1x32xf32>
    %110 = vector.extract_strided_slice %79 {offsets = [0, 0, 0], sizes = [4, 1, 8], strides = [1, 1, 1]} : vector<4x1x32xf32> to vector<4x1x8xf32>
    %111 = vector.extract_strided_slice %104 {offsets = [0, 0, 0], sizes = [4, 8, 8], strides = [1, 1, 1]} : vector<4x8x32xf32> to vector<4x8x8xf32>
    "tpu.trace_start"() <{level = 10 : i32, message = "nqd,nkd->nqk"}> : () -> ()
    %cst_38 = arith.constant dense<0.000000e+00> : vector<4x1x8xf32>
    %112 = tpu.matmul %110, %111, %cst_38 {dimension_numbers = #tpu.dot_dimension_numbers<[2], [2], [1], [1], [0, 0, 0, 1, 1, 1], [0], [0]>} : vector<4x1x8xf32>, vector<4x8x8xf32>, vector<4x1x8xf32> -> vector<4x1x8xf32>
    "tpu.trace_stop"() : () -> ()
    %cst_39 = arith.constant 0.353553385 : f32
    %113 = vector.broadcast %cst_39 : f32 to vector<4x1x8xf32>
    %114 = arith.mulf %112, %113 : vector<4x1x8xf32>
    %cst_40 = arith.constant dense<0xFF800000> : vector<4x1xf32>
    %115 = vector.multi_reduction <maximumf>, %114, %cst_40 [2] : vector<4x1x8xf32> to vector<4x1xf32>
    %116 = vector.shape_cast %115 : vector<4x1xf32> to vector<4x1x1xf32>
    %117 = vector.broadcast %116 : vector<4x1x1xf32> to vector<4x1x8xf32>
    %118 = arith.subf %114, %117 : vector<4x1x8xf32>
    %119 = math.exp %118 : vector<4x1x8xf32>
    %cst_41 = arith.constant dense<0.000000e+00> : vector<4x1xf32>
    %120 = vector.multi_reduction <add>, %119, %cst_41 [2] : vector<4x1x8xf32> to vector<4x1xf32>
    %121 = vector.shape_cast %120 : vector<4x1xf32> to vector<4x1x1xf32>
    %cst_42 = arith.constant 9.99999971E-10 : f32
    %122 = vector.broadcast %cst_42 : f32 to vector<4x1x1xf32>
    %123 = arith.addf %121, %122 : vector<4x1x1xf32>
    %124 = vector.broadcast %123 : vector<4x1x1xf32> to vector<4x1x8xf32>
    %125 = arith.divf %119, %124 : vector<4x1x8xf32>
    %cst_43 = arith.constant 9.99999971E-10 : f32
    %cst_44 = arith.constant 1.000000e+00 : f32
    %126 = vector.broadcast %cst_43 : f32 to vector<4x1x8xf32>
    %127 = arith.maximumf %126, %125 : vector<4x1x8xf32>
    %128 = vector.broadcast %cst_44 : f32 to vector<4x1x8xf32>
    %129 = arith.minimumf %128, %127 : vector<4x1x8xf32>
    %130 = vector.extract_strided_slice %105 {offsets = [0, 0, 0], sizes = [4, 8, 8], strides = [1, 1, 1]} : vector<4x8x32xf32> to vector<4x8x8xf32>
    "tpu.trace_start"() <{level = 10 : i32, message = "nqk,nkd->nqd"}> : () -> ()
    %cst_45 = arith.constant dense<0.000000e+00> : vector<4x1x8xf32>
    %131 = tpu.matmul %129, %130, %cst_45 {dimension_numbers = #tpu.dot_dimension_numbers<[2], [1], [1], [2], [0, 0, 0, 1, 1, 2], [0], [0]>} : vector<4x1x8xf32>, vector<4x8x8xf32>, vector<4x1x8xf32> -> vector<4x1x8xf32>
    "tpu.trace_stop"() : () -> ()
    %c0_46 = arith.constant 0 : index
    %c0_47 = arith.constant 0 : index
    %c0_48 = arith.constant 0 : index
    %132 = vector.load %arg10[%c0_46, %c0_47, %c0_48] : memref<4x1x32xf32, #tpu.memory_space<vmem>>, vector<4x1x8xf32>
    tpu.vector_store %arg10[%c0_46, %c0_47, %c0_48], %131 {strides = array<i32>} : memref<4x1x32xf32, #tpu.memory_space<vmem>>, vector<4x1x8xf32>,
    %133 = vector.extract_strided_slice %79 {offsets = [0, 0, 8], sizes = [4, 1, 8], strides = [1, 1, 1]} : vector<4x1x32xf32> to vector<4x1x8xf32>
    %134 = vector.extract_strided_slice %104 {offsets = [0, 0, 8], sizes = [4, 8, 8], strides = [1, 1, 1]} : vector<4x8x32xf32> to vector<4x8x8xf32>
    "tpu.trace_start"() <{level = 10 : i32, message = "nqd,nkd->nqk"}> : () -> ()
    %cst_49 = arith.constant dense<0.000000e+00> : vector<4x1x8xf32>
    %135 = tpu.matmul %133, %134, %cst_49 {dimension_numbers = #tpu.dot_dimension_numbers<[2], [2], [1], [1], [0, 0, 0, 1, 1, 1], [0], [0]>} : vector<4x1x8xf32>, vector<4x8x8xf32>, vector<4x1x8xf32> -> vector<4x1x8xf32>
    "tpu.trace_stop"() : () -> ()
    %cst_50 = arith.constant 0.353553385 : f32
    %136 = vector.broadcast %cst_50 : f32 to vector<4x1x8xf32>
    %137 = arith.mulf %135, %136 : vector<4x1x8xf32>
    %cst_51 = arith.constant dense<0xFF800000> : vector<4x1xf32>
    %138 = vector.multi_reduction <maximumf>, %137, %cst_51 [2] : vector<4x1x8xf32> to vector<4x1xf32>
    %139 = vector.shape_cast %138 : vector<4x1xf32> to vector<4x1x1xf32>
    %140 = vector.broadcast %139 : vector<4x1x1xf32> to vector<4x1x8xf32>
    %141 = arith.subf %137, %140 : vector<4x1x8xf32>
    %142 = math.exp %141 : vector<4x1x8xf32>
    %cst_52 = arith.constant dense<0.000000e+00> : vector<4x1xf32>
    %143 = vector.multi_reduction <add>, %142, %cst_52 [2] : vector<4x1x8xf32> to vector<4x1xf32>
    %144 = vector.shape_cast %143 : vector<4x1xf32> to vector<4x1x1xf32>
    %cst_53 = arith.constant 9.99999971E-10 : f32
    %145 = vector.broadcast %cst_53 : f32 to vector<4x1x1xf32>
    %146 = arith.addf %144, %145 : vector<4x1x1xf32>
    %147 = vector.broadcast %146 : vector<4x1x1xf32> to vector<4x1x8xf32>
    %148 = arith.divf %142, %147 : vector<4x1x8xf32>
    %cst_54 = arith.constant 9.99999971E-10 : f32
    %cst_55 = arith.constant 1.000000e+00 : f32
    %149 = vector.broadcast %cst_54 : f32 to vector<4x1x8xf32>
    %150 = arith.maximumf %149, %148 : vector<4x1x8xf32>
    %151 = vector.broadcast %cst_55 : f32 to vector<4x1x8xf32>
    %152 = arith.minimumf %151, %150 : vector<4x1x8xf32>
    %153 = vector.extract_strided_slice %105 {offsets = [0, 0, 8], sizes = [4, 8, 8], strides = [1, 1, 1]} : vector<4x8x32xf32> to vector<4x8x8xf32>
    "tpu.trace_start"() <{level = 10 : i32, message = "nqk,nkd->nqd"}> : () -> ()
    %cst_56 = arith.constant dense<0.000000e+00> : vector<4x1x8xf32>
    %154 = tpu.matmul %152, %153, %cst_56 {dimension_numbers = #tpu.dot_dimension_numbers<[2], [1], [1], [2], [0, 0, 0, 1, 1, 2], [0], [0]>} : vector<4x1x8xf32>, vector<4x8x8xf32>, vector<4x1x8xf32> -> vector<4x1x8xf32>
    "tpu.trace_stop"() : () -> ()
    %c0_57 = arith.constant 0 : index
    %c0_58 = arith.constant 0 : index
    %c8 = arith.constant 8 : index
    %155 = vector.load %arg10[%c0_57, %c0_58, %c8] : memref<4x1x32xf32, #tpu.memory_space<vmem>>, vector<4x1x8xf32>
    tpu.vector_store %arg10[%c0_57, %c0_58, %c8], %154 {strides = array<i32>} : memref<4x1x32xf32, #tpu.memory_space<vmem>>, vector<4x1x8xf32>,
    %156 = vector.extract_strided_slice %79 {offsets = [0, 0, 16], sizes = [4, 1, 8], strides = [1, 1, 1]} : vector<4x1x32xf32> to vector<4x1x8xf32>
    %157 = vector.extract_strided_slice %104 {offsets = [0, 0, 16], sizes = [4, 8, 8], strides = [1, 1, 1]} : vector<4x8x32xf32> to vector<4x8x8xf32>
    "tpu.trace_start"() <{level = 10 : i32, message = "nqd,nkd->nqk"}> : () -> ()
    %cst_59 = arith.constant dense<0.000000e+00> : vector<4x1x8xf32>
    %158 = tpu.matmul %156, %157, %cst_59 {dimension_numbers = #tpu.dot_dimension_numbers<[2], [2], [1], [1], [0, 0, 0, 1, 1, 1], [0], [0]>} : vector<4x1x8xf32>, vector<4x8x8xf32>, vector<4x1x8xf32> -> vector<4x1x8xf32>
    "tpu.trace_stop"() : () -> ()
    %cst_60 = arith.constant 0.353553385 : f32
    %159 = vector.broadcast %cst_60 : f32 to vector<4x1x8xf32>
    %160 = arith.mulf %158, %159 : vector<4x1x8xf32>
    %cst_61 = arith.constant dense<0xFF800000> : vector<4x1xf32>
    %161 = vector.multi_reduction <maximumf>, %160, %cst_61 [2] : vector<4x1x8xf32> to vector<4x1xf32>
    %162 = vector.shape_cast %161 : vector<4x1xf32> to vector<4x1x1xf32>
    %163 = vector.broadcast %162 : vector<4x1x1xf32> to vector<4x1x8xf32>
    %164 = arith.subf %160, %163 : vector<4x1x8xf32>
    %165 = math.exp %164 : vector<4x1x8xf32>
    %cst_62 = arith.constant dense<0.000000e+00> : vector<4x1xf32>
    %166 = vector.multi_reduction <add>, %165, %cst_62 [2] : vector<4x1x8xf32> to vector<4x1xf32>
    %167 = vector.shape_cast %166 : vector<4x1xf32> to vector<4x1x1xf32>
    %cst_63 = arith.constant 9.99999971E-10 : f32
    %168 = vector.broadcast %cst_63 : f32 to vector<4x1x1xf32>
    %169 = arith.addf %167, %168 : vector<4x1x1xf32>
    %170 = vector.broadcast %169 : vector<4x1x1xf32> to vector<4x1x8xf32>
    %171 = arith.divf %165, %170 : vector<4x1x8xf32>
    %cst_64 = arith.constant 9.99999971E-10 : f32
    %cst_65 = arith.constant 1.000000e+00 : f32
    %172 = vector.broadcast %cst_64 : f32 to vector<4x1x8xf32>
    %173 = arith.maximumf %172, %171 : vector<4x1x8xf32>
    %174 = vector.broadcast %cst_65 : f32 to vector<4x1x8xf32>
    %175 = arith.minimumf %174, %173 : vector<4x1x8xf32>
    %176 = vector.extract_strided_slice %105 {offsets = [0, 0, 16], sizes = [4, 8, 8], strides = [1, 1, 1]} : vector<4x8x32xf32> to vector<4x8x8xf32>
    "tpu.trace_start"() <{level = 10 : i32, message = "nqk,nkd->nqd"}> : () -> ()
    %cst_66 = arith.constant dense<0.000000e+00> : vector<4x1x8xf32>
    %177 = tpu.matmul %175, %176, %cst_66 {dimension_numbers = #tpu.dot_dimension_numbers<[2], [1], [1], [2], [0, 0, 0, 1, 1, 2], [0], [0]>} : vector<4x1x8xf32>, vector<4x8x8xf32>, vector<4x1x8xf32> -> vector<4x1x8xf32>
    "tpu.trace_stop"() : () -> ()
    %c0_67 = arith.constant 0 : index
    %c0_68 = arith.constant 0 : index
    %c16 = arith.constant 16 : index
    %178 = vector.load %arg10[%c0_67, %c0_68, %c16] : memref<4x1x32xf32, #tpu.memory_space<vmem>>, vector<4x1x8xf32>
    tpu.vector_store %arg10[%c0_67, %c0_68, %c16], %177 {strides = array<i32>} : memref<4x1x32xf32, #tpu.memory_space<vmem>>, vector<4x1x8xf32>,
    %179 = vector.extract_strided_slice %79 {offsets = [0, 0, 24], sizes = [4, 1, 8], strides = [1, 1, 1]} : vector<4x1x32xf32> to vector<4x1x8xf32>
    %180 = vector.extract_strided_slice %104 {offsets = [0, 0, 24], sizes = [4, 8, 8], strides = [1, 1, 1]} : vector<4x8x32xf32> to vector<4x8x8xf32>
    "tpu.trace_start"() <{level = 10 : i32, message = "nqd,nkd->nqk"}> : () -> ()
    %cst_69 = arith.constant dense<0.000000e+00> : vector<4x1x8xf32>
    %181 = tpu.matmul %179, %180, %cst_69 {dimension_numbers = #tpu.dot_dimension_numbers<[2], [2], [1], [1], [0, 0, 0, 1, 1, 1], [0], [0]>} : vector<4x1x8xf32>, vector<4x8x8xf32>, vector<4x1x8xf32> -> vector<4x1x8xf32>
    "tpu.trace_stop"() : () -> ()
    %cst_70 = arith.constant 0.353553385 : f32
    %182 = vector.broadcast %cst_70 : f32 to vector<4x1x8xf32>
    %183 = arith.mulf %181, %182 : vector<4x1x8xf32>
    %cst_71 = arith.constant dense<0xFF800000> : vector<4x1xf32>
    %184 = vector.multi_reduction <maximumf>, %183, %cst_71 [2] : vector<4x1x8xf32> to vector<4x1xf32>
    %185 = vector.shape_cast %184 : vector<4x1xf32> to vector<4x1x1xf32>
    %186 = vector.broadcast %185 : vector<4x1x1xf32> to vector<4x1x8xf32>
    %187 = arith.subf %183, %186 : vector<4x1x8xf32>
    %188 = math.exp %187 : vector<4x1x8xf32>
    %cst_72 = arith.constant dense<0.000000e+00> : vector<4x1xf32>
    %189 = vector.multi_reduction <add>, %188, %cst_72 [2] : vector<4x1x8xf32> to vector<4x1xf32>
    %190 = vector.shape_cast %189 : vector<4x1xf32> to vector<4x1x1xf32>
    %cst_73 = arith.constant 9.99999971E-10 : f32
    %191 = vector.broadcast %cst_73 : f32 to vector<4x1x1xf32>
    %192 = arith.addf %190, %191 : vector<4x1x1xf32>
    %193 = vector.broadcast %192 : vector<4x1x1xf32> to vector<4x1x8xf32>
    %194 = arith.divf %188, %193 : vector<4x1x8xf32>
    %cst_74 = arith.constant 9.99999971E-10 : f32
    %cst_75 = arith.constant 1.000000e+00 : f32
    %195 = vector.broadcast %cst_74 : f32 to vector<4x1x8xf32>
    %196 = arith.maximumf %195, %194 : vector<4x1x8xf32>
    %197 = vector.broadcast %cst_75 : f32 to vector<4x1x8xf32>
    %198 = arith.minimumf %197, %196 : vector<4x1x8xf32>
    %199 = vector.extract_strided_slice %105 {offsets = [0, 0, 24], sizes = [4, 8, 8], strides = [1, 1, 1]} : vector<4x8x32xf32> to vector<4x8x8xf32>
    "tpu.trace_start"() <{level = 10 : i32, message = "nqk,nkd->nqd"}> : () -> ()
    %cst_76 = arith.constant dense<0.000000e+00> : vector<4x1x8xf32>
    %200 = tpu.matmul %198, %199, %cst_76 {dimension_numbers = #tpu.dot_dimension_numbers<[2], [1], [1], [2], [0, 0, 0, 1, 1, 2], [0], [0]>} : vector<4x1x8xf32>, vector<4x8x8xf32>, vector<4x1x8xf32> -> vector<4x1x8xf32>
    "tpu.trace_stop"() : () -> ()
    %c0_77 = arith.constant 0 : index
    %c0_78 = arith.constant 0 : index
    %c24 = arith.constant 24 : index
    %201 = vector.load %arg10[%c0_77, %c0_78, %c24] : memref<4x1x32xf32, #tpu.memory_space<vmem>>, vector<4x1x8xf32>
    tpu.vector_store %arg10[%c0_77, %c0_78, %c24], %200 {strides = array<i32>} : memref<4x1x32xf32, #tpu.memory_space<vmem>>, vector<4x1x8xf32>,
    %c0_79 = arith.constant 0 : index
    %c0_80 = arith.constant 0 : index
    %c0_81 = arith.constant 0 : index
    %202 = vector.load %arg10[%c0_79, %c0_80, %c0_81] : memref<4x1x32xf32, #tpu.memory_space<vmem>>, vector<4x1x32xf32>
    %203 = vector.shape_cast %106 : vector<32x32xf32> to vector<1x32x32xf32>
    %204 = vector.broadcast %203 : vector<1x32x32xf32> to vector<4x32x32xf32>
    "tpu.trace_start"() <{level = 10 : i32, message = "nqv,nvd->nqd"}> : () -> ()
    %cst_82 = arith.constant dense<0.000000e+00> : vector<4x1x32xf32>
    %205 = tpu.matmul %202, %204, %cst_82 {dimension_numbers = #tpu.dot_dimension_numbers<[2], [1], [1], [2], [0, 0, 0, 1, 1, 2], [0], [0]>} : vector<4x1x32xf32>, vector<4x32x32xf32>, vector<4x1x32xf32> -> vector<4x1x32xf32>
    "tpu.trace_stop"() : () -> ()
    %206 = vector.shape_cast %107 : vector<1x32xf32> to vector<1x1x32xf32>
    %207 = vector.broadcast %206 : vector<1x1x32xf32> to vector<4x1x32xf32>
    %208 = arith.addf %205, %207 : vector<4x1x32xf32>
    %cst_83 = arith.constant dense<0.000000e+00> : vector<4x1xf32>
    %209 = vector.multi_reduction <add>, %208, %cst_83 [2] : vector<4x1x32xf32> to vector<4x1xf32>
    %210 = vector.shape_cast %209 : vector<4x1xf32> to vector<4x1x1xf32>
    %cst_84 = arith.constant 3.200000e+01 : f32
    %211 = vector.broadcast %cst_84 : f32 to vector<4x1x1xf32>
    %212 = arith.divf %210, %211 : vector<4x1x1xf32>
    %213 = vector.broadcast %212 : vector<4x1x1xf32> to vector<4x1x32xf32>
    %214 = arith.subf %208, %213 : vector<4x1x32xf32>
    %215 = arith.mulf %214, %214 : vector<4x1x32xf32>
    %cst_85 = arith.constant dense<0.000000e+00> : vector<4x1xf32>
    %216 = vector.multi_reduction <add>, %215, %cst_85 [2] : vector<4x1x32xf32> to vector<4x1xf32>
    %217 = vector.shape_cast %216 : vector<4x1xf32> to vector<4x1x1xf32>
    %cst_86 = arith.constant 3.200000e+01 : f32
    %218 = vector.broadcast %cst_86 : f32 to vector<4x1x1xf32>
    %219 = arith.divf %217, %218 : vector<4x1x1xf32>
    %cst_87 = arith.constant 9.99999974E-6 : f32
    %220 = vector.broadcast %cst_87 : f32 to vector<4x1x1xf32>
    %221 = arith.addf %219, %220 : vector<4x1x1xf32>
    %222 = math.rsqrt %221 : vector<4x1x1xf32>
    %223 = vector.broadcast %222 : vector<4x1x1xf32> to vector<4x1x32xf32>
    %224 = arith.mulf %214, %223 : vector<4x1x32xf32>
    %225 = vector.shape_cast %108 : vector<1x32xf32> to vector<1x1x32xf32>
    %226 = vector.broadcast %225 : vector<1x1x32xf32> to vector<4x1x32xf32>
    %227 = arith.mulf %224, %226 : vector<4x1x32xf32>
    %228 = vector.shape_cast %109 : vector<1x32xf32> to vector<1x1x32xf32>
    %229 = vector.broadcast %228 : vector<1x1x32xf32> to vector<4x1x32xf32>
    %230 = arith.addf %227, %229 : vector<4x1x32xf32>
    %cst_88 = arith.constant -1.000000e+02 : f32
    %cst_89 = arith.constant 1.000000e+02 : f32
    %231 = vector.broadcast %cst_88 : f32 to vector<4x1x32xf32>
    %232 = arith.maximumf %231, %230 : vector<4x1x32xf32>
    %233 = vector.broadcast %cst_89 : f32 to vector<4x1x32xf32>
    %234 = arith.minimumf %233, %232 : vector<4x1x32xf32>
    %c0_90 = arith.constant 0 : index
    %c0_91 = arith.constant 0 : index
    %c0_92 = arith.constant 0 : index
    %235 = vector.load %arg9[%c0_90, %c0_91, %c0_92] : memref<4x1x32xf32, #tpu.memory_space<vmem>>, vector<4x1x32xf32>
    tpu.vector_store %arg9[%c0_90, %c0_91, %c0_92], %234 {strides = array<i32>} : memref<4x1x32xf32, #tpu.memory_space<vmem>>, vector<4x1x32xf32>,
    return
  }
  func.func @transform_0(%arg0: i32) -> (i32, i32, i32) {
    %c0_i32 = arith.constant 0 : i32
    %c0_i32_0 = arith.constant 0 : i32
    %c0_i32_1 = arith.constant 0 : i32
    %c0_i32_2 = arith.constant 0 : i32
    return %c0_i32, %c0_i32_0, %c0_i32_1 : i32, i32, i32
  }
  func.func @transform_1(%arg0: i32) -> (i32, i32) {
    %c0_i32 = arith.constant 0 : i32
    %c0_i32_0 = arith.constant 0 : i32
    %c0_i32_1 = arith.constant 0 : i32
    return %c0_i32, %c0_i32_0 : i32, i32
  }
  func.func @transform_2(%arg0: i32) -> (i32, i32, i32) {
    %c0_i32 = arith.constant 0 : i32
    %c0_i32_0 = arith.constant 0 : i32
    %c0_i32_1 = arith.constant 0 : i32
    %c0_i32_2 = arith.constant 0 : i32
    return %c0_i32, %c0_i32_0, %c0_i32_1 : i32, i32, i32
  }
  func.func @transform_3(%arg0: i32) -> (i32, i32) {
    %c0_i32 = arith.constant 0 : i32
    %c0_i32_0 = arith.constant 0 : i32
    %c0_i32_1 = arith.constant 0 : i32
    return %c0_i32, %c0_i32_0 : i32, i32
  }
  func.func @transform_4(%arg0: i32) -> (i32, i32) {
    %c0_i32 = arith.constant 0 : i32
    %c0_i32_0 = arith.constant 0 : i32
    %c0_i32_1 = arith.constant 0 : i32
    return %c0_i32, %c0_i32_0 : i32, i32
  }
  func.func @transform_5(%arg0: i32) -> (i32, i32) {
    %c0_i32 = arith.constant 0 : i32
    %c0_i32_0 = arith.constant 0 : i32
    %c0_i32_1 = arith.constant 0 : i32
    return %c0_i32, %c0_i32_0 : i32, i32
  }
  func.func @transform_6(%arg0: i32) -> (i32, i32) {
    %c0_i32 = arith.constant 0 : i32
    %c0_i32_0 = arith.constant 0 : i32
    %c0_i32_1 = arith.constant 0 : i32
    return %c0_i32, %c0_i32_0 : i32, i32
  }
  func.func @transform_7(%arg0: i32) -> (i32, i32) {
    %c0_i32 = arith.constant 0 : i32
    %c0_i32_0 = arith.constant 0 : i32
    %c0_i32_1 = arith.constant 0 : i32
    return %c0_i32, %c0_i32_0 : i32, i32
  }
  func.func @transform_8(%arg0: i32) -> (i32, i32, i32) {
    %c0_i32 = arith.constant 0 : i32
    %c0_i32_0 = arith.constant 0 : i32
    %c0_i32_1 = arith.constant 0 : i32
    %c0_i32_2 = arith.constant 0 : i32
    return %c0_i32, %c0_i32_0, %c0_i32_1 : i32, i32, i32
  }
}

module attributes {stable_mosaic.version = 11 : i64} {
  func.func @_transformer_layer_kernel(%arg0: i32, %arg1: memref<2x2x32xf32, #tpu.memory_space<vmem>>, %arg2: memref<4x32xf32, #tpu.memory_space<vmem>>, %arg3: memref<32x96xf32, #tpu.memory_space<vmem>>, %arg4: memref<1x96xf32, #tpu.memory_space<vmem>>, %arg5: memref<32x32xf32, #tpu.memory_space<vmem>>, %arg6: memref<1x32xf32, #tpu.memory_space<vmem>>, %arg7: memref<32x64xf32, #tpu.memory_space<vmem>>, %arg8: memref<1x64xf32, #tpu.memory_space<vmem>>, %arg9: memref<64x32xf32, #tpu.memory_space<vmem>>, %arg10: memref<1x32xf32, #tpu.memory_space<vmem>>, %arg11: memref<2x2x32xf32, #tpu.memory_space<vmem>>, %arg12: memref<2x2x32xf32, #tpu.memory_space<vmem>>) attributes {dimension_semantics = [#tpu.dimension_semantics<arbitrary>], iteration_bounds = array<i64: 1>, scalar_prefetch = 0 : i64, scratch_operands = 1 : i64, tpu.core_type = #tpu.core_type<tc>, window_params = [{pipeline_mode = #tpu.pipeline_mode<synchronous>, transform_indices = @transform_0, window_bounds = array<i64: 2, 2, 32>}, {pipeline_mode = #tpu.pipeline_mode<synchronous>, transform_indices = @transform_1, window_bounds = array<i64: 4, 32>}, {pipeline_mode = #tpu.pipeline_mode<synchronous>, transform_indices = @transform_2, window_bounds = array<i64: 32, 96>}, {pipeline_mode = #tpu.pipeline_mode<synchronous>, transform_indices = @transform_3, window_bounds = array<i64: 1, 96>}, {pipeline_mode = #tpu.pipeline_mode<synchronous>, transform_indices = @transform_4, window_bounds = array<i64: 32, 32>}, {pipeline_mode = #tpu.pipeline_mode<synchronous>, transform_indices = @transform_5, window_bounds = array<i64: 1, 32>}, {pipeline_mode = #tpu.pipeline_mode<synchronous>, transform_indices = @transform_6, window_bounds = array<i64: 32, 64>}, {pipeline_mode = #tpu.pipeline_mode<synchronous>, transform_indices = @transform_7, window_bounds = array<i64: 1, 64>}, {pipeline_mode = #tpu.pipeline_mode<synchronous>, transform_indices = @transform_8, window_bounds = array<i64: 64, 32>}, {pipeline_mode = #tpu.pipeline_mode<synchronous>, transform_indices = @transform_9, window_bounds = array<i64: 1, 32>}, {pipeline_mode = #tpu.pipeline_mode<synchronous>, transform_indices = @transform_10, window_bounds = array<i64: 2, 2, 32>}]} {
    %c0 = arith.constant 0 : index
    %c0_0 = arith.constant 0 : index
    %c0_1 = arith.constant 0 : index
    %0 = vector.load %arg1[%c0, %c0_0, %c0_1] : memref<2x2x32xf32, #tpu.memory_space<vmem>>, vector<2x2x32xf32>
    %c0_2 = arith.constant 0 : index
    %c0_3 = arith.constant 0 : index
    %1 = vector.load %arg2[%c0_2, %c0_3] : memref<4x32xf32, #tpu.memory_space<vmem>>, vector<4x32xf32>
    %cst = arith.constant dense<0.000000e+00> : vector<2x2xf32>
    %2 = vector.multi_reduction <add>, %0, %cst [2] : vector<2x2x32xf32> to vector<2x2xf32>
    %3 = vector.shape_cast %2 : vector<2x2xf32> to vector<2x2x1xf32>
    %cst_4 = arith.constant 3.200000e+01 : f32
    %4 = vector.broadcast %cst_4 : f32 to vector<2x2x1xf32>
    %5 = arith.divf %3, %4 : vector<2x2x1xf32>
    %6 = vector.broadcast %5 : vector<2x2x1xf32> to vector<2x2x32xf32>
    %7 = arith.subf %0, %6 : vector<2x2x32xf32>
    %8 = arith.mulf %7, %7 : vector<2x2x32xf32>
    %cst_5 = arith.constant dense<0.000000e+00> : vector<2x2xf32>
    %9 = vector.multi_reduction <add>, %8, %cst_5 [2] : vector<2x2x32xf32> to vector<2x2xf32>
    %10 = vector.shape_cast %9 : vector<2x2xf32> to vector<2x2x1xf32>
    %cst_6 = arith.constant 3.200000e+01 : f32
    %11 = vector.broadcast %cst_6 : f32 to vector<2x2x1xf32>
    %12 = arith.divf %10, %11 : vector<2x2x1xf32>
    %cst_7 = arith.constant 9.99999974E-6 : f32
    %13 = vector.broadcast %cst_7 : f32 to vector<2x2x1xf32>
    %14 = arith.addf %12, %13 : vector<2x2x1xf32>
    %15 = math.rsqrt %14 : vector<2x2x1xf32>
    %16 = vector.broadcast %15 : vector<2x2x1xf32> to vector<2x2x32xf32>
    %17 = arith.mulf %7, %16 : vector<2x2x32xf32>
    %c0_8 = arith.constant 0 : index
    %c0_9 = arith.constant 0 : index
    %18 = vector.load %arg3[%c0_8, %c0_9] : memref<32x96xf32, #tpu.memory_space<vmem>>, vector<32x96xf32>
    %19 = vector.shape_cast %18 : vector<32x96xf32> to vector<1x32x96xf32>
    %20 = vector.broadcast %19 : vector<1x32x96xf32> to vector<2x32x96xf32>
    "tpu.trace_start"() <{level = 10 : i32, message = "nld,ndf->nlf"}> : () -> ()
    %cst_10 = arith.constant dense<0.000000e+00> : vector<2x2x96xf32>
    %21 = tpu.matmul %17, %20, %cst_10 {dimension_numbers = #tpu.dot_dimension_numbers<[2], [1], [1], [2], [0, 0, 0, 1, 1, 2], [0], [0]>} : vector<2x2x32xf32>, vector<2x32x96xf32>, vector<2x2x96xf32> -> vector<2x2x96xf32>
    "tpu.trace_stop"() : () -> ()
    %c0_11 = arith.constant 0 : index
    %c0_12 = arith.constant 0 : index
    %22 = vector.load %arg4[%c0_11, %c0_12] : memref<1x96xf32, #tpu.memory_space<vmem>>, vector<1x96xf32>
    %23 = vector.shape_cast %22 : vector<1x96xf32> to vector<1x1x96xf32>
    %24 = vector.broadcast %23 : vector<1x1x96xf32> to vector<2x2x96xf32>
    %25 = arith.addf %21, %24 : vector<2x2x96xf32>
    %26 = vector.extract_strided_slice %25 {offsets = [0, 0, 0], sizes = [2, 2, 32], strides = [1, 1, 1]} : vector<2x2x96xf32> to vector<2x2x32xf32>
    %27 = vector.extract_strided_slice %25 {offsets = [0, 0, 32], sizes = [2, 2, 32], strides = [1, 1, 1]} : vector<2x2x96xf32> to vector<2x2x32xf32>
    %28 = vector.extract_strided_slice %25 {offsets = [0, 0, 64], sizes = [2, 2, 32], strides = [1, 1, 1]} : vector<2x2x96xf32> to vector<2x2x32xf32>
    %c0_13 = arith.constant 0 : index
    %c0_14 = arith.constant 0 : index
    %29 = vector.load %arg5[%c0_13, %c0_14] : memref<32x32xf32, #tpu.memory_space<vmem>>, vector<32x32xf32>
    %c0_15 = arith.constant 0 : index
    %c0_16 = arith.constant 0 : index
    %30 = vector.load %arg6[%c0_15, %c0_16] : memref<1x32xf32, #tpu.memory_space<vmem>>, vector<1x32xf32>
    %31 = vector.extract_strided_slice %1 {offsets = [0, 0], sizes = [1, 32], strides = [1, 1]} : vector<4x32xf32> to vector<1x32xf32>
    %32 = vector.extract_strided_slice %1 {offsets = [1, 0], sizes = [1, 32], strides = [1, 1]} : vector<4x32xf32> to vector<1x32xf32>
    %33 = vector.extract_strided_slice %26 {offsets = [0, 0, 0], sizes = [2, 2, 8], strides = [1, 1, 1]} : vector<2x2x32xf32> to vector<2x2x8xf32>
    %34 = vector.extract_strided_slice %27 {offsets = [0, 0, 0], sizes = [2, 2, 8], strides = [1, 1, 1]} : vector<2x2x32xf32> to vector<2x2x8xf32>
    "tpu.trace_start"() <{level = 10 : i32, message = "nqd,nkd->nqk"}> : () -> ()
    %cst_17 = arith.constant dense<0.000000e+00> : vector<2x2x2xf32>
    %35 = tpu.matmul %33, %34, %cst_17 {dimension_numbers = #tpu.dot_dimension_numbers<[2], [2], [1], [1], [0, 0, 0, 1, 1, 1], [0], [0]>} : vector<2x2x8xf32>, vector<2x2x8xf32>, vector<2x2x2xf32> -> vector<2x2x2xf32>
    "tpu.trace_stop"() : () -> ()
    %cst_18 = arith.constant 0.353553385 : f32
    %36 = vector.broadcast %cst_18 : f32 to vector<2x2x2xf32>
    %37 = arith.mulf %35, %36 : vector<2x2x2xf32>
    %cst_19 = arith.constant dense<0xFF800000> : vector<2x2xf32>
    %38 = vector.multi_reduction <maximumf>, %37, %cst_19 [2] : vector<2x2x2xf32> to vector<2x2xf32>
    %39 = vector.shape_cast %38 : vector<2x2xf32> to vector<2x2x1xf32>
    %40 = vector.broadcast %39 : vector<2x2x1xf32> to vector<2x2x2xf32>
    %41 = arith.subf %37, %40 : vector<2x2x2xf32>
    %42 = math.exp %41 : vector<2x2x2xf32>
    %cst_20 = arith.constant dense<0.000000e+00> : vector<2x2xf32>
    %43 = vector.multi_reduction <add>, %42, %cst_20 [2] : vector<2x2x2xf32> to vector<2x2xf32>
    %44 = vector.shape_cast %43 : vector<2x2xf32> to vector<2x2x1xf32>
    %cst_21 = arith.constant 9.99999971E-10 : f32
    %45 = vector.broadcast %cst_21 : f32 to vector<2x2x1xf32>
    %46 = arith.addf %44, %45 : vector<2x2x1xf32>
    %47 = vector.broadcast %46 : vector<2x2x1xf32> to vector<2x2x2xf32>
    %48 = arith.divf %42, %47 : vector<2x2x2xf32>
    %cst_22 = arith.constant 9.99999971E-10 : f32
    %cst_23 = arith.constant 1.000000e+00 : f32
    %49 = vector.broadcast %cst_22 : f32 to vector<2x2x2xf32>
    %50 = arith.maximumf %49, %48 : vector<2x2x2xf32>
    %51 = vector.broadcast %cst_23 : f32 to vector<2x2x2xf32>
    %52 = arith.minimumf %51, %50 : vector<2x2x2xf32>
    %53 = vector.extract_strided_slice %28 {offsets = [0, 0, 0], sizes = [2, 2, 8], strides = [1, 1, 1]} : vector<2x2x32xf32> to vector<2x2x8xf32>
    "tpu.trace_start"() <{level = 10 : i32, message = "nqk,nkd->nqd"}> : () -> ()
    %cst_24 = arith.constant dense<0.000000e+00> : vector<2x2x8xf32>
    %54 = tpu.matmul %52, %53, %cst_24 {dimension_numbers = #tpu.dot_dimension_numbers<[2], [1], [1], [2], [0, 0, 0, 1, 1, 2], [0], [0]>} : vector<2x2x2xf32>, vector<2x2x8xf32>, vector<2x2x8xf32> -> vector<2x2x8xf32>
    "tpu.trace_stop"() : () -> ()
    %c0_25 = arith.constant 0 : index
    %c0_26 = arith.constant 0 : index
    %c0_27 = arith.constant 0 : index
    %55 = vector.load %arg12[%c0_25, %c0_26, %c0_27] : memref<2x2x32xf32, #tpu.memory_space<vmem>>, vector<2x2x8xf32>
    tpu.vector_store %arg12[%c0_25, %c0_26, %c0_27], %54 {strides = array<i32>} : memref<2x2x32xf32, #tpu.memory_space<vmem>>, vector<2x2x8xf32>,
    %56 = vector.extract_strided_slice %26 {offsets = [0, 0, 8], sizes = [2, 2, 8], strides = [1, 1, 1]} : vector<2x2x32xf32> to vector<2x2x8xf32>
    %57 = vector.extract_strided_slice %27 {offsets = [0, 0, 8], sizes = [2, 2, 8], strides = [1, 1, 1]} : vector<2x2x32xf32> to vector<2x2x8xf32>
    "tpu.trace_start"() <{level = 10 : i32, message = "nqd,nkd->nqk"}> : () -> ()
    %cst_28 = arith.constant dense<0.000000e+00> : vector<2x2x2xf32>
    %58 = tpu.matmul %56, %57, %cst_28 {dimension_numbers = #tpu.dot_dimension_numbers<[2], [2], [1], [1], [0, 0, 0, 1, 1, 1], [0], [0]>} : vector<2x2x8xf32>, vector<2x2x8xf32>, vector<2x2x2xf32> -> vector<2x2x2xf32>
    "tpu.trace_stop"() : () -> ()
    %cst_29 = arith.constant 0.353553385 : f32
    %59 = vector.broadcast %cst_29 : f32 to vector<2x2x2xf32>
    %60 = arith.mulf %58, %59 : vector<2x2x2xf32>
    %cst_30 = arith.constant dense<0xFF800000> : vector<2x2xf32>
    %61 = vector.multi_reduction <maximumf>, %60, %cst_30 [2] : vector<2x2x2xf32> to vector<2x2xf32>
    %62 = vector.shape_cast %61 : vector<2x2xf32> to vector<2x2x1xf32>
    %63 = vector.broadcast %62 : vector<2x2x1xf32> to vector<2x2x2xf32>
    %64 = arith.subf %60, %63 : vector<2x2x2xf32>
    %65 = math.exp %64 : vector<2x2x2xf32>
    %cst_31 = arith.constant dense<0.000000e+00> : vector<2x2xf32>
    %66 = vector.multi_reduction <add>, %65, %cst_31 [2] : vector<2x2x2xf32> to vector<2x2xf32>
    %67 = vector.shape_cast %66 : vector<2x2xf32> to vector<2x2x1xf32>
    %cst_32 = arith.constant 9.99999971E-10 : f32
    %68 = vector.broadcast %cst_32 : f32 to vector<2x2x1xf32>
    %69 = arith.addf %67, %68 : vector<2x2x1xf32>
    %70 = vector.broadcast %69 : vector<2x2x1xf32> to vector<2x2x2xf32>
    %71 = arith.divf %65, %70 : vector<2x2x2xf32>
    %cst_33 = arith.constant 9.99999971E-10 : f32
    %cst_34 = arith.constant 1.000000e+00 : f32
    %72 = vector.broadcast %cst_33 : f32 to vector<2x2x2xf32>
    %73 = arith.maximumf %72, %71 : vector<2x2x2xf32>
    %74 = vector.broadcast %cst_34 : f32 to vector<2x2x2xf32>
    %75 = arith.minimumf %74, %73 : vector<2x2x2xf32>
    %76 = vector.extract_strided_slice %28 {offsets = [0, 0, 8], sizes = [2, 2, 8], strides = [1, 1, 1]} : vector<2x2x32xf32> to vector<2x2x8xf32>
    "tpu.trace_start"() <{level = 10 : i32, message = "nqk,nkd->nqd"}> : () -> ()
    %cst_35 = arith.constant dense<0.000000e+00> : vector<2x2x8xf32>
    %77 = tpu.matmul %75, %76, %cst_35 {dimension_numbers = #tpu.dot_dimension_numbers<[2], [1], [1], [2], [0, 0, 0, 1, 1, 2], [0], [0]>} : vector<2x2x2xf32>, vector<2x2x8xf32>, vector<2x2x8xf32> -> vector<2x2x8xf32>
    "tpu.trace_stop"() : () -> ()
    %c0_36 = arith.constant 0 : index
    %c0_37 = arith.constant 0 : index
    %c8 = arith.constant 8 : index
    %78 = vector.load %arg12[%c0_36, %c0_37, %c8] : memref<2x2x32xf32, #tpu.memory_space<vmem>>, vector<2x2x8xf32>
    tpu.vector_store %arg12[%c0_36, %c0_37, %c8], %77 {strides = array<i32>} : memref<2x2x32xf32, #tpu.memory_space<vmem>>, vector<2x2x8xf32>,
    %79 = vector.extract_strided_slice %26 {offsets = [0, 0, 16], sizes = [2, 2, 8], strides = [1, 1, 1]} : vector<2x2x32xf32> to vector<2x2x8xf32>
    %80 = vector.extract_strided_slice %27 {offsets = [0, 0, 16], sizes = [2, 2, 8], strides = [1, 1, 1]} : vector<2x2x32xf32> to vector<2x2x8xf32>
    "tpu.trace_start"() <{level = 10 : i32, message = "nqd,nkd->nqk"}> : () -> ()
    %cst_38 = arith.constant dense<0.000000e+00> : vector<2x2x2xf32>
    %81 = tpu.matmul %79, %80, %cst_38 {dimension_numbers = #tpu.dot_dimension_numbers<[2], [2], [1], [1], [0, 0, 0, 1, 1, 1], [0], [0]>} : vector<2x2x8xf32>, vector<2x2x8xf32>, vector<2x2x2xf32> -> vector<2x2x2xf32>
    "tpu.trace_stop"() : () -> ()
    %cst_39 = arith.constant 0.353553385 : f32
    %82 = vector.broadcast %cst_39 : f32 to vector<2x2x2xf32>
    %83 = arith.mulf %81, %82 : vector<2x2x2xf32>
    %cst_40 = arith.constant dense<0xFF800000> : vector<2x2xf32>
    %84 = vector.multi_reduction <maximumf>, %83, %cst_40 [2] : vector<2x2x2xf32> to vector<2x2xf32>
    %85 = vector.shape_cast %84 : vector<2x2xf32> to vector<2x2x1xf32>
    %86 = vector.broadcast %85 : vector<2x2x1xf32> to vector<2x2x2xf32>
    %87 = arith.subf %83, %86 : vector<2x2x2xf32>
    %88 = math.exp %87 : vector<2x2x2xf32>
    %cst_41 = arith.constant dense<0.000000e+00> : vector<2x2xf32>
    %89 = vector.multi_reduction <add>, %88, %cst_41 [2] : vector<2x2x2xf32> to vector<2x2xf32>
    %90 = vector.shape_cast %89 : vector<2x2xf32> to vector<2x2x1xf32>
    %cst_42 = arith.constant 9.99999971E-10 : f32
    %91 = vector.broadcast %cst_42 : f32 to vector<2x2x1xf32>
    %92 = arith.addf %90, %91 : vector<2x2x1xf32>
    %93 = vector.broadcast %92 : vector<2x2x1xf32> to vector<2x2x2xf32>
    %94 = arith.divf %88, %93 : vector<2x2x2xf32>
    %cst_43 = arith.constant 9.99999971E-10 : f32
    %cst_44 = arith.constant 1.000000e+00 : f32
    %95 = vector.broadcast %cst_43 : f32 to vector<2x2x2xf32>
    %96 = arith.maximumf %95, %94 : vector<2x2x2xf32>
    %97 = vector.broadcast %cst_44 : f32 to vector<2x2x2xf32>
    %98 = arith.minimumf %97, %96 : vector<2x2x2xf32>
    %99 = vector.extract_strided_slice %28 {offsets = [0, 0, 16], sizes = [2, 2, 8], strides = [1, 1, 1]} : vector<2x2x32xf32> to vector<2x2x8xf32>
    "tpu.trace_start"() <{level = 10 : i32, message = "nqk,nkd->nqd"}> : () -> ()
    %cst_45 = arith.constant dense<0.000000e+00> : vector<2x2x8xf32>
    %100 = tpu.matmul %98, %99, %cst_45 {dimension_numbers = #tpu.dot_dimension_numbers<[2], [1], [1], [2], [0, 0, 0, 1, 1, 2], [0], [0]>} : vector<2x2x2xf32>, vector<2x2x8xf32>, vector<2x2x8xf32> -> vector<2x2x8xf32>
    "tpu.trace_stop"() : () -> ()
    %c0_46 = arith.constant 0 : index
    %c0_47 = arith.constant 0 : index
    %c16 = arith.constant 16 : index
    %101 = vector.load %arg12[%c0_46, %c0_47, %c16] : memref<2x2x32xf32, #tpu.memory_space<vmem>>, vector<2x2x8xf32>
    tpu.vector_store %arg12[%c0_46, %c0_47, %c16], %100 {strides = array<i32>} : memref<2x2x32xf32, #tpu.memory_space<vmem>>, vector<2x2x8xf32>,
    %102 = vector.extract_strided_slice %26 {offsets = [0, 0, 24], sizes = [2, 2, 8], strides = [1, 1, 1]} : vector<2x2x32xf32> to vector<2x2x8xf32>
    %103 = vector.extract_strided_slice %27 {offsets = [0, 0, 24], sizes = [2, 2, 8], strides = [1, 1, 1]} : vector<2x2x32xf32> to vector<2x2x8xf32>
    "tpu.trace_start"() <{level = 10 : i32, message = "nqd,nkd->nqk"}> : () -> ()
    %cst_48 = arith.constant dense<0.000000e+00> : vector<2x2x2xf32>
    %104 = tpu.matmul %102, %103, %cst_48 {dimension_numbers = #tpu.dot_dimension_numbers<[2], [2], [1], [1], [0, 0, 0, 1, 1, 1], [0], [0]>} : vector<2x2x8xf32>, vector<2x2x8xf32>, vector<2x2x2xf32> -> vector<2x2x2xf32>
    "tpu.trace_stop"() : () -> ()
    %cst_49 = arith.constant 0.353553385 : f32
    %105 = vector.broadcast %cst_49 : f32 to vector<2x2x2xf32>
    %106 = arith.mulf %104, %105 : vector<2x2x2xf32>
    %cst_50 = arith.constant dense<0xFF800000> : vector<2x2xf32>
    %107 = vector.multi_reduction <maximumf>, %106, %cst_50 [2] : vector<2x2x2xf32> to vector<2x2xf32>
    %108 = vector.shape_cast %107 : vector<2x2xf32> to vector<2x2x1xf32>
    %109 = vector.broadcast %108 : vector<2x2x1xf32> to vector<2x2x2xf32>
    %110 = arith.subf %106, %109 : vector<2x2x2xf32>
    %111 = math.exp %110 : vector<2x2x2xf32>
    %cst_51 = arith.constant dense<0.000000e+00> : vector<2x2xf32>
    %112 = vector.multi_reduction <add>, %111, %cst_51 [2] : vector<2x2x2xf32> to vector<2x2xf32>
    %113 = vector.shape_cast %112 : vector<2x2xf32> to vector<2x2x1xf32>
    %cst_52 = arith.constant 9.99999971E-10 : f32
    %114 = vector.broadcast %cst_52 : f32 to vector<2x2x1xf32>
    %115 = arith.addf %113, %114 : vector<2x2x1xf32>
    %116 = vector.broadcast %115 : vector<2x2x1xf32> to vector<2x2x2xf32>
    %117 = arith.divf %111, %116 : vector<2x2x2xf32>
    %cst_53 = arith.constant 9.99999971E-10 : f32
    %cst_54 = arith.constant 1.000000e+00 : f32
    %118 = vector.broadcast %cst_53 : f32 to vector<2x2x2xf32>
    %119 = arith.maximumf %118, %117 : vector<2x2x2xf32>
    %120 = vector.broadcast %cst_54 : f32 to vector<2x2x2xf32>
    %121 = arith.minimumf %120, %119 : vector<2x2x2xf32>
    %122 = vector.extract_strided_slice %28 {offsets = [0, 0, 24], sizes = [2, 2, 8], strides = [1, 1, 1]} : vector<2x2x32xf32> to vector<2x2x8xf32>
    "tpu.trace_start"() <{level = 10 : i32, message = "nqk,nkd->nqd"}> : () -> ()
    %cst_55 = arith.constant dense<0.000000e+00> : vector<2x2x8xf32>
    %123 = tpu.matmul %121, %122, %cst_55 {dimension_numbers = #tpu.dot_dimension_numbers<[2], [1], [1], [2], [0, 0, 0, 1, 1, 2], [0], [0]>} : vector<2x2x2xf32>, vector<2x2x8xf32>, vector<2x2x8xf32> -> vector<2x2x8xf32>
    "tpu.trace_stop"() : () -> ()
    %c0_56 = arith.constant 0 : index
    %c0_57 = arith.constant 0 : index
    %c24 = arith.constant 24 : index
    %124 = vector.load %arg12[%c0_56, %c0_57, %c24] : memref<2x2x32xf32, #tpu.memory_space<vmem>>, vector<2x2x8xf32>
    tpu.vector_store %arg12[%c0_56, %c0_57, %c24], %123 {strides = array<i32>} : memref<2x2x32xf32, #tpu.memory_space<vmem>>, vector<2x2x8xf32>,
    %c0_58 = arith.constant 0 : index
    %c0_59 = arith.constant 0 : index
    %c0_60 = arith.constant 0 : index
    %125 = vector.load %arg12[%c0_58, %c0_59, %c0_60] : memref<2x2x32xf32, #tpu.memory_space<vmem>>, vector<2x2x32xf32>
    %126 = vector.shape_cast %29 : vector<32x32xf32> to vector<1x32x32xf32>
    %127 = vector.broadcast %126 : vector<1x32x32xf32> to vector<2x32x32xf32>
    "tpu.trace_start"() <{level = 10 : i32, message = "nqv,nvd->nqd"}> : () -> ()
    %cst_61 = arith.constant dense<0.000000e+00> : vector<2x2x32xf32>
    %128 = tpu.matmul %125, %127, %cst_61 {dimension_numbers = #tpu.dot_dimension_numbers<[2], [1], [1], [2], [0, 0, 0, 1, 1, 2], [0], [0]>} : vector<2x2x32xf32>, vector<2x32x32xf32>, vector<2x2x32xf32> -> vector<2x2x32xf32>
    "tpu.trace_stop"() : () -> ()
    %129 = vector.shape_cast %30 : vector<1x32xf32> to vector<1x1x32xf32>
    %130 = vector.broadcast %129 : vector<1x1x32xf32> to vector<2x2x32xf32>
    %131 = arith.addf %128, %130 : vector<2x2x32xf32>
    %cst_62 = arith.constant dense<0.000000e+00> : vector<2x2xf32>
    %132 = vector.multi_reduction <add>, %131, %cst_62 [2] : vector<2x2x32xf32> to vector<2x2xf32>
    %133 = vector.shape_cast %132 : vector<2x2xf32> to vector<2x2x1xf32>
    %cst_63 = arith.constant 3.200000e+01 : f32
    %134 = vector.broadcast %cst_63 : f32 to vector<2x2x1xf32>
    %135 = arith.divf %133, %134 : vector<2x2x1xf32>
    %136 = vector.broadcast %135 : vector<2x2x1xf32> to vector<2x2x32xf32>
    %137 = arith.subf %131, %136 : vector<2x2x32xf32>
    %138 = arith.mulf %137, %137 : vector<2x2x32xf32>
    %cst_64 = arith.constant dense<0.000000e+00> : vector<2x2xf32>
    %139 = vector.multi_reduction <add>, %138, %cst_64 [2] : vector<2x2x32xf32> to vector<2x2xf32>
    %140 = vector.shape_cast %139 : vector<2x2xf32> to vector<2x2x1xf32>
    %cst_65 = arith.constant 3.200000e+01 : f32
    %141 = vector.broadcast %cst_65 : f32 to vector<2x2x1xf32>
    %142 = arith.divf %140, %141 : vector<2x2x1xf32>
    %cst_66 = arith.constant 9.99999974E-6 : f32
    %143 = vector.broadcast %cst_66 : f32 to vector<2x2x1xf32>
    %144 = arith.addf %142, %143 : vector<2x2x1xf32>
    %145 = math.rsqrt %144 : vector<2x2x1xf32>
    %146 = vector.broadcast %145 : vector<2x2x1xf32> to vector<2x2x32xf32>
    %147 = arith.mulf %137, %146 : vector<2x2x32xf32>
    %148 = vector.shape_cast %31 : vector<1x32xf32> to vector<1x1x32xf32>
    %149 = vector.broadcast %148 : vector<1x1x32xf32> to vector<2x2x32xf32>
    %150 = arith.mulf %147, %149 : vector<2x2x32xf32>
    %151 = vector.shape_cast %32 : vector<1x32xf32> to vector<1x1x32xf32>
    %152 = vector.broadcast %151 : vector<1x1x32xf32> to vector<2x2x32xf32>
    %153 = arith.addf %150, %152 : vector<2x2x32xf32>
    %154 = arith.addf %0, %153 : vector<2x2x32xf32>
    %cst_67 = arith.constant dense<0.000000e+00> : vector<2x2xf32>
    %155 = vector.multi_reduction <add>, %154, %cst_67 [2] : vector<2x2x32xf32> to vector<2x2xf32>
    %156 = vector.shape_cast %155 : vector<2x2xf32> to vector<2x2x1xf32>
    %cst_68 = arith.constant 3.200000e+01 : f32
    %157 = vector.broadcast %cst_68 : f32 to vector<2x2x1xf32>
    %158 = arith.divf %156, %157 : vector<2x2x1xf32>
    %159 = vector.broadcast %158 : vector<2x2x1xf32> to vector<2x2x32xf32>
    %160 = arith.subf %154, %159 : vector<2x2x32xf32>
    %161 = arith.mulf %160, %160 : vector<2x2x32xf32>
    %cst_69 = arith.constant dense<0.000000e+00> : vector<2x2xf32>
    %162 = vector.multi_reduction <add>, %161, %cst_69 [2] : vector<2x2x32xf32> to vector<2x2xf32>
    %163 = vector.shape_cast %162 : vector<2x2xf32> to vector<2x2x1xf32>
    %cst_70 = arith.constant 3.200000e+01 : f32
    %164 = vector.broadcast %cst_70 : f32 to vector<2x2x1xf32>
    %165 = arith.divf %163, %164 : vector<2x2x1xf32>
    %cst_71 = arith.constant 9.99999974E-6 : f32
    %166 = vector.broadcast %cst_71 : f32 to vector<2x2x1xf32>
    %167 = arith.addf %165, %166 : vector<2x2x1xf32>
    %168 = math.rsqrt %167 : vector<2x2x1xf32>
    %169 = vector.broadcast %168 : vector<2x2x1xf32> to vector<2x2x32xf32>
    %170 = arith.mulf %160, %169 : vector<2x2x32xf32>
    %c0_72 = arith.constant 0 : index
    %c0_73 = arith.constant 0 : index
    %171 = vector.load %arg7[%c0_72, %c0_73] : memref<32x64xf32, #tpu.memory_space<vmem>>, vector<32x64xf32>
    %172 = vector.shape_cast %171 : vector<32x64xf32> to vector<1x32x64xf32>
    %173 = vector.broadcast %172 : vector<1x32x64xf32> to vector<2x32x64xf32>
    "tpu.trace_start"() <{level = 10 : i32, message = "nld,ndf->nlf"}> : () -> ()
    %cst_74 = arith.constant dense<0.000000e+00> : vector<2x2x64xf32>
    %174 = tpu.matmul %170, %173, %cst_74 {dimension_numbers = #tpu.dot_dimension_numbers<[2], [1], [1], [2], [0, 0, 0, 1, 1, 2], [0], [0]>} : vector<2x2x32xf32>, vector<2x32x64xf32>, vector<2x2x64xf32> -> vector<2x2x64xf32>
    "tpu.trace_stop"() : () -> ()
    %c0_75 = arith.constant 0 : index
    %c0_76 = arith.constant 0 : index
    %175 = vector.load %arg8[%c0_75, %c0_76] : memref<1x64xf32, #tpu.memory_space<vmem>>, vector<1x64xf32>
    %176 = vector.shape_cast %175 : vector<1x64xf32> to vector<1x1x64xf32>
    %177 = vector.broadcast %176 : vector<1x1x64xf32> to vector<2x2x64xf32>
    %178 = arith.addf %174, %177 : vector<2x2x64xf32>
    %cst_77 = arith.constant 5.000000e-01 : f32
    %179 = vector.broadcast %cst_77 : f32 to vector<2x2x64xf32>
    %180 = arith.mulf %179, %178 : vector<2x2x64xf32>
    %cst_78 = arith.constant 0.707106769 : f32
    %181 = vector.broadcast %cst_78 : f32 to vector<2x2x64xf32>
    %182 = arith.mulf %178, %181 : vector<2x2x64xf32>
    %183 = math.absf %182 : vector<2x2x64xf32>
    %cst_79 = arith.constant 0.327591091 : f32
    %184 = vector.broadcast %cst_79 : f32 to vector<2x2x64xf32>
    %185 = arith.mulf %184, %183 : vector<2x2x64xf32>
    %cst_80 = arith.constant 1.000000e+00 : f32
    %186 = vector.broadcast %cst_80 : f32 to vector<2x2x64xf32>
    %187 = arith.addf %186, %185 : vector<2x2x64xf32>
    %cst_81 = arith.constant 1.000000e+00 : f32
    %188 = vector.broadcast %cst_81 : f32 to vector<2x2x64xf32>
    %189 = arith.divf %188, %187 : vector<2x2x64xf32>
    %cst_82 = arith.constant 1.06140542 : f32
    %190 = vector.broadcast %cst_82 : f32 to vector<2x2x64xf32>
    %191 = arith.mulf %190, %189 : vector<2x2x64xf32>
    %cst_83 = arith.constant -1.45315206 : f32
    %192 = vector.broadcast %cst_83 : f32 to vector<2x2x64xf32>
    %193 = arith.addf %191, %192 : vector<2x2x64xf32>
    %194 = arith.mulf %193, %189 : vector<2x2x64xf32>
    %cst_84 = arith.constant 1.42141378 : f32
    %195 = vector.broadcast %cst_84 : f32 to vector<2x2x64xf32>
    %196 = arith.addf %194, %195 : vector<2x2x64xf32>
    %197 = arith.mulf %196, %189 : vector<2x2x64xf32>
    %cst_85 = arith.constant -0.284496725 : f32
    %198 = vector.broadcast %cst_85 : f32 to vector<2x2x64xf32>
    %199 = arith.addf %197, %198 : vector<2x2x64xf32>
    %200 = arith.mulf %199, %189 : vector<2x2x64xf32>
    %cst_86 = arith.constant 0.254829586 : f32
    %201 = vector.broadcast %cst_86 : f32 to vector<2x2x64xf32>
    %202 = arith.addf %200, %201 : vector<2x2x64xf32>
    %203 = arith.mulf %202, %189 : vector<2x2x64xf32>
    %cst_87 = arith.constant 0.000000e+00 : f32
    %204 = vector.broadcast %cst_87 : f32 to vector<2x2x64xf32>
    %205 = arith.subf %204, %183 : vector<2x2x64xf32>
    %206 = arith.mulf %205, %183 : vector<2x2x64xf32>
    %207 = math.exp %206 : vector<2x2x64xf32>
    %208 = arith.mulf %203, %207 : vector<2x2x64xf32>
    %cst_88 = arith.constant 1.000000e+00 : f32
    %209 = vector.broadcast %cst_88 : f32 to vector<2x2x64xf32>
    %210 = arith.subf %209, %208 : vector<2x2x64xf32>
    %cst_89 = arith.constant 0.000000e+00 : f32
    %211 = vector.broadcast %cst_89 : f32 to vector<2x2x64xf32>
    %212 = arith.cmpf oge, %182, %211 : vector<2x2x64xf32>
    %cst_90 = arith.constant 0.000000e+00 : f32
    %213 = vector.broadcast %cst_90 : f32 to vector<2x2x64xf32>
    %214 = arith.subf %213, %210 : vector<2x2x64xf32>
    %215 = arith.select %212, %210, %214 : vector<2x2x64xi1>, vector<2x2x64xf32>
    %cst_91 = arith.constant 1.000000e+00 : f32
    %216 = vector.broadcast %cst_91 : f32 to vector<2x2x64xf32>
    %217 = arith.addf %216, %215 : vector<2x2x64xf32>
    %218 = arith.mulf %180, %217 : vector<2x2x64xf32>
    %c0_92 = arith.constant 0 : index
    %c0_93 = arith.constant 0 : index
    %219 = vector.load %arg9[%c0_92, %c0_93] : memref<64x32xf32, #tpu.memory_space<vmem>>, vector<64x32xf32>
    %220 = vector.shape_cast %219 : vector<64x32xf32> to vector<1x64x32xf32>
    %221 = vector.broadcast %220 : vector<1x64x32xf32> to vector<2x64x32xf32>
    "tpu.trace_start"() <{level = 10 : i32, message = "nlf,nfd->nld"}> : () -> ()
    %cst_94 = arith.constant dense<0.000000e+00> : vector<2x2x32xf32>
    %222 = tpu.matmul %218, %221, %cst_94 {dimension_numbers = #tpu.dot_dimension_numbers<[2], [1], [1], [2], [0, 0, 0, 1, 1, 2], [0], [0]>} : vector<2x2x64xf32>, vector<2x64x32xf32>, vector<2x2x32xf32> -> vector<2x2x32xf32>
    "tpu.trace_stop"() : () -> ()
    %c0_95 = arith.constant 0 : index
    %c0_96 = arith.constant 0 : index
    %223 = vector.load %arg10[%c0_95, %c0_96] : memref<1x32xf32, #tpu.memory_space<vmem>>, vector<1x32xf32>
    %224 = vector.shape_cast %223 : vector<1x32xf32> to vector<1x1x32xf32>
    %225 = vector.broadcast %224 : vector<1x1x32xf32> to vector<2x2x32xf32>
    %226 = arith.addf %222, %225 : vector<2x2x32xf32>
    %227 = arith.addf %226, %154 : vector<2x2x32xf32>
    %228 = vector.extract_strided_slice %1 {offsets = [2, 0], sizes = [1, 32], strides = [1, 1]} : vector<4x32xf32> to vector<1x32xf32>
    %229 = vector.extract_strided_slice %1 {offsets = [3, 0], sizes = [1, 32], strides = [1, 1]} : vector<4x32xf32> to vector<1x32xf32>
    %cst_97 = arith.constant dense<0.000000e+00> : vector<2x2xf32>
    %230 = vector.multi_reduction <add>, %227, %cst_97 [2] : vector<2x2x32xf32> to vector<2x2xf32>
    %231 = vector.shape_cast %230 : vector<2x2xf32> to vector<2x2x1xf32>
    %cst_98 = arith.constant 3.200000e+01 : f32
    %232 = vector.broadcast %cst_98 : f32 to vector<2x2x1xf32>
    %233 = arith.divf %231, %232 : vector<2x2x1xf32>
    %234 = vector.broadcast %233 : vector<2x2x1xf32> to vector<2x2x32xf32>
    %235 = arith.subf %227, %234 : vector<2x2x32xf32>
    %236 = arith.mulf %235, %235 : vector<2x2x32xf32>
    %cst_99 = arith.constant dense<0.000000e+00> : vector<2x2xf32>
    %237 = vector.multi_reduction <add>, %236, %cst_99 [2] : vector<2x2x32xf32> to vector<2x2xf32>
    %238 = vector.shape_cast %237 : vector<2x2xf32> to vector<2x2x1xf32>
    %cst_100 = arith.constant 3.200000e+01 : f32
    %239 = vector.broadcast %cst_100 : f32 to vector<2x2x1xf32>
    %240 = arith.divf %238, %239 : vector<2x2x1xf32>
    %cst_101 = arith.constant 9.99999974E-6 : f32
    %241 = vector.broadcast %cst_101 : f32 to vector<2x2x1xf32>
    %242 = arith.addf %240, %241 : vector<2x2x1xf32>
    %243 = math.rsqrt %242 : vector<2x2x1xf32>
    %244 = vector.broadcast %243 : vector<2x2x1xf32> to vector<2x2x32xf32>
    %245 = arith.mulf %235, %244 : vector<2x2x32xf32>
    %246 = vector.shape_cast %228 : vector<1x32xf32> to vector<1x1x32xf32>
    %247 = vector.broadcast %246 : vector<1x1x32xf32> to vector<2x2x32xf32>
    %248 = arith.mulf %245, %247 : vector<2x2x32xf32>
    %249 = vector.shape_cast %229 : vector<1x32xf32> to vector<1x1x32xf32>
    %250 = vector.broadcast %249 : vector<1x1x32xf32> to vector<2x2x32xf32>
    %251 = arith.addf %248, %250 : vector<2x2x32xf32>
    %cst_102 = arith.constant -1.000000e+02 : f32
    %cst_103 = arith.constant 1.000000e+02 : f32
    %252 = vector.broadcast %cst_102 : f32 to vector<2x2x32xf32>
    %253 = arith.maximumf %252, %251 : vector<2x2x32xf32>
    %254 = vector.broadcast %cst_103 : f32 to vector<2x2x32xf32>
    %255 = arith.minimumf %254, %253 : vector<2x2x32xf32>
    %c0_104 = arith.constant 0 : index
    %c0_105 = arith.constant 0 : index
    %c0_106 = arith.constant 0 : index
    %256 = vector.load %arg11[%c0_104, %c0_105, %c0_106] : memref<2x2x32xf32, #tpu.memory_space<vmem>>, vector<2x2x32xf32>
    tpu.vector_store %arg11[%c0_104, %c0_105, %c0_106], %255 {strides = array<i32>} : memref<2x2x32xf32, #tpu.memory_space<vmem>>, vector<2x2x32xf32>,
    return
  }
  func.func @transform_0(%arg0: i32) -> (i32, i32, i32) {
    %c0_i32 = arith.constant 0 : i32
    %c0_i32_0 = arith.constant 0 : i32
    %c0_i32_1 = arith.constant 0 : i32
    %c0_i32_2 = arith.constant 0 : i32
    return %c0_i32, %c0_i32_0, %c0_i32_1 : i32, i32, i32
  }
  func.func @transform_1(%arg0: i32) -> (i32, i32) {
    %c0_i32 = arith.constant 0 : i32
    %c0_i32_0 = arith.constant 0 : i32
    %c0_i32_1 = arith.constant 0 : i32
    return %c0_i32, %c0_i32_0 : i32, i32
  }
  func.func @transform_2(%arg0: i32) -> (i32, i32) {
    %c0_i32 = arith.constant 0 : i32
    %c0_i32_0 = arith.constant 0 : i32
    %c0_i32_1 = arith.constant 0 : i32
    return %c0_i32, %c0_i32_0 : i32, i32
  }
  func.func @transform_3(%arg0: i32) -> (i32, i32) {
    %c0_i32 = arith.constant 0 : i32
    %c0_i32_0 = arith.constant 0 : i32
    %c0_i32_1 = arith.constant 0 : i32
    return %c0_i32, %c0_i32_0 : i32, i32
  }
  func.func @transform_4(%arg0: i32) -> (i32, i32) {
    %c0_i32 = arith.constant 0 : i32
    %c0_i32_0 = arith.constant 0 : i32
    %c0_i32_1 = arith.constant 0 : i32
    return %c0_i32, %c0_i32_0 : i32, i32
  }
  func.func @transform_5(%arg0: i32) -> (i32, i32) {
    %c0_i32 = arith.constant 0 : i32
    %c0_i32_0 = arith.constant 0 : i32
    %c0_i32_1 = arith.constant 0 : i32
    return %c0_i32, %c0_i32_0 : i32, i32
  }
  func.func @transform_6(%arg0: i32) -> (i32, i32) {
    %c0_i32 = arith.constant 0 : i32
    %c0_i32_0 = arith.constant 0 : i32
    %c0_i32_1 = arith.constant 0 : i32
    return %c0_i32, %c0_i32_0 : i32, i32
  }
  func.func @transform_7(%arg0: i32) -> (i32, i32) {
    %c0_i32 = arith.constant 0 : i32
    %c0_i32_0 = arith.constant 0 : i32
    %c0_i32_1 = arith.constant 0 : i32
    return %c0_i32, %c0_i32_0 : i32, i32
  }
  func.func @transform_8(%arg0: i32) -> (i32, i32) {
    %c0_i32 = arith.constant 0 : i32
    %c0_i32_0 = arith.constant 0 : i32
    %c0_i32_1 = arith.constant 0 : i32
    return %c0_i32, %c0_i32_0 : i32, i32
  }
  func.func @transform_9(%arg0: i32) -> (i32, i32) {
    %c0_i32 = arith.constant 0 : i32
    %c0_i32_0 = arith.constant 0 : i32
    %c0_i32_1 = arith.constant 0 : i32
    return %c0_i32, %c0_i32_0 : i32, i32
  }
  func.func @transform_10(%arg0: i32) -> (i32, i32, i32) {
    %c0_i32 = arith.constant 0 : i32
    %c0_i32_0 = arith.constant 0 : i32
    %c0_i32_1 = arith.constant 0 : i32
    %c0_i32_2 = arith.constant 0 : i32
    return %c0_i32, %c0_i32_0, %c0_i32_1 : i32, i32, i32
  }
}

module attributes {stable_mosaic.version = 11 : i64} {
  func.func @_logits_kernel(%arg0: i32, %arg1: memref<4x32xf32, #tpu.memory_space<vmem>>, %arg2: memref<32x128xf32, #tpu.memory_space<vmem>>, %arg3: memref<1x128xf32, #tpu.memory_space<vmem>>, %arg4: memref<4x128xf32, #tpu.memory_space<vmem>>) attributes {dimension_semantics = [#tpu.dimension_semantics<arbitrary>], iteration_bounds = array<i64: 1>, scalar_prefetch = 0 : i64, scratch_operands = 0 : i64, tpu.core_type = #tpu.core_type<tc>, window_params = [{pipeline_mode = #tpu.pipeline_mode<synchronous>, transform_indices = @transform_0, window_bounds = array<i64: 4, 32>}, {pipeline_mode = #tpu.pipeline_mode<synchronous>, transform_indices = @transform_1, window_bounds = array<i64: 32, 128>}, {pipeline_mode = #tpu.pipeline_mode<synchronous>, transform_indices = @transform_2, window_bounds = array<i64: 1, 128>}, {pipeline_mode = #tpu.pipeline_mode<synchronous>, transform_indices = @transform_3, window_bounds = array<i64: 4, 128>}]} {
    %c0 = arith.constant 0 : index
    %c0_0 = arith.constant 0 : index
    %0 = vector.load %arg1[%c0, %c0_0] : memref<4x32xf32, #tpu.memory_space<vmem>>, vector<4x32xf32>
    %cst = arith.constant dense<0.000000e+00> : vector<4xf32>
    %1 = vector.multi_reduction <add>, %0, %cst [1] : vector<4x32xf32> to vector<4xf32>
    %2 = vector.shape_cast %1 : vector<4xf32> to vector<4x1xf32>
    %cst_1 = arith.constant 3.200000e+01 : f32
    %3 = vector.broadcast %cst_1 : f32 to vector<4x1xf32>
    %4 = arith.divf %2, %3 : vector<4x1xf32>
    %5 = vector.broadcast %4 : vector<4x1xf32> to vector<4x32xf32>
    %6 = arith.subf %0, %5 : vector<4x32xf32>
    %7 = arith.mulf %6, %6 : vector<4x32xf32>
    %cst_2 = arith.constant dense<0.000000e+00> : vector<4xf32>
    %8 = vector.multi_reduction <add>, %7, %cst_2 [1] : vector<4x32xf32> to vector<4xf32>
    %9 = vector.shape_cast %8 : vector<4xf32> to vector<4x1xf32>
    %cst_3 = arith.constant 3.200000e+01 : f32
    %10 = vector.broadcast %cst_3 : f32 to vector<4x1xf32>
    %11 = arith.divf %9, %10 : vector<4x1xf32>
    %cst_4 = arith.constant 9.99999974E-6 : f32
    %12 = vector.broadcast %cst_4 : f32 to vector<4x1xf32>
    %13 = arith.addf %11, %12 : vector<4x1xf32>
    %14 = math.rsqrt %13 : vector<4x1xf32>
    %15 = vector.broadcast %14 : vector<4x1xf32> to vector<4x32xf32>
    %16 = arith.mulf %6, %15 : vector<4x32xf32>
    %c0_5 = arith.constant 0 : index
    %c0_6 = arith.constant 0 : index
    %17 = vector.load %arg2[%c0_5, %c0_6] : memref<32x128xf32, #tpu.memory_space<vmem>>, vector<32x128xf32>
    %cst_7 = arith.constant dense<0.000000e+00> : vector<4x128xf32>
    %18 = tpu.matmul %16, %17, %cst_7 {dimension_numbers = #tpu.dot_dimension_numbers<[1], [0], [0], [1], [0, 0, 1, 1], [], []>} : vector<4x32xf32>, vector<32x128xf32>, vector<4x128xf32> -> vector<4x128xf32>
    %c0_8 = arith.constant 0 : index
    %c0_9 = arith.constant 0 : index
    %19 = vector.load %arg3[%c0_8, %c0_9] : memref<1x128xf32, #tpu.memory_space<vmem>>, vector<1x128xf32>
    %20 = vector.broadcast %19 : vector<1x128xf32> to vector<4x128xf32>
    %21 = arith.addf %18, %20 : vector<4x128xf32>
    %cst_10 = arith.constant -1.000000e+02 : f32
    %cst_11 = arith.constant 1.000000e+02 : f32
    %22 = vector.broadcast %cst_10 : f32 to vector<4x128xf32>
    %23 = arith.maximumf %22, %21 : vector<4x128xf32>
    %24 = vector.broadcast %cst_11 : f32 to vector<4x128xf32>
    %25 = arith.minimumf %24, %23 : vector<4x128xf32>
    %c0_12 = arith.constant 0 : index
    %c0_13 = arith.constant 0 : index
    %26 = vector.load %arg4[%c0_12, %c0_13] : memref<4x128xf32, #tpu.memory_space<vmem>>, vector<4x128xf32>
    tpu.vector_store %arg4[%c0_12, %c0_13], %25 {strides = array<i32>} : memref<4x128xf32, #tpu.memory_space<vmem>>, vector<4x128xf32>,
    return
  }
  func.func @transform_0(%arg0: i32) -> (i32, i32) {
    %c0_i32 = arith.constant 0 : i32
    %c0_i32_0 = arith.constant 0 : i32
    %c0_i32_1 = arith.constant 0 : i32
    return %c0_i32, %c0_i32_0 : i32, i32
  }
  func.func @transform_1(%arg0: i32) -> (i32, i32) {
    %c0_i32 = arith.constant 0 : i32
    %c0_i32_0 = arith.constant 0 : i32
    %c0_i32_1 = arith.constant 0 : i32
    return %c0_i32, %c0_i32_0 : i32, i32
  }
  func.func @transform_2(%arg0: i32) -> (i32, i32) {
    %c0_i32 = arith.constant 0 : i32
    %c0_i32_0 = arith.constant 0 : i32
    %c0_i32_1 = arith.constant 0 : i32
    return %c0_i32, %c0_i32_0 : i32, i32
  }
  func.func @transform_3(%arg0: i32) -> (i32, i32) {
    %c0_i32 = arith.constant 0 : i32
    %c0_i32_0 = arith.constant 0 : i32
    %c0_i32_1 = arith.constant 0 : i32
    return %c0_i32, %c0_i32_0 : i32, i32
  }
}

</mosaic_0001>

<bundles_post_ra>
// kernel: tpu_custom_call.1
= control target key start
LH: loop header
LB: loop body
LE: loop exit
PB: predicated region body
PF: predicated region fallthrough
CT: control target
= control target key end

     0   :  { %6 = vsyncpa [#allocation3], 0  ;;  %s157_s0 = inlined_call_operand.hbm [shape: f32[8,128], index: 0, kind: input, shape index: {}]   ;;  %s158_s1 = inlined_call_operand.hbm [shape: f32[8,128], index: 1, kind: output, shape index: {}]  }
   0x1   :  { %7 = vsyncpa [#allocation4], 0  ;;  %s13_s8 = sshll.u32 %s157_s0, 4  ;;  %s139_s9 = smov [#allocation2]   ;;  %s14_s8 = int_to_ptr.hbm [resolvable:$true] %s13_s8 }
   0x2   :  { %s15_s10 = sshll.u32 %s139_s9, 4  ;;  %s16_s10 = int_to_ptr.vmem [resolvable:$true] %s15_s10 }
   0x3   :  { %18 = dma.hbm_to_vmem [thread:$0]  %s14_s8, 128, %s16_s10, [#allocation3]  }
   0x4   :  { %135 = dma.done.wait [#allocation3], 128  }
   0x5   :  { %136 = vsyncadd [#allocation3], 4294967168  ;;  %v23_v0 = vld [vmem:[#allocation2] sm:$0xff]  ;;  %s140_s0 = smov [#allocation5]   ;;  %s72_s14 = sshll.u32 %s158_s1, 4  ;;  %s73_s14 = int_to_ptr.hbm [resolvable:$true] %s72_s14 }
   0x6   :  { %v24_v1 = vmul.f32 %v23_v0, %v23_v0  ;;  %s70_s11 = sshll.u32 %s140_s0, 4  ;;  %s71_s11 = int_to_ptr.vmem [resolvable:$true] %s70_s11 }
   0x8   :  { %v25_v2 = vmin.f32 %v24_v1, 16.0 }
   0xa   :  { %v26_v3 = vmul.f32 2.1237322e-06, %v25_v2  ;;  %v37_v4 = vmul.f32 3.8918573e-05, %v25_v2 }
   0xc   :  { %v27_v5 = vadd.f32 0.00028619796, %v26_v3  ;;  %v38_v6 = vadd.f32 0.001143296, %v37_v4 }
   0xe   :  { %v28_v7 = vmul.f32 %v27_v5, %v25_v2  ;;  %v39_v8 = vmul.f32 %v38_v6, %v25_v2 }
  0x10   :  { %v29_v9 = vadd.f32 0.0036580483, %v28_v7  ;;  %v40_v10 = vadd.f32 0.014752088, %v39_v8 }
  0x12   :  { %v30_v11 = vmul.f32 %v29_v9, %v25_v2  ;;  %v41_v12 = vmul.f32 %v40_v10, %v25_v2 }
  0x14   :  { %v42_v13 = vadd.f32 0.112945676, %v41_v12  ;;  %v31_v14 = vadd.f32 0.05243302, %v30_v11 }
  0x16   :  { %v43_v15 = vmul.f32 %v42_v13, %v25_v2  ;;  %v32_v17 = vmul.f32 %v31_v14, %v25_v2 }
  0x18   :  { %v44_v16 = vadd.f32 0.4994258, %v43_v15  ;;  %v33_v20 = vadd.f32 0.18741608, %v32_v17 }
  0x1a   :  { %v45_v18 = vmul.f32 %v44_v16, %v25_v2  ;;  %v34_v21 = vmul.f32 %v33_v20, %v25_v2 }
  0x1c   :  { %v46_v19 = vadd.f32 1.0, %v45_v18  ;;  %v35_v24 = vadd.f32 1.1283791, %v34_v21 }
  0x1e   :  { %85 = vrcp.f32 %v46_v19  ;;  %v58_v25 = vand.u32 2147483648, %v46_v19  ;;  %vm52_vm0 = vweird.f32 %v46_v19  ;;  %v56_v27 = vand.u32 2147483647, %v46_v19 }
  0x1f   :  { %v36_v30 = vmul.f32 %v35_v24, %v23_v0 }
  0x20   :  { %v59_v29 = vor.u32 1.1754944e-38, %v58_v25  ;;  %vm57_vm3 = vcmp.eq.f32.partialorder %v56_v27, 8.507059e+37 }
  0x24   :  { %v86_v22 = vpop.eup %85 }
  0x25   :  { %v48_v23 = vmul.f32 %v86_v22, %v46_v19  ;;  %vm53_vm1 = vweird.f32 %v86_v22 }
  0x26   :  { %vm54_vm2 = vmor %vm52_vm0, %vm53_vm1 }
  0x27   :  { %v49_v26 = vsub.f32 1.0, %v48_v23 }
  0x29   :  { %v50_v28 = vmul.f32 %v86_v22, %v49_v26 }
  0x2b   :  { %v51_v31 = vadd.f32 %v86_v22, %v50_v28 }
  0x2d   :  { %v55_v32 = vsel %vm54_vm2, %v86_v22, %v51_v31 }
  0x2e   :  { %v60_v33 = vsel %vm57_vm3, %v59_v29, %v55_v32 }
  0x2f   :  { %v61_v34 = vmul.f32 %v60_v33, %v36_v30 }
  0x31   :  { %v82_v35 = vclamps-f32 %v61_v34, 1.0 }
  0x33   :  { %64 = vst [vmem:[#allocation5] sm:$0xff] %v82_v35 }
  0x34   :  { %75 = dma.vmem_to_hbm [thread:$0]  %s71_s11, 128, %s73_s14, [#allocation4]  }
  0x35   :  { %137 = dma.done.wait [#allocation4], 128  }
  0x36   :  { %138 = vsyncadd [#allocation4], 4294967168 }
  0x37   :  { %80 = vsyncpa [#allocation3], 1 }
  0x38   :  { %81 = vsyncpa [#allocation4], 1 }

// kernel: hierarchical_transformer_fwd.8
= control target key start
LH: loop header
LB: loop body
LE: loop exit
PB: predicated region body
PF: predicated region fallthrough
CT: control target
= control target key end

     0   :  { %vm38_vm0 = vcmask 254976   ;;  %v1375_v4 = vmov 32.0   ;;  %vm98_vm5 = vcmask 261120   ;;  %s1376_s26 = smov 96   ;;  %vm153_vm9 = vcmask 64512   ;;  %s1378_s27 = smov 88   ;;  %s1729_s0 = inlined_call_operand.vmem [shape: f32[2,2,32], index: 0, kind: input, shape index: {}]   ;;  %s1730_s3 = inlined_call_operand.vmem [shape: f32[1,96], index: 3, kind: input, shape index: {}]   ;;  %s1731_s2 = inlined_call_operand.vmem [shape: f32[32,96], index: 2, kind: input, shape index: {}]   ;;  %s1732_s5 = inlined_call_operand.vmem [shape: f32[1,32], index: 5, kind: input, shape index: {}]   ;;  %s1733_s4 = inlined_call_operand.vmem [shape: f32[32,32], index: 4, kind: input, shape index: {}]   ;;  %s1734_s1 = inlined_call_operand.vmem [shape: f32[4,32], index: 1, kind: input, shape index: {}]   ;;  %s1735_s7 = inlined_call_operand.vmem [shape: f32[1,64], index: 7, kind: input, shape index: {}]   ;;  %s1736_s6 = inlined_call_operand.vmem [shape: f32[32,64], index: 6, kind: input, shape index: {}]   ;;  %s1737_s9 = inlined_call_operand.vmem [shape: f32[1,32], index: 9, kind: input, shape index: {}]   ;;  %s1738_s8 = inlined_call_operand.vmem [shape: f32[64,32], index: 8, kind: input, shape index: {}]   ;;  %s1739_s10 = inlined_call_operand.vmem [shape: f32[2,2,32], index: 10, kind: output, shape index: {}]  }
   0x1   :  { %v35_v0 = vld [vmem:[%s1729_s0] sm:$0x3]  ;;  %v36_v2 = vld [vmem:[%s1729_s0 + $0x2] sm:$0x3]  ;;  %1315 = vrcp.f32 %v1375_v4  ;;  %v93_v21 = vld [vmem:[%s1731_s2 + $0x18] sm:$0xff]  ;;  %vm207_vm10 = vcmask 9216  }
   0x2   :  { %v39_v1 = vsel %vm38_vm0, %v35_v0, 0.0  ;;  %v42_v3 = vsel %vm38_vm0, %v36_v2, 0.0  ;;  %114 = vmatpush.msra.mxu0 %v93_v21  ;;  %137 = vmatpush.msra.mxu1 %v93_v21  ;;  %v92_v22 = vld [vmem:[%s1731_s2 + $0x10] sm:$0xff]  ;;  %v91_v23 = vld [vmem:[%s1731_s2 + $0x8] sm:$0xff]  ;;  %v90_v24 = vld [vmem:[%s1731_s2] sm:$0xff]  ;;  %s1379_s28 = smov 80  }
   0x3   :  { %40 = vadd.xlane.f32.xlu0 %v39_v1  ;;  %v1311_v47 = vld [vmem:[%s1730_s3] ss:$0 sm:$0xff]  ;;  %s1377_s3 = smov 64   ;;  %s1380_s29 = smov 120   ;;  %vm268_vm11 = vcmask 1041408  }
   0x4   :  { %115 = vmatpush.msra.mxu0 %v92_v22  ;;  %138 = vmatpush.msra.mxu1 %v92_v22  ;;  %s1381_s30 = smov 112   ;;  %s1382_s11 = smov 72  }
   0x5   :  { %s1383_s12 = smov 104   ;;  %s1384_s13 = smov 56  }
   0x6   :  { %116 = vmatpush.msra.mxu0 %v91_v23  ;;  %139 = vmatpush.msra.mxu1 %v91_v23  ;;  %s1385_s14 = smov 48   ;;  %s1386_s15 = smov 40  }
   0x7   :  { %v1316_v5 = vpop.eup %1315  ;;  %s1387_s16 = smov 8   ;;  %s1388_s17 = smov 16  }
   0x8   :  { %v46_v6 = vmul.f32 32.0, %v1316_v5  ;;  %vm50_vm1 = vweird.f32 %v1316_v5  ;;  %117 = vmatpush.msra.mxu0 %v90_v24  ;;  %140 = vmatpush.msra.mxu1 %v90_v24  ;;  %s1389_s18 = smov 24  }
   0xa   :  { %v47_v7 = vsub.f32 1.0, %v46_v6 }
   0xb   :  { %43 = vadd.xlane.f32.xlu0 %v42_v3 }
   0xc   :  { %v48_v8 = vmul.f32 %v1316_v5, %v47_v7 }
   0xe   :  { %v49_v9 = vadd.f32 %v1316_v5, %v48_v8 }
  0x10   :  { %v1453_v10 = vsel %vm50_vm1, %v1316_v5, %v49_v9 }
  0x76   :  { %v41_v11 = vpop.xlane.xlu0 %40 }
  0x77   :  { %v52_v12 = vmul.f32 %v1453_v10, %v41_v11 }
  0x79   :  { %v54_v13 = vsub.f32 %v35_v0, %v52_v12 }
  0x7b   :  { %v56_v14 = vmul.f32 %v54_v13, %v54_v13 }
  0x7d   :  { %v58_v15 = vsel %vm38_vm0, %v56_v14, 0.0 }
  0x7e   :  { %59 = vadd.xlane.f32.xlu1 %v58_v15  ;;  %v44_v16 = vpop.xlane.xlu0 %43 }
  0x7f   :  { %v53_v17 = vmul.f32 %v1453_v10, %v44_v16 }
  0x81   :  { %v55_v18 = vsub.f32 %v36_v2, %v53_v17 }
  0x83   :  { %v57_v19 = vmul.f32 %v55_v18, %v55_v18 }
  0x85   :  { %v61_v20 = vsel %vm38_vm0, %v57_v19, 0.0 }
  0x86   :  { %62 = vadd.xlane.f32.xlu1 %v61_v20 }
  0xf1   :  { %v60_v25 = vpop.xlane.xlu1 %59 }
  0xf2   :  { %v64_v26 = vmul.f32 %v60_v25, %v1453_v10 }
  0xf4   :  { %v66_v27 = vadd.f32 1e-05, %v64_v26 }
  0xf6   :  { %1317 = vrsqrt.f32 %v66_v27  ;;  %vm74_vm3 = vweird.f32 %v66_v27 }
  0xf9   :  { %v63_v28 = vpop.xlane.xlu1 %62 }
  0xfa   :  { %v65_v29 = vmul.f32 %v63_v28, %v1453_v10 }
  0xfc   :  { %v1318_v30 = vpop.eup %1317  ;;  %v67_v31 = vadd.f32 1e-05, %v65_v29 }
  0xfd   :  { %v69_v32 = vmul.f32 %v1318_v30, %v66_v27  ;;  %vm75_vm2 = vweird.f32 %v1318_v30 }
  0xfe   :  { %1319 = vrsqrt.f32 %v67_v31  ;;  %vm76_vm4 = vmor %vm74_vm3, %vm75_vm2  ;;  %vm84_vm7 = vweird.f32 %v67_v31  ;;  %vm264_vm2 = vcmask 15360  }
  0xff   :  { %v70_v33 = vmul.f32 %v1318_v30, %v69_v32 }
 0x101   :  { %v71_v34 = vmul.f32 0.5, %v70_v33 }
 0x103   :  { %v72_v35 = vsub.f32 1.5, %v71_v34 }
 0x104   :  { %v1320_v36 = vpop.eup %1319 }
 0x105   :  { %v79_v37 = vmul.f32 %v1320_v36, %v67_v31  ;;  %v73_v38 = vmul.f32 %v1318_v30, %v72_v35  ;;  %vm85_vm6 = vweird.f32 %v1320_v36 }
 0x106   :  { %vm86_vm8 = vmor %vm84_vm7, %vm85_vm6  ;;  %vm318_vm7 = vcmask 58368  }
 0x107   :  { %v80_v39 = vmul.f32 %v1320_v36, %v79_v37  ;;  %v77_v40 = vsel %vm76_vm4, %v1318_v30, %v73_v38 }
 0x108   :  { %v88_v41 = vmul.f32 %v77_v40, %v54_v13 }
 0x109   :  { %v81_v42 = vmul.f32 0.5, %v80_v39 }
 0x10a   :  { %1254 = vmatmul.msk.f32.vlgmr.msra.gmra.mxu0 %vm98_vm5, %v88_v41 }
 0x10b   :  { %v82_v43 = vsub.f32 1.5, %v81_v42 }
 0x10d   :  { %v83_v44 = vmul.f32 %v1320_v36, %v82_v43 }
 0x10f   :  { %v87_v45 = vsel %vm86_vm8, %v1320_v36, %v83_v44 }
 0x110   :  { %v89_v46 = vmul.f32 %v87_v45, %v55_v18 }
 0x112   :  { %1255 = vmatmul.msk.f32.vlgmr.msra.gmra.mxu1 %vm98_vm5, %v89_v46 }
 0x187   :  { %v119_v48 = vpop.f32.mrf.mxu0 }
 0x188   :  { %v1478_v49 = vadd.f32 %v1311_v47, %v119_v48 }
 0x18a   :  { %151 = vrot.lane.b32.xlu2 %v1478_v49, %s1376_s26 }
 0x18f   :  { %v142_v50 = vpop.f32.mrf.mxu1 }
 0x190   :  { %v1481_v51 = vadd.f32 %v1311_v47, %v142_v50 }
 0x192   :  { %179 = vrot.lane.b32.xlu2 %v1481_v51, %s1376_s26 }
 0x1e4   :  { %v152_v52 = vpop.permute.xlu2 %151 }
 0x1e5   :  { %1256 = vmatpush.xpose.msk.msra.mxu2 %vm153_vm9, %v152_v52 }
 0x1e8   :  { %1257 = vmatmul.msk.f32.vlgmr.msra.gmra.mxu2 %vm153_vm9, %v1478_v49 }
 0x1ec   :  { %v180_v53 = vpop.permute.xlu2 %179 }
 0x1ed   :  { %1258 = vmatpush.xpose.msk.msra.mxu3 %vm153_vm9, %v180_v53 }
 0x1f0   :  { %1259 = vmatmul.msk.f32.vlgmr.msra.gmra.mxu3 %vm153_vm9, %v1481_v51 }
 0x26b   :  { %v175_v54 = vpop.f32.mrf.mxu2 }
 0x26c   :  { %v205_v55 = vmul.f32 0.35355338, %v175_v54 }
 0x26e   :  { %v208_v56 = vsel %vm207_vm10, %v205_v55, -inf }
 0x26f   :  { %209 = vmax.xlane.f32.xlu0 %v208_v56 }
 0x273   :  { %v202_v57 = vpop.f32.mrf.mxu3 }
 0x274   :  { %v206_v58 = vmul.f32 0.35355338, %v202_v57 }
 0x276   :  { %v211_v59 = vsel %vm207_vm10, %v206_v58, -inf }
 0x277   :  { %212 = vmax.xlane.f32.xlu1 %v211_v59 }
 0x283   :  { %291 = vrot.lane.b32.xlu0 %v1481_v51, %s1377_s3 }
 0x28b   :  { %351 = vrot.lane.b32.xlu0 %v1481_v51, %s1378_s27 }
 0x290   :  { %262 = vrot.lane.b32.xlu1 %v1478_v49, %s1377_s3 }
 0x293   :  { %500 = vrot.lane.b32.xlu0 %v1478_v49, %s1379_s28 }
 0x298   :  { %323 = vrot.lane.b32.xlu1 %v1478_v49, %s1378_s27 }
 0x2a0   :  { %321 = vrot.lane.b32.xlu1 %v1478_v49, %s1380_s29 }
 0x2a8   :  { %528 = vrot.lane.b32.xlu1 %v1481_v51, %s1379_s28 }
 0x2b0   :  { %526 = vrot.lane.b32.xlu1 %v1481_v51, %s1381_s30 }
 0x2b8   :  { %705 = vrot.lane.b32.xlu1 %v1481_v51, %s1382_s11 }
 0x2e2   :  { %v210_v60 = vpop.xlane.xlu0 %209 }
 0x2e3   :  { %v214_v61 = vsub.f32 %v205_v55, %v210_v60 }
 0x2e5   :  { %v216_v62 = vmul.f32 1.442695, %v214_v61 }
 0x2e7   :  { %1321 = vpow2.f32 %v216_v62 }
 0x2ea   :  { %v213_v63 = vpop.xlane.xlu1 %212 }
 0x2eb   :  { %v215_v0 = vsub.f32 %v206_v58, %v213_v63 }
 0x2ed   :  { %v1322_v1 = vpop.eup %1321  ;;  %v218_v2 = vmul.f32 1.442695, %v215_v0 }
 0x2ee   :  { %v220_v3 = vsel %vm207_vm10, %v1322_v1, 0.0 }
 0x2ef   :  { %1323 = vpow2.f32 %v218_v2  ;;  %221 = vadd.xlane.f32.xlu2 %v220_v3 }
 0x2f5   :  { %v1503_v4 = vpop.eup %1323  ;;  %v292_v5 = vpop.permute.xlu0 %291 }
 0x2f6   :  { %1262 = vmatpush.msk.msrb.mxu3 %vm268_vm11, %v292_v5  ;;  %v223_v6 = vsel %vm207_vm10, %v1503_v4, 0.0 }
 0x2f7   :  { %224 = vadd.xlane.f32.xlu0 %v223_v6 }
 0x2fd   :  { %v352_v7 = vpop.permute.xlu0 %351 }
 0x2fe   :  { %1266 = vmatpush.xpose.msk.msra.mxu3 %vm153_vm9, %v352_v7 }
 0x302   :  { %v263_v8 = vpop.permute.xlu1 %262 }
 0x303   :  { %1260 = vmatpush.msk.msrb.mxu2 %vm268_vm11, %v263_v8 }
 0x305   :  { %v501_v9 = vpop.permute.xlu0 %500 }
 0x306   :  { %1272 = vmatpush.xpose.msk.msrb.mxu0 %vm153_vm9, %v501_v9 }
 0x307   :  { %349 = vrot.lane.b32.xlu2 %v1481_v51, %s1380_s29 }
 0x30a   :  { %v324_v11 = vpop.permute.xlu1 %323 }
 0x30b   :  { %498 = vrot.lane.b32.xlu0 %v1478_v49, %s1381_s30  ;;  %1264 = vmatpush.xpose.msk.msra.mxu2 %vm153_vm9, %v324_v11 }
 0x30f   :  { %675 = vrot.lane.b32.xlu2 %v1478_v49, %s1383_s12 }
 0x312   :  { %v322_v12 = vpop.permute.xlu1 %321 }
 0x313   :  { %677 = vrot.lane.b32.xlu0 %v1478_v49, %s1382_s11 }
 0x31a   :  { %v529_v13 = vpop.permute.xlu1 %528 }
 0x31b   :  { %703 = vrot.lane.b32.xlu0 %v1481_v51, %s1383_s12  ;;  %1274 = vmatpush.xpose.msk.msrb.mxu1 %vm153_vm9, %v529_v13 }
 0x322   :  { %v527_v14 = vpop.permute.xlu1 %526 }
 0x323   :  { %1275 = vmatmul.msk.f32.vlgmr.msrb.gmra.mxu1 %vm153_vm9, %v527_v14 }
 0x32a   :  { %v706_v15 = vpop.permute.xlu1 %705 }
 0x32b   :  { %1282 = vmatpush.xpose.msk.msra.mxu1 %vm153_vm9, %v706_v15 }
 0x362   :  { %v222_v16 = vpop.xlane.xlu2 %221 }
 0x363   :  { %v226_v17 = vadd.f32 1e-09, %v222_v16 }
 0x365   :  { %1325 = vrcp.f32 %v226_v17  ;;  %v239_v23 = vand.u32 2147483648, %v226_v17  ;;  %v237_v25 = vand.u32 2147483647, %v226_v17  ;;  %vm233_vm13 = vweird.f32 %v226_v17 }
 0x367   :  { %v240_v28 = vor.u32 1.1754944e-38, %v239_v23  ;;  %vm238_vm15 = vcmp.eq.f32.partialorder %v237_v25, 8.507059e+37 }
 0x36a   :  { %v225_v18 = vpop.xlane.xlu0 %224  ;;  %v350_v44 = vpop.permute.xlu2 %349 }
 0x36b   :  { %v1326_v19 = vpop.eup %1325  ;;  %v227_v20 = vadd.f32 1e-09, %v225_v18 }
 0x36c   :  { %v229_v21 = vmul.f32 %v1326_v19, %v226_v17  ;;  %vm234_vm12 = vweird.f32 %v1326_v19 }
 0x36d   :  { %1327 = vrcp.f32 %v227_v20  ;;  %vm235_vm14 = vmor %vm233_vm13, %vm234_vm12  ;;  %v254_v34 = vand.u32 2147483648, %v227_v20  ;;  %v252_v37 = vand.u32 2147483647, %v227_v20  ;;  %vm248_vm3 = vweird.f32 %v227_v20 }
 0x36e   :  { %v230_v22 = vsub.f32 1.0, %v229_v21 }
 0x36f   :  { %v255_v40 = vor.u32 1.1754944e-38, %v254_v34  ;;  %vm253_vm6 = vcmp.eq.f32.partialorder %v252_v37, 8.507059e+37 }
 0x370   :  { %v231_v24 = vmul.f32 %v1326_v19, %v230_v22 }
 0x372   :  { %v232_v26 = vadd.f32 %v1326_v19, %v231_v24  ;;  %v676_v50 = vpop.permute.xlu2 %675 }
 0x373   :  { %v1328_v27 = vpop.eup %1327 }
 0x374   :  { %v244_v29 = vmul.f32 %v1328_v27, %v227_v20  ;;  %v236_v30 = vsel %vm235_vm14, %v1326_v19, %v232_v26  ;;  %vm249_vm1 = vweird.f32 %v1328_v27 }
 0x375   :  { %v241_v31 = vsel %vm238_vm15, %v240_v28, %v236_v30  ;;  %vm250_vm4 = vmor %vm248_vm3, %vm249_vm1 }
 0x376   :  { %v245_v32 = vsub.f32 1.0, %v244_v29  ;;  %v242_v33 = vmul.f32 %v1322_v1, %v241_v31 }
 0x378   :  { %v246_v35 = vmul.f32 %v1328_v27, %v245_v32  ;;  %v258_v36 = vmax.f32 %v242_v33, 1e-09 }
 0x37a   :  { %v260_v38 = vmin.f32 %v258_v36, 1.0  ;;  %v247_v39 = vadd.f32 %v1328_v27, %v246_v35 }
 0x37c   :  { %1261 = vmatmul.msk.f32.vlgmr.msrb.gmra.mxu2 %vm264_vm2, %v260_v38  ;;  %v251_v41 = vsel %vm250_vm4, %v1328_v27, %v247_v39 }
 0x37d   :  { %v499_v42 = vpop.permute.xlu0 %498  ;;  %v256_v43 = vsel %vm253_vm6, %v255_v40, %v251_v41 }
 0x37e   :  { %1273 = vmatmul.msk.f32.vlgmr.msrb.gmra.mxu0 %vm153_vm9, %v499_v42  ;;  %v257_v45 = vmul.f32 %v1503_v4, %v256_v43 }
 0x380   :  { %v259_v46 = vmax.f32 %v257_v45, 1e-09 }
 0x382   :  { %v261_v47 = vmin.f32 %v259_v46, 1.0 }
 0x384   :  { %1263 = vmatmul.msk.f32.vlgmr.msrb.gmra.mxu3 %vm264_vm2, %v261_v47  ;;  %1265 = vmatmul.msk.f32.vlgmr.msra.gmra.mxu2 %vm153_vm9, %v322_v12 }
 0x385   :  { %v678_v48 = vpop.permute.xlu0 %677 }
 0x386   :  { %1280 = vmatpush.xpose.msk.msra.mxu0 %vm153_vm9, %v678_v48 }
 0x389   :  { %1281 = vmatmul.msk.f32.vlgmr.msra.gmra.mxu0 %vm153_vm9, %v676_v50 }
 0x38c   :  { %1267 = vmatmul.msk.f32.vlgmr.msra.gmra.mxu3 %vm153_vm9, %v350_v44 }
 0x38d   :  { %v704_v52 = vpop.permute.xlu0 %703 }
 0x38e   :  { %1283 = vmatmul.msk.f32.vlgmr.msra.gmra.mxu1 %vm153_vm9, %v704_v52 }
 0x3a0   :  { %v551_v53 = vpop.f32.mrf.mxu1 }
 0x3a1   :  { %v555_v54 = vmul.f32 0.35355338, %v551_v53 }
 0x3a3   :  { %v559_v55 = vsel %vm207_vm10, %v555_v54, -inf }
 0x3a4   :  { %560 = vmax.xlane.f32.xlu2 %v559_v55 }
 0x3fb   :  { %v523_v56 = vpop.f32.mrf.mxu0 }
 0x3fc   :  { %v554_v57 = vmul.f32 0.35355338, %v523_v56 }
 0x3fe   :  { %v556_v58 = vsel %vm207_vm10, %v554_v57, -inf }
 0x3ff   :  { %v288_v59 = vpop.f32.mrf.mxu2  ;;  %557 = vmax.xlane.f32.xlu0 %v556_v58 }
 0x400   :  { %319 = vst.msk [vmem:[#allocation2] sm:$0x3] %vm318_vm7, %v288_v59 }
 0x406   :  { %v700_v60 = vpop.f32.mrf.mxu0 }
 0x407   :  { %v731_v61 = vmul.f32 0.35355338, %v700_v60  ;;  %v315_v62 = vpop.f32.mrf.mxu3  ;;  %v346_v25 = vpop.f32.mrf.mxu2 }
 0x408   :  { %320 = vst.msk [vmem:[#allocation2 + $0x2] sm:$0x3] %vm318_vm7, %v315_v62  ;;  %v377_v27 = vmul.f32 0.35355338, %v346_v25 }
 0x409   :  { %v733_v63 = vsel %vm207_vm10, %v731_v61, -inf }
 0x40a   :  { %734 = vmax.xlane.f32.xlu1 %v733_v63  ;;  %v379_v29 = vsel %vm207_vm10, %v377_v27, -inf }
 0x40b   :  { %v728_v0 = vpop.f32.mrf.mxu1 }
 0x40c   :  { %v732_v1 = vmul.f32 0.35355338, %v728_v0 }
 0x40e   :  { %v736_v2 = vsel %vm207_vm10, %v732_v1, -inf }
 0x40f   :  { %737 = vmax.xlane.f32.xlu0 %v736_v2  ;;  %v374_v8 = vpop.f32.mrf.mxu3 }
 0x410   :  { %v378_v9 = vmul.f32 0.35355338, %v374_v8 }
 0x412   :  { %v382_v11 = vsel %vm207_vm10, %v378_v9, -inf }
 0x417   :  { %v561_v3 = vpop.xlane.xlu2 %560 }
 0x418   :  { %v563_v4 = vsub.f32 %v555_v54, %v561_v3 }
 0x41a   :  { %v566_v5 = vmul.f32 1.442695, %v563_v4 }
 0x41c   :  { %1329 = vpow2.f32 %v566_v5 }
 0x422   :  { %v1534_v6 = vpop.eup %1329 }
 0x423   :  { %v571_v7 = vsel %vm207_vm10, %v1534_v6, 0.0 }
 0x424   :  { %572 = vadd.xlane.f32.xlu2 %v571_v7 }
 0x42c   :  { %383 = vmax.xlane.f32.xlu2 %v382_v11 }
 0x444   :  { %433 = vrot.lane.b32.xlu2 %v1478_v49, %s1384_s13 }
 0x472   :  { %v558_v12 = vpop.xlane.xlu0 %557 }
 0x473   :  { %v562_v13 = vsub.f32 %v554_v57, %v558_v12 }
 0x475   :  { %v564_v14 = vmul.f32 1.442695, %v562_v13 }
 0x477   :  { %1331 = vpow2.f32 %v564_v14 }
 0x47d   :  { %v1541_v15 = vpop.eup %1331  ;;  %v735_v16 = vpop.xlane.xlu1 %734 }
 0x47e   :  { %v739_v17 = vsub.f32 %v731_v61, %v735_v16  ;;  %v568_v18 = vsel %vm207_vm10, %v1541_v15, 0.0 }
 0x47f   :  { %569 = vadd.xlane.f32.xlu0 %v568_v18 }
 0x480   :  { %v741_v19 = vmul.f32 1.442695, %v739_v17 }
 0x482   :  { %1333 = vpow2.f32 %v741_v19  ;;  %v738_v20 = vpop.xlane.xlu0 %737 }
 0x483   :  { %v740_v21 = vsub.f32 %v732_v1, %v738_v20 }
 0x485   :  { %v743_v22 = vmul.f32 1.442695, %v740_v21 }
 0x487   :  { %1335 = vpow2.f32 %v743_v22 }
 0x488   :  { %v1545_v23 = vpop.eup %1333 }
 0x489   :  { %v745_v24 = vsel %vm207_vm10, %v1545_v23, 0.0 }
 0x48a   :  { %746 = vadd.xlane.f32.xlu1 %v745_v24 }
 0x48d   :  { %v1549_v26 = vpop.eup %1335 }
 0x48e   :  { %v748_v28 = vsel %vm207_vm10, %v1549_v26, 0.0 }
 0x48f   :  { %749 = vadd.xlane.f32.xlu0 %v748_v28 }
 0x492   :  { %380 = vmax.xlane.f32.xlu1 %v379_v29 }
 0x497   :  { %v573_v30 = vpop.xlane.xlu2 %572 }
 0x498   :  { %v575_v47 = vadd.f32 1e-09, %v573_v30 }
 0x49a   :  { %v602_v2 = vand.u32 2147483648, %v575_v47  ;;  %v600_v3 = vand.u32 2147483647, %v575_v47 }
 0x49c   :  { %v603_v11 = vor.u32 1.1754944e-38, %v602_v2  ;;  %vm601_vm1 = vcmp.eq.f32.partialorder %v600_v3, 8.507059e+37 }
 0x49f   :  { %v384_v31 = vpop.xlane.xlu2 %383 }
 0x4a0   :  { %v386_v33 = vsub.f32 %v378_v9, %v384_v31 }
 0x4a2   :  { %v389_v34 = vmul.f32 1.442695, %v386_v33 }
 0x4a3   :  { %610 = vrot.lane.b32.xlu0 %v1478_v49, %s1385_s14 }
 0x4a4   :  { %1337 = vpow2.f32 %v389_v34 }
 0x4a7   :  { %v434_v32 = vpop.permute.xlu2 %433 }
 0x4a8   :  { %1268 = vmatpush.msk.msrb.mxu2 %vm268_vm11, %v434_v32 }
 0x4aa   :  { %v1338_v35 = vpop.eup %1337 }
 0x4ab   :  { %460 = vrot.lane.b32.xlu1 %v1481_v51, %s1384_s13  ;;  %637 = vrot.lane.b32.xlu0 %v1481_v51, %s1385_s14  ;;  %v394_v36 = vsel %vm207_vm10, %v1338_v35, 0.0 }
 0x4d5   :  { %395 = vadd.xlane.f32.xlu1 %v394_v36 }
 0x4ee   :  { %814 = vrot.lane.b32.xlu1 %v1481_v51, %s1386_s15 }
 0x4f2   :  { %v1563_v38 = vpop.xlane.xlu0 %569 }
 0x4fd   :  { %v1561_v37 = vpop.xlane.xlu1 %746 }
 0x4fe   :  { %v751_v33 = vadd.f32 1e-09, %v1561_v37 }
 0x502   :  { %v750_v42 = vpop.xlane.xlu0 %749 }
 0x503   :  { %v752_v48 = vadd.f32 1e-09, %v750_v42 }
 0x505   :  { %v381_v39 = vpop.xlane.xlu1 %380  ;;  %v779_v18 = vand.u32 2147483648, %v752_v48  ;;  %vm773_vm4 = vweird.f32 %v752_v48  ;;  %v777_v19 = vand.u32 2147483647, %v752_v48 }
 0x506   :  { %v385_v40 = vsub.f32 %v377_v27, %v381_v39 }
 0x507   :  { %v780_v25 = vor.u32 1.1754944e-38, %v779_v18  ;;  %vm778_vm7 = vcmp.eq.f32.partialorder %v777_v19, 8.507059e+37  ;;  %v148_v19 = vld [vmem:[%s1733_s4 + $0x18] sm:$0xff] }
 0x508   :  { %v387_v41 = vmul.f32 1.442695, %v385_v40  ;;  %872 = vmatpush.msrb.mxu0 %v148_v19  ;;  %895 = vmatpush.msrb.mxu1 %v148_v19 }
 0x50a   :  { %1339 = vpow2.f32 %v387_v41 }
 0x50b   :  { %1341 = vrcp.f32 %v575_v47 }
 0x50c   :  { %1343 = vrcp.f32 %v752_v48 }
 0x510   :  { %v1565_v43 = vpop.eup %1339 }
 0x511   :  { %v391_v44 = vsel %vm207_vm10, %v1565_v43, 0.0  ;;  %v1342_v50 = vpop.eup %1341  ;;  %vm596_vm10 = vweird.f32 %v575_v47 }
 0x512   :  { %392 = vadd.xlane.f32.xlu2 %v391_v44  ;;  %v592_v53 = vmul.f32 %v1342_v50, %v575_v47  ;;  %v1344_v56 = vpop.eup %1343  ;;  %vm597_vm8 = vweird.f32 %v1342_v50 }
 0x513   :  { %v769_v59 = vmul.f32 %v1344_v56, %v752_v48  ;;  %vm598_vm12 = vmor %vm596_vm10, %vm597_vm8  ;;  %vm774_vm3 = vweird.f32 %v1344_v56 }
 0x514   :  { %v593_v55 = vsub.f32 1.0, %v592_v53  ;;  %vm775_vm6 = vmor %vm773_vm4, %vm774_vm3  ;;  %vm758_vm4 = vweird.f32 %v751_v33 }
 0x515   :  { %v611_v45 = vpop.permute.xlu0 %610 }
 0x516   :  { %1276 = vmatpush.msk.msra.mxu2 %vm268_vm11, %v611_v45  ;;  %v594_v58 = vmul.f32 %v1342_v50, %v593_v55 }
 0x518   :  { %v595_v62 = vadd.f32 %v1342_v50, %v594_v58 }
 0x51a   :  { %v599_v9 = vsel %vm598_vm12, %v1342_v50, %v595_v62 }
 0x51b   :  { %v604_v14 = vsel %vm601_vm1, %v603_v11, %v599_v9 }
 0x51c   :  { %v605_v22 = vmul.f32 %v1534_v6, %v604_v14  ;;  %v574_v6 = vadd.f32 1e-09, %v1563_v38 }
 0x51d   :  { %v461_v46 = vpop.permute.xlu1 %460  ;;  %v638_v51 = vpop.permute.xlu0 %637 }
 0x51e   :  { %1270 = vmatpush.msk.msrb.mxu3 %vm268_vm11, %v461_v46  ;;  %v607_v27 = vmax.f32 %v605_v22, 1e-09  ;;  %vm581_vm10 = vweird.f32 %v574_v6  ;;  %v587_v50 = vand.u32 2147483648, %v574_v6  ;;  %v145_v22 = vld [vmem:[%s1733_s4] sm:$0xff] }
 0x520   :  { %1278 = vmatpush.msk.msra.mxu3 %vm268_vm11, %v638_v51  ;;  %v609_v29 = vmin.f32 %v607_v27, 1.0  ;;  %v588_v58 = vor.u32 1.1754944e-38, %v587_v50 }
 0x52a   :  { %787 = vrot.lane.b32.xlu2 %v1478_v49, %s1386_s15  ;;  %v770_v49 = vsub.f32 1.0, %v769_v59 }
 0x52c   :  { %v771_v7 = vmul.f32 %v1344_v56, %v770_v49  ;;  %v764_v49 = vand.u32 2147483648, %v751_v33 }
 0x52e   :  { %v772_v16 = vadd.f32 %v1344_v56, %v771_v7 }
 0x530   :  { %v776_v24 = vsel %vm775_vm6, %v1344_v56, %v772_v16 }
 0x531   :  { %v781_v28 = vsel %vm778_vm7, %v780_v25, %v776_v24 }
 0x532   :  { %v782_v30 = vmul.f32 %v1549_v26, %v781_v28 }
 0x534   :  { %v784_v31 = vmax.f32 %v782_v30, 1e-09 }
 0x536   :  { %v786_v32 = vmin.f32 %v784_v31, 1.0 }
 0x548   :  { %v396_v52 = vpop.xlane.xlu1 %395 }
 0x549   :  { %v398_v54 = vadd.f32 1e-09, %v396_v52  ;;  %v585_v52 = vand.u32 2147483647, %v574_v6 }
 0x54b   :  { %1345 = vrcp.f32 %v398_v54  ;;  %v425_v63 = vand.u32 2147483648, %v398_v54  ;;  %v423_v1 = vand.u32 2147483647, %v398_v54  ;;  %vm419_vm13 = vweird.f32 %v398_v54 }
 0x54c   :  { %1347 = vrcp.f32 %v574_v6  ;;  %vm586_vm1 = vcmp.eq.f32.partialorder %v585_v52, 8.507059e+37 }
 0x54d   :  { %v426_v5 = vor.u32 1.1754944e-38, %v425_v63  ;;  %vm424_vm15 = vcmp.eq.f32.partialorder %v423_v1, 8.507059e+37  ;;  %1349 = vrcp.f32 %v751_v33 }
 0x551   :  { %v1346_v57 = vpop.eup %1345 }
 0x552   :  { %v415_v60 = vmul.f32 %v1346_v57, %v398_v54  ;;  %vm420_vm9 = vweird.f32 %v1346_v57  ;;  %v1348_v34 = vpop.eup %1347 }
 0x553   :  { %vm421_vm14 = vmor %vm419_vm13, %vm420_vm9  ;;  %v577_v36 = vmul.f32 %v1348_v34, %v574_v6  ;;  %v1350_v41 = vpop.eup %1349  ;;  %vm582_vm8 = vweird.f32 %v1348_v34 }
 0x554   :  { %v416_v61 = vsub.f32 1.0, %v415_v60  ;;  %v754_v44 = vmul.f32 %v1350_v41, %v751_v33  ;;  %vm583_vm12 = vmor %vm581_vm10, %vm582_vm8  ;;  %vm759_vm3 = vweird.f32 %v1350_v41  ;;  %vm849_vm8 = vcmask 255168  }
 0x555   :  { %v578_v40 = vsub.f32 1.0, %v577_v36  ;;  %vm760_vm6 = vmor %vm758_vm4, %vm759_vm3 }
 0x556   :  { %v417_v0 = vmul.f32 %v1346_v57, %v416_v61  ;;  %v755_v38 = vsub.f32 1.0, %v754_v44 }
 0x557   :  { %v579_v42 = vmul.f32 %v1348_v34, %v578_v40 }
 0x558   :  { %v418_v4 = vadd.f32 %v1346_v57, %v417_v0  ;;  %v756_v55 = vmul.f32 %v1350_v41, %v755_v38  ;;  %v762_v0 = vand.u32 2147483647, %v751_v33 }
 0x559   :  { %v580_v51 = vadd.f32 %v1348_v34, %v579_v42 }
 0x55a   :  { %v422_v8 = vsel %vm421_vm14, %v1346_v57, %v418_v4  ;;  %v757_v62 = vadd.f32 %v1350_v41, %v756_v55  ;;  %vm763_vm7 = vcmp.eq.f32.partialorder %v762_v0, 8.507059e+37 }
 0x55b   :  { %v427_v12 = vsel %vm424_vm15, %v426_v5, %v422_v8  ;;  %v584_v57 = vsel %vm583_vm12, %v1348_v34, %v580_v51  ;;  %v765_v5 = vor.u32 1.1754944e-38, %v764_v49 }
 0x55c   :  { %v428_v13 = vmul.f32 %v1338_v35, %v427_v12  ;;  %v589_v61 = vsel %vm586_vm1, %v588_v58, %v584_v57  ;;  %v761_v4 = vsel %vm760_vm6, %v1350_v41, %v757_v62 }
 0x55d   :  { %v590_v2 = vmul.f32 %v1541_v15, %v589_v61  ;;  %v766_v7 = vsel %vm763_vm7, %v765_v5, %v761_v4  ;;  %v1618_v61 = vld [vmem:[%s1734_s1] sm:$0xf] }
 0x55e   :  { %v430_v17 = vmax.f32 %v428_v13, 1e-09  ;;  %v767_v9 = vmul.f32 %v1545_v23, %v766_v7  ;;  %v947_v0 = vperm.slane %v1618_v61, 0  ;;  %v950_v4 = vperm.slane %v1618_v61, 1 }
 0x560   :  { %v815_v20 = vpop.permute.xlu1 %814  ;;  %v432_v21 = vmin.f32 %v430_v17, 1.0  ;;  %v783_v11 = vmax.f32 %v767_v9, 1e-09 }
 0x562   :  { %1271 = vmatmul.msk.f32.vlgmr.msrb.gmra.mxu3 %vm264_vm2, %v432_v21  ;;  %v785_v12 = vmin.f32 %v783_v11, 1.0  ;;  %v146_v21 = vld [vmem:[%s1733_s4 + $0x8] sm:$0xff]  ;;  %v1373_v11 = vld [vmem:[%s1729_s0] sm:$0x3] }
 0x563   :  { %1286 = vmatpush.msk.msrb.mxu3 %vm268_vm11, %v815_v20  ;;  %v147_v20 = vld [vmem:[%s1733_s4 + $0x10] sm:$0xff] }
 0x564   :  { %873 = vmatpush.msrb.mxu0 %v147_v20  ;;  %896 = vmatpush.msrb.mxu1 %v147_v20 }
 0x566   :  { %874 = vmatpush.msrb.mxu0 %v146_v21  ;;  %897 = vmatpush.msrb.mxu1 %v146_v21 }
 0x568   :  { %875 = vmatpush.msrb.mxu0 %v145_v22  ;;  %898 = vmatpush.msrb.mxu1 %v145_v22 }
 0x56a   :  { %1279 = vmatmul.msk.f32.vlgmr.msra.gmra.mxu3 %vm264_vm2, %v609_v29 }
 0x572   :  { %1287 = vmatmul.msk.f32.vlgmr.msrb.gmra.mxu3 %vm264_vm2, %v786_v32  ;;  %v1312_v32 = vld [vmem:[%s1732_s5] ss:$0 sm:$0xff] }
 0x585   :  { %v393_v35 = vpop.xlane.xlu2 %392 }
 0x586   :  { %v397_v39 = vadd.f32 1e-09, %v393_v35 }
 0x588   :  { %1351 = vrcp.f32 %v397_v39  ;;  %v410_v47 = vand.u32 2147483648, %v397_v39  ;;  %v408_v37 = vand.u32 2147483647, %v397_v39  ;;  %vm404_vm13 = vweird.f32 %v397_v39 }
 0x58a   :  { %v411_v54 = vor.u32 1.1754944e-38, %v410_v47  ;;  %vm409_vm15 = vcmp.eq.f32.partialorder %v408_v37, 8.507059e+37 }
 0x58d   :  { %v788_v3 = vpop.permute.xlu2 %787 }
 0x58e   :  { %v1352_v26 = vpop.eup %1351 }
 0x58f   :  { %v400_v45 = vmul.f32 %v1352_v26, %v397_v39  ;;  %vm405_vm9 = vweird.f32 %v1352_v26 }
 0x590   :  { %vm406_vm14 = vmor %vm404_vm13, %vm405_vm9 }
 0x591   :  { %v401_v46 = vsub.f32 1.0, %v400_v45 }
 0x593   :  { %v402_v48 = vmul.f32 %v1352_v26, %v401_v46 }
 0x595   :  { %v403_v53 = vadd.f32 %v1352_v26, %v402_v48 }
 0x597   :  { %v407_v56 = vsel %vm406_vm14, %v1352_v26, %v403_v53 }
 0x598   :  { %v412_v59 = vsel %vm409_vm15, %v411_v54, %v407_v56 }
 0x599   :  { %v413_v60 = vmul.f32 %v1565_v43, %v412_v59  ;;  %v606_v43 = vmax.f32 %v590_v2, 1e-09 }
 0x59b   :  { %v429_v63 = vmax.f32 %v413_v60, 1e-09  ;;  %v608_v8 = vmin.f32 %v606_v43, 1.0 }
 0x59d   :  { %v431_v1 = vmin.f32 %v429_v63, 1.0 }
 0x59f   :  { %1269 = vmatmul.msk.f32.vlgmr.msrb.gmra.mxu2 %vm264_vm2, %v431_v1 }
 0x5a0   :  { %1284 = vmatpush.msk.msrb.mxu2 %vm268_vm11, %v788_v3  ;;  %vm495_vm11 = vcmask 123968  }
 0x5a7   :  { %1277 = vmatmul.msk.f32.vlgmr.msra.gmra.mxu2 %vm264_vm2, %v608_v8 }
 0x5af   :  { %1285 = vmatmul.msk.f32.vlgmr.msrb.gmra.mxu2 %vm264_vm2, %v785_v12  ;;  %vm672_vm2 = vcmask 189568  }
 0x5e5   :  { %v484_v15 = vpop.f32.mrf.mxu3 }
 0x5e6   :  { %491 = vrot.lane.b32.xlu2 %v484_v15, %s1387_s16 }
 0x5ed   :  { %v661_v14 = vpop.f32.mrf.mxu3 }
 0x5f5   :  { %v838_v17 = vpop.f32.mrf.mxu3 }
 0x622   :  { %v457_v13 = vpop.f32.mrf.mxu2 }
 0x623   :  { %489 = vrot.lane.b32.xlu0 %v457_v13, %s1387_s16 }
 0x62a   :  { %v634_v16 = vpop.f32.mrf.mxu2 }
 0x62b   :  { %666 = vrot.lane.b32.xlu1 %v634_v16, %s1388_s17  ;;  %668 = vrot.lane.b32.xlu0 %v661_v14, %s1388_s17 }
 0x632   :  { %v811_v18 = vpop.f32.mrf.mxu2 }
 0x633   :  { %843 = vrot.lane.b32.xlu2 %v811_v18, %s1389_s18  ;;  %845 = vrot.lane.b32.xlu1 %v838_v17, %s1389_s18  ;;  %v1374_v17 = vld [vmem:[%s1729_s0 + $0x2] sm:$0x3] }
 0x640   :  { %v492_v23 = vpop.permute.xlu2 %491 }
 0x641   :  { %497 = vst.msk [vmem:[#allocation2 + $0x2] sm:$0x3] %vm495_vm11, %v492_v23 }
 0x68d   :  { %v844_v28 = vpop.permute.xlu2 %843 }
 0x695   :  { %v490_v24 = vpop.permute.xlu0 %489 }
 0x696   :  { %496 = vst.msk [vmem:[#allocation2] sm:$0x3] %vm495_vm11, %v490_v24 }
 0x69d   :  { %v667_v25 = vpop.permute.xlu1 %666  ;;  %v669_v27 = vpop.permute.xlu0 %668 }
 0x69e   :  { %673 = vst.msk [vmem:[#allocation2] sm:$0x3] %vm672_vm2, %v667_v25 }
 0x69f   :  { %850 = vst.msk [vmem:[#allocation2] sm:$0x3] %vm849_vm8, %v844_v28 }
 0x6a0   :  { %674 = vst.msk [vmem:[#allocation2 + $0x2] sm:$0x3] %vm672_vm2, %v669_v27 }
 0x6a5   :  { %v846_v29 = vpop.permute.xlu1 %845 }
 0x6a6   :  { %851 = vst.msk [vmem:[#allocation2 + $0x2] sm:$0x3] %vm849_vm8, %v846_v29  ;;  %v852_v30 = vld [vmem:[#allocation2] sm:$0x3] }
 0x6a7   :  { %1288 = vmatmul.msk.f32.vlgmr.msrb.gmra.mxu0 %vm98_vm5, %v852_v30 }
 0x6ad   :  { %v853_v31 = vld [vmem:[#allocation2 + $0x2] sm:$0x3] }
 0x6ae   :  { %1289 = vmatmul.msk.f32.vlgmr.msrb.gmra.mxu1 %vm98_vm5, %v853_v31  ;;  %v1002_v31 = vld [vmem:[%s1736_s6 + $0x18] sm:$0xff] }
 0x6af   :  { %1022 = vmatpush.msra.mxu2 %v1002_v31  ;;  %1045 = vmatpush.msra.mxu3 %v1002_v31 }
 0x724   :  { %v877_v6 = vpop.f32.mrf.mxu0 }
 0x725   :  { %v878_v33 = vadd.f32 %v1312_v32, %v877_v6  ;;  %v1000_v6 = vld [vmem:[%s1736_s6 + $0x8] sm:$0xff] }
 0x727   :  { %v903_v34 = vsel %vm38_vm0, %v878_v33, 0.0 }
 0x728   :  { %904 = vadd.xlane.f32.xlu0 %v903_v34 }
 0x72b   :  { %v900_v35 = vpop.f32.mrf.mxu1 }
 0x72c   :  { %v901_v36 = vadd.f32 %v1312_v32, %v900_v35  ;;  %v1001_v32 = vld [vmem:[%s1736_s6 + $0x10] sm:$0xff] }
 0x72d   :  { %1023 = vmatpush.msra.mxu2 %v1001_v32  ;;  %1046 = vmatpush.msra.mxu3 %v1001_v32 }
 0x72e   :  { %v906_v39 = vsel %vm38_vm0, %v901_v36, 0.0 }
 0x72f   :  { %907 = vadd.xlane.f32.xlu2 %v906_v39  ;;  %1024 = vmatpush.msra.mxu2 %v1000_v6 }
 0x730   :  { %1047 = vmatpush.msra.mxu3 %v1000_v6 }
 0x79b   :  { %v905_v40 = vpop.xlane.xlu0 %904 }
 0x79c   :  { %v909_v41 = vmul.f32 %v905_v40, %v1453_v10 }
 0x79e   :  { %v911_v26 = vsub.f32 %v878_v33, %v909_v41  ;;  %v999_v33 = vld [vmem:[%s1736_s6] sm:$0xff] }
 0x79f   :  { %1025 = vmatpush.msra.mxu2 %v999_v33  ;;  %1048 = vmatpush.msra.mxu3 %v999_v33 }
 0x7a0   :  { %v913_v42 = vmul.f32 %v911_v26, %v911_v26 }
 0x7a2   :  { %v908_v44 = vpop.xlane.xlu2 %907  ;;  %v915_v45 = vsel %vm38_vm0, %v913_v42, 0.0 }
 0x7a3   :  { %v910_v46 = vmul.f32 %v908_v44, %v1453_v10  ;;  %916 = vadd.xlane.f32.xlu1 %v915_v45 }
 0x7a5   :  { %v912_v51 = vsub.f32 %v901_v36, %v910_v46 }
 0x7a7   :  { %v914_v47 = vmul.f32 %v912_v51, %v912_v51 }
 0x7a9   :  { %v918_v38 = vsel %vm38_vm0, %v914_v47, 0.0 }
 0x7aa   :  { %919 = vadd.xlane.f32.xlu2 %v918_v38 }
 0x816   :  { %v917_v48 = vpop.xlane.xlu1 %916 }
 0x817   :  { %v921_v37 = vmul.f32 %v917_v48, %v1453_v10 }
 0x819   :  { %v923_v50 = vadd.f32 1e-05, %v921_v37 }
 0x81b   :  { %1353 = vrsqrt.f32 %v923_v50  ;;  %vm931_vm10 = vweird.f32 %v923_v50 }
 0x81d   :  { %v920_v52 = vpop.xlane.xlu2 %919 }
 0x81e   :  { %v922_v53 = vmul.f32 %v920_v52, %v1453_v10 }
 0x820   :  { %v924_v54 = vadd.f32 1e-05, %v922_v53 }
 0x821   :  { %v1354_v55 = vpop.eup %1353 }
 0x822   :  { %v926_v56 = vmul.f32 %v1354_v55, %v923_v50  ;;  %1355 = vrsqrt.f32 %v924_v54  ;;  %vm932_vm9 = vweird.f32 %v1354_v55  ;;  %vm941_vm14 = vweird.f32 %v924_v54 }
 0x823   :  { %vm933_vm12 = vmor %vm931_vm10, %vm932_vm9 }
 0x824   :  { %v927_v57 = vmul.f32 %v1354_v55, %v926_v56 }
 0x826   :  { %v928_v58 = vmul.f32 0.5, %v927_v57  ;;  %v1313_v57 = vld [vmem:[%s1735_s7] ss:$0 sm:$0xff] }
 0x828   :  { %v1356_v59 = vpop.eup %1355  ;;  %v929_v60 = vsub.f32 1.5, %v928_v58 }
 0x829   :  { %v936_v62 = vmul.f32 %v1356_v59, %v924_v54  ;;  %vm942_vm13 = vweird.f32 %v1356_v59 }
 0x82a   :  { %v930_v63 = vmul.f32 %v1354_v55, %v929_v60  ;;  %vm943_vm15 = vmor %vm941_vm14, %vm942_vm13 }
 0x82b   :  { %v937_v49 = vmul.f32 %v1356_v59, %v936_v62 }
 0x82c   :  { %v934_v1 = vsel %vm933_vm12, %v1354_v55, %v930_v63 }
 0x82d   :  { %v945_v2 = vmul.f32 %v934_v1, %v911_v26  ;;  %v938_v3 = vmul.f32 0.5, %v937_v49 }
 0x82f   :  { %v939_v5 = vsub.f32 1.5, %v938_v3  ;;  %v948_v43 = vmul.f32 %v947_v0, %v945_v2  ;;  %v1140_v3 = vld [vmem:[%s1738_s8 + $0x38] sm:$0xff] }
 0x830   :  { %1157 = vmatpush.msra.mxu0 %v1140_v3  ;;  %1180 = vmatpush.msra.mxu1 %v1140_v3 }
 0x831   :  { %v940_v7 = vmul.f32 %v1356_v59, %v939_v5  ;;  %v951_v8 = vadd.f32 %v950_v4, %v948_v43  ;;  %v1139_v5 = vld [vmem:[%s1738_s8 + $0x30] sm:$0xff] }
 0x832   :  { %1158 = vmatpush.msra.mxu0 %v1139_v5  ;;  %1181 = vmatpush.msra.mxu1 %v1139_v5 }
 0x833   :  { %v944_v9 = vsel %vm943_vm15, %v1356_v59, %v940_v7  ;;  %v1625_v12 = vadd.f32 %v1373_v11, %v951_v8  ;;  %v1138_v7 = vld [vmem:[%s1738_s8 + $0x28] sm:$0xff]  ;;  %v1137_v11 = vld [vmem:[%s1738_s8 + $0x20] sm:$0xff] }
 0x834   :  { %v946_v15 = vmul.f32 %v944_v9, %v912_v51  ;;  %1159 = vmatpush.msra.mxu0 %v1138_v7  ;;  %1182 = vmatpush.msra.mxu1 %v1138_v7 }
 0x835   :  { %v955_v13 = vsel %vm38_vm0, %v1625_v12, 0.0 }
 0x836   :  { %956 = vadd.xlane.f32.xlu0 %v955_v13  ;;  %v949_v14 = vmul.f32 %v947_v0, %v946_v15  ;;  %1160 = vmatpush.msra.mxu0 %v1137_v11  ;;  %v1136_v13 = vld [vmem:[%s1738_s8 + $0x18] sm:$0xff] }
 0x837   :  { %1183 = vmatpush.msra.mxu1 %v1137_v11 }
 0x838   :  { %v952_v16 = vadd.f32 %v950_v4, %v949_v14  ;;  %1161 = vmatpush.msra.mxu0 %v1136_v13 }
 0x839   :  { %1184 = vmatpush.msra.mxu1 %v1136_v13 }
 0x83a   :  { %v1632_v18 = vadd.f32 %v1374_v17, %v952_v16  ;;  %v1135_v17 = vld [vmem:[%s1738_s8 + $0x10] sm:$0xff] }
 0x83b   :  { %1162 = vmatpush.msra.mxu0 %v1135_v17  ;;  %1185 = vmatpush.msra.mxu1 %v1135_v17 }
 0x83c   :  { %v958_v23 = vsel %vm38_vm0, %v1632_v18, 0.0 }
 0x83d   :  { %959 = vadd.xlane.f32.xlu1 %v958_v23 }
 0x8a9   :  { %v957_v19 = vpop.xlane.xlu0 %956 }
 0x8aa   :  { %v961_v20 = vmul.f32 %v957_v19, %v1453_v10 }
 0x8ac   :  { %v963_v21 = vsub.f32 %v1625_v12, %v961_v20  ;;  %v1134_v20 = vld [vmem:[%s1738_s8 + $0x8] sm:$0xff] }
 0x8ad   :  { %1163 = vmatpush.msra.mxu0 %v1134_v20  ;;  %1186 = vmatpush.msra.mxu1 %v1134_v20 }
 0x8ae   :  { %v965_v22 = vmul.f32 %v963_v21, %v963_v21 }
 0x8b0   :  { %v960_v24 = vpop.xlane.xlu1 %959  ;;  %v967_v25 = vsel %vm38_vm0, %v965_v22, 0.0 }
 0x8b1   :  { %v962_v27 = vmul.f32 %v960_v24, %v1453_v10  ;;  %968 = vadd.xlane.f32.xlu2 %v967_v25 }
 0x8b3   :  { %v964_v28 = vsub.f32 %v1632_v18, %v962_v27  ;;  %v1133_v27 = vld [vmem:[%s1738_s8] sm:$0xff] }
 0x8b4   :  { %1164 = vmatpush.msra.mxu0 %v1133_v27  ;;  %1187 = vmatpush.msra.mxu1 %v1133_v27 }
 0x8b5   :  { %v966_v29 = vmul.f32 %v964_v28, %v964_v28 }
 0x8b7   :  { %v970_v30 = vsel %vm38_vm0, %v966_v29, 0.0 }
 0x8b8   :  { %971 = vadd.xlane.f32.xlu0 %v970_v30 }
 0x924   :  { %v969_v34 = vpop.xlane.xlu2 %968 }
 0x925   :  { %v973_v35 = vmul.f32 %v969_v34, %v1453_v10 }
 0x927   :  { %v975_v36 = vadd.f32 1e-05, %v973_v35 }
 0x929   :  { %1357 = vrsqrt.f32 %v975_v36  ;;  %vm983_vm3 = vweird.f32 %v975_v36 }
 0x92b   :  { %v972_v39 = vpop.xlane.xlu0 %971 }
 0x92c   :  { %v974_v40 = vmul.f32 %v972_v39, %v1453_v10 }
 0x92e   :  { %v976_v41 = vadd.f32 1e-05, %v974_v40 }
 0x92f   :  { %v1358_v26 = vpop.eup %1357 }
 0x930   :  { %v978_v42 = vmul.f32 %v1358_v26, %v975_v36  ;;  %1359 = vrsqrt.f32 %v976_v41  ;;  %vm984_vm1 = vweird.f32 %v1358_v26  ;;  %vm993_vm7 = vweird.f32 %v976_v41 }
 0x931   :  { %vm985_vm4 = vmor %vm983_vm3, %vm984_vm1  ;;  %vm1145_vm1 = vcmask 523264  }
 0x932   :  { %v979_v44 = vmul.f32 %v1358_v26, %v978_v42 }
 0x934   :  { %v980_v45 = vmul.f32 0.5, %v979_v44 }
 0x936   :  { %v1360_v46 = vpop.eup %1359  ;;  %v981_v51 = vsub.f32 1.5, %v980_v45 }
 0x937   :  { %v988_v47 = vmul.f32 %v1360_v46, %v976_v41  ;;  %vm994_vm6 = vweird.f32 %v1360_v46 }
 0x938   :  { %v982_v38 = vmul.f32 %v1358_v26, %v981_v51  ;;  %vm995_vm11 = vmor %vm993_vm7, %vm994_vm6 }
 0x939   :  { %v989_v48 = vmul.f32 %v1360_v46, %v988_v47 }
 0x93a   :  { %v986_v37 = vsel %vm985_vm4, %v1358_v26, %v982_v38 }
 0x93b   :  { %v997_v50 = vmul.f32 %v986_v37, %v963_v21  ;;  %v990_v52 = vmul.f32 0.5, %v989_v48 }
 0x93d   :  { %v991_v53 = vsub.f32 1.5, %v990_v52  ;;  %1290 = vmatmul.msk.f32.vlgmr.msra.gmra.mxu2 %vm98_vm5, %v997_v50 }
 0x93f   :  { %v992_v54 = vmul.f32 %v1360_v46, %v991_v53 }
 0x941   :  { %v996_v55 = vsel %vm995_vm11, %v1360_v46, %v992_v54 }
 0x942   :  { %v998_v56 = vmul.f32 %v996_v55, %v964_v28 }
 0x944   :  { %1291 = vmatmul.msk.f32.vlgmr.msra.gmra.mxu3 %vm98_vm5, %v998_v56 }
 0x9c0   :  { %v1027_v58 = vpop.f32.mrf.mxu2 }
 0x9c1   :  { %v1661_v59 = vadd.f32 %v1313_v57, %v1027_v58 }
 0x9c3   :  { %v1664_v60 = vmul.f32 0.70710677, %v1661_v59 }
 0x9c5   :  { %v1057_v62 = vand.u32 2147483647, %v1664_v60  ;;  %vm1123_vm15 = vcmp.ge.f32.partialorder %v1664_v60, 0.0  ;;  %v1314_v60 = vld [vmem:[%s1737_s9] ss:$0 sm:$0xff] }
 0x9c7   :  { %v1059_v63 = vmul.f32 0.3275911, %v1057_v62  ;;  %v1050_v49 = vpop.f32.mrf.mxu3  ;;  %v1111_v30 = vsub.f32 0.0, %v1057_v62 }
 0x9c8   :  { %v1667_v0 = vadd.f32 %v1313_v57, %v1050_v49 }
 0x9c9   :  { %v1061_v1 = vadd.f32 1.0, %v1059_v63  ;;  %v1113_v36 = vmul.f32 %v1111_v30, %v1057_v62 }
 0x9ca   :  { %v1670_v2 = vmul.f32 0.70710677, %v1667_v0  ;;  %v1054_v17 = vmul.f32 0.5, %v1667_v0 }
 0x9cb   :  { %1361 = vrcp.f32 %v1061_v1  ;;  %v1074_v16 = vand.u32 2147483648, %v1061_v1  ;;  %v1072_v19 = vand.u32 2147483647, %v1061_v1  ;;  %vm1068_vm2 = vweird.f32 %v1061_v1 }
 0x9cc   :  { %v1676_v4 = vand.u32 2147483647, %v1670_v2  ;;  %v1115_v46 = vmul.f32 1.442695, %v1113_v36  ;;  %vm1124_vm3 = vcmp.ge.f32.partialorder %v1670_v2, 0.0 }
 0x9cd   :  { %v1075_v24 = vor.u32 1.1754944e-38, %v1074_v16  ;;  %vm1073_vm9 = vcmp.eq.f32.partialorder %v1072_v19, 8.507059e+37 }
 0x9ce   :  { %v1060_v43 = vmul.f32 0.3275911, %v1676_v4  ;;  %v1112_v45 = vsub.f32 0.0, %v1676_v4 }
 0x9d0   :  { %v1062_v8 = vadd.f32 1.0, %v1060_v43  ;;  %v1114_v37 = vmul.f32 %v1112_v45, %v1676_v4 }
 0x9d1   :  { %v1362_v9 = vpop.eup %1361 }
 0x9d2   :  { %v1064_v15 = vmul.f32 %v1362_v9, %v1061_v1  ;;  %1363 = vrcp.f32 %v1062_v8  ;;  %vm1069_vm5 = vweird.f32 %v1362_v9  ;;  %v1089_v6 = vand.u32 2147483648, %v1062_v8 }
 0x9d3   :  { %vm1070_vm8 = vmor %vm1068_vm2, %vm1069_vm5  ;;  %v1087_v34 = vand.u32 2147483647, %v1062_v8  ;;  %vm1083_vm12 = vweird.f32 %v1062_v8  ;;  %1365 = vpow2.f32 %v1115_v46  ;;  %v1117_v55 = vmul.f32 1.442695, %v1114_v37 }
 0x9d4   :  { %v1065_v14 = vsub.f32 1.0, %v1064_v15  ;;  %v1090_v41 = vor.u32 1.1754944e-38, %v1089_v6 }
 0x9d5   :  { %vm1088_vm14 = vcmp.eq.f32.partialorder %v1087_v34, 8.507059e+37  ;;  %1367 = vpow2.f32 %v1117_v55 }
 0x9d6   :  { %v1066_v23 = vmul.f32 %v1362_v9, %v1065_v14 }
 0x9d8   :  { %v1364_v21 = vpop.eup %1363  ;;  %v1067_v22 = vadd.f32 %v1362_v9, %v1066_v23 }
 0x9d9   :  { %v1079_v25 = vmul.f32 %v1364_v21, %v1062_v8  ;;  %vm1084_vm10 = vweird.f32 %v1364_v21  ;;  %v1366_v58 = vpop.eup %1365  ;;  %v1053_v8 = vmul.f32 0.5, %v1661_v59 }
 0x9da   :  { %v1071_v28 = vsel %vm1070_vm8, %v1362_v9, %v1067_v22  ;;  %vm1085_vm13 = vmor %vm1083_vm12, %vm1084_vm10 }
 0x9db   :  { %v1076_v29 = vsel %vm1073_vm9, %v1075_v24, %v1071_v28  ;;  %v1080_v31 = vsub.f32 1.0, %v1079_v25  ;;  %v1368_v4 = vpop.eup %1367 }
 0x9dc   :  { %v1093_v32 = vmul.f32 1.0614054, %v1076_v29 }
 0x9dd   :  { %v1081_v33 = vmul.f32 %v1364_v21, %v1080_v31 }
 0x9de   :  { %v1095_v35 = vadd.f32 -1.4531521, %v1093_v32 }
 0x9df   :  { %v1082_v39 = vadd.f32 %v1364_v21, %v1081_v33 }
 0x9e0   :  { %v1097_v40 = vmul.f32 %v1095_v35, %v1076_v29 }
 0x9e1   :  { %v1086_v26 = vsel %vm1085_vm13, %v1364_v21, %v1082_v39 }
 0x9e2   :  { %v1099_v42 = vadd.f32 1.4214138, %v1097_v40  ;;  %v1091_v44 = vsel %vm1088_vm14, %v1090_v41, %v1086_v26 }
 0x9e3   :  { %v1094_v51 = vmul.f32 1.0614054, %v1091_v44 }
 0x9e4   :  { %v1101_v47 = vmul.f32 %v1099_v42, %v1076_v29 }
 0x9e5   :  { %v1096_v38 = vadd.f32 -1.4531521, %v1094_v51 }
 0x9e6   :  { %v1103_v48 = vadd.f32 -0.28449672, %v1101_v47 }
 0x9e7   :  { %v1098_v50 = vmul.f32 %v1096_v38, %v1091_v44 }
 0x9e8   :  { %v1105_v52 = vmul.f32 %v1103_v48, %v1076_v29  ;;  %v1238_v48 = vperm.slane %v1618_v61, 2 }
 0x9e9   :  { %v1100_v53 = vadd.f32 1.4214138, %v1098_v50 }
 0x9ea   :  { %v1107_v54 = vadd.f32 0.2548296, %v1105_v52  ;;  %v1241_v52 = vperm.slane %v1618_v61, 3 }
 0x9eb   :  { %v1102_v56 = vmul.f32 %v1100_v53, %v1091_v44 }
 0x9ec   :  { %v1109_v57 = vmul.f32 %v1107_v54, %v1076_v29 }
 0x9ed   :  { %v1104_v62 = vadd.f32 -0.28449672, %v1102_v56 }
 0x9ee   :  { %v1119_v63 = vmul.f32 %v1366_v58, %v1109_v57 }
 0x9ef   :  { %v1106_v49 = vmul.f32 %v1104_v62, %v1091_v44 }
 0x9f0   :  { %v1121_v1 = vsub.f32 1.0, %v1119_v63 }
 0x9f1   :  { %v1108_v3 = vadd.f32 0.2548296, %v1106_v49 }
 0x9f2   :  { %v1125_v5 = vsub.f32 0.0, %v1121_v1 }
 0x9f3   :  { %v1110_v43 = vmul.f32 %v1108_v3, %v1091_v44 }
 0x9f4   :  { %v1127_v7 = vsel %vm1123_vm15, %v1121_v1, %v1125_v5 }
 0x9f5   :  { %v1129_v9 = vadd.f32 1.0, %v1127_v7  ;;  %v1120_v11 = vmul.f32 %v1368_v4, %v1110_v43 }
 0x9f7   :  { %v1131_v15 = vmul.f32 %v1129_v9, %v1053_v8  ;;  %v1122_v13 = vsub.f32 1.0, %v1120_v11 }
 0x9f9   :  { %v1126_v14 = vsub.f32 0.0, %v1122_v13  ;;  %1292 = vmatmul.msk.f32.vlgmr.msra.gmra.mxu0 %vm1145_vm1, %v1131_v15 }
 0x9fb   :  { %v1128_v16 = vsel %vm1124_vm3, %v1122_v13, %v1126_v14 }
 0x9fc   :  { %v1130_v23 = vadd.f32 1.0, %v1128_v16 }
 0x9fe   :  { %v1132_v19 = vmul.f32 %v1130_v23, %v1054_v17 }
 0xa00   :  { %1293 = vmatmul.msk.f32.vlgmr.msra.gmra.mxu1 %vm1145_vm1, %v1132_v19 }
 0xa76   :  { %v1166_v59 = vpop.f32.mrf.mxu0 }
 0xa77   :  { %v1167_v20 = vadd.f32 %v1314_v60, %v1166_v59 }
 0xa79   :  { %v1192_v21 = vadd.f32 %v1167_v20, %v1625_v12 }
 0xa7b   :  { %v1194_v22 = vsel %vm38_vm0, %v1192_v21, 0.0 }
 0xa7c   :  { %1195 = vadd.xlane.f32.xlu1 %v1194_v22 }
 0xa7d   :  { %v1189_v24 = vpop.f32.mrf.mxu1 }
 0xa7e   :  { %v1190_v25 = vadd.f32 %v1314_v60, %v1189_v24 }
 0xa80   :  { %v1193_v2 = vadd.f32 %v1190_v25, %v1632_v18 }
 0xa82   :  { %v1197_v0 = vsel %vm38_vm0, %v1193_v2, 0.0 }
 0xa83   :  { %1198 = vadd.xlane.f32.xlu2 %v1197_v0 }
 0xaef   :  { %v1196_v27 = vpop.xlane.xlu1 %1195 }
 0xaf0   :  { %v1200_v28 = vmul.f32 %v1196_v27, %v1453_v10 }
 0xaf2   :  { %v1202_v29 = vsub.f32 %v1192_v21, %v1200_v28 }
 0xaf4   :  { %v1204_v30 = vmul.f32 %v1202_v29, %v1202_v29 }
 0xaf6   :  { %v1199_v31 = vpop.xlane.xlu2 %1198  ;;  %v1206_v32 = vsel %vm38_vm0, %v1204_v30, 0.0 }
 0xaf7   :  { %v1201_v12 = vmul.f32 %v1199_v31, %v1453_v10  ;;  %1207 = vadd.xlane.f32.xlu0 %v1206_v32 }
 0xaf9   :  { %v1203_v6 = vsub.f32 %v1193_v2, %v1201_v12 }
 0xafb   :  { %v1205_v33 = vmul.f32 %v1203_v6, %v1203_v6 }
 0xafd   :  { %v1209_v34 = vsel %vm38_vm0, %v1205_v33, 0.0 }
 0xafe   :  { %1210 = vadd.xlane.f32.xlu1 %v1209_v34 }
 0xb6a   :  { %v1208_v18 = vpop.xlane.xlu0 %1207 }
 0xb6b   :  { %v1212_v35 = vmul.f32 %v1208_v18, %v1453_v10 }
 0xb6d   :  { %v1214_v36 = vadd.f32 1e-05, %v1212_v35 }
 0xb6f   :  { %1369 = vrsqrt.f32 %v1214_v36  ;;  %vm1222_vm6 = vweird.f32 %v1214_v36 }
 0xb71   :  { %v1211_v39 = vpop.xlane.xlu1 %1210 }
 0xb72   :  { %v1213_v40 = vmul.f32 %v1211_v39, %v1453_v10 }
 0xb74   :  { %v1215_v41 = vadd.f32 1e-05, %v1213_v40 }
 0xb75   :  { %v1370_v26 = vpop.eup %1369 }
 0xb76   :  { %v1217_v42 = vmul.f32 %v1370_v26, %v1214_v36  ;;  %1371 = vrsqrt.f32 %v1215_v41  ;;  %vm1223_vm4 = vweird.f32 %v1370_v26  ;;  %vm1232_vm5 = vweird.f32 %v1215_v41 }
 0xb77   :  { %vm1224_vm7 = vmor %vm1222_vm6, %vm1223_vm4 }
 0xb78   :  { %v1218_v44 = vmul.f32 %v1370_v26, %v1217_v42 }
 0xb7a   :  { %v1219_v45 = vmul.f32 0.5, %v1218_v44 }
 0xb7c   :  { %v1372_v46 = vpop.eup %1371  ;;  %v1220_v51 = vsub.f32 1.5, %v1219_v45 }
 0xb7d   :  { %v1227_v47 = vmul.f32 %v1372_v46, %v1215_v41  ;;  %vm1233_vm11 = vweird.f32 %v1372_v46 }
 0xb7e   :  { %v1221_v38 = vmul.f32 %v1370_v26, %v1220_v51  ;;  %vm1234_vm2 = vmor %vm1232_vm5, %vm1233_vm11 }
 0xb7f   :  { %v1228_v37 = vmul.f32 %v1372_v46, %v1227_v47 }
 0xb80   :  { %v1225_v50 = vsel %vm1224_vm7, %v1370_v26, %v1221_v38 }
 0xb81   :  { %v1236_v10 = vmul.f32 %v1225_v50, %v1202_v29  ;;  %v1229_v53 = vmul.f32 0.5, %v1228_v37 }
 0xb83   :  { %v1239_v54 = vmul.f32 %v1238_v48, %v1236_v10  ;;  %v1230_v55 = vsub.f32 1.5, %v1229_v53 }
 0xb85   :  { %v1242_v56 = vadd.f32 %v1241_v52, %v1239_v54  ;;  %v1231_v57 = vmul.f32 %v1372_v46, %v1230_v55 }
 0xb87   :  { %v1294_v58 = vclamps-f32 %v1242_v56, 100.0  ;;  %v1235_v62 = vsel %vm1234_vm2, %v1372_v46, %v1231_v57 }
 0xb88   :  { %v1237_v63 = vmul.f32 %v1235_v62, %v1203_v6 }
 0xb89   :  { %1248 = vst.msk [vmem:[%s1739_s10] sm:$0x3] %vm38_vm0, %v1294_v58 }
 0xb8a   :  { %v1240_v49 = vmul.f32 %v1238_v48, %v1237_v63 }
 0xb8c   :  { %v1243_v1 = vadd.f32 %v1241_v52, %v1240_v49 }
 0xb8e   :  { %v1295_v61 = vclamps-f32 %v1243_v1, 100.0 }
 0xb90   :  { %1249 = vst.msk [vmem:[%s1739_s10 + $0x2] sm:$0x3] %vm38_vm0, %v1295_v61 }

// kernel: hierarchical_transformer_fwd.5
= control target key start
LH: loop header
LB: loop body
LE: loop exit
PB: predicated region body
PF: predicated region fallthrough
CT: control target
= control target key end

     0   :  { %vm63_vm0 = vcmask 261120   ;;  %v2766_v20 = vmov 32.0   ;;  %s2767_s29 = smov 96   ;;  %s2769_s30 = smov 64   ;;  %s3483_s0 = inlined_call_operand.vmem [shape: f32[4,8,32], index: 0, kind: input, shape index: {}]   ;;  %s3484_s1 = inlined_call_operand.vmem [shape: f32[4,8,32], index: 1, kind: input, shape index: {}]   ;;  %s3485_s2 = inlined_call_operand.vmem [shape: f32[2,32], index: 2, kind: input, shape index: {}]   ;;  %s3486_s4 = inlined_call_operand.vmem [shape: f32[32,96], index: 4, kind: input, shape index: {}]   ;;  %s3487_s5 = inlined_call_operand.vmem [shape: f32[1,96], index: 5, kind: input, shape index: {}]   ;;  %s3488_s7 = inlined_call_operand.vmem [shape: f32[1,32], index: 7, kind: input, shape index: {}]   ;;  %s3489_s6 = inlined_call_operand.vmem [shape: f32[32,32], index: 6, kind: input, shape index: {}]   ;;  %s3490_s3 = inlined_call_operand.vmem [shape: f32[4,32], index: 3, kind: input, shape index: {}]   ;;  %s3491_s9 = inlined_call_operand.vmem [shape: f32[1,64], index: 9, kind: input, shape index: {}]   ;;  %s3492_s8 = inlined_call_operand.vmem [shape: f32[32,64], index: 8, kind: input, shape index: {}]   ;;  %s3493_s11 = inlined_call_operand.vmem [shape: f32[1,32], index: 11, kind: input, shape index: {}]   ;;  %s3494_s10 = inlined_call_operand.vmem [shape: f32[64,32], index: 10, kind: input, shape index: {}]   ;;  %s3495_s12 = inlined_call_operand.vmem [shape: f32[4,8,32], index: 12, kind: output, shape index: {}]  }
   0x1   :  { %v43_v0 = vld [vmem:[%s3483_s0 + $0x10] sm:$0xff]  ;;  %v41_v2 = vld [vmem:[%s3483_s0] sm:$0xff]  ;;  %v44_v6 = vld [vmem:[%s3483_s0 + $0x18] sm:$0xff]  ;;  %2644 = vrcp.f32 %v2766_v20  ;;  %s2770_s13 = smov 120   ;;  %s2771_s14 = smov 56  }
   0x2   :  { %v55_v1 = vld [vmem:[%s3484_s1 + $0x10] sm:$0xff]  ;;  %v2513_v3 = vclamps-f32 %v43_v0, 100.0  ;;  %v2511_v4 = vclamps-f32 %v41_v2, 100.0  ;;  %v53_v5 = vld [vmem:[%s3484_s1] sm:$0xff]  ;;  %v42_v7 = vld [vmem:[%s3483_s0 + $0x8] sm:$0xff]  ;;  %v2514_v10 = vclamps-f32 %v44_v6, 100.0 }
   0x3   :  { %v2512_v11 = vclamps-f32 %v42_v7, 100.0  ;;  %v56_v12 = vld [vmem:[%s3484_s1 + $0x18] sm:$0xff]  ;;  %v54_v13 = vld [vmem:[%s3484_s1 + $0x8] sm:$0xff]  ;;  %v2638_v7 = vld [vmem:[%s3485_s2] ss:$0 sm:$0xff]  ;;  %s2772_s15 = smov 112  }
   0x4   :  { %v59_v8 = vadd.f32 %v2513_v3, %v55_v1  ;;  %v57_v9 = vadd.f32 %v2511_v4, %v53_v5  ;;  %v60_v16 = vadd.f32 %v2514_v10, %v56_v12  ;;  %v2639_v12 = vld [vmem:[%s3485_s2 + $0x1] ss:$0 sm:$0xff]  ;;  %s2773_s16 = smov 80   ;;  %s2774_s17 = smov 48  }
   0x5   :  { %v58_v17 = vadd.f32 %v2512_v11, %v54_v13  ;;  %s2775_s18 = smov 72   ;;  %s2776_s0 = smov 104  }
   0x6   :  { %v70_v14 = vsel %vm63_vm0, %v59_v8, 0.0  ;;  %v64_v15 = vsel %vm63_vm0, %v57_v9, 0.0  ;;  %v73_v18 = vsel %vm63_vm0, %v60_v16, 0.0  ;;  %s2777_s1 = smov 40   ;;  %s2778_s19 = smov 16  }
   0x7   :  { %71 = vadd.xlane.f32.xlu0 %v70_v14  ;;  %65 = vadd.xlane.f32.xlu2 %v64_v15  ;;  %v67_v19 = vsel %vm63_vm0, %v58_v17, 0.0  ;;  %v2645_v21 = vpop.eup %2644  ;;  %s2779_s20 = smov 8   ;;  %s2780_s2 = smov 24  }
   0x8   :  { %v77_v22 = vmul.f32 32.0, %v2645_v21  ;;  %vm81_vm1 = vweird.f32 %v2645_v21 }
   0xa   :  { %v78_v23 = vsub.f32 1.0, %v77_v22 }
   0xc   :  { %v79_v24 = vmul.f32 %v2645_v21, %v78_v23 }
   0xe   :  { %v80_v25 = vadd.f32 %v2645_v21, %v79_v24 }
   0xf   :  { %74 = vadd.xlane.f32.xlu0 %v73_v18  ;;  %68 = vadd.xlane.f32.xlu2 %v67_v19 }
  0x10   :  { %v2874_v26 = vsel %vm81_vm1, %v2645_v21, %v80_v25 }
  0x7a   :  { %v72_v27 = vpop.xlane.xlu0 %71  ;;  %v66_v28 = vpop.xlane.xlu2 %65 }
  0x7b   :  { %v85_v29 = vmul.f32 %v2874_v26, %v72_v27  ;;  %v83_v30 = vmul.f32 %v2874_v26, %v66_v28 }
  0x7d   :  { %v89_v31 = vsub.f32 %v59_v8, %v85_v29  ;;  %v2878_v32 = vsub.f32 %v57_v9, %v83_v30 }
  0x7f   :  { %v93_v33 = vmul.f32 %v89_v31, %v89_v31  ;;  %v91_v34 = vmul.f32 %v2878_v32, %v2878_v32 }
  0x81   :  { %v101_v35 = vsel %vm63_vm0, %v93_v33, 0.0  ;;  %v95_v36 = vsel %vm63_vm0, %v91_v34, 0.0 }
  0x82   :  { %102 = vadd.xlane.f32.xlu1 %v101_v35  ;;  %v75_v37 = vpop.xlane.xlu0 %74  ;;  %96 = vadd.xlane.f32.xlu0 %v95_v36  ;;  %v69_v38 = vpop.xlane.xlu2 %68 }
  0x83   :  { %v86_v39 = vmul.f32 %v2874_v26, %v75_v37  ;;  %v84_v40 = vmul.f32 %v2874_v26, %v69_v38 }
  0x85   :  { %v2886_v41 = vsub.f32 %v60_v16, %v86_v39  ;;  %v2890_v43 = vsub.f32 %v58_v17, %v84_v40 }
  0x87   :  { %v94_v42 = vmul.f32 %v2886_v41, %v2886_v41  ;;  %v92_v45 = vmul.f32 %v2890_v43, %v2890_v43 }
  0x89   :  { %v104_v44 = vsel %vm63_vm0, %v94_v42, 0.0  ;;  %v98_v46 = vsel %vm63_vm0, %v92_v45, 0.0 }
  0x8a   :  { %105 = vadd.xlane.f32.xlu1 %v104_v44 }
  0x92   :  { %99 = vadd.xlane.f32.xlu1 %v98_v46 }
  0xf5   :  { %v103_v47 = vpop.xlane.xlu1 %102  ;;  %v97_v48 = vpop.xlane.xlu0 %96 }
  0xf6   :  { %v109_v49 = vmul.f32 %v103_v47, %v2874_v26  ;;  %v107_v50 = vmul.f32 %v97_v48, %v2874_v26 }
  0xf8   :  { %v113_v51 = vadd.f32 1e-05, %v109_v49  ;;  %v111_v52 = vadd.f32 1e-05, %v107_v50 }
  0xfa   :  { %2646 = vrsqrt.f32 %v113_v51  ;;  %vm141_vm3 = vweird.f32 %v113_v51  ;;  %vm121_vm5 = vweird.f32 %v111_v52 }
  0xfb   :  { %2648 = vrsqrt.f32 %v111_v52 }
  0xfd   :  { %v106_v53 = vpop.xlane.xlu1 %105 }
  0xfe   :  { %v110_v54 = vmul.f32 %v106_v53, %v2874_v26 }
 0x100   :  { %v2647_v55 = vpop.eup %2646  ;;  %v114_v56 = vadd.f32 1e-05, %v110_v54 }
 0x101   :  { %v2649_v57 = vpop.eup %2648  ;;  %v136_v58 = vmul.f32 %v2647_v55, %v113_v51  ;;  %vm142_vm2 = vweird.f32 %v2647_v55 }
 0x102   :  { %v116_v59 = vmul.f32 %v2649_v57, %v111_v52  ;;  %2650 = vrsqrt.f32 %v114_v56  ;;  %vm143_vm4 = vmor %vm141_vm3, %vm142_vm2  ;;  %vm122_vm6 = vweird.f32 %v2649_v57  ;;  %vm151_vm9 = vweird.f32 %v114_v56 }
 0x103   :  { %v137_v60 = vmul.f32 %v2647_v55, %v136_v58  ;;  %vm2906_vm8 = vmor %vm121_vm5, %vm122_vm6  ;;  %v261_v58 = vld [vmem:[%s3486_s4 + $0x18] sm:$0xff] }
 0x104   :  { %v117_v61 = vmul.f32 %v2649_v57, %v116_v59  ;;  %327 = vmatpush.msra.mxu2 %v261_v58  ;;  %350 = vmatpush.msra.mxu3 %v261_v58  ;;  %v260_v59 = vld [vmem:[%s3486_s4 + $0x10] sm:$0xff] }
 0x105   :  { %v138_v62 = vmul.f32 0.5, %v137_v60  ;;  %v100_v63 = vpop.xlane.xlu1 %99  ;;  %281 = vmatpush.msra.mxu0 %v261_v58  ;;  %304 = vmatpush.msra.mxu1 %v261_v58  ;;  %v259_v60 = vld [vmem:[%s3486_s4 + $0x8] sm:$0xff] }
 0x106   :  { %v108_v0 = vmul.f32 %v100_v63, %v2874_v26  ;;  %v118_v2 = vmul.f32 0.5, %v117_v61  ;;  %328 = vmatpush.msra.mxu2 %v260_v59  ;;  %351 = vmatpush.msra.mxu3 %v260_v59  ;;  %v258_v61 = vld [vmem:[%s3486_s4] sm:$0xff] }
 0x107   :  { %v139_v1 = vsub.f32 1.5, %v138_v62  ;;  %282 = vmatpush.msra.mxu0 %v260_v59  ;;  %305 = vmatpush.msra.mxu1 %v260_v59 }
 0x108   :  { %v2651_v3 = vpop.eup %2650  ;;  %v112_v4 = vadd.f32 1e-05, %v108_v0  ;;  %v119_v9 = vsub.f32 1.5, %v118_v2  ;;  %329 = vmatpush.msra.mxu2 %v259_v60  ;;  %352 = vmatpush.msra.mxu3 %v259_v60 }
 0x109   :  { %v140_v5 = vmul.f32 %v2647_v55, %v139_v1  ;;  %v146_v6 = vmul.f32 %v2651_v3, %v114_v56  ;;  %vm152_vm7 = vweird.f32 %v2651_v3  ;;  %283 = vmatpush.msra.mxu0 %v259_v60  ;;  %306 = vmatpush.msra.mxu1 %v259_v60 }
 0x10a   :  { %2652 = vrsqrt.f32 %v112_v4  ;;  %v120_v15 = vmul.f32 %v2649_v57, %v119_v9  ;;  %vm153_vm10 = vmor %vm151_vm9, %vm152_vm7  ;;  %vm131_vm11 = vweird.f32 %v112_v4  ;;  %330 = vmatpush.msra.mxu2 %v258_v61  ;;  %353 = vmatpush.msra.mxu3 %v258_v61 }
 0x10b   :  { %v144_v8 = vsel %vm143_vm4, %v2647_v55, %v140_v5  ;;  %v147_v10 = vmul.f32 %v2651_v3, %v146_v6  ;;  %284 = vmatpush.msra.mxu0 %v258_v61  ;;  %307 = vmatpush.msra.mxu1 %v258_v61 }
 0x10c   :  { %v157_v11 = vmul.f32 %v144_v8, %v89_v31  ;;  %v124_v23 = vsel %vm2906_vm8, %v2649_v57, %v120_v15 }
 0x10d   :  { %v148_v13 = vmul.f32 0.5, %v147_v10  ;;  %v155_v30 = vmul.f32 %v124_v23, %v2878_v32 }
 0x10e   :  { %v162_v14 = vmul.f32 %v2638_v7, %v157_v11 }
 0x10f   :  { %v149_v16 = vsub.f32 1.5, %v148_v13  ;;  %v160_v36 = vmul.f32 %v2638_v7, %v155_v30 }
 0x110   :  { %v2653_v17 = vpop.eup %2652  ;;  %v2910_v19 = vadd.f32 %v2639_v12, %v162_v14 }
 0x111   :  { %v150_v20 = vmul.f32 %v2651_v3, %v149_v16  ;;  %v126_v21 = vmul.f32 %v2653_v17, %v112_v4  ;;  %vm132_vm12 = vweird.f32 %v2653_v17  ;;  %v2923_v39 = vadd.f32 %v2639_v12, %v160_v36 }
 0x112   :  { %v176_v22 = vsel %vm63_vm0, %v2910_v19, 0.0  ;;  %vm133_vm13 = vmor %vm131_vm11, %vm132_vm12  ;;  %vm366_vm11 = vcmask 64512  }
 0x113   :  { %v154_v24 = vsel %vm153_vm10, %v2651_v3, %v150_v20  ;;  %v127_v25 = vmul.f32 %v2653_v17, %v126_v21  ;;  %177 = vadd.xlane.f32.xlu2 %v176_v22  ;;  %v170_v32 = vsel %vm63_vm0, %v2923_v39, 0.0 }
 0x114   :  { %v158_v27 = vmul.f32 %v154_v24, %v2886_v41 }
 0x115   :  { %v128_v28 = vmul.f32 0.5, %v127_v25 }
 0x116   :  { %v163_v29 = vmul.f32 %v2638_v7, %v158_v27 }
 0x117   :  { %v129_v31 = vsub.f32 1.5, %v128_v28 }
 0x118   :  { %v2918_v33 = vadd.f32 %v2639_v12, %v163_v29 }
 0x119   :  { %v130_v34 = vmul.f32 %v2653_v17, %v129_v31 }
 0x11a   :  { %v179_v35 = vsel %vm63_vm0, %v2918_v33, 0.0 }
 0x11b   :  { %v134_v37 = vsel %vm133_vm13, %v2653_v17, %v130_v34  ;;  %180 = vadd.xlane.f32.xlu0 %v179_v35 }
 0x11c   :  { %v156_v38 = vmul.f32 %v134_v37, %v2890_v43 }
 0x11e   :  { %v161_v40 = vmul.f32 %v2638_v7, %v156_v38 }
 0x120   :  { %v2925_v41 = vadd.f32 %v2639_v12, %v161_v40 }
 0x122   :  { %v173_v52 = vsel %vm63_vm0, %v2925_v41, 0.0 }
 0x123   :  { %171 = vadd.xlane.f32.xlu0 %v170_v32 }
 0x186   :  { %v178_v42 = vpop.xlane.xlu2 %177 }
 0x187   :  { %v184_v44 = vmul.f32 %v178_v42, %v2874_v26 }
 0x189   :  { %v2931_v45 = vsub.f32 %v2910_v19, %v184_v44 }
 0x18b   :  { %v192_v46 = vmul.f32 %v2931_v45, %v2931_v45 }
 0x18d   :  { %v200_v43 = vsel %vm63_vm0, %v192_v46, 0.0 }
 0x18e   :  { %v181_v47 = vpop.xlane.xlu0 %180  ;;  %201 = vadd.xlane.f32.xlu1 %v200_v43 }
 0x18f   :  { %v185_v48 = vmul.f32 %v181_v47, %v2874_v26 }
 0x191   :  { %v2938_v49 = vsub.f32 %v2918_v33, %v185_v48 }
 0x193   :  { %v193_v50 = vmul.f32 %v2938_v49, %v2938_v49 }
 0x195   :  { %v203_v51 = vsel %vm63_vm0, %v193_v50, 0.0 }
 0x196   :  { %204 = vadd.xlane.f32.xlu2 %v203_v51  ;;  %v172_v53 = vpop.xlane.xlu0 %171  ;;  %174 = vadd.xlane.f32.xlu1 %v173_v52  ;;  %v2640_v51 = vld [vmem:[%s3487_s5] ss:$0 sm:$0xff]  ;;  %s2768_s5 = smov 88  }
 0x197   :  { %v182_v54 = vmul.f32 %v172_v53, %v2874_v26 }
 0x199   :  { %v2947_v55 = vsub.f32 %v2923_v39, %v182_v54 }
 0x19b   :  { %v190_v56 = vmul.f32 %v2947_v55, %v2947_v55 }
 0x19d   :  { %v194_v57 = vsel %vm63_vm0, %v190_v56, 0.0 }
 0x19e   :  { %195 = vadd.xlane.f32.xlu2 %v194_v57 }
 0x201   :  { %v202_v62 = vpop.xlane.xlu1 %201 }
 0x202   :  { %v208_v63 = vmul.f32 %v202_v62, %v2874_v26 }
 0x204   :  { %v212_v0 = vadd.f32 1e-05, %v208_v63 }
 0x206   :  { %2654 = vrsqrt.f32 %v212_v0  ;;  %vm240_vm15 = vweird.f32 %v212_v0 }
 0x209   :  { %v175_v1 = vpop.xlane.xlu1 %174  ;;  %v205_v2 = vpop.xlane.xlu2 %204 }
 0x20a   :  { %v183_v3 = vmul.f32 %v175_v1, %v2874_v26  ;;  %v209_v4 = vmul.f32 %v205_v2, %v2874_v26 }
 0x20c   :  { %v2655_v5 = vpop.eup %2654  ;;  %v187_v6 = vsub.f32 %v2925_v41, %v183_v3  ;;  %v213_v7 = vadd.f32 1e-05, %v209_v4 }
 0x20d   :  { %v235_v8 = vmul.f32 %v2655_v5, %v212_v0  ;;  %vm241_vm14 = vweird.f32 %v2655_v5 }
 0x20e   :  { %2656 = vrsqrt.f32 %v213_v7  ;;  %v191_v9 = vmul.f32 %v187_v6, %v187_v6  ;;  %vm242_vm1 = vmor %vm240_vm15, %vm241_vm14  ;;  %vm250_vm3 = vweird.f32 %v213_v7 }
 0x20f   :  { %v236_v10 = vmul.f32 %v2655_v5, %v235_v8 }
 0x210   :  { %v197_v11 = vsel %vm63_vm0, %v191_v9, 0.0 }
 0x211   :  { %v237_v12 = vmul.f32 0.5, %v236_v10  ;;  %198 = vadd.xlane.f32.xlu0 %v197_v11  ;;  %v196_v13 = vpop.xlane.xlu2 %195 }
 0x212   :  { %v206_v14 = vmul.f32 %v196_v13, %v2874_v26 }
 0x213   :  { %v238_v15 = vsub.f32 1.5, %v237_v12 }
 0x214   :  { %v2657_v16 = vpop.eup %2656  ;;  %v210_v17 = vadd.f32 1e-05, %v206_v14 }
 0x215   :  { %v245_v18 = vmul.f32 %v2657_v16, %v213_v7  ;;  %v239_v20 = vmul.f32 %v2655_v5, %v238_v15  ;;  %vm251_vm2 = vweird.f32 %v2657_v16 }
 0x216   :  { %2658 = vrsqrt.f32 %v210_v17  ;;  %vm252_vm4 = vmor %vm250_vm3, %vm251_vm2  ;;  %vm220_vm6 = vweird.f32 %v210_v17 }
 0x217   :  { %v246_v21 = vmul.f32 %v2657_v16, %v245_v18  ;;  %v243_v22 = vsel %vm242_vm1, %v2655_v5, %v239_v20 }
 0x218   :  { %v256_v23 = vmul.f32 %v243_v22, %v2931_v45 }
 0x219   :  { %v247_v24 = vmul.f32 0.5, %v246_v21 }
 0x21a   :  { %2517 = vmatmul.msk.f32.vlgmr.msra.gmra.mxu2 %vm63_vm0, %v256_v23 }
 0x21b   :  { %v248_v25 = vsub.f32 1.5, %v247_v24 }
 0x21c   :  { %v2659_v27 = vpop.eup %2658 }
 0x21d   :  { %v215_v28 = vmul.f32 %v2659_v27, %v210_v17  ;;  %v249_v29 = vmul.f32 %v2657_v16, %v248_v25  ;;  %vm221_vm5 = vweird.f32 %v2659_v27 }
 0x21e   :  { %vm222_vm7 = vmor %vm220_vm6, %vm221_vm5 }
 0x21f   :  { %v216_v30 = vmul.f32 %v2659_v27, %v215_v28  ;;  %v253_v31 = vsel %vm252_vm4, %v2657_v16, %v249_v29 }
 0x220   :  { %v257_v34 = vmul.f32 %v253_v31, %v2938_v49 }
 0x221   :  { %v217_v35 = vmul.f32 0.5, %v216_v30 }
 0x222   :  { %2518 = vmatmul.msk.f32.vlgmr.msra.gmra.mxu3 %vm63_vm0, %v257_v34 }
 0x223   :  { %v218_v36 = vsub.f32 1.5, %v217_v35 }
 0x225   :  { %v219_v37 = vmul.f32 %v2659_v27, %v218_v36 }
 0x227   :  { %v223_v38 = vsel %vm222_vm7, %v2659_v27, %v219_v37 }
 0x228   :  { %v254_v40 = vmul.f32 %v223_v38, %v2947_v55 }
 0x22a   :  { %2515 = vmatmul.msk.f32.vlgmr.msra.gmra.mxu0 %vm63_vm0, %v254_v40 }
 0x284   :  { %v199_v32 = vpop.xlane.xlu0 %198 }
 0x285   :  { %v207_v42 = vmul.f32 %v199_v32, %v2874_v26 }
 0x287   :  { %v211_v44 = vadd.f32 1e-05, %v207_v42 }
 0x289   :  { %2660 = vrsqrt.f32 %v211_v44  ;;  %vm230_vm9 = vweird.f32 %v211_v44 }
 0x28f   :  { %v2661_v45 = vpop.eup %2660 }
 0x290   :  { %v225_v46 = vmul.f32 %v2661_v45, %v211_v44  ;;  %vm231_vm8 = vweird.f32 %v2661_v45 }
 0x291   :  { %vm232_vm10 = vmor %vm230_vm9, %vm231_vm8 }
 0x292   :  { %v226_v43 = vmul.f32 %v2661_v45, %v225_v46 }
 0x294   :  { %v227_v47 = vmul.f32 0.5, %v226_v43 }
 0x296   :  { %v228_v48 = vsub.f32 1.5, %v227_v47 }
 0x298   :  { %v229_v49 = vmul.f32 %v2661_v45, %v228_v48 }
 0x29a   :  { %v233_v50 = vsel %vm232_vm10, %v2661_v45, %v229_v49 }
 0x29b   :  { %v255_v52 = vmul.f32 %v233_v50, %v187_v6 }
 0x29d   :  { %2516 = vmatmul.msk.f32.vlgmr.msra.gmra.mxu1 %vm63_vm0, %v255_v52  ;;  %v332_v53 = vpop.f32.mrf.mxu2 }
 0x29e   :  { %v2981_v54 = vadd.f32 %v2640_v51, %v332_v53 }
 0x2a0   :  { %419 = vrot.lane.b32.xlu1 %v2981_v54, %s2767_s29 }
 0x2a5   :  { %v355_v55 = vpop.f32.mrf.mxu3 }
 0x2a6   :  { %v2984_v56 = vadd.f32 %v2640_v51, %v355_v55 }
 0x2a7   :  { %v286_v57 = vpop.f32.mrf.mxu0 }
 0x2a8   :  { %v2986_v58 = vadd.f32 %v2640_v51, %v286_v57  ;;  %446 = vrot.lane.b32.xlu2 %v2984_v56, %s2767_s29  ;;  %v3017_v22 = vpack.i.bf16 %v2984_v56, %v2981_v54 }
 0x2aa   :  { %364 = vrot.lane.b32.xlu0 %v2986_v58, %s2767_s29 }
 0x302   :  { %v447_v59 = vpop.permute.xlu2 %446 }
 0x303   :  { %2525 = vmatpush.xpose.msk.msrb.mxu3 %vm366_vm11, %v447_v59 }
 0x306   :  { %2526 = vmatmul.msk.f32.vlgmr.msrb.gmra.mxu3 %vm366_vm11, %v2984_v56 }
 0x312   :  { %v420_v60 = vpop.permute.xlu1 %419 }
 0x313   :  { %2523 = vmatpush.xpose.msk.msrb.mxu2 %vm366_vm11, %v420_v60 }
 0x316   :  { %2524 = vmatmul.msk.f32.vlgmr.msrb.gmra.mxu2 %vm366_vm11, %v2981_v54 }
 0x31a   :  { %v309_v61 = vpop.f32.mrf.mxu1 }
 0x31b   :  { %v2996_v62 = vadd.f32 %v2640_v51, %v309_v61 }
 0x31c   :  { %v365_v63 = vpop.permute.xlu0 %364 }
 0x31d   :  { %392 = vrot.lane.b32.xlu2 %v2996_v62, %s2767_s29  ;;  %2519 = vmatpush.xpose.msk.msrb.mxu0 %vm366_vm11, %v365_v63  ;;  %v3027_v25 = vpack.i.bf16 %v2996_v62, %v2986_v58 }
 0x320   :  { %2520 = vmatmul.msk.f32.vlgmr.msrb.gmra.mxu0 %vm366_vm11, %v2986_v58 }
 0x377   :  { %v393_v0 = vpop.permute.xlu2 %392 }
 0x378   :  { %2521 = vmatpush.xpose.msk.msrb.mxu1 %vm366_vm11, %v393_v0 }
 0x37b   :  { %2522 = vmatmul.msk.f32.vlgmr.msrb.gmra.mxu1 %vm366_vm11, %v2996_v62 }
 0x389   :  { %v469_v1 = vpop.f32.mrf.mxu3 }
 0x38a   :  { %v475_v2 = vmul.f32 0.35355338, %v469_v1 }
 0x38c   :  { %v485_v3 = vsel %vm366_vm11, %v475_v2, -inf }
 0x38d   :  { %486 = vmax.xlane.f32.xlu0 %v485_v3 }
 0x399   :  { %v442_v4 = vpop.f32.mrf.mxu2 }
 0x39a   :  { %v474_v5 = vmul.f32 0.35355338, %v442_v4 }
 0x39c   :  { %v482_v6 = vsel %vm366_vm11, %v474_v5, -inf }
 0x39d   :  { %483 = vmax.xlane.f32.xlu1 %v482_v6  ;;  %v388_v7 = vpop.f32.mrf.mxu0 }
 0x39e   :  { %v472_v8 = vmul.f32 0.35355338, %v388_v7 }
 0x3a0   :  { %v476_v9 = vsel %vm366_vm11, %v472_v8, -inf }
 0x3a1   :  { %477 = vmax.xlane.f32.xlu2 %v476_v9  ;;  %750 = vrot.lane.b32.xlu0 %v2981_v54, %s2768_s5 }
 0x3f8   :  { %v415_v10 = vpop.f32.mrf.mxu1 }
 0x3f9   :  { %v473_v11 = vmul.f32 0.35355338, %v415_v10 }
 0x3fb   :  { %v479_v12 = vsel %vm366_vm11, %v473_v11, -inf }
 0x3fc   :  { %480 = vmax.xlane.f32.xlu1 %v479_v12 }
 0x400   :  { %v487_v13 = vpop.xlane.xlu0 %486 }
 0x401   :  { %v491_v14 = vsub.f32 %v475_v2, %v487_v13 }
 0x403   :  { %v498_v15 = vmul.f32 1.442695, %v491_v14 }
 0x405   :  { %2662 = vpow2.f32 %v498_v15 }
 0x40b   :  { %v3011_v16 = vpop.eup %2662 }
 0x40c   :  { %v509_v17 = vsel %vm366_vm11, %v3011_v16, 0.0 }
 0x40d   :  { %510 = vadd.xlane.f32.xlu2 %v509_v17 }
 0x410   :  { %v484_v18 = vpop.xlane.xlu1 %483 }
 0x411   :  { %v490_v20 = vsub.f32 %v474_v5, %v484_v18 }
 0x413   :  { %v496_v21 = vmul.f32 1.442695, %v490_v20  ;;  %v751_v44 = vpop.permute.xlu0 %750 }
 0x414   :  { %v478_v27 = vpop.xlane.xlu2 %477 }
 0x415   :  { %2664 = vpow2.f32 %v496_v21  ;;  %2599 = vrot.lane.b32.xlu1 %v3017_v22, %s2769_s30  ;;  %v488_v28 = vsub.f32 %v472_v8, %v478_v27 }
 0x417   :  { %v492_v29 = vmul.f32 1.442695, %v488_v28 }
 0x419   :  { %2666 = vpow2.f32 %v492_v29 }
 0x41b   :  { %v3020_v23 = vpop.eup %2664 }
 0x41c   :  { %v506_v24 = vsel %vm366_vm11, %v3020_v23, 0.0 }
 0x41d   :  { %507 = vadd.xlane.f32.xlu0 %v506_v24  ;;  %776 = vrot.lane.b32.xlu1 %v2984_v56, %s2770_s13 }
 0x41f   :  { %v3039_v30 = vpop.eup %2666 }
 0x420   :  { %v500_v31 = vsel %vm366_vm11, %v3039_v30, 0.0 }
 0x425   :  { %778 = vrot.lane.b32.xlu2 %v2984_v56, %s2768_s5  ;;  %2604 = vrot.lane.b32.xlu1 %v3027_v25, %s2769_s30 }
 0x42d   :  { %694 = vrot.lane.b32.xlu1 %v2986_v58, %s2768_s5 }
 0x431   :  { %748 = vrot.lane.b32.xlu0 %v2981_v54, %s2770_s13 }
 0x435   :  { %722 = vrot.lane.b32.xlu1 %v2996_v62, %s2768_s5 }
 0x43d   :  { %692 = vrot.lane.b32.xlu1 %v2986_v58, %s2770_s13 }
 0x445   :  { %720 = vrot.lane.b32.xlu1 %v2996_v62, %s2770_s13 }
 0x44e   :  { %501 = vadd.xlane.f32.xlu2 %v500_v31 }
 0x46f   :  { %v481_v34 = vpop.xlane.xlu1 %480 }
 0x470   :  { %v489_v35 = vsub.f32 %v473_v11, %v481_v34 }
 0x472   :  { %v494_v36 = vmul.f32 1.442695, %v489_v35 }
 0x474   :  { %2668 = vpow2.f32 %v494_v36 }
 0x47a   :  { %v3043_v37 = vpop.eup %2668 }
 0x47b   :  { %v503_v38 = vsel %vm366_vm11, %v3043_v37, 0.0 }
 0x47c   :  { %504 = vadd.xlane.f32.xlu0 %v503_v38 }
 0x480   :  { %v511_v40 = vpop.xlane.xlu2 %510 }
 0x481   :  { %v515_v32 = vadd.f32 1e-09, %v511_v40 }
 0x483   :  { %2670 = vrcp.f32 %v515_v32  ;;  %v572_v51 = vand.u32 2147483648, %v515_v32  ;;  %v570_v52 = vand.u32 2147483647, %v515_v32  ;;  %vm566_vm13 = vweird.f32 %v515_v32 }
 0x485   :  { %v573_v60 = vor.u32 1.1754944e-38, %v572_v51  ;;  %vm571_vm15 = vcmp.eq.f32.partialorder %v570_v52, 8.507059e+37 }
 0x487   :  { %v2600_v42 = vpop.permute.xlu1 %2599 }
 0x488   :  { %v2602_v45 = vunpack.i.h.bf16 %v2600_v42  ;;  %v2601_v46 = vunpack.i.l.bf16 %v2600_v42  ;;  %v779_v48 = vpop.permute.xlu2 %778 }
 0x489   :  { %v2671_v43 = vpop.eup %2670 }
 0x48a   :  { %v562_v47 = vmul.f32 %v2671_v43, %v515_v32  ;;  %657 = vmatpush.msra.mxu2 %v2601_v46  ;;  %683 = vmatpush.msra.mxu3 %v2602_v45  ;;  %vm567_vm12 = vweird.f32 %v2671_v43 }
 0x48b   :  { %vm568_vm14 = vmor %vm566_vm13, %vm567_vm12 }
 0x48c   :  { %2535 = vmatpush.xpose.msk.msrb.mxu2 %vm366_vm11, %v751_v44  ;;  %2537 = vmatpush.xpose.msk.msrb.mxu3 %vm366_vm11, %v779_v48  ;;  %v563_v49 = vsub.f32 1.0, %v562_v47 }
 0x48e   :  { %v564_v50 = vmul.f32 %v2671_v43, %v563_v49 }
 0x48f   :  { %v777_v53 = vpop.permute.xlu1 %776 }
 0x490   :  { %v565_v55 = vadd.f32 %v2671_v43, %v564_v50  ;;  %v508_v57 = vpop.xlane.xlu0 %507 }
 0x491   :  { %v514_v59 = vadd.f32 1e-09, %v508_v57 }
 0x492   :  { %v569_v61 = vsel %vm568_vm14, %v2671_v43, %v565_v55 }
 0x493   :  { %2672 = vrcp.f32 %v514_v59  ;;  %v574_v63 = vsel %vm571_vm15, %v573_v60, %v569_v61  ;;  %v557_v9 = vand.u32 2147483648, %v514_v59  ;;  %v555_v11 = vand.u32 2147483647, %v514_v59 }
 0x494   :  { %v575_v0 = vmul.f32 %v3011_v16, %v574_v63  ;;  %vm551_vm2 = vweird.f32 %v514_v59 }
 0x495   :  { %v558_v14 = vor.u32 1.1754944e-38, %v557_v9  ;;  %vm556_vm4 = vcmp.eq.f32.partialorder %v555_v11, 8.507059e+37 }
 0x496   :  { %v579_v2 = vmax.f32 %v575_v0, 1e-09 }
 0x497   :  { %v2605_v1 = vpop.permute.xlu1 %2604 }
 0x498   :  { %v2607_v3 = vunpack.i.h.bf16 %v2605_v1  ;;  %v2606_v4 = vunpack.i.l.bf16 %v2605_v1  ;;  %v583_v6 = vmin.f32 %v579_v2, 1.0 }
 0x499   :  { %v2673_v5 = vpop.eup %2672 }
 0x49a   :  { %v547_v7 = vmul.f32 %v2673_v5, %v514_v59  ;;  %605 = vmatpush.msra.mxu0 %v2606_v4  ;;  %631 = vmatpush.msra.mxu1 %v2607_v3  ;;  %vm552_vm1 = vweird.f32 %v2673_v5 }
 0x49b   :  { %2530 = vmatmul.msk.f32.vlgmr.msra.gmra.mxu3 %vm366_vm11, %v583_v6  ;;  %vm553_vm3 = vmor %vm551_vm2, %vm552_vm1 }
 0x49c   :  { %v548_v8 = vsub.f32 1.0, %v547_v7 }
 0x49e   :  { %v549_v10 = vmul.f32 %v2673_v5, %v548_v8 }
 0x49f   :  { %v695_v12 = vpop.permute.xlu1 %694 }
 0x4a0   :  { %v550_v13 = vadd.f32 %v2673_v5, %v549_v10  ;;  %2531 = vmatpush.xpose.msk.msrb.mxu0 %vm366_vm11, %v695_v12 }
 0x4a2   :  { %v554_v15 = vsel %vm553_vm3, %v2673_v5, %v550_v13 }
 0x4a3   :  { %2538 = vmatmul.msk.f32.vlgmr.msrb.gmra.mxu3 %vm366_vm11, %v777_v53  ;;  %v559_v16 = vsel %vm556_vm4, %v558_v14, %v554_v15  ;;  %v749_v24 = vpop.permute.xlu0 %748 }
 0x4a4   :  { %v560_v17 = vmul.f32 %v3020_v23, %v559_v16 }
 0x4a6   :  { %v578_v18 = vmax.f32 %v560_v17, 1e-09 }
 0x4a7   :  { %v723_v20 = vpop.permute.xlu1 %722 }
 0x4a8   :  { %2533 = vmatpush.xpose.msk.msrb.mxu1 %vm366_vm11, %v723_v20  ;;  %v582_v21 = vmin.f32 %v578_v18, 1.0 }
 0x4aa   :  { %2529 = vmatmul.msk.f32.vlgmr.msra.gmra.mxu2 %vm366_vm11, %v582_v21 }
 0x4af   :  { %v693_v43 = vpop.permute.xlu1 %692 }
 0x4b2   :  { %2536 = vmatmul.msk.f32.vlgmr.msrb.gmra.mxu2 %vm366_vm11, %v749_v24 }
 0x4b7   :  { %v721_v1 = vpop.permute.xlu1 %720 }
 0x4c1   :  { %v502_v27 = vpop.xlane.xlu2 %501 }
 0x4c2   :  { %v512_v28 = vadd.f32 1e-09, %v502_v27 }
 0x4c4   :  { %2674 = vrcp.f32 %v512_v28  ;;  %v527_v35 = vand.u32 2147483648, %v512_v28  ;;  %v525_v23 = vand.u32 2147483647, %v512_v28  ;;  %vm521_vm6 = vweird.f32 %v512_v28 }
 0x4c6   :  { %v528_v40 = vor.u32 1.1754944e-38, %v527_v35  ;;  %vm526_vm8 = vcmp.eq.f32.partialorder %v525_v23, 8.507059e+37 }
 0x4ca   :  { %v2675_v29 = vpop.eup %2674 }
 0x4cb   :  { %v517_v31 = vmul.f32 %v2675_v29, %v512_v28  ;;  %vm522_vm5 = vweird.f32 %v2675_v29 }
 0x4cc   :  { %vm523_vm7 = vmor %vm521_vm6, %vm522_vm5 }
 0x4cd   :  { %v518_v34 = vsub.f32 1.0, %v517_v31 }
 0x4cf   :  { %v519_v36 = vmul.f32 %v2675_v29, %v518_v34 }
 0x4d1   :  { %v520_v38 = vadd.f32 %v2675_v29, %v519_v36 }
 0x4d3   :  { %v524_v32 = vsel %vm523_vm7, %v2675_v29, %v520_v38 }
 0x4d4   :  { %v529_v42 = vsel %vm526_vm8, %v528_v40, %v524_v32 }
 0x4d5   :  { %v530_v44 = vmul.f32 %v3039_v30, %v529_v42 }
 0x4d7   :  { %v576_v45 = vmax.f32 %v530_v44, 1e-09 }
 0x4d9   :  { %v580_v46 = vmin.f32 %v576_v45, 1.0 }
 0x4db   :  { %2527 = vmatmul.msk.f32.vlgmr.msra.gmra.mxu0 %vm366_vm11, %v580_v46 }
 0x4e3   :  { %2532 = vmatmul.msk.f32.vlgmr.msrb.gmra.mxu0 %vm366_vm11, %v693_v43 }
 0x4ef   :  { %v505_v47 = vpop.xlane.xlu0 %504 }
 0x4f0   :  { %v513_v48 = vadd.f32 1e-09, %v505_v47 }
 0x4f2   :  { %2676 = vrcp.f32 %v513_v48  ;;  %v542_v52 = vand.u32 2147483648, %v513_v48  ;;  %v540_v55 = vand.u32 2147483647, %v513_v48  ;;  %vm536_vm10 = vweird.f32 %v513_v48 }
 0x4f4   :  { %v543_v30 = vor.u32 1.1754944e-38, %v542_v52  ;;  %vm541_vm13 = vcmp.eq.f32.partialorder %v540_v55, 8.507059e+37 }
 0x4f8   :  { %v2677_v49 = vpop.eup %2676 }
 0x4f9   :  { %v532_v50 = vmul.f32 %v2677_v49, %v513_v48  ;;  %vm537_vm9 = vweird.f32 %v2677_v49 }
 0x4fa   :  { %vm538_vm12 = vmor %vm536_vm10, %vm537_vm9 }
 0x4fb   :  { %v533_v51 = vsub.f32 1.0, %v532_v50 }
 0x4fd   :  { %v534_v53 = vmul.f32 %v2677_v49, %v533_v51 }
 0x4ff   :  { %v535_v57 = vadd.f32 %v2677_v49, %v534_v53 }
 0x501   :  { %v539_v59 = vsel %vm538_vm12, %v2677_v49, %v535_v57 }
 0x502   :  { %v544_v60 = vsel %vm541_vm13, %v543_v30, %v539_v59 }
 0x503   :  { %v545_v61 = vmul.f32 %v3043_v37, %v544_v60 }
 0x505   :  { %v577_v63 = vmax.f32 %v545_v61, 1e-09 }
 0x507   :  { %v581_v0 = vmin.f32 %v577_v63, 1.0 }
 0x509   :  { %2528 = vmatmul.msk.f32.vlgmr.msra.gmra.mxu1 %vm366_vm11, %v581_v0 }
 0x511   :  { %2534 = vmatmul.msk.f32.vlgmr.msrb.gmra.mxu1 %vm366_vm11, %v721_v1 }
 0x51e   :  { %v685_v2 = vpop.f32.mrf.mxu3 }
 0x51f   :  { %691 = vst.msk [vmem:[#allocation2 + $0x18] sm:$0xff] %vm366_vm11, %v685_v2 }
 0x526   :  { %v801_v3 = vpop.f32.mrf.mxu3 }
 0x527   :  { %v807_v4 = vmul.f32 0.35355338, %v801_v3 }
 0x529   :  { %v817_v5 = vsel %vm366_vm11, %v807_v4, -inf }
 0x52a   :  { %818 = vmax.xlane.f32.xlu0 %v817_v5 }
 0x52d   :  { %v659_v6 = vpop.f32.mrf.mxu2 }
 0x52e   :  { %690 = vst.msk [vmem:[#allocation2 + $0x10] sm:$0xff] %vm366_vm11, %v659_v6 }
 0x535   :  { %v773_v7 = vpop.f32.mrf.mxu2 }
 0x536   :  { %v806_v37 = vmul.f32 0.35355338, %v773_v7 }
 0x538   :  { %v814_v8 = vsel %vm366_vm11, %v806_v37, -inf }
 0x539   :  { %815 = vmax.xlane.f32.xlu2 %v814_v8 }
 0x53e   :  { %2609 = vrot.lane.b32.xlu0 %v3017_v22, %s2771_s14 }
 0x558   :  { %v607_v9 = vpop.f32.mrf.mxu0 }
 0x559   :  { %688 = vst.msk [vmem:[#allocation2] sm:$0xff] %vm366_vm11, %v607_v9 }
 0x560   :  { %v717_v10 = vpop.f32.mrf.mxu0 }
 0x561   :  { %v804_v11 = vmul.f32 0.35355338, %v717_v10 }
 0x563   :  { %v808_v12 = vsel %vm366_vm11, %v804_v11, -inf }
 0x564   :  { %809 = vmax.xlane.f32.xlu1 %v808_v12 }
 0x57d   :  { %1097 = vrot.lane.b32.xlu1 %v2981_v54, %s2772_s15 }
 0x585   :  { %2614 = vrot.lane.b32.xlu1 %v3027_v25, %s2771_s14 }
 0x586   :  { %v633_v13 = vpop.f32.mrf.mxu1 }
 0x587   :  { %689 = vst.msk [vmem:[#allocation2 + $0x8] sm:$0xff] %vm366_vm11, %v633_v13 }
 0x58d   :  { %1043 = vrot.lane.b32.xlu1 %v2986_v58, %s2773_s16 }
 0x58e   :  { %v745_v14 = vpop.f32.mrf.mxu1 }
 0x58f   :  { %v805_v15 = vmul.f32 0.35355338, %v745_v14 }
 0x591   :  { %v811_v16 = vsel %vm366_vm11, %v805_v15, -inf }
 0x592   :  { %812 = vmax.xlane.f32.xlu2 %v811_v16 }
 0x595   :  { %1071 = vrot.lane.b32.xlu1 %v2996_v62, %s2773_s16 }
 0x59d   :  { %v819_v17 = vpop.xlane.xlu0 %818  ;;  %1069 = vrot.lane.b32.xlu1 %v2996_v62, %s2772_s15 }
 0x59e   :  { %v823_v18 = vsub.f32 %v807_v4, %v819_v17 }
 0x5a0   :  { %v830_v20 = vmul.f32 1.442695, %v823_v18 }
 0x5a2   :  { %2678 = vpow2.f32 %v830_v20 }
 0x5a8   :  { %v3079_v21 = vpop.eup %2678 }
 0x5a9   :  { %v841_v24 = vsel %vm366_vm11, %v3079_v21, 0.0 }
 0x5aa   :  { %842 = vadd.xlane.f32.xlu2 %v841_v24 }
 0x5ac   :  { %v816_v27 = vpop.xlane.xlu2 %815 }
 0x5ad   :  { %v822_v28 = vsub.f32 %v806_v37, %v816_v27 }
 0x5af   :  { %v828_v29 = vmul.f32 1.442695, %v822_v28 }
 0x5b0   :  { %v2610_v31 = vpop.permute.xlu0 %2609 }
 0x5b1   :  { %2680 = vpow2.f32 %v828_v29  ;;  %v2612_v34 = vunpack.i.h.bf16 %v2610_v31  ;;  %v2611_v35 = vunpack.i.l.bf16 %v2610_v31 }
 0x5b3   :  { %989 = vmatpush.msra.mxu2 %v2611_v35  ;;  %1015 = vmatpush.msra.mxu3 %v2612_v34 }
 0x5b7   :  { %v3083_v36 = vpop.eup %2680 }
 0x5b8   :  { %v838_v23 = vsel %vm366_vm11, %v3083_v36, 0.0 }
 0x5b9   :  { %839 = vadd.xlane.f32.xlu0 %v838_v23 }
 0x5c2   :  { %1099 = vrot.lane.b32.xlu2 %v2981_v54, %s2773_s16 }
 0x5cd   :  { %1127 = vrot.lane.b32.xlu0 %v2984_v56, %s2773_s16 }
 0x5d5   :  { %1125 = vrot.lane.b32.xlu0 %v2984_v56, %s2772_s15 }
 0x5d7   :  { %v810_v38 = vpop.xlane.xlu1 %809 }
 0x5d8   :  { %v820_v40 = vsub.f32 %v804_v11, %v810_v38 }
 0x5da   :  { %v824_v32 = vmul.f32 1.442695, %v820_v40 }
 0x5dc   :  { %2682 = vpow2.f32 %v824_v32 }
 0x5e2   :  { %v3091_v42 = vpop.eup %2682 }
 0x5e3   :  { %v832_v44 = vsel %vm366_vm11, %v3091_v42, 0.0 }
 0x5eb   :  { %833 = vadd.xlane.f32.xlu2 %v832_v44 }
 0x5ef   :  { %v3095_v45 = vpop.permute.xlu1 %1097 }
 0x5f7   :  { %v2615_v46 = vpop.permute.xlu1 %2614 }
 0x5f8   :  { %v2617_v43 = vunpack.i.h.bf16 %v2615_v46  ;;  %v2616_v47 = vunpack.i.l.bf16 %v2615_v46 }
 0x5fa   :  { %937 = vmatpush.msra.mxu0 %v2616_v47  ;;  %963 = vmatpush.msra.mxu1 %v2617_v43 }
 0x5ff   :  { %v1044_v48 = vpop.permute.xlu1 %1043 }
 0x600   :  { %2543 = vmatpush.xpose.msk.msrb.mxu0 %vm366_vm11, %v1044_v48 }
 0x603   :  { %1041 = vrot.lane.b32.xlu2 %v2986_v58, %s2772_s15 }
 0x605   :  { %v813_v49 = vpop.xlane.xlu2 %812 }
 0x606   :  { %v821_v50 = vsub.f32 %v805_v15, %v813_v49 }
 0x607   :  { %v1072_v51 = vpop.permute.xlu1 %1071 }
 0x608   :  { %v826_v52 = vmul.f32 1.442695, %v821_v50  ;;  %2545 = vmatpush.xpose.msk.msrb.mxu1 %vm366_vm11, %v1072_v51 }
 0x60a   :  { %2684 = vpow2.f32 %v826_v52 }
 0x610   :  { %v3101_v53 = vpop.eup %2684 }
 0x611   :  { %v835_v55 = vsel %vm366_vm11, %v3101_v53, 0.0 }
 0x612   :  { %836 = vadd.xlane.f32.xlu0 %v835_v55 }
 0x61d   :  { %v843_v57 = vpop.xlane.xlu2 %842 }
 0x61e   :  { %v847_v30 = vadd.f32 1e-09, %v843_v57 }
 0x620   :  { %2686 = vrcp.f32 %v847_v30  ;;  %v904_v1 = vand.u32 2147483648, %v847_v30  ;;  %v902_v2 = vand.u32 2147483647, %v847_v30  ;;  %vm898_vm15 = vweird.f32 %v847_v30 }
 0x622   :  { %v905_v6 = vor.u32 1.1754944e-38, %v904_v1  ;;  %vm903_vm2 = vcmp.eq.f32.partialorder %v902_v2, 8.507059e+37 }
 0x625   :  { %v1100_v59 = vpop.permute.xlu2 %1099 }
 0x626   :  { %v2687_v60 = vpop.eup %2686  ;;  %2547 = vmatpush.xpose.msk.msrb.mxu2 %vm366_vm11, %v1100_v59 }
 0x627   :  { %v894_v61 = vmul.f32 %v2687_v60, %v847_v30  ;;  %vm899_vm14 = vweird.f32 %v2687_v60 }
 0x628   :  { %vm900_vm1 = vmor %vm898_vm15, %vm899_vm14 }
 0x629   :  { %v895_v63 = vsub.f32 1.0, %v894_v61 }
 0x62b   :  { %v896_v0 = vmul.f32 %v2687_v60, %v895_v63 }
 0x62c   :  { %v840_v3 = vpop.xlane.xlu0 %839 }
 0x62d   :  { %v897_v4 = vadd.f32 %v2687_v60, %v896_v0  ;;  %v846_v5 = vadd.f32 1e-09, %v840_v3 }
 0x62f   :  { %2688 = vrcp.f32 %v846_v5  ;;  %v901_v7 = vsel %vm900_vm1, %v2687_v60, %v897_v4  ;;  %v889_v14 = vand.u32 2147483648, %v846_v5  ;;  %v887_v16 = vand.u32 2147483647, %v846_v5 }
 0x630   :  { %v906_v37 = vsel %vm903_vm2, %v905_v6, %v901_v7  ;;  %vm883_vm4 = vweird.f32 %v846_v5  ;;  %v1070_v6 = vpop.permute.xlu1 %1069 }
 0x631   :  { %v907_v8 = vmul.f32 %v3079_v21, %v906_v37  ;;  %v890_v18 = vor.u32 1.1754944e-38, %v889_v14  ;;  %vm888_vm6 = vcmp.eq.f32.partialorder %v887_v16, 8.507059e+37 }
 0x633   :  { %v911_v9 = vmax.f32 %v907_v8, 1e-09 }
 0x635   :  { %v2689_v10 = vpop.eup %2688  ;;  %v915_v12 = vmin.f32 %v911_v9, 1.0 }
 0x636   :  { %v879_v11 = vmul.f32 %v2689_v10, %v846_v5  ;;  %vm884_vm3 = vweird.f32 %v2689_v10 }
 0x637   :  { %2542 = vmatmul.msk.f32.vlgmr.msra.gmra.mxu3 %vm366_vm11, %v915_v12  ;;  %vm885_vm5 = vmor %vm883_vm4, %vm884_vm3 }
 0x638   :  { %v880_v13 = vsub.f32 1.0, %v879_v11 }
 0x63a   :  { %v881_v15 = vmul.f32 %v2689_v10, %v880_v13 }
 0x63c   :  { %v882_v17 = vadd.f32 %v2689_v10, %v881_v15 }
 0x63e   :  { %v886_v20 = vsel %vm885_vm5, %v2689_v10, %v882_v17 }
 0x63f   :  { %v1128_v24 = vpop.permute.xlu0 %1127  ;;  %v891_v27 = vsel %vm888_vm6, %v890_v18, %v886_v20 }
 0x640   :  { %2549 = vmatpush.xpose.msk.msrb.mxu3 %vm366_vm11, %v1128_v24  ;;  %v892_v21 = vmul.f32 %v3083_v36, %v891_v27 }
 0x642   :  { %v910_v28 = vmax.f32 %v892_v21, 1e-09 }
 0x644   :  { %v914_v29 = vmin.f32 %v910_v28, 1.0 }
 0x646   :  { %2541 = vmatmul.msk.f32.vlgmr.msra.gmra.mxu2 %vm366_vm11, %v914_v29 }
 0x647   :  { %v1126_v31 = vpop.permute.xlu0 %1125 }
 0x648   :  { %2550 = vmatmul.msk.f32.vlgmr.msrb.gmra.mxu3 %vm366_vm11, %v1126_v31 }
 0x64e   :  { %2548 = vmatmul.msk.f32.vlgmr.msrb.gmra.mxu2 %vm366_vm11, %v3095_v45 }
 0x65e   :  { %v834_v34 = vpop.xlane.xlu2 %833 }
 0x65f   :  { %v844_v35 = vadd.f32 1e-09, %v834_v34 }
 0x661   :  { %2690 = vrcp.f32 %v844_v35  ;;  %v859_v32 = vand.u32 2147483648, %v844_v35  ;;  %v857_v36 = vand.u32 2147483647, %v844_v35  ;;  %vm853_vm8 = vweird.f32 %v844_v35 }
 0x663   :  { %v860_v43 = vor.u32 1.1754944e-38, %v859_v32  ;;  %vm858_vm10 = vcmp.eq.f32.partialorder %v857_v36, 8.507059e+37 }
 0x666   :  { %v1042_v51 = vpop.permute.xlu2 %1041 }
 0x667   :  { %v2691_v23 = vpop.eup %2690 }
 0x668   :  { %v849_v38 = vmul.f32 %v2691_v23, %v844_v35  ;;  %vm854_vm7 = vweird.f32 %v2691_v23 }
 0x669   :  { %vm855_vm9 = vmor %vm853_vm8, %vm854_vm7 }
 0x66a   :  { %v850_v40 = vsub.f32 1.0, %v849_v38 }
 0x66c   :  { %v851_v44 = vmul.f32 %v2691_v23, %v850_v40 }
 0x66e   :  { %v852_v46 = vadd.f32 %v2691_v23, %v851_v44 }
 0x670   :  { %v856_v47 = vsel %vm855_vm9, %v2691_v23, %v852_v46 }
 0x671   :  { %v861_v48 = vsel %vm858_vm10, %v860_v43, %v856_v47 }
 0x672   :  { %v862_v49 = vmul.f32 %v3091_v42, %v861_v48 }
 0x674   :  { %v908_v45 = vmax.f32 %v862_v49, 1e-09 }
 0x676   :  { %v912_v50 = vmin.f32 %v908_v45, 1.0 }
 0x678   :  { %2539 = vmatmul.msk.f32.vlgmr.msra.gmra.mxu0 %vm366_vm11, %v912_v50 }
 0x680   :  { %2544 = vmatmul.msk.f32.vlgmr.msrb.gmra.mxu0 %vm366_vm11, %v1042_v51 }
 0x685   :  { %v837_v52 = vpop.xlane.xlu0 %836 }
 0x686   :  { %v845_v55 = vadd.f32 1e-09, %v837_v52 }
 0x688   :  { %2692 = vrcp.f32 %v845_v55  ;;  %v874_v60 = vand.u32 2147483648, %v845_v55  ;;  %v872_v63 = vand.u32 2147483647, %v845_v55  ;;  %vm868_vm13 = vweird.f32 %v845_v55 }
 0x68a   :  { %v875_v42 = vor.u32 1.1754944e-38, %v874_v60  ;;  %vm873_vm15 = vcmp.eq.f32.partialorder %v872_v63, 8.507059e+37 }
 0x68e   :  { %v2693_v57 = vpop.eup %2692 }
 0x68f   :  { %v864_v30 = vmul.f32 %v2693_v57, %v845_v55  ;;  %vm869_vm12 = vweird.f32 %v2693_v57 }
 0x690   :  { %vm870_vm14 = vmor %vm868_vm13, %vm869_vm12 }
 0x691   :  { %v865_v59 = vsub.f32 1.0, %v864_v30 }
 0x693   :  { %v866_v61 = vmul.f32 %v2693_v57, %v865_v59 }
 0x695   :  { %v867_v0 = vadd.f32 %v2693_v57, %v866_v61 }
 0x697   :  { %v871_v1 = vsel %vm870_vm14, %v2693_v57, %v867_v0 }
 0x698   :  { %v876_v2 = vsel %vm873_vm15, %v875_v42, %v871_v1 }
 0x699   :  { %v877_v3 = vmul.f32 %v3101_v53, %v876_v2 }
 0x69b   :  { %v909_v4 = vmax.f32 %v877_v3, 1e-09 }
 0x69d   :  { %v913_v5 = vmin.f32 %v909_v4, 1.0 }
 0x69f   :  { %2540 = vmatmul.msk.f32.vlgmr.msra.gmra.mxu1 %vm366_vm11, %v913_v5 }
 0x6a7   :  { %2546 = vmatmul.msk.f32.vlgmr.msrb.gmra.mxu1 %vm366_vm11, %v1070_v6 }
 0x6ba   :  { %v3120_v7 = vpop.f32.mrf.mxu3 }
 0x6c9   :  { %v3122_v37 = vpop.f32.mrf.mxu2 }
 0x6cb   :  { %v1150_v8 = vpop.f32.mrf.mxu3 }
 0x6cc   :  { %v1156_v9 = vmul.f32 0.35355338, %v1150_v8 }
 0x6ce   :  { %v1166_v10 = vsel %vm366_vm11, %v1156_v9, -inf }
 0x6cf   :  { %1167 = vmax.xlane.f32.xlu1 %v1166_v10 }
 0x6d1   :  { %v1122_v11 = vpop.f32.mrf.mxu2 }
 0x6d2   :  { %v1155_v12 = vmul.f32 0.35355338, %v1122_v11 }
 0x6d4   :  { %v1163_v53 = vsel %vm366_vm11, %v1155_v12, -inf }
 0x6d5   :  { %1164 = vmax.xlane.f32.xlu0 %v1163_v53 }
 0x6f5   :  { %v3126_v13 = vpop.f32.mrf.mxu0 }
 0x6fd   :  { %v1066_v14 = vpop.f32.mrf.mxu0 }
 0x6fe   :  { %v1153_v15 = vmul.f32 0.35355338, %v1066_v14 }
 0x700   :  { %v1157_v16 = vsel %vm366_vm11, %v1153_v15, -inf }
 0x701   :  { %1158 = vmax.xlane.f32.xlu0 %v1157_v16 }
 0x71c   :  { %v3129_v17 = vpop.f32.mrf.mxu1 }
 0x724   :  { %v1094_v18 = vpop.f32.mrf.mxu1 }
 0x725   :  { %v1154_v20 = vmul.f32 0.35355338, %v1094_v18 }
 0x727   :  { %v1160_v24 = vsel %vm366_vm11, %v1154_v20, -inf }
 0x728   :  { %1161 = vmax.xlane.f32.xlu0 %v1160_v24 }
 0x742   :  { %v1168_v27 = vpop.xlane.xlu1 %1167 }
 0x743   :  { %v1172_v21 = vsub.f32 %v1156_v9, %v1168_v27 }
 0x745   :  { %v1179_v28 = vmul.f32 1.442695, %v1172_v21 }
 0x747   :  { %2694 = vpow2.f32 %v1179_v28 }
 0x748   :  { %v1165_v29 = vpop.xlane.xlu0 %1164 }
 0x749   :  { %v1171_v31 = vsub.f32 %v1155_v12, %v1165_v29 }
 0x74b   :  { %v1177_v34 = vmul.f32 1.442695, %v1171_v31 }
 0x74d   :  { %v3132_v35 = vpop.eup %2694  ;;  %2696 = vpow2.f32 %v1177_v34 }
 0x74e   :  { %v1190_v23 = vsel %vm366_vm11, %v3132_v35, 0.0 }
 0x74f   :  { %1191 = vadd.xlane.f32.xlu0 %v1190_v23 }
 0x753   :  { %v3136_v38 = vpop.eup %2696 }
 0x754   :  { %v1187_v40 = vsel %vm366_vm11, %v3136_v38, 0.0 }
 0x755   :  { %1188 = vadd.xlane.f32.xlu2 %v1187_v40 }
 0x763   :  { %2619 = vrot.lane.b32.xlu0 %v3017_v22, %s2774_s17 }
 0x76d   :  { %1476 = vrot.lane.b32.xlu2 %v2984_v56, %s2775_s18 }
 0x774   :  { %v1159_v32 = vpop.xlane.xlu0 %1158 }
 0x775   :  { %v1169_v44 = vsub.f32 %v1153_v15, %v1159_v32  ;;  %1474 = vrot.lane.b32.xlu2 %v2984_v56, %s2776_s0 }
 0x777   :  { %v1173_v36 = vmul.f32 1.442695, %v1169_v44 }
 0x779   :  { %2698 = vpow2.f32 %v1173_v36 }
 0x77d   :  { %1392 = vrot.lane.b32.xlu2 %v2986_v58, %s2775_s18 }
 0x77f   :  { %v3144_v46 = vpop.eup %2698 }
 0x780   :  { %v1181_v43 = vsel %vm366_vm11, %v3144_v46, 0.0 }
 0x781   :  { %1182 = vadd.xlane.f32.xlu1 %v1181_v43 }
 0x785   :  { %1418 = vrot.lane.b32.xlu2 %v2996_v62, %s2776_s0 }
 0x79a   :  { %1448 = vrot.lane.b32.xlu1 %v2981_v54, %s2775_s18 }
 0x79b   :  { %v1162_v47 = vpop.xlane.xlu0 %1161 }
 0x79c   :  { %v1170_v48 = vsub.f32 %v1154_v20, %v1162_v47 }
 0x79e   :  { %v1175_v49 = vmul.f32 1.442695, %v1170_v48 }
 0x7a0   :  { %2700 = vpow2.f32 %v1175_v49 }
 0x7a2   :  { %1446 = vrot.lane.b32.xlu1 %v2981_v54, %s2776_s0 }
 0x7a6   :  { %v3151_v56 = vpop.eup %2700 }
 0x7a7   :  { %v1184_v45 = vsel %vm366_vm11, %v3151_v56, 0.0 }
 0x7a8   :  { %1185 = vadd.xlane.f32.xlu0 %v1184_v45 }
 0x7aa   :  { %2624 = vrot.lane.b32.xlu1 %v3027_v25, %s2774_s17 }
 0x7b2   :  { %1390 = vrot.lane.b32.xlu1 %v2986_v58, %s2776_s0 }
 0x7bc   :  { %1420 = vrot.lane.b32.xlu0 %v2996_v62, %s2775_s18 }
 0x7c2   :  { %v1192_v50 = vpop.xlane.xlu0 %1191 }
 0x7c3   :  { %v1196_v51 = vadd.f32 1e-09, %v1192_v50 }
 0x7c5   :  { %2702 = vrcp.f32 %v1196_v51  ;;  %v1253_v59 = vand.u32 2147483648, %v1196_v51  ;;  %v1251_v61 = vand.u32 2147483647, %v1196_v51  ;;  %vm1247_vm2 = vweird.f32 %v1196_v51 }
 0x7c7   :  { %v1254_v58 = vor.u32 1.1754944e-38, %v1253_v59  ;;  %vm1252_vm4 = vcmp.eq.f32.partialorder %v1251_v61, 8.507059e+37 }
 0x7c8   :  { %v1189_v52 = vpop.xlane.xlu2 %1188 }
 0x7c9   :  { %v1195_v55 = vadd.f32 1e-09, %v1189_v52 }
 0x7cb   :  { %v2703_v57 = vpop.eup %2702  ;;  %2704 = vrcp.f32 %v1195_v55  ;;  %v1236_v2 = vand.u32 2147483647, %v1195_v55  ;;  %v1238_v3 = vand.u32 2147483648, %v1195_v55  ;;  %vm1232_vm6 = vweird.f32 %v1195_v55 }
 0x7cc   :  { %v1243_v54 = vmul.f32 %v2703_v57, %v1196_v51  ;;  %vm1248_vm1 = vweird.f32 %v2703_v57 }
 0x7cd   :  { %vm1249_vm3 = vmor %vm1247_vm2, %vm1248_vm1  ;;  %v1239_v14 = vor.u32 1.1754944e-38, %v1238_v3  ;;  %vm1237_vm8 = vcmp.eq.f32.partialorder %v1236_v2, 8.507059e+37 }
 0x7ce   :  { %v1244_v30 = vsub.f32 1.0, %v1243_v54 }
 0x7d0   :  { %v1245_v60 = vmul.f32 %v2703_v57, %v1244_v30  ;;  %v1477_v12 = vpop.permute.xlu2 %1476 }
 0x7d1   :  { %v2705_v63 = vpop.eup %2704 }
 0x7d2   :  { %v1246_v0 = vadd.f32 %v2703_v57, %v1245_v60  ;;  %v1228_v42 = vmul.f32 %v2705_v63, %v1195_v55  ;;  %vm1233_vm5 = vweird.f32 %v2705_v63 }
 0x7d3   :  { %vm1234_vm7 = vmor %vm1232_vm6, %vm1233_vm5 }
 0x7d4   :  { %v1229_v62 = vsub.f32 1.0, %v1228_v42  ;;  %v1250_v1 = vsel %vm1249_vm3, %v2703_v57, %v1246_v0 }
 0x7d5   :  { %v2620_v4 = vpop.permute.xlu0 %2619  ;;  %v1255_v5 = vsel %vm1252_vm4, %v1254_v58, %v1250_v1 }
 0x7d6   :  { %v1230_v6 = vmul.f32 %v2705_v63, %v1229_v62  ;;  %v2622_v8 = vunpack.i.h.bf16 %v2620_v4  ;;  %v2621_v9 = vunpack.i.l.bf16 %v2620_v4  ;;  %v1256_v10 = vmul.f32 %v3132_v35, %v1255_v5 }
 0x7d8   :  { %v1231_v11 = vadd.f32 %v2705_v63, %v1230_v6  ;;  %1338 = vmatpush.msra.mxu2 %v2621_v9  ;;  %1364 = vmatpush.msra.mxu3 %v2622_v8  ;;  %v1260_v53 = vmax.f32 %v1256_v10, 1e-09  ;;  %v1475_v21 = vpop.permute.xlu2 %1474 }
 0x7da   :  { %2561 = vmatpush.xpose.msk.msrb.mxu3 %vm366_vm11, %v1477_v12  ;;  %v1264_v15 = vmin.f32 %v1260_v53, 1.0  ;;  %v1235_v16 = vsel %vm1234_vm7, %v2705_v63, %v1231_v11 }
 0x7db   :  { %v1240_v18 = vsel %vm1237_vm8, %v1239_v14, %v1235_v16 }
 0x7dc   :  { %2554 = vmatmul.msk.f32.vlgmr.msra.gmra.mxu3 %vm366_vm11, %v1264_v15  ;;  %v1241_v20 = vmul.f32 %v3136_v38, %v1240_v18 }
 0x7de   :  { %v1259_v24 = vmax.f32 %v1241_v20, 1e-09 }
 0x7e0   :  { %v1263_v27 = vmin.f32 %v1259_v24, 1.0  ;;  %v1393_v30 = vpop.permute.xlu2 %1392 }
 0x7e2   :  { %2553 = vmatmul.msk.f32.vlgmr.msra.gmra.mxu2 %vm366_vm11, %v1263_v27 }
 0x7e4   :  { %2562 = vmatmul.msk.f32.vlgmr.msrb.gmra.mxu3 %vm366_vm11, %v1475_v21 }
 0x7e8   :  { %v1419_v8 = vpop.permute.xlu2 %1418 }
 0x7f4   :  { %v1183_v28 = vpop.xlane.xlu1 %1182 }
 0x7f5   :  { %v1193_v29 = vadd.f32 1e-09, %v1183_v28 }
 0x7f7   :  { %2706 = vrcp.f32 %v1193_v29  ;;  %v1208_v44 = vand.u32 2147483648, %v1193_v29  ;;  %vm1202_vm10 = vweird.f32 %v1193_v29  ;;  %v1206_v38 = vand.u32 2147483647, %v1193_v29 }
 0x7f9   :  { %v1209_v43 = vor.u32 1.1754944e-38, %v1208_v44  ;;  %vm1207_vm13 = vcmp.eq.f32.partialorder %v1206_v38, 8.507059e+37 }
 0x7fd   :  { %v2707_v31 = vpop.eup %2706 }
 0x7fe   :  { %v1198_v34 = vmul.f32 %v2707_v31, %v1193_v29  ;;  %vm1203_vm9 = vweird.f32 %v2707_v31 }
 0x7ff   :  { %vm1204_vm12 = vmor %vm1202_vm10, %vm1203_vm9 }
 0x800   :  { %v1199_v35 = vsub.f32 1.0, %v1198_v34 }
 0x802   :  { %v1200_v23 = vmul.f32 %v2707_v31, %v1199_v35 }
 0x804   :  { %v1201_v40 = vadd.f32 %v2707_v31, %v1200_v23 }
 0x806   :  { %v1205_v36 = vsel %vm1204_vm12, %v2707_v31, %v1201_v40 }
 0x807   :  { %v1210_v47 = vsel %vm1207_vm13, %v1209_v43, %v1205_v36 }
 0x808   :  { %v1211_v49 = vmul.f32 %v3144_v46, %v1210_v47 }
 0x80a   :  { %v1257_v45 = vmax.f32 %v1211_v49, 1e-09 }
 0x80c   :  { %v1449_v32 = vpop.permute.xlu1 %1448  ;;  %v1261_v54 = vmin.f32 %v1257_v45, 1.0 }
 0x80d   :  { %2559 = vmatpush.xpose.msk.msrb.mxu2 %vm366_vm11, %v1449_v32 }
 0x814   :  { %v1447_v48 = vpop.permute.xlu1 %1446 }
 0x815   :  { %2560 = vmatmul.msk.f32.vlgmr.msrb.gmra.mxu2 %vm366_vm11, %v1447_v48 }
 0x81b   :  { %v1186_v50 = vpop.xlane.xlu0 %1185 }
 0x81c   :  { %v2625_v51 = vpop.permute.xlu1 %2624  ;;  %v1194_v52 = vadd.f32 1e-09, %v1186_v50 }
 0x81d   :  { %v2627_v55 = vunpack.i.h.bf16 %v2625_v51  ;;  %v2626_v57 = vunpack.i.l.bf16 %v2625_v51 }
 0x81e   :  { %2708 = vrcp.f32 %v1194_v52  ;;  %v1223_v46 = vand.u32 2147483648, %v1194_v52  ;;  %v1221_v42 = vand.u32 2147483647, %v1194_v52  ;;  %vm1217_vm15 = vweird.f32 %v1194_v52 }
 0x81f   :  { %1286 = vmatpush.msra.mxu0 %v2626_v57  ;;  %1312 = vmatpush.msra.mxu1 %v2627_v55 }
 0x820   :  { %2551 = vmatmul.msk.f32.vlgmr.msra.gmra.mxu0 %vm366_vm11, %v1261_v54  ;;  %v1224_v62 = vor.u32 1.1754944e-38, %v1223_v46  ;;  %vm1222_vm2 = vcmp.eq.f32.partialorder %v1221_v42, 8.507059e+37 }
 0x821   :  { %2555 = vmatpush.xpose.msk.msrb.mxu0 %vm366_vm11, %v1393_v30 }
 0x824   :  { %v2709_v59 = vpop.eup %2708  ;;  %v1391_v63 = vpop.permute.xlu1 %1390 }
 0x825   :  { %v1213_v60 = vmul.f32 %v2709_v59, %v1194_v52  ;;  %vm1218_vm14 = vweird.f32 %v2709_v59 }
 0x826   :  { %vm1219_vm1 = vmor %vm1217_vm15, %vm1218_vm14 }
 0x827   :  { %v1214_v61 = vsub.f32 1.0, %v1213_v60 }
 0x828   :  { %2556 = vmatmul.msk.f32.vlgmr.msrb.gmra.mxu0 %vm366_vm11, %v1391_v63 }
 0x829   :  { %v1215_v0 = vmul.f32 %v2709_v59, %v1214_v61 }
 0x82b   :  { %v1216_v58 = vadd.f32 %v2709_v59, %v1215_v0 }
 0x82d   :  { %v1220_v1 = vsel %vm1219_vm1, %v2709_v59, %v1216_v58  ;;  %vm1036_vm1 = vcmask 130112  }
 0x82e   :  { %v1421_v2 = vpop.permute.xlu0 %1420  ;;  %v1225_v3 = vsel %vm1222_vm2, %v1224_v62, %v1220_v1 }
 0x82f   :  { %2557 = vmatpush.xpose.msk.msrb.mxu1 %vm366_vm11, %v1421_v2  ;;  %v1226_v4 = vmul.f32 %v3151_v56, %v1225_v3 }
 0x831   :  { %v1258_v5 = vmax.f32 %v1226_v4, 1e-09 }
 0x833   :  { %v1262_v6 = vmin.f32 %v1258_v5, 1.0 }
 0x835   :  { %2552 = vmatmul.msk.f32.vlgmr.msra.gmra.mxu1 %vm366_vm11, %v1262_v6 }
 0x83d   :  { %2558 = vmatmul.msk.f32.vlgmr.msrb.gmra.mxu1 %vm366_vm11, %v1419_v8 }
 0x85f   :  { %v1366_v9 = vpop.f32.mrf.mxu3 }
 0x865   :  { %v1340_v53 = vpop.f32.mrf.mxu2 }
 0x867   :  { %v1499_v10 = vpop.f32.mrf.mxu3 }
 0x868   :  { %v1505_v11 = vmul.f32 0.35355338, %v1499_v10 }
 0x86a   :  { %v1515_v12 = vsel %vm366_vm11, %v1505_v11, -inf }
 0x86b   :  { %1516 = vmax.xlane.f32.xlu2 %v1515_v12 }
 0x898   :  { %v1471_v14 = vpop.f32.mrf.mxu2 }
 0x899   :  { %v1504_v15 = vmul.f32 0.35355338, %v1471_v14 }
 0x89b   :  { %v1512_v16 = vsel %vm366_vm11, %v1504_v15, -inf }
 0x89c   :  { %1513 = vmax.xlane.f32.xlu1 %v1512_v16 }
 0x89d   :  { %v3177_v56 = vpop.f32.mrf.mxu0 }
 0x8a5   :  { %v1415_v18 = vpop.f32.mrf.mxu0 }
 0x8a6   :  { %v1502_v20 = vmul.f32 0.35355338, %v1415_v18 }
 0x8a8   :  { %v1506_v24 = vsel %vm366_vm11, %v1502_v20, -inf }
 0x8a9   :  { %1507 = vmax.xlane.f32.xlu0 %v1506_v24 }
 0x8b2   :  { %v1314_v27 = vpop.f32.mrf.mxu1 }
 0x8ba   :  { %v1443_v21 = vpop.f32.mrf.mxu1 }
 0x8bb   :  { %v1503_v28 = vmul.f32 0.35355338, %v1443_v21 }
 0x8bd   :  { %v1509_v29 = vsel %vm366_vm11, %v1503_v28, -inf }
 0x8be   :  { %1510 = vmax.xlane.f32.xlu1 %v1509_v29 }
 0x8de   :  { %v1517_v31 = vpop.xlane.xlu2 %1516 }
 0x8df   :  { %v1521_v34 = vsub.f32 %v1505_v11, %v1517_v31 }
 0x8e1   :  { %v1528_v35 = vmul.f32 1.442695, %v1521_v34 }
 0x8e3   :  { %2710 = vpow2.f32 %v1528_v35 }
 0x8e9   :  { %v2711_v23 = vpop.eup %2710 }
 0x8ea   :  { %v1539_v40 = vsel %vm366_vm11, %v2711_v23, 0.0 }
 0x8eb   :  { %1540 = vadd.xlane.f32.xlu1 %v1539_v40 }
 0x904   :  { %2629 = vrot.lane.b32.xlu1 %v3017_v22, %s2777_s1 }
 0x90c   :  { %1377 = vrot.lane.b32.xlu1 %v1340_v53, %s2778_s19 }
 0x90f   :  { %v1514_v32 = vpop.xlane.xlu1 %1513 }
 0x910   :  { %v1520_v44 = vsub.f32 %v1504_v15, %v1514_v32 }
 0x912   :  { %v1526_v38 = vmul.f32 1.442695, %v1520_v44 }
 0x914   :  { %2712 = vpow2.f32 %v1526_v38 }
 0x91a   :  { %v3184_v36 = vpop.eup %2712 }
 0x91b   :  { %v1536_v43 = vsel %vm366_vm11, %v3184_v36, 0.0 }
 0x91c   :  { %1537 = vadd.xlane.f32.xlu2 %v1536_v43  ;;  %v1508_v47 = vpop.xlane.xlu0 %1507 }
 0x91d   :  { %v1518_v48 = vsub.f32 %v1502_v20, %v1508_v47 }
 0x91f   :  { %v1522_v49 = vmul.f32 1.442695, %v1518_v48 }
 0x921   :  { %2714 = vpow2.f32 %v1522_v49 }
 0x927   :  { %v3188_v45 = vpop.eup %2714 }
 0x928   :  { %v1530_v22 = vsel %vm366_vm11, %v3188_v45, 0.0 }
 0x929   :  { %1531 = vadd.xlane.f32.xlu2 %v1530_v22 }
 0x931   :  { %v1511_v50 = vpop.xlane.xlu1 %1510 }
 0x932   :  { %v1519_v51 = vsub.f32 %v1503_v28, %v1511_v50 }
 0x934   :  { %v1524_v52 = vmul.f32 1.442695, %v1519_v51 }
 0x936   :  { %2716 = vpow2.f32 %v1524_v52 }
 0x93c   :  { %v3192_v55 = vpop.eup %2716 }
 0x93d   :  { %v1533_v57 = vsel %vm366_vm11, %v3192_v55, 0.0 }
 0x93e   :  { %1534 = vadd.xlane.f32.xlu0 %v1533_v57 }
 0x941   :  { %2634 = vrot.lane.b32.xlu2 %v3027_v25, %s2777_s1 }
 0x949   :  { %1379 = vrot.lane.b32.xlu2 %v1366_v9, %s2778_s19 }
 0x951   :  { %1024 = vrot.lane.b32.xlu2 %v3126_v13, %s2779_s20 }
 0x952   :  { %1028 = vrot.lane.b32.xlu0 %v3122_v37, %s2779_s20 }
 0x959   :  { %1375 = vrot.lane.b32.xlu2 %v1314_v27, %s2778_s19 }
 0x95a   :  { %1030 = vrot.lane.b32.xlu0 %v3120_v7, %s2779_s20 }
 0x95e   :  { %v1541_v54 = vpop.xlane.xlu1 %1540 }
 0x95f   :  { %v1545_v30 = vadd.f32 1e-09, %v1541_v54 }
 0x961   :  { %2718 = vrcp.f32 %v1545_v30  ;;  %v1602_v61 = vand.u32 2147483648, %v1545_v30  ;;  %v1600_v46 = vand.u32 2147483647, %v1545_v30  ;;  %vm1596_vm4 = vweird.f32 %v1545_v30 }
 0x963   :  { %v1603_v13 = vor.u32 1.1754944e-38, %v1602_v61  ;;  %vm1601_vm6 = vcmp.eq.f32.partialorder %v1600_v46, 8.507059e+37 }
 0x967   :  { %v2719_v59 = vpop.eup %2718 }
 0x968   :  { %v1592_v60 = vmul.f32 %v2719_v59, %v1545_v30  ;;  %vm1597_vm3 = vweird.f32 %v2719_v59 }
 0x969   :  { %vm1598_vm5 = vmor %vm1596_vm4, %vm1597_vm3 }
 0x96a   :  { %v1593_v25 = vsub.f32 1.0, %v1592_v60 }
 0x96c   :  { %v1594_v63 = vmul.f32 %v2719_v59, %v1593_v25 }
 0x96e   :  { %v1595_v0 = vadd.f32 %v2719_v59, %v1594_v63 }
 0x970   :  { %v1599_v37 = vsel %vm1598_vm5, %v2719_v59, %v1595_v0 }
 0x971   :  { %v1604_v42 = vsel %vm1601_vm6, %v1603_v13, %v1599_v37  ;;  %vm1385_vm6 = vcmask 195712  }
 0x972   :  { %v1605_v58 = vmul.f32 %v2711_v23, %v1604_v42 }
 0x974   :  { %v1609_v62 = vmax.f32 %v1605_v58, 1e-09 }
 0x976   :  { %v2630_v7 = vpop.permute.xlu1 %2629  ;;  %v1613_v3 = vmin.f32 %v1609_v62, 1.0 }
 0x977   :  { %v2632_v1 = vunpack.i.h.bf16 %v2630_v7  ;;  %v2631_v2 = vunpack.i.l.bf16 %v2630_v7 }
 0x979   :  { %1687 = vmatpush.msra.mxu2 %v2631_v2  ;;  %1713 = vmatpush.msra.mxu3 %v2632_v1 }
 0x97a   :  { %2566 = vmatmul.msk.f32.vlgmr.msra.gmra.mxu3 %vm366_vm11, %v1613_v3 }
 0x97e   :  { %v1378_v37 = vpop.permute.xlu1 %1377 }
 0x98f   :  { %v1538_v4 = vpop.xlane.xlu2 %1537 }
 0x990   :  { %v1544_v5 = vadd.f32 1e-09, %v1538_v4  ;;  %v361_v4 = vld [vmem:[%s3489_s6 + $0x18] sm:$0xff] }
 0x991   :  { %1830 = vmatpush.msrb.mxu3 %v361_v4  ;;  %1807 = vmatpush.msrb.mxu2 %v361_v4 }
 0x992   :  { %2720 = vrcp.f32 %v1544_v5  ;;  %v1587_v10 = vand.u32 2147483648, %v1544_v5  ;;  %v1585_v53 = vand.u32 2147483647, %v1544_v5  ;;  %vm1581_vm8 = vweird.f32 %v1544_v5 }
 0x994   :  { %v1588_v16 = vor.u32 1.1754944e-38, %v1587_v10  ;;  %vm1586_vm10 = vcmp.eq.f32.partialorder %v1585_v53, 8.507059e+37 }
 0x998   :  { %v2721_v6 = vpop.eup %2720 }
 0x999   :  { %v1577_v8 = vmul.f32 %v2721_v6, %v1544_v5  ;;  %vm1582_vm7 = vweird.f32 %v2721_v6  ;;  %v360_v5 = vld [vmem:[%s3489_s6 + $0x10] sm:$0xff] }
 0x99a   :  { %vm1583_vm9 = vmor %vm1581_vm8, %vm1582_vm7  ;;  %1831 = vmatpush.msrb.mxu3 %v360_v5  ;;  %1808 = vmatpush.msrb.mxu2 %v360_v5 }
 0x99b   :  { %v1578_v9 = vsub.f32 1.0, %v1577_v8 }
 0x99c   :  { %v1532_v11 = vpop.xlane.xlu2 %1531 }
 0x99d   :  { %v1579_v12 = vmul.f32 %v2721_v6, %v1578_v9  ;;  %v1542_v14 = vadd.f32 1e-09, %v1532_v11 }
 0x99f   :  { %v1580_v15 = vadd.f32 %v2721_v6, %v1579_v12  ;;  %2722 = vrcp.f32 %v1542_v14  ;;  %v1557_v40 = vand.u32 2147483648, %v1542_v14  ;;  %v1555_v44 = vand.u32 2147483647, %v1542_v14 }
 0x9a0   :  { %vm1551_vm13 = vweird.f32 %v1542_v14 }
 0x9a1   :  { %v1584_v18 = vsel %vm1583_vm9, %v2721_v6, %v1580_v15  ;;  %vm1556_vm15 = vcmp.eq.f32.partialorder %v1555_v44, 8.507059e+37 }
 0x9a2   :  { %v1589_v20 = vsel %vm1586_vm10, %v1588_v16, %v1584_v18 }
 0x9a3   :  { %v1590_v24 = vmul.f32 %v3184_v36, %v1589_v20  ;;  %v1558_v36 = vor.u32 1.1754944e-38, %v1557_v40  ;;  %v2641_v20 = vld [vmem:[%s3488_s7] ss:$0 sm:$0xff] }
 0x9a4   :  { %v2635_v27 = vpop.permute.xlu2 %2634 }
 0x9a5   :  { %v2723_v21 = vpop.eup %2722  ;;  %v2637_v28 = vunpack.i.h.bf16 %v2635_v27  ;;  %v2636_v29 = vunpack.i.l.bf16 %v2635_v27  ;;  %v1608_v31 = vmax.f32 %v1590_v24, 1e-09 }
 0x9a6   :  { %v1547_v34 = vmul.f32 %v2723_v21, %v1542_v14  ;;  %vm1552_vm12 = vweird.f32 %v2723_v21 }
 0x9a7   :  { %1635 = vmatpush.msra.mxu0 %v2636_v29  ;;  %1661 = vmatpush.msra.mxu1 %v2637_v28  ;;  %v1612_v35 = vmin.f32 %v1608_v31, 1.0  ;;  %vm1553_vm14 = vmor %vm1551_vm13, %vm1552_vm12 }
 0x9a8   :  { %v1548_v23 = vsub.f32 1.0, %v1547_v34 }
 0x9a9   :  { %2565 = vmatmul.msk.f32.vlgmr.msra.gmra.mxu2 %vm366_vm11, %v1612_v35  ;;  %1761 = vmatpush.msrb.mxu0 %v361_v4 }
 0x9aa   :  { %v1549_v32 = vmul.f32 %v2723_v21, %v1548_v23  ;;  %1784 = vmatpush.msrb.mxu1 %v361_v4 }
 0x9ab   :  { %1762 = vmatpush.msrb.mxu0 %v360_v5 }
 0x9ac   :  { %v1550_v38 = vadd.f32 %v2723_v21, %v1549_v32  ;;  %v1380_v43 = vpop.permute.xlu2 %1379  ;;  %1785 = vmatpush.msrb.mxu1 %v360_v5 }
 0x9ae   :  { %v1554_v47 = vsel %vm1553_vm14, %v2723_v21, %v1550_v38 }
 0x9af   :  { %v1559_v48 = vsel %vm1556_vm15, %v1558_v36, %v1554_v47 }
 0x9b0   :  { %v1560_v49 = vmul.f32 %v3188_v45, %v1559_v48 }
 0x9b1   :  { %v1535_v22 = vpop.xlane.xlu0 %1534 }
 0x9b2   :  { %v1543_v50 = vadd.f32 1e-09, %v1535_v22  ;;  %v1606_v51 = vmax.f32 %v1560_v49, 1e-09 }
 0x9b4   :  { %2724 = vrcp.f32 %v1543_v50  ;;  %v1025_v52 = vpop.permute.xlu2 %1024  ;;  %v1610_v57 = vmin.f32 %v1606_v51, 1.0  ;;  %v1572_v60 = vand.u32 2147483648, %v1543_v50  ;;  %v1570_v61 = vand.u32 2147483647, %v1543_v50 }
 0x9b5   :  { %1037 = vst.msk [vmem:[#allocation2] sm:$0xff] %vm1036_vm1, %v1025_v52  ;;  %vm1566_vm3 = vweird.f32 %v1543_v50 }
 0x9b6   :  { %2563 = vmatmul.msk.f32.vlgmr.msra.gmra.mxu0 %vm366_vm11, %v1610_v57  ;;  %v1573_v45 = vor.u32 1.1754944e-38, %v1572_v60  ;;  %vm1571_vm5 = vcmp.eq.f32.partialorder %v1570_v61, 8.507059e+37 }
 0x9ba   :  { %v2725_v54 = vpop.eup %2724 }
 0x9bb   :  { %v1562_v30 = vmul.f32 %v2725_v54, %v1543_v50  ;;  %vm1567_vm2 = vweird.f32 %v2725_v54 }
 0x9bc   :  { %vm1568_vm4 = vmor %vm1566_vm3, %vm1567_vm2  ;;  %v1376_v53 = vpop.permute.xlu2 %1375 }
 0x9bd   :  { %v1563_v59 = vsub.f32 1.0, %v1562_v30 }
 0x9bf   :  { %v1564_v25 = vmul.f32 %v2725_v54, %v1563_v59 }
 0x9c1   :  { %v1565_v63 = vadd.f32 %v2725_v54, %v1564_v25 }
 0x9c3   :  { %v1569_v46 = vsel %vm1568_vm4, %v2725_v54, %v1565_v63 }
 0x9c4   :  { %v1029_v0 = vpop.permute.xlu0 %1028  ;;  %v1574_v13 = vsel %vm1571_vm5, %v1573_v45, %v1569_v46 }
 0x9c5   :  { %1039 = vst.msk [vmem:[#allocation2 + $0x10] sm:$0xff] %vm1036_vm1, %v1029_v0  ;;  %v1575_v42 = vmul.f32 %v3192_v55, %v1574_v13 }
 0x9c6   :  { %1388 = vst.msk [vmem:[#allocation2 + $0x10] sm:$0xff] %vm1385_vm6, %v1378_v37 }
 0x9c7   :  { %v1607_v58 = vmax.f32 %v1575_v42, 1e-09 }
 0x9c9   :  { %v1611_v62 = vmin.f32 %v1607_v58, 1.0 }
 0x9cb   :  { %2564 = vmatmul.msk.f32.vlgmr.msra.gmra.mxu1 %vm366_vm11, %v1611_v62  ;;  %vm1734_vm11 = vcmask 261312  }
 0x9cc   :  { %v1031_v7 = vpop.permute.xlu0 %1030 }
 0x9cd   :  { %1040 = vst.msk [vmem:[#allocation2 + $0x18] sm:$0xff] %vm1036_vm1, %v1031_v7 }
 0x9ce   :  { %1389 = vst.msk [vmem:[#allocation2 + $0x18] sm:$0xff] %vm1385_vm6, %v1380_v43 }
 0x9fd   :  { %v1715_v1 = vpop.f32.mrf.mxu3 }
 0x9fe   :  { %1728 = vrot.lane.b32.xlu1 %v1715_v1, %s2780_s2 }
 0xa06   :  { %1373 = vrot.lane.b32.xlu1 %v3177_v56, %s2778_s19  ;;  %v359_v56 = vld [vmem:[%s3489_s6 + $0x8] sm:$0xff] }
 0xa07   :  { %1832 = vmatpush.msrb.mxu3 %v359_v56  ;;  %1809 = vmatpush.msrb.mxu2 %v359_v56 }
 0xa08   :  { %1763 = vmatpush.msrb.mxu0 %v359_v56  ;;  %1786 = vmatpush.msrb.mxu1 %v359_v56 }
 0xa2c   :  { %v1689_v2 = vpop.f32.mrf.mxu2 }
 0xa2d   :  { %1726 = vrot.lane.b32.xlu0 %v1689_v2, %s2780_s2  ;;  %v3271_v2 = vld [vmem:[%s3490_s3] sm:$0xf] }
 0xa2e   :  { %v1931_v56 = vperm.slane %v3271_v2, 1 }
 0xa33   :  { %v1637_v55 = vpop.f32.mrf.mxu0 }
 0xa35   :  { %1026 = vrot.lane.b32.xlu0 %v3129_v17, %s2779_s20  ;;  %v358_v17 = vld [vmem:[%s3489_s6] sm:$0xff] }
 0xa36   :  { %1833 = vmatpush.msrb.mxu3 %v358_v17  ;;  %1810 = vmatpush.msrb.mxu2 %v358_v17 }
 0xa37   :  { %1764 = vmatpush.msrb.mxu0 %v358_v17  ;;  %1787 = vmatpush.msrb.mxu1 %v358_v17 }
 0xa3d   :  { %1722 = vrot.lane.b32.xlu0 %v1637_v55, %s2780_s2 }
 0xa48   :  { %v1663_v3 = vpop.f32.mrf.mxu1 }
 0xa49   :  { %1724 = vrot.lane.b32.xlu1 %v1663_v3, %s2780_s2  ;;  %v3274_v3 = vperm.slane %v3271_v2, 0 }
 0xa70   :  { %v1729_v6 = vpop.permute.xlu1 %1728 }
 0xa71   :  { %1738 = vst.msk [vmem:[#allocation2 + $0x18] sm:$0xff] %vm1734_vm11, %v1729_v6 }
 0xa78   :  { %v1374_v8 = vpop.permute.xlu1 %1373  ;;  %v1742_v9 = vld [vmem:[#allocation2 + $0x18] sm:$0xff] }
 0xa79   :  { %1386 = vst.msk [vmem:[#allocation2] sm:$0xff] %vm1385_vm6, %v1374_v8  ;;  %2570 = vmatmul.msk.f32.vlgmr.msrb.gmra.mxu3 %vm63_vm0, %v1742_v9 }
 0xa9f   :  { %v1727_v10 = vpop.permute.xlu0 %1726 }
 0xaa0   :  { %1737 = vst.msk [vmem:[#allocation2 + $0x10] sm:$0xff] %vm1734_vm11, %v1727_v10 }
 0xaa7   :  { %v1027_v11 = vpop.permute.xlu0 %1026  ;;  %v1741_v12 = vld [vmem:[#allocation2 + $0x10] sm:$0xff] }
 0xaa8   :  { %1038 = vst.msk [vmem:[#allocation2 + $0x8] sm:$0xff] %vm1036_vm1, %v1027_v11  ;;  %2569 = vmatmul.msk.f32.vlgmr.msrb.gmra.mxu2 %vm63_vm0, %v1741_v12 }
 0xaa9   :  { %1387 = vst.msk [vmem:[#allocation2 + $0x8] sm:$0xff] %vm1385_vm6, %v1376_v53 }
 0xaaf   :  { %v1723_v14 = vpop.permute.xlu0 %1722 }
 0xab0   :  { %1735 = vst.msk [vmem:[#allocation2] sm:$0xff] %vm1734_vm11, %v1723_v14 }
 0xab7   :  { %v1739_v15 = vld [vmem:[#allocation2] sm:$0xff] }
 0xab8   :  { %2567 = vmatmul.msk.f32.vlgmr.msrb.gmra.mxu0 %vm63_vm0, %v1739_v15 }
 0xabb   :  { %v1725_v16 = vpop.permute.xlu1 %1724 }
 0xabc   :  { %1736 = vst.msk [vmem:[#allocation2 + $0x8] sm:$0xff] %vm1734_vm11, %v1725_v16 }
 0xac3   :  { %v1740_v18 = vld [vmem:[#allocation2 + $0x8] sm:$0xff] }
 0xac4   :  { %2568 = vmatmul.msk.f32.vlgmr.msrb.gmra.mxu1 %vm63_vm0, %v1740_v18 }
 0xafc   :  { %v1835_v24 = vpop.f32.mrf.mxu3 }
 0xafd   :  { %v1836_v27 = vadd.f32 %v2641_v20, %v1835_v24 }
 0xaff   :  { %v1847_v21 = vsel %vm63_vm0, %v1836_v27, 0.0 }
 0xb00   :  { %1848 = vadd.xlane.f32.xlu0 %v1847_v21 }
 0xb2b   :  { %v1812_v28 = vpop.f32.mrf.mxu2 }
 0xb2c   :  { %v1813_v29 = vadd.f32 %v2641_v20, %v1812_v28 }
 0xb2e   :  { %v1844_v31 = vsel %vm63_vm0, %v1813_v29, 0.0 }
 0xb2f   :  { %1845 = vadd.xlane.f32.xlu2 %v1844_v31 }
 0xb35   :  { %v1766_v34 = vpop.f32.mrf.mxu0 }
 0xb36   :  { %v1767_v35 = vadd.f32 %v2641_v20, %v1766_v34 }
 0xb38   :  { %v1838_v23 = vsel %vm63_vm0, %v1767_v35, 0.0 }
 0xb39   :  { %1839 = vadd.xlane.f32.xlu1 %v1838_v23 }
 0xb41   :  { %v1789_v40 = vpop.f32.mrf.mxu1 }
 0xb42   :  { %v1790_v32 = vadd.f32 %v2641_v20, %v1789_v40 }
 0xb44   :  { %v1841_v44 = vsel %vm63_vm0, %v1790_v32, 0.0 }
 0xb45   :  { %1842 = vadd.xlane.f32.xlu2 %v1841_v44 }
 0xb73   :  { %v1849_v38 = vpop.xlane.xlu0 %1848 }
 0xb74   :  { %v1853_v43 = vmul.f32 %v1849_v38, %v2874_v26 }
 0xb76   :  { %v1857_v36 = vsub.f32 %v1836_v27, %v1853_v43 }
 0xb78   :  { %v1861_v47 = vmul.f32 %v1857_v36, %v1857_v36 }
 0xb7a   :  { %v1871_v48 = vsel %vm63_vm0, %v1861_v47, 0.0 }
 0xb7b   :  { %1872 = vadd.xlane.f32.xlu2 %v1871_v48 }
 0xba2   :  { %v1846_v49 = vpop.xlane.xlu2 %1845 }
 0xba3   :  { %v1852_v22 = vmul.f32 %v1846_v49, %v2874_v26 }
 0xba5   :  { %v1856_v50 = vsub.f32 %v1813_v29, %v1852_v22 }
 0xba7   :  { %v1860_v51 = vmul.f32 %v1856_v50, %v1856_v50 }
 0xba9   :  { %v1868_v52 = vsel %vm63_vm0, %v1860_v51, 0.0 }
 0xbaa   :  { %1869 = vadd.xlane.f32.xlu0 %v1868_v52 }
 0xbac   :  { %v1840_v57 = vpop.xlane.xlu1 %1839 }
 0xbad   :  { %v1850_v54 = vmul.f32 %v1840_v57, %v2874_v26 }
 0xbaf   :  { %v3256_v30 = vsub.f32 %v1767_v35, %v1850_v54 }
 0xbb1   :  { %v1858_v59 = vmul.f32 %v3256_v30, %v3256_v30 }
 0xbb3   :  { %v1862_v60 = vsel %vm63_vm0, %v1858_v59, 0.0 }
 0xbb4   :  { %1863 = vadd.xlane.f32.xlu1 %v1862_v60 }
 0xbb8   :  { %v1843_v25 = vpop.xlane.xlu2 %1842 }
 0xbb9   :  { %v1851_v61 = vmul.f32 %v1843_v25, %v2874_v26 }
 0xbbb   :  { %v3262_v63 = vsub.f32 %v1790_v32, %v1851_v61 }
 0xbbd   :  { %v1859_v45 = vmul.f32 %v3262_v63, %v3262_v63 }
 0xbbf   :  { %v1865_v46 = vsel %vm63_vm0, %v1859_v45, 0.0 }
 0xbc0   :  { %1866 = vadd.xlane.f32.xlu0 %v1865_v46 }
 0xbee   :  { %v1873_v0 = vpop.xlane.xlu2 %1872 }
 0xbef   :  { %v1877_v13 = vmul.f32 %v1873_v0, %v2874_v26 }
 0xbf1   :  { %v1881_v37 = vadd.f32 1e-05, %v1877_v13 }
 0xbf3   :  { %2726 = vrsqrt.f32 %v1881_v37  ;;  %vm1918_vm8 = vweird.f32 %v1881_v37 }
 0xbf9   :  { %v2727_v42 = vpop.eup %2726 }
 0xbfa   :  { %v1913_v58 = vmul.f32 %v2727_v42, %v1881_v37  ;;  %vm1919_vm7 = vweird.f32 %v2727_v42 }
 0xbfb   :  { %vm1920_vm9 = vmor %vm1918_vm8, %vm1919_vm7 }
 0xbfc   :  { %v1914_v62 = vmul.f32 %v2727_v42, %v1913_v58 }
 0xbfe   :  { %v1915_v7 = vmul.f32 0.5, %v1914_v62 }
 0xc00   :  { %v1916_v1 = vsub.f32 1.5, %v1915_v7 }
 0xc02   :  { %v1917_v55 = vmul.f32 %v2727_v42, %v1916_v1 }
 0xc04   :  { %v1921_v4 = vsel %vm1920_vm9, %v2727_v42, %v1917_v55 }
 0xc05   :  { %v1925_v5 = vmul.f32 %v1921_v4, %v1857_v36 }
 0xc07   :  { %v1930_v17 = vmul.f32 %v3274_v3, %v1925_v5 }
 0xc09   :  { %v1935_v6 = vadd.f32 %v1931_v56, %v1930_v17 }
 0xc0b   :  { %v3279_v8 = vadd.f32 %v1935_v6, %v2918_v33 }
 0xc0d   :  { %v1949_v9 = vsel %vm63_vm0, %v3279_v8, 0.0 }
 0xc0e   :  { %1950 = vadd.xlane.f32.xlu1 %v1949_v9 }
 0xc1d   :  { %v1870_v10 = vpop.xlane.xlu0 %1869 }
 0xc1e   :  { %v1876_v11 = vmul.f32 %v1870_v10, %v2874_v26 }
 0xc20   :  { %v1880_v12 = vadd.f32 1e-05, %v1876_v11 }
 0xc22   :  { %2728 = vrsqrt.f32 %v1880_v12  ;;  %vm1908_vm12 = vweird.f32 %v1880_v12 }
 0xc27   :  { %v1864_v53 = vpop.xlane.xlu1 %1863 }
 0xc28   :  { %v2729_v14 = vpop.eup %2728  ;;  %v1874_v15 = vmul.f32 %v1864_v53, %v2874_v26 }
 0xc29   :  { %v1903_v16 = vmul.f32 %v2729_v14, %v1880_v12  ;;  %vm1909_vm10 = vweird.f32 %v2729_v14 }
 0xc2a   :  { %v1878_v18 = vadd.f32 1e-05, %v1874_v15  ;;  %vm1910_vm13 = vmor %vm1908_vm12, %vm1909_vm10  ;;  %v2030_v15 = vld [vmem:[%s3492_s8 + $0x10] sm:$0xff] }
 0xc2b   :  { %v1904_v20 = vmul.f32 %v2729_v14, %v1903_v16  ;;  %v2029_v16 = vld [vmem:[%s3492_s8 + $0x8] sm:$0xff] }
 0xc2c   :  { %2730 = vrsqrt.f32 %v1878_v18  ;;  %vm1888_vm15 = vweird.f32 %v1878_v18 }
 0xc2d   :  { %v1905_v24 = vmul.f32 0.5, %v1904_v20 }
 0xc2f   :  { %v1906_v33 = vsub.f32 1.5, %v1905_v24 }
 0xc31   :  { %v1907_v27 = vmul.f32 %v2729_v14, %v1906_v33 }
 0xc32   :  { %v2731_v21 = vpop.eup %2730 }
 0xc33   :  { %v1911_v28 = vsel %vm1910_vm13, %v2729_v14, %v1907_v27  ;;  %v1883_v29 = vmul.f32 %v2731_v21, %v1878_v18  ;;  %v1867_v31 = vpop.xlane.xlu0 %1866  ;;  %vm1889_vm14 = vweird.f32 %v2731_v21  ;;  %v2031_v14 = vld [vmem:[%s3492_s8 + $0x18] sm:$0xff]  ;;  %v2028_v18 = vld [vmem:[%s3492_s8] sm:$0xff] }
 0xc34   :  { %v1924_v34 = vmul.f32 %v1911_v28, %v1856_v50  ;;  %v1875_v35 = vmul.f32 %v1867_v31, %v2874_v26  ;;  %vm1890_vm1 = vmor %vm1888_vm15, %vm1889_vm14  ;;  %2120 = vmatpush.msra.mxu3 %v2031_v14  ;;  %2097 = vmatpush.msra.mxu2 %v2031_v14 }
 0xc35   :  { %v1884_v23 = vmul.f32 %v2731_v21, %v1883_v29  ;;  %2051 = vmatpush.msra.mxu0 %v2031_v14  ;;  %2074 = vmatpush.msra.mxu1 %v2031_v14 }
 0xc36   :  { %v1879_v40 = vadd.f32 1e-05, %v1875_v35  ;;  %v1929_v32 = vmul.f32 %v3274_v3, %v1924_v34  ;;  %2121 = vmatpush.msra.mxu3 %v2030_v15  ;;  %2098 = vmatpush.msra.mxu2 %v2030_v15 }
 0xc37   :  { %v1885_v44 = vmul.f32 0.5, %v1884_v23  ;;  %2052 = vmatpush.msra.mxu0 %v2030_v15  ;;  %2075 = vmatpush.msra.mxu1 %v2030_v15  ;;  %v2292_v15 = vld [vmem:[%s3494_s10 + $0x20] sm:$0xff] }
 0xc38   :  { %2732 = vrsqrt.f32 %v1879_v40  ;;  %v1934_v38 = vadd.f32 %v1931_v56, %v1929_v32  ;;  %vm1898_vm3 = vweird.f32 %v1879_v40  ;;  %2122 = vmatpush.msra.mxu3 %v2029_v16  ;;  %2099 = vmatpush.msra.mxu2 %v2029_v16 }
 0xc39   :  { %v1886_v43 = vsub.f32 1.5, %v1885_v44  ;;  %2053 = vmatpush.msra.mxu0 %v2029_v16  ;;  %2076 = vmatpush.msra.mxu1 %v2029_v16 }
 0xc3a   :  { %v3288_v36 = vadd.f32 %v1934_v38, %v2910_v19  ;;  %2123 = vmatpush.msra.mxu3 %v2028_v18  ;;  %2100 = vmatpush.msra.mxu2 %v2028_v18 }
 0xc3b   :  { %v1887_v47 = vmul.f32 %v2731_v21, %v1886_v43  ;;  %2054 = vmatpush.msra.mxu0 %v2028_v18  ;;  %2077 = vmatpush.msra.mxu1 %v2028_v18 }
 0xc3c   :  { %v1946_v48 = vsel %vm63_vm0, %v3288_v36, 0.0 }
 0xc3d   :  { %v1891_v49 = vsel %vm1890_vm1, %v2731_v21, %v1887_v47  ;;  %1947 = vadd.xlane.f32.xlu2 %v1946_v48 }
 0xc3e   :  { %v2733_v22 = vpop.eup %2732  ;;  %v1922_v50 = vmul.f32 %v1891_v49, %v3256_v30 }
 0xc3f   :  { %v1893_v51 = vmul.f32 %v2733_v22, %v1879_v40  ;;  %vm1899_vm2 = vweird.f32 %v2733_v22 }
 0xc40   :  { %v1927_v52 = vmul.f32 %v3274_v3, %v1922_v50  ;;  %vm1900_vm4 = vmor %vm1898_vm3, %vm1899_vm2 }
 0xc41   :  { %v1894_v57 = vmul.f32 %v2733_v22, %v1893_v51 }
 0xc42   :  { %v1932_v54 = vadd.f32 %v1931_v56, %v1927_v52 }
 0xc43   :  { %v1895_v59 = vmul.f32 0.5, %v1894_v57 }
 0xc44   :  { %v3295_v19 = vadd.f32 %v1932_v54, %v2923_v39 }
 0xc45   :  { %v1896_v60 = vsub.f32 1.5, %v1895_v59 }
 0xc46   :  { %v1940_v25 = vsel %vm63_vm0, %v3295_v19, 0.0 }
 0xc47   :  { %v1897_v61 = vmul.f32 %v2733_v22, %v1896_v60  ;;  %1941 = vadd.xlane.f32.xlu0 %v1940_v25 }
 0xc49   :  { %v1901_v45 = vsel %vm1900_vm4, %v2733_v22, %v1897_v61 }
 0xc4a   :  { %v1923_v30 = vmul.f32 %v1901_v45, %v3262_v63 }
 0xc4c   :  { %v1928_v46 = vmul.f32 %v3274_v3, %v1923_v30 }
 0xc4e   :  { %v1933_v0 = vadd.f32 %v1931_v56, %v1928_v46 }
 0xc50   :  { %v3302_v13 = vadd.f32 %v1933_v0, %v2925_v41 }
 0xc52   :  { %v1943_v39 = vsel %vm63_vm0, %v3302_v13, 0.0 }
 0xc53   :  { %1944 = vadd.xlane.f32.xlu2 %v1943_v39 }
 0xc81   :  { %v1951_v37 = vpop.xlane.xlu1 %1950 }
 0xc82   :  { %v1955_v42 = vmul.f32 %v1951_v37, %v2874_v26 }
 0xc84   :  { %v1959_v58 = vsub.f32 %v3279_v8, %v1955_v42 }
 0xc86   :  { %v1963_v62 = vmul.f32 %v1959_v58, %v1959_v58 }
 0xc88   :  { %v1973_v7 = vsel %vm63_vm0, %v1963_v62, 0.0 }
 0xc89   :  { %1974 = vadd.xlane.f32.xlu0 %v1973_v7 }
 0xcb0   :  { %v1948_v63 = vpop.xlane.xlu2 %1947 }
 0xcb1   :  { %v1954_v1 = vmul.f32 %v1948_v63, %v2874_v26 }
 0xcb3   :  { %v3311_v55 = vsub.f32 %v3288_v36, %v1954_v1 }
 0xcb5   :  { %v1962_v41 = vmul.f32 %v3311_v55, %v3311_v55 }
 0xcb7   :  { %v1970_v3 = vsel %vm63_vm0, %v1962_v41, 0.0 }
 0xcb8   :  { %1971 = vadd.xlane.f32.xlu1 %v1970_v3 }
 0xcba   :  { %v1942_v4 = vpop.xlane.xlu0 %1941 }
 0xcbb   :  { %v1952_v5 = vmul.f32 %v1942_v4, %v2874_v26  ;;  %v3356_v4 = vld [vmem:[%s3491_s9] ss:$0 sm:$0xff] }
 0xcbd   :  { %v3318_v56 = vsub.f32 %v3295_v19, %v1952_v5 }
 0xcbf   :  { %v1960_v17 = vmul.f32 %v3318_v56, %v3318_v56 }
 0xcc1   :  { %v1964_v6 = vsel %vm63_vm0, %v1960_v17, 0.0 }
 0xcc2   :  { %1965 = vadd.xlane.f32.xlu2 %v1964_v6 }
 0xcc6   :  { %v1945_v9 = vpop.xlane.xlu2 %1944 }
 0xcc7   :  { %v1953_v10 = vmul.f32 %v1945_v9, %v2874_v26 }
 0xcc9   :  { %v3325_v11 = vsub.f32 %v3302_v13, %v1953_v10 }
 0xccb   :  { %v1961_v12 = vmul.f32 %v3325_v11, %v3325_v11 }
 0xccd   :  { %v1967_v53 = vsel %vm63_vm0, %v1961_v12, 0.0  ;;  %v2294_v12 = vld [vmem:[%s3494_s10 + $0x30] sm:$0xff] }
 0xcce   :  { %1968 = vadd.xlane.f32.xlu1 %v1967_v53  ;;  %v2293_v53 = vld [vmem:[%s3494_s10 + $0x28] sm:$0xff] }
 0xcfc   :  { %v1975_v20 = vpop.xlane.xlu0 %1974 }
 0xcfd   :  { %v1979_v24 = vmul.f32 %v1975_v20, %v2874_v26  ;;  %v2291_v20 = vld [vmem:[%s3494_s10 + $0x18] sm:$0xff] }
 0xcff   :  { %v1983_v33 = vadd.f32 1e-05, %v1979_v24 }
 0xd01   :  { %2734 = vrsqrt.f32 %v1983_v33  ;;  %vm2020_vm6 = vweird.f32 %v1983_v33 }
 0xd07   :  { %v2735_v27 = vpop.eup %2734 }
 0xd08   :  { %v2015_v21 = vmul.f32 %v2735_v27, %v1983_v33  ;;  %vm2021_vm5 = vweird.f32 %v2735_v27 }
 0xd09   :  { %vm2022_vm11 = vmor %vm2020_vm6, %vm2021_vm5 }
 0xd0a   :  { %v2016_v28 = vmul.f32 %v2735_v27, %v2015_v21  ;;  %v2290_v21 = vld [vmem:[%s3494_s10 + $0x10] sm:$0xff] }
 0xd0c   :  { %v2017_v29 = vmul.f32 0.5, %v2016_v28 }
 0xd0e   :  { %v2018_v31 = vsub.f32 1.5, %v2017_v29  ;;  %v2289_v29 = vld [vmem:[%s3494_s10 + $0x8] sm:$0xff] }
 0xd10   :  { %v2019_v34 = vmul.f32 %v2735_v27, %v2018_v31 }
 0xd12   :  { %v2023_v35 = vsel %vm2022_vm11, %v2735_v27, %v2019_v34  ;;  %vm2300_vm11 = vcmask 523264  }
 0xd13   :  { %v2027_v23 = vmul.f32 %v2023_v35, %v1959_v58  ;;  %v2288_v35 = vld [vmem:[%s3494_s10] sm:$0xff] }
 0xd15   :  { %2574 = vmatmul.msk.f32.vlgmr.msra.gmra.mxu3 %vm63_vm0, %v2027_v23 }
 0xd2b   :  { %v1972_v40 = vpop.xlane.xlu1 %1971 }
 0xd2c   :  { %v1978_v32 = vmul.f32 %v1972_v40, %v2874_v26 }
 0xd2e   :  { %v1982_v44 = vadd.f32 1e-05, %v1978_v32 }
 0xd30   :  { %2736 = vrsqrt.f32 %v1982_v44  ;;  %vm2010_vm8 = vweird.f32 %v1982_v44 }
 0xd35   :  { %v1966_v38 = vpop.xlane.xlu2 %1965 }
 0xd36   :  { %v2737_v43 = vpop.eup %2736  ;;  %v1976_v47 = vmul.f32 %v1966_v38, %v2874_v26 }
 0xd37   :  { %v2005_v48 = vmul.f32 %v2737_v43, %v1982_v44  ;;  %vm2011_vm7 = vweird.f32 %v2737_v43 }
 0xd38   :  { %v1980_v49 = vadd.f32 1e-05, %v1976_v47  ;;  %vm2012_vm9 = vmor %vm2010_vm8, %vm2011_vm7 }
 0xd39   :  { %v2006_v22 = vmul.f32 %v2737_v43, %v2005_v48 }
 0xd3a   :  { %2738 = vrsqrt.f32 %v1980_v49  ;;  %vm1990_vm12 = vweird.f32 %v1980_v49 }
 0xd3b   :  { %v2007_v50 = vmul.f32 0.5, %v2006_v22 }
 0xd3d   :  { %v2008_v51 = vsub.f32 1.5, %v2007_v50 }
 0xd3f   :  { %v2009_v52 = vmul.f32 %v2737_v43, %v2008_v51 }
 0xd40   :  { %v2739_v57 = vpop.eup %2738 }
 0xd41   :  { %v2013_v54 = vsel %vm2012_vm9, %v2737_v43, %v2009_v52  ;;  %v1985_v59 = vmul.f32 %v2739_v57, %v1980_v49  ;;  %v1969_v60 = vpop.xlane.xlu1 %1968  ;;  %vm1991_vm10 = vweird.f32 %v2739_v57 }
 0xd42   :  { %v2026_v25 = vmul.f32 %v2013_v54, %v3311_v55  ;;  %v1977_v61 = vmul.f32 %v1969_v60, %v2874_v26  ;;  %vm1992_vm13 = vmor %vm1990_vm12, %vm1991_vm10 }
 0xd43   :  { %v1986_v45 = vmul.f32 %v2739_v57, %v1985_v59 }
 0xd44   :  { %v1981_v30 = vadd.f32 1e-05, %v1977_v61  ;;  %2573 = vmatmul.msk.f32.vlgmr.msra.gmra.mxu2 %vm63_vm0, %v2026_v25 }
 0xd45   :  { %v1987_v46 = vmul.f32 0.5, %v1986_v45 }
 0xd46   :  { %2740 = vrsqrt.f32 %v1981_v30  ;;  %vm2000_vm15 = vweird.f32 %v1981_v30 }
 0xd47   :  { %v1988_v0 = vsub.f32 1.5, %v1987_v46 }
 0xd49   :  { %v1989_v39 = vmul.f32 %v2739_v57, %v1988_v0 }
 0xd4b   :  { %v1993_v37 = vsel %vm1992_vm13, %v2739_v57, %v1989_v39 }
 0xd4c   :  { %v2741_v42 = vpop.eup %2740  ;;  %v2024_v58 = vmul.f32 %v1993_v37, %v3318_v56 }
 0xd4d   :  { %v1995_v62 = vmul.f32 %v2741_v42, %v1981_v30  ;;  %vm2001_vm14 = vweird.f32 %v2741_v42 }
 0xd4e   :  { %2571 = vmatmul.msk.f32.vlgmr.msra.gmra.mxu0 %vm63_vm0, %v2024_v58  ;;  %vm2002_vm1 = vmor %vm2000_vm15, %vm2001_vm14 }
 0xd4f   :  { %v1996_v7 = vmul.f32 %v2741_v42, %v1995_v62 }
 0xd51   :  { %v1997_v63 = vmul.f32 0.5, %v1996_v7 }
 0xd53   :  { %v1998_v1 = vsub.f32 1.5, %v1997_v63 }
 0xd55   :  { %v1999_v55 = vmul.f32 %v2741_v42, %v1998_v1 }
 0xd57   :  { %v2003_v41 = vsel %vm2002_vm1, %v2741_v42, %v1999_v55 }
 0xd58   :  { %v2025_v3 = vmul.f32 %v2003_v41, %v3325_v11  ;;  %v2295_v11 = vld [vmem:[%s3494_s10 + $0x38] sm:$0xff] }
 0xd59   :  { %2381 = vmatpush.msrb.mxu3 %v2295_v11  ;;  %2358 = vmatpush.msrb.mxu2 %v2295_v11 }
 0xd5a   :  { %2572 = vmatmul.msk.f32.vlgmr.msra.gmra.mxu1 %vm63_vm0, %v2025_v3  ;;  %2312 = vmatpush.msrb.mxu0 %v2295_v11 }
 0xd5b   :  { %2335 = vmatpush.msrb.mxu1 %v2295_v11  ;;  %2382 = vmatpush.msrb.mxu3 %v2294_v12 }
 0xd5c   :  { %2359 = vmatpush.msrb.mxu2 %v2294_v12  ;;  %2313 = vmatpush.msrb.mxu0 %v2294_v12 }
 0xd5d   :  { %2336 = vmatpush.msrb.mxu1 %v2294_v12  ;;  %2383 = vmatpush.msrb.mxu3 %v2293_v53 }
 0xd5e   :  { %2360 = vmatpush.msrb.mxu2 %v2293_v53  ;;  %2314 = vmatpush.msrb.mxu0 %v2293_v53 }
 0xd5f   :  { %2337 = vmatpush.msrb.mxu1 %v2293_v53  ;;  %2384 = vmatpush.msrb.mxu3 %v2292_v15 }
 0xd60   :  { %2361 = vmatpush.msrb.mxu2 %v2292_v15  ;;  %2315 = vmatpush.msrb.mxu0 %v2292_v15 }
 0xd61   :  { %2338 = vmatpush.msrb.mxu1 %v2292_v15  ;;  %2385 = vmatpush.msrb.mxu3 %v2291_v20 }
 0xd62   :  { %2362 = vmatpush.msrb.mxu2 %v2291_v20  ;;  %2316 = vmatpush.msrb.mxu0 %v2291_v20 }
 0xd63   :  { %2339 = vmatpush.msrb.mxu1 %v2291_v20  ;;  %2386 = vmatpush.msrb.mxu3 %v2290_v21 }
 0xd64   :  { %2363 = vmatpush.msrb.mxu2 %v2290_v21  ;;  %2317 = vmatpush.msrb.mxu0 %v2290_v21 }
 0xd65   :  { %2340 = vmatpush.msrb.mxu1 %v2290_v21  ;;  %2387 = vmatpush.msrb.mxu3 %v2289_v29 }
 0xd66   :  { %2364 = vmatpush.msrb.mxu2 %v2289_v29  ;;  %2318 = vmatpush.msrb.mxu0 %v2289_v29 }
 0xd67   :  { %2341 = vmatpush.msrb.mxu1 %v2289_v29  ;;  %2388 = vmatpush.msrb.mxu3 %v2288_v35 }
 0xd68   :  { %2365 = vmatpush.msrb.mxu2 %v2288_v35  ;;  %2319 = vmatpush.msrb.mxu0 %v2288_v35 }
 0xd69   :  { %2342 = vmatpush.msrb.mxu1 %v2288_v35 }
 0xd98   :  { %v2125_v5 = vpop.f32.mrf.mxu3 }
 0xd99   :  { %v3359_v56 = vadd.f32 %v3356_v4, %v2125_v5 }
 0xd9b   :  { %v3362_v17 = vmul.f32 0.70710677, %v3359_v56  ;;  %v2131_v37 = vmul.f32 0.5, %v3359_v56 }
 0xd9d   :  { %v2139_v6 = vand.u32 2147483647, %v3362_v17  ;;  %vm2271_vm6 = vcmp.ge.f32.partialorder %v3362_v17, 0.0 }
 0xd9f   :  { %v2143_v9 = vmul.f32 0.3275911, %v2139_v6  ;;  %v2247_v40 = vsub.f32 0.0, %v2139_v6 }
 0xda1   :  { %v2147_v10 = vadd.f32 1.0, %v2143_v9  ;;  %v2251_v38 = vmul.f32 %v2247_v40, %v2139_v6 }
 0xda3   :  { %2742 = vrcp.f32 %v2147_v10  ;;  %v2204_v24 = vand.u32 2147483648, %v2147_v10  ;;  %v2202_v27 = vand.u32 2147483647, %v2147_v10  ;;  %vm2198_vm3 = vweird.f32 %v2147_v10 }
 0xda4   :  { %v2258_v48 = vmul.f32 1.442695, %v2251_v38 }
 0xda5   :  { %v2205_v31 = vor.u32 1.1754944e-38, %v2204_v24  ;;  %vm2203_vm5 = vcmp.eq.f32.partialorder %v2202_v27, 8.507059e+37 }
 0xda6   :  { %2744 = vpow2.f32 %v2258_v48 }
 0xda9   :  { %v2743_v14 = vpop.eup %2742 }
 0xdaa   :  { %v2194_v16 = vmul.f32 %v2743_v14, %v2147_v10  ;;  %vm2199_vm2 = vweird.f32 %v2743_v14 }
 0xdab   :  { %vm2200_vm4 = vmor %vm2198_vm3, %vm2199_vm2 }
 0xdac   :  { %v2195_v18 = vsub.f32 1.0, %v2194_v16  ;;  %v2745_v57 = vpop.eup %2744 }
 0xdae   :  { %v2196_v33 = vmul.f32 %v2743_v14, %v2195_v18 }
 0xdb0   :  { %v2197_v28 = vadd.f32 %v2743_v14, %v2196_v33 }
 0xdb2   :  { %v2201_v34 = vsel %vm2200_vm4, %v2743_v14, %v2197_v28 }
 0xdb3   :  { %v2206_v23 = vsel %vm2203_vm5, %v2205_v31, %v2201_v34 }
 0xdb4   :  { %v2211_v32 = vmul.f32 1.0614054, %v2206_v23 }
 0xdb6   :  { %v2215_v44 = vadd.f32 -1.4531521, %v2211_v32 }
 0xdb8   :  { %v2219_v43 = vmul.f32 %v2215_v44, %v2206_v23 }
 0xdba   :  { %v2223_v47 = vadd.f32 1.4214138, %v2219_v43 }
 0xdbc   :  { %v2227_v49 = vmul.f32 %v2223_v47, %v2206_v23 }
 0xdbe   :  { %v2231_v22 = vadd.f32 -0.28449672, %v2227_v49 }
 0xdc0   :  { %v2235_v50 = vmul.f32 %v2231_v22, %v2206_v23 }
 0xdc2   :  { %v2239_v51 = vadd.f32 0.2548296, %v2235_v50 }
 0xdc4   :  { %v2243_v52 = vmul.f32 %v2239_v51, %v2206_v23 }
 0xdc6   :  { %v2263_v54 = vmul.f32 %v2745_v57, %v2243_v52 }
 0xdc7   :  { %v2102_v59 = vpop.f32.mrf.mxu2 }
 0xdc8   :  { %v2267_v60 = vsub.f32 1.0, %v2263_v54  ;;  %v3390_v25 = vadd.f32 %v3356_v4, %v2102_v59 }
 0xdca   :  { %v2275_v61 = vsub.f32 0.0, %v2267_v60  ;;  %v3393_v45 = vmul.f32 0.70710677, %v3390_v25 }
 0xdcb   :  { %v2056_v30 = vpop.f32.mrf.mxu0 }
 0xdcc   :  { %v2279_v46 = vsel %vm2271_vm6, %v2267_v60, %v2275_v61  ;;  %v2138_v0 = vand.u32 2147483647, %v3393_v45  ;;  %v3398_v39 = vadd.f32 %v3356_v4, %v2056_v30  ;;  %vm2270_vm5 = vcmp.ge.f32.partialorder %v3393_v45, 0.0 }
 0xdcd   :  { %v2283_v42 = vadd.f32 1.0, %v2279_v46 }
 0xdce   :  { %v2142_v58 = vmul.f32 0.3275911, %v2138_v0  ;;  %v3402_v62 = vmul.f32 0.70710677, %v3398_v39  ;;  %v2246_v20 = vsub.f32 0.0, %v2138_v0  ;;  %v2128_v45 = vmul.f32 0.5, %v3398_v39 }
 0xdcf   :  { %v2287_v7 = vmul.f32 %v2283_v42, %v2131_v37  ;;  %v2643_v39 = vld [vmem:[%s3493_s11] ss:$0 sm:$0xff] }
 0xdd0   :  { %v2146_v63 = vadd.f32 1.0, %v2142_v58  ;;  %v2136_v1 = vand.u32 2147483647, %v3402_v62  ;;  %v2250_v32 = vmul.f32 %v2246_v20, %v2138_v0  ;;  %vm2268_vm6 = vcmp.ge.f32.partialorder %v3402_v62, 0.0 }
 0xdd1   :  { %2578 = vmatmul.msk.f32.vlgmr.msrb.gmra.mxu3 %vm2300_vm11, %v2287_v7 }
 0xdd2   :  { %2746 = vrcp.f32 %v2146_v63  ;;  %v2140_v55 = vmul.f32 0.3275911, %v2136_v1  ;;  %v2189_v10 = vand.u32 2147483648, %v2146_v63  ;;  %v2187_v14 = vand.u32 2147483647, %v2146_v63 }
 0xdd3   :  { %vm2183_vm8 = vweird.f32 %v2146_v63  ;;  %v2244_v47 = vsub.f32 0.0, %v2136_v1  ;;  %v2256_v51 = vmul.f32 1.442695, %v2250_v32 }
 0xdd4   :  { %v2144_v41 = vadd.f32 1.0, %v2140_v55  ;;  %vm2188_vm10 = vcmp.eq.f32.partialorder %v2187_v14, 8.507059e+37 }
 0xdd5   :  { %v2248_v54 = vmul.f32 %v2244_v47, %v2136_v1 }
 0xdd6   :  { %2748 = vrcp.f32 %v2144_v41  ;;  %v2157_v21 = vand.u32 2147483647, %v2144_v41  ;;  %v2159_v28 = vand.u32 2147483648, %v2144_v41  ;;  %vm2153_vm13 = vweird.f32 %v2144_v41 }
 0xdd7   :  { %v2079_v3 = vpop.f32.mrf.mxu1  ;;  %v2252_v58 = vmul.f32 1.442695, %v2248_v54 }
 0xdd8   :  { %v2747_v5 = vpop.eup %2746  ;;  %v3407_v56 = vadd.f32 %v3356_v4, %v2079_v3  ;;  %v2190_v4 = vor.u32 1.1754944e-38, %v2189_v10  ;;  %v2160_v40 = vor.u32 1.1754944e-38, %v2159_v28  ;;  %vm2158_vm15 = vcmp.eq.f32.partialorder %v2157_v21, 8.507059e+37 }
 0xdd9   :  { %v2179_v17 = vmul.f32 %v2747_v5, %v2146_v63  ;;  %vm2184_vm7 = vweird.f32 %v2747_v5 }
 0xdda   :  { %v3410_v6 = vmul.f32 0.70710677, %v3407_v56  ;;  %vm2185_vm9 = vmor %vm2183_vm8, %vm2184_vm7  ;;  %v2129_v62 = vmul.f32 0.5, %v3407_v56 }
 0xddb   :  { %v2180_v9 = vsub.f32 1.0, %v2179_v17 }
 0xddc   :  { %v3413_v11 = vand.u32 2147483647, %v3410_v6  ;;  %v2749_v12 = vpop.eup %2748  ;;  %vm2269_vm7 = vcmp.ge.f32.partialorder %v3410_v6, 0.0 }
 0xddd   :  { %v2181_v53 = vmul.f32 %v2747_v5, %v2180_v9  ;;  %v2149_v15 = vmul.f32 %v2749_v12, %v2144_v41  ;;  %vm2154_vm12 = vweird.f32 %v2749_v12 }
 0xdde   :  { %v2141_v16 = vmul.f32 0.3275911, %v3413_v11  ;;  %vm2155_vm14 = vmor %vm2153_vm13, %vm2154_vm12  ;;  %v2245_v17 = vsub.f32 0.0, %v3413_v11 }
 0xddf   :  { %v2182_v18 = vadd.f32 %v2747_v5, %v2181_v53  ;;  %v2150_v24 = vsub.f32 1.0, %v2149_v15 }
 0xde0   :  { %v2145_v33 = vadd.f32 1.0, %v2141_v16 }
 0xde1   :  { %v2186_v27 = vsel %vm2185_vm9, %v2747_v5, %v2182_v18  ;;  %v2151_v31 = vmul.f32 %v2749_v12, %v2150_v24  ;;  %v2249_v18 = vmul.f32 %v2245_v17, %v3413_v11 }
 0xde2   :  { %v2191_v29 = vsel %vm2188_vm10, %v2190_v4, %v2186_v27  ;;  %2750 = vrcp.f32 %v2145_v33  ;;  %v2174_v61 = vand.u32 2147483648, %v2145_v33  ;;  %v2172_v0 = vand.u32 2147483647, %v2145_v33 }
 0xde3   :  { %v2210_v34 = vmul.f32 1.0614054, %v2191_v29  ;;  %v2152_v35 = vadd.f32 %v2749_v12, %v2151_v31  ;;  %2752 = vpow2.f32 %v2256_v51  ;;  %vm2168_vm2 = vweird.f32 %v2145_v33 }
 0xde4   :  { %v2175_v55 = vor.u32 1.1754944e-38, %v2174_v61  ;;  %vm2173_vm4 = vcmp.eq.f32.partialorder %v2172_v0, 8.507059e+37  ;;  %2754 = vpow2.f32 %v2252_v58  ;;  %v2254_v31 = vmul.f32 1.442695, %v2249_v18 }
 0xde5   :  { %v2214_v23 = vadd.f32 -1.4531521, %v2210_v34  ;;  %v2156_v44 = vsel %vm2155_vm14, %v2749_v12, %v2152_v35  ;;  %v2130_v35 = vmul.f32 0.5, %v3390_v25 }
 0xde6   :  { %v2161_v43 = vsel %vm2158_vm15, %v2160_v40, %v2156_v44  ;;  %2756 = vpow2.f32 %v2254_v31 }
 0xde7   :  { %v2218_v38 = vmul.f32 %v2214_v23, %v2191_v29  ;;  %v2208_v49 = vmul.f32 1.0614054, %v2161_v43 }
 0xde8   :  { %v2751_v48 = vpop.eup %2750 }
 0xde9   :  { %v2222_v22 = vadd.f32 1.4214138, %v2218_v38  ;;  %v2164_v50 = vmul.f32 %v2751_v48, %v2145_v33  ;;  %v2212_v52 = vadd.f32 -1.4531521, %v2208_v49  ;;  %vm2169_vm1 = vweird.f32 %v2751_v48  ;;  %v2753_v12 = vpop.eup %2752 }
 0xdea   :  { %vm2170_vm3 = vmor %vm2168_vm2, %vm2169_vm1  ;;  %v2755_v33 = vpop.eup %2754 }
 0xdeb   :  { %v2226_v57 = vmul.f32 %v2222_v22, %v2191_v29  ;;  %v2165_v59 = vsub.f32 1.0, %v2164_v50  ;;  %v2216_v60 = vmul.f32 %v2212_v52, %v2161_v43 }
 0xdec   :  { %v2757_v50 = vpop.eup %2756 }
 0xded   :  { %v2230_v30 = vadd.f32 -0.28449672, %v2226_v57  ;;  %v2166_v46 = vmul.f32 %v2751_v48, %v2165_v59  ;;  %v2220_v37 = vadd.f32 1.4214138, %v2216_v60 }
 0xdef   :  { %v2234_v42 = vmul.f32 %v2230_v30, %v2191_v29  ;;  %v2167_v7 = vadd.f32 %v2751_v48, %v2166_v46  ;;  %v2224_v63 = vmul.f32 %v2220_v37, %v2161_v43 }
 0xdf1   :  { %v2238_v41 = vadd.f32 0.2548296, %v2234_v42  ;;  %v2171_v3 = vsel %vm2170_vm3, %v2751_v48, %v2167_v7  ;;  %v2228_v1 = vadd.f32 -0.28449672, %v2224_v63 }
 0xdf2   :  { %v2176_v5 = vsel %vm2173_vm4, %v2175_v55, %v2171_v3 }
 0xdf3   :  { %v2242_v9 = vmul.f32 %v2238_v41, %v2191_v29  ;;  %v2209_v10 = vmul.f32 1.0614054, %v2176_v5  ;;  %v2232_v53 = vmul.f32 %v2228_v1, %v2161_v43 }
 0xdf5   :  { %v2262_v14 = vmul.f32 %v2753_v12, %v2242_v9  ;;  %v2213_v15 = vadd.f32 -1.4531521, %v2209_v10  ;;  %v2236_v16 = vadd.f32 0.2548296, %v2232_v53 }
 0xdf7   :  { %v2266_v4 = vsub.f32 1.0, %v2262_v14  ;;  %v2217_v20 = vmul.f32 %v2213_v15, %v2176_v5  ;;  %v2240_v24 = vmul.f32 %v2236_v16, %v2161_v43 }
 0xdf9   :  { %v2274_v27 = vsub.f32 0.0, %v2266_v4  ;;  %v2221_v21 = vadd.f32 1.4214138, %v2217_v20  ;;  %v2260_v28 = vmul.f32 %v2755_v33, %v2240_v24 }
 0xdfb   :  { %v2278_v29 = vsel %vm2270_vm5, %v2266_v4, %v2274_v27  ;;  %v2225_v34 = vmul.f32 %v2221_v21, %v2176_v5  ;;  %v2264_v40 = vsub.f32 1.0, %v2260_v28 }
 0xdfc   :  { %v2282_v23 = vadd.f32 1.0, %v2278_v29 }
 0xdfd   :  { %v2229_v32 = vadd.f32 -0.28449672, %v2225_v34  ;;  %v2272_v38 = vsub.f32 0.0, %v2264_v40 }
 0xdfe   :  { %v2286_v44 = vmul.f32 %v2282_v23, %v2130_v35 }
 0xdff   :  { %v2233_v11 = vmul.f32 %v2229_v32, %v2176_v5  ;;  %v2276_v43 = vsel %vm2268_vm6, %v2264_v40, %v2272_v38 }
 0xe00   :  { %2577 = vmatmul.msk.f32.vlgmr.msrb.gmra.mxu2 %vm2300_vm11, %v2286_v44  ;;  %v2280_v47 = vadd.f32 1.0, %v2276_v43 }
 0xe01   :  { %v2237_v48 = vadd.f32 0.2548296, %v2233_v11 }
 0xe02   :  { %v2284_v49 = vmul.f32 %v2280_v47, %v2128_v45 }
 0xe03   :  { %v2241_v22 = vmul.f32 %v2237_v48, %v2176_v5 }
 0xe04   :  { %2575 = vmatmul.msk.f32.vlgmr.msrb.gmra.mxu0 %vm2300_vm11, %v2284_v49 }
 0xe05   :  { %v2261_v25 = vmul.f32 %v2757_v50, %v2241_v22 }
 0xe07   :  { %v2265_v51 = vsub.f32 1.0, %v2261_v25 }
 0xe09   :  { %v2273_v52 = vsub.f32 0.0, %v2265_v51 }
 0xe0b   :  { %v2277_v57 = vsel %vm2269_vm7, %v2265_v51, %v2273_v52 }
 0xe0c   :  { %v2281_v54 = vadd.f32 1.0, %v2277_v57 }
 0xe0e   :  { %v2285_v59 = vmul.f32 %v2281_v54, %v2129_v62 }
 0xe10   :  { %2576 = vmatmul.msk.f32.vlgmr.msrb.gmra.mxu1 %vm2300_vm11, %v2285_v59 }
 0xe54   :  { %v2390_v46 = vpop.f32.mrf.mxu3 }
 0xe55   :  { %v2391_v42 = vadd.f32 %v2643_v39, %v2390_v46  ;;  %v2490_v46 = vperm.slane %v3271_v2, 3 }
 0xe57   :  { %v2396_v7 = vadd.f32 %v2391_v42, %v3279_v8 }
 0xe59   :  { %v2406_v41 = vsel %vm63_vm0, %v2396_v7, 0.0 }
 0xe81   :  { %v2321_v60 = vpop.f32.mrf.mxu0 }
 0xe82   :  { %v2322_v61 = vadd.f32 %v2643_v39, %v2321_v60 }
 0xe83   :  { %v2367_v30 = vpop.f32.mrf.mxu2 }
 0xe84   :  { %v2368_v0 = vadd.f32 %v2643_v39, %v2367_v30  ;;  %v2393_v37 = vadd.f32 %v2322_v61, %v3295_v19 }
 0xe86   :  { %v2395_v6 = vadd.f32 %v2368_v0, %v3288_v36  ;;  %v2397_v56 = vsel %vm63_vm0, %v2393_v37, 0.0 }
 0xe87   :  { %2398 = vadd.xlane.f32.xlu0 %v2397_v56 }
 0xe88   :  { %v2403_v58 = vsel %vm63_vm0, %v2395_v6, 0.0 }
 0xe89   :  { %2404 = vadd.xlane.f32.xlu1 %v2403_v58 }
 0xe8d   :  { %v2344_v63 = vpop.f32.mrf.mxu1 }
 0xe8e   :  { %v2345_v55 = vadd.f32 %v2643_v39, %v2344_v63  ;;  %v2485_v39 = vperm.slane %v3271_v2, 2 }
 0xe8f   :  { %2407 = vadd.xlane.f32.xlu0 %v2406_v41 }
 0xe90   :  { %v2394_v3 = vadd.f32 %v2345_v55, %v3302_v13 }
 0xe92   :  { %v2400_v19 = vsel %vm63_vm0, %v2394_v3, 0.0 }
 0xe93   :  { %2401 = vadd.xlane.f32.xlu2 %v2400_v19 }
 0xefa   :  { %v2399_v36 = vpop.xlane.xlu0 %2398 }
 0xefb   :  { %v2409_v1 = vmul.f32 %v2399_v36, %v2874_v26 }
 0xefc   :  { %v2405_v5 = vpop.xlane.xlu1 %2404 }
 0xefd   :  { %v2411_v17 = vmul.f32 %v2405_v5, %v2874_v26  ;;  %v2413_v9 = vsub.f32 %v2393_v37, %v2409_v1 }
 0xeff   :  { %v3440_v10 = vsub.f32 %v2395_v6, %v2411_v17  ;;  %v2417_v8 = vmul.f32 %v2413_v9, %v2413_v9 }
 0xf01   :  { %v2419_v12 = vmul.f32 %v3440_v10, %v3440_v10  ;;  %v2421_v53 = vsel %vm63_vm0, %v2417_v8, 0.0 }
 0xf02   :  { %2422 = vadd.xlane.f32.xlu2 %v2421_v53  ;;  %v2408_v13 = vpop.xlane.xlu0 %2407 }
 0xf03   :  { %v2427_v14 = vsel %vm63_vm0, %v2419_v12, 0.0  ;;  %v2412_v15 = vmul.f32 %v2408_v13, %v2874_v26 }
 0xf04   :  { %2428 = vadd.xlane.f32.xlu0 %v2427_v14 }
 0xf05   :  { %v3447_v16 = vsub.f32 %v2396_v7, %v2412_v15 }
 0xf06   :  { %v2402_v18 = vpop.xlane.xlu2 %2401 }
 0xf07   :  { %v2410_v4 = vmul.f32 %v2402_v18, %v2874_v26  ;;  %v2420_v20 = vmul.f32 %v3447_v16, %v3447_v16 }
 0xf09   :  { %v3452_v24 = vsub.f32 %v2394_v3, %v2410_v4  ;;  %v2430_v33 = vsel %vm63_vm0, %v2420_v20, 0.0 }
 0xf0a   :  { %2431 = vadd.xlane.f32.xlu2 %v2430_v33 }
 0xf0b   :  { %v2418_v27 = vmul.f32 %v3452_v24, %v3452_v24 }
 0xf0d   :  { %v2424_v21 = vsel %vm63_vm0, %v2418_v27, 0.0 }
 0xf0e   :  { %2425 = vadd.xlane.f32.xlu1 %v2424_v21 }
 0xf75   :  { %v2423_v28 = vpop.xlane.xlu2 %2422 }
 0xf76   :  { %v2433_v31 = vmul.f32 %v2423_v28, %v2874_v26 }
 0xf77   :  { %v2429_v29 = vpop.xlane.xlu0 %2428 }
 0xf78   :  { %v2435_v34 = vmul.f32 %v2429_v29, %v2874_v26  ;;  %v2437_v35 = vadd.f32 1e-05, %v2433_v31 }
 0xf7a   :  { %v2439_v23 = vadd.f32 1e-05, %v2435_v34  ;;  %2758 = vrsqrt.f32 %v2437_v35  ;;  %vm2447_vm9 = vweird.f32 %v2437_v35 }
 0xf7c   :  { %2760 = vrsqrt.f32 %v2439_v23  ;;  %vm2467_vm12 = vweird.f32 %v2439_v23 }
 0xf7d   :  { %v2432_v40 = vpop.xlane.xlu2 %2431 }
 0xf7e   :  { %v2436_v32 = vmul.f32 %v2432_v40, %v2874_v26 }
 0xf80   :  { %v2759_v44 = vpop.eup %2758  ;;  %v2440_v38 = vadd.f32 1e-05, %v2436_v32 }
 0xf81   :  { %v2426_v11 = vpop.xlane.xlu1 %2425  ;;  %v2442_v45 = vmul.f32 %v2759_v44, %v2437_v35  ;;  %vm2448_vm11 = vweird.f32 %v2759_v44 }
 0xf82   :  { %v2761_v43 = vpop.eup %2760  ;;  %v2434_v47 = vmul.f32 %v2426_v11, %v2874_v26  ;;  %2762 = vrsqrt.f32 %v2440_v38  ;;  %vm2449_vm10 = vmor %vm2447_vm9, %vm2448_vm11  ;;  %vm2477_vm15 = vweird.f32 %v2440_v38 }
 0xf83   :  { %v2462_v48 = vmul.f32 %v2761_v43, %v2439_v23  ;;  %v2443_v49 = vmul.f32 %v2759_v44, %v2442_v45  ;;  %vm2468_vm8 = vweird.f32 %v2761_v43 }
 0xf84   :  { %v2438_v22 = vadd.f32 1e-05, %v2434_v47  ;;  %vm2469_vm13 = vmor %vm2467_vm12, %vm2468_vm8 }
 0xf85   :  { %v2463_v50 = vmul.f32 %v2761_v43, %v2462_v48  ;;  %v2444_v25 = vmul.f32 0.5, %v2443_v49 }
 0xf86   :  { %2764 = vrsqrt.f32 %v2438_v22  ;;  %vm2457_vm3 = vweird.f32 %v2438_v22 }
 0xf87   :  { %v2464_v51 = vmul.f32 0.5, %v2463_v50  ;;  %v2445_v52 = vsub.f32 1.5, %v2444_v25 }
 0xf88   :  { %v2763_v57 = vpop.eup %2762 }
 0xf89   :  { %v2465_v62 = vsub.f32 1.5, %v2464_v51  ;;  %v2446_v54 = vmul.f32 %v2759_v44, %v2445_v52  ;;  %v2472_v59 = vmul.f32 %v2763_v57, %v2440_v38  ;;  %vm2478_vm14 = vweird.f32 %v2763_v57 }
 0xf8a   :  { %vm2479_vm1 = vmor %vm2477_vm15, %vm2478_vm14 }
 0xf8b   :  { %v2466_v26 = vmul.f32 %v2761_v43, %v2465_v62  ;;  %v2450_v61 = vsel %vm2449_vm10, %v2759_v44, %v2446_v54  ;;  %v2473_v30 = vmul.f32 %v2763_v57, %v2472_v59 }
 0xf8c   :  { %v2765_v60 = vpop.eup %2764  ;;  %v2481_v0 = vmul.f32 %v2450_v61, %v2413_v9 }
 0xf8d   :  { %v2470_v37 = vsel %vm2469_vm13, %v2761_v43, %v2466_v26  ;;  %v2452_v6 = vmul.f32 %v2765_v60, %v2438_v22  ;;  %v2474_v56 = vmul.f32 0.5, %v2473_v30  ;;  %vm2458_vm2 = vweird.f32 %v2765_v60 }
 0xf8e   :  { %v2483_v42 = vmul.f32 %v2470_v37, %v3440_v10  ;;  %v2486_v58 = vmul.f32 %v2485_v39, %v2481_v0  ;;  %vm2459_vm4 = vmor %vm2457_vm3, %vm2458_vm2 }
 0xf8f   :  { %v2453_v7 = vmul.f32 %v2765_v60, %v2452_v6  ;;  %v2475_v55 = vsub.f32 1.5, %v2474_v56 }
 0xf90   :  { %v2488_v63 = vmul.f32 %v2485_v39, %v2483_v42  ;;  %v2491_v41 = vadd.f32 %v2490_v46, %v2486_v58 }
 0xf91   :  { %v2454_v3 = vmul.f32 0.5, %v2453_v7  ;;  %v2476_v36 = vmul.f32 %v2763_v57, %v2475_v55 }
 0xf92   :  { %v2493_v19 = vadd.f32 %v2490_v46, %v2488_v63  ;;  %v2579_v1 = vclamps-f32 %v2491_v41, 100.0 }
 0xf93   :  { %v2455_v5 = vsub.f32 1.5, %v2454_v3  ;;  %v2480_v17 = vsel %vm2479_vm1, %v2763_v57, %v2476_v36 }
 0xf94   :  { %v2581_v2 = vclamps-f32 %v2493_v19, 100.0  ;;  %2503 = vst.msk [vmem:[%s3495_s12] sm:$0xff] %vm63_vm0, %v2579_v1  ;;  %v2484_v9 = vmul.f32 %v2480_v17, %v3447_v16 }
 0xf95   :  { %v2456_v10 = vmul.f32 %v2765_v60, %v2455_v5 }
 0xf96   :  { %2505 = vst.msk [vmem:[%s3495_s12 + $0x10] sm:$0xff] %vm63_vm0, %v2581_v2  ;;  %v2489_v8 = vmul.f32 %v2485_v39, %v2484_v9 }
 0xf97   :  { %v2460_v12 = vsel %vm2459_vm4, %v2765_v60, %v2456_v10 }
 0xf98   :  { %v2482_v53 = vmul.f32 %v2460_v12, %v3452_v24  ;;  %v2494_v13 = vadd.f32 %v2490_v46, %v2489_v8 }
 0xf9a   :  { %v2487_v14 = vmul.f32 %v2485_v39, %v2482_v53  ;;  %v2582_v15 = vclamps-f32 %v2494_v13, 100.0 }
 0xf9c   :  { %v2492_v18 = vadd.f32 %v2490_v46, %v2487_v14  ;;  %2506 = vst.msk [vmem:[%s3495_s12 + $0x18] sm:$0xff] %vm63_vm0, %v2582_v15 }
 0xf9e   :  { %v2580_v16 = vclamps-f32 %v2492_v18, 100.0 }
 0xfa0   :  { %2504 = vst.msk [vmem:[%s3495_s12 + $0x8] sm:$0xff] %vm63_vm0, %v2580_v16 }

// kernel: hierarchical_transformer_fwd.7
= control target key start
LH: loop header
LB: loop body
LE: loop exit
PB: predicated region body
PF: predicated region fallthrough
CT: control target
= control target key end

     0   :  { %vm34_vm0 = vcmask 261120   ;;  %v2259_v8 = vmov 32.0   ;;  %vm245_vm14 = vcmask 253952   ;;  %s2262_s26 = smov 112   ;;  %s2263_s27 = smov 88   ;;  %s2856_s0 = inlined_call_operand.vmem [shape: f32[4,8,32], index: 0, kind: input, shape index: {}]   ;;  %s2857_s1 = inlined_call_operand.vmem [shape: f32[4,32], index: 1, kind: input, shape index: {}]   ;;  %s2858_s2 = inlined_call_operand.vmem [shape: f32[1,1,32], index: 2, kind: input, shape index: {}]   ;;  %s2859_s4 = inlined_call_operand.vmem [shape: f32[32,96], index: 4, kind: input, shape index: {}]   ;;  %s2860_s5 = inlined_call_operand.vmem [shape: f32[1,96], index: 5, kind: input, shape index: {}]   ;;  %s2861_s6 = inlined_call_operand.vmem [shape: f32[32,32], index: 6, kind: input, shape index: {}]   ;;  %s2862_s7 = inlined_call_operand.vmem [shape: f32[1,32], index: 7, kind: input, shape index: {}]   ;;  %s2863_s3 = inlined_call_operand.vmem [shape: f32[2,32], index: 3, kind: input, shape index: {}]   ;;  %s2864_s8 = inlined_call_operand.vmem [shape: f32[4,1,32], index: 8, kind: output, shape index: {}]  }
   0x1   :  { %v30_v0 = vld [vmem:[%s2856_s0 + $0x8] sm:$0xff]  ;;  %v29_v1 = vld [vmem:[%s2856_s0] sm:$0xff]  ;;  %v31_v4 = vld [vmem:[%s2856_s0 + $0x10] sm:$0xff]  ;;  %2159 = vrcp.f32 %v2259_v8  ;;  %s2264_s28 = smov 80   ;;  %s2265_s29 = smov 104  }
   0x2   :  { %v38_v2 = vsel %vm34_vm0, %v30_v0, 0.0  ;;  %v35_v3 = vsel %vm34_vm0, %v29_v1, 0.0  ;;  %v32_v5 = vld [vmem:[%s2856_s0 + $0x18] sm:$0xff]  ;;  %v41_v6 = vsel %vm34_vm0, %v31_v4, 0.0  ;;  %v2364_v56 = vld [vmem:[%s2857_s1] sm:$0xf] }
   0x3   :  { %39 = vadd.xlane.f32.xlu0 %v38_v2  ;;  %36 = vadd.xlane.f32.xlu1 %v35_v3  ;;  %v44_v7 = vsel %vm34_vm0, %v32_v5, 0.0  ;;  %s2266_s30 = smov 72   ;;  %s2267_s9 = smov 16  }
   0x4   :  { %s2268_s10 = smov 8   ;;  %s2269_s11 = smov 24  }
   0x7   :  { %v2160_v9 = vpop.eup %2159 }
   0x8   :  { %v48_v10 = vmul.f32 32.0, %v2160_v9  ;;  %vm52_vm1 = vweird.f32 %v2160_v9 }
   0xa   :  { %v49_v11 = vsub.f32 1.0, %v48_v10 }
   0xb   :  { %42 = vadd.xlane.f32.xlu0 %v41_v6  ;;  %45 = vadd.xlane.f32.xlu1 %v44_v7 }
   0xc   :  { %v50_v12 = vmul.f32 %v2160_v9, %v49_v11 }
   0xe   :  { %v51_v13 = vadd.f32 %v2160_v9, %v50_v12 }
  0x10   :  { %v2331_v14 = vsel %vm52_vm1, %v2160_v9, %v51_v13 }
  0x76   :  { %v40_v15 = vpop.xlane.xlu0 %39  ;;  %v37_v16 = vpop.xlane.xlu1 %36 }
  0x77   :  { %v55_v17 = vmul.f32 %v2331_v14, %v40_v15  ;;  %v54_v18 = vmul.f32 %v2331_v14, %v37_v16 }
  0x79   :  { %v2335_v19 = vsub.f32 %v30_v0, %v55_v17  ;;  %v2337_v20 = vsub.f32 %v29_v1, %v54_v18  ;;  %v130_v0 = vperm.slane %v2364_v56, 0 }
  0x7b   :  { %v63_v21 = vmul.f32 %v2335_v19, %v2335_v19  ;;  %v62_v22 = vmul.f32 %v2337_v20, %v2337_v20 }
  0x7d   :  { %v69_v23 = vsel %vm34_vm0, %v63_v21, 0.0  ;;  %v66_v24 = vsel %vm34_vm0, %v62_v22, 0.0 }
  0x7e   :  { %70 = vadd.xlane.f32.xlu2 %v69_v23  ;;  %v43_v25 = vpop.xlane.xlu0 %42  ;;  %67 = vadd.xlane.f32.xlu0 %v66_v24  ;;  %v46_v26 = vpop.xlane.xlu1 %45 }
  0x7f   :  { %v56_v27 = vmul.f32 %v2331_v14, %v43_v25  ;;  %v57_v28 = vmul.f32 %v2331_v14, %v46_v26 }
  0x81   :  { %v2347_v29 = vsub.f32 %v31_v4, %v56_v27  ;;  %v2349_v30 = vsub.f32 %v32_v5, %v57_v28  ;;  %v135_v5 = vperm.slane %v2364_v56, 1 }
  0x83   :  { %v64_v31 = vmul.f32 %v2347_v29, %v2347_v29  ;;  %v65_v32 = vmul.f32 %v2349_v30, %v2349_v30 }
  0x85   :  { %v72_v33 = vsel %vm34_vm0, %v64_v31, 0.0  ;;  %v75_v34 = vsel %vm34_vm0, %v65_v32, 0.0 }
  0x86   :  { %73 = vadd.xlane.f32.xlu2 %v72_v33  ;;  %76 = vadd.xlane.f32.xlu1 %v75_v34 }
  0xf1   :  { %v71_v35 = vpop.xlane.xlu2 %70  ;;  %v68_v36 = vpop.xlane.xlu0 %67 }
  0xf2   :  { %v79_v37 = vmul.f32 %v71_v35, %v2331_v14  ;;  %v78_v38 = vmul.f32 %v68_v36, %v2331_v14 }
  0xf4   :  { %v83_v39 = vadd.f32 1e-05, %v79_v37  ;;  %v82_v40 = vadd.f32 1e-05, %v78_v38 }
  0xf6   :  { %2161 = vrsqrt.f32 %v83_v39  ;;  %vm92_vm2 = vweird.f32 %v82_v40  ;;  %vm102_vm5 = vweird.f32 %v83_v39 }
  0xf7   :  { %2163 = vrsqrt.f32 %v82_v40 }
  0xf9   :  { %v74_v41 = vpop.xlane.xlu2 %73  ;;  %v77_v42 = vpop.xlane.xlu1 %76 }
  0xfa   :  { %v80_v43 = vmul.f32 %v74_v41, %v2331_v14  ;;  %v81_v44 = vmul.f32 %v77_v42, %v2331_v14 }
  0xfc   :  { %v2162_v45 = vpop.eup %2161  ;;  %v84_v46 = vadd.f32 1e-05, %v80_v43  ;;  %v85_v47 = vadd.f32 1e-05, %v81_v44 }
  0xfd   :  { %v2164_v48 = vpop.eup %2163  ;;  %v97_v49 = vmul.f32 %v2162_v45, %v83_v39  ;;  %vm103_vm4 = vweird.f32 %v2162_v45 }
  0xfe   :  { %v87_v50 = vmul.f32 %v2164_v48, %v82_v40  ;;  %2165 = vrsqrt.f32 %v84_v46  ;;  %vm93_vm3 = vweird.f32 %v2164_v48  ;;  %vm104_vm7 = vmor %vm102_vm5, %vm103_vm4  ;;  %vm122_vm8 = vweird.f32 %v85_v47 }
  0xff   :  { %v98_v51 = vmul.f32 %v2162_v45, %v97_v49  ;;  %2167 = vrsqrt.f32 %v85_v47  ;;  %vm94_vm6 = vmor %vm92_vm2, %vm93_vm3  ;;  %vm112_vm11 = vweird.f32 %v84_v46 }
 0x100   :  { %v88_v52 = vmul.f32 %v2164_v48, %v87_v50 }
 0x101   :  { %v99_v53 = vmul.f32 0.5, %v98_v51  ;;  %v2403_v51 = vld [vmem:[%s2858_s2] sm:$0x1] }
 0x102   :  { %v89_v54 = vmul.f32 0.5, %v88_v52  ;;  %v246_v52 = vsel %vm245_vm14, %v2403_v51, 0.0 }
 0x103   :  { %v100_v55 = vsub.f32 1.5, %v99_v53 }
 0x104   :  { %v2166_v57 = vpop.eup %2165  ;;  %v90_v58 = vsub.f32 1.5, %v89_v54 }
 0x105   :  { %v2168_v59 = vpop.eup %2167  ;;  %v101_v60 = vmul.f32 %v2162_v45, %v100_v55  ;;  %v107_v61 = vmul.f32 %v2166_v57, %v84_v46  ;;  %vm113_vm10 = vweird.f32 %v2166_v57 }
 0x106   :  { %v91_v62 = vmul.f32 %v2164_v48, %v90_v58  ;;  %v117_v63 = vmul.f32 %v2168_v59, %v85_v47  ;;  %vm123_vm9 = vweird.f32 %v2168_v59  ;;  %vm114_vm13 = vmor %vm112_vm11, %vm113_vm10 }
 0x107   :  { %v108_v1 = vmul.f32 %v2166_v57, %v107_v61  ;;  %v105_v2 = vsel %vm104_vm7, %v2162_v45, %v101_v60  ;;  %vm124_vm12 = vmor %vm122_vm8, %vm123_vm9 }
 0x108   :  { %v118_v3 = vmul.f32 %v2168_v59, %v117_v63  ;;  %v127_v4 = vmul.f32 %v105_v2, %v2335_v19  ;;  %v95_v6 = vsel %vm94_vm6, %v2164_v48, %v91_v62 }
 0x109   :  { %v109_v7 = vmul.f32 0.5, %v108_v1  ;;  %v126_v8 = vmul.f32 %v95_v6, %v2337_v20 }
 0x10a   :  { %v119_v9 = vmul.f32 0.5, %v118_v3  ;;  %v132_v10 = vmul.f32 %v130_v0, %v127_v4 }
 0x10b   :  { %v110_v11 = vsub.f32 1.5, %v109_v7  ;;  %v131_v12 = vmul.f32 %v130_v0, %v126_v8 }
 0x10c   :  { %v120_v13 = vsub.f32 1.5, %v119_v9  ;;  %v137_v15 = vadd.f32 %v135_v5, %v132_v10 }
 0x10d   :  { %v111_v16 = vmul.f32 %v2166_v57, %v110_v11  ;;  %v136_v17 = vadd.f32 %v135_v5, %v131_v12 }
 0x10e   :  { %v121_v18 = vmul.f32 %v2168_v59, %v120_v13  ;;  %v143_v19 = vsel %vm34_vm0, %v137_v15, 0.0 }
 0x10f   :  { %144 = vadd.xlane.f32.xlu2 %v143_v19  ;;  %v140_v20 = vsel %vm34_vm0, %v136_v17, 0.0  ;;  %v115_v21 = vsel %vm114_vm13, %v2166_v57, %v111_v16  ;;  %v228_v19 = vperm.slane %v2364_v56, 2 }
 0x110   :  { %141 = vadd.xlane.f32.xlu1 %v140_v20  ;;  %v128_v22 = vmul.f32 %v115_v21, %v2347_v29  ;;  %v125_v23 = vsel %vm124_vm12, %v2168_v59, %v121_v18 }
 0x111   :  { %v129_v24 = vmul.f32 %v125_v23, %v2349_v30 }
 0x112   :  { %v133_v25 = vmul.f32 %v130_v0, %v128_v22 }
 0x113   :  { %v134_v26 = vmul.f32 %v130_v0, %v129_v24  ;;  %v233_v24 = vperm.slane %v2364_v56, 3 }
 0x114   :  { %v138_v27 = vadd.f32 %v135_v5, %v133_v25 }
 0x115   :  { %v139_v28 = vadd.f32 %v135_v5, %v134_v26 }
 0x116   :  { %v146_v31 = vsel %vm34_vm0, %v138_v27, 0.0 }
 0x117   :  { %147 = vadd.xlane.f32.xlu0 %v146_v31  ;;  %v149_v32 = vsel %vm34_vm0, %v139_v28, 0.0 }
 0x118   :  { %150 = vadd.xlane.f32.xlu2 %v149_v32 }
 0x182   :  { %v145_v33 = vpop.xlane.xlu2 %144 }
 0x183   :  { %v153_v34 = vmul.f32 %v145_v33, %v2331_v14  ;;  %v142_v35 = vpop.xlane.xlu1 %141 }
 0x184   :  { %v152_v36 = vmul.f32 %v142_v35, %v2331_v14 }
 0x185   :  { %v2378_v29 = vsub.f32 %v137_v15, %v153_v34 }
 0x186   :  { %v2380_v37 = vsub.f32 %v136_v17, %v152_v36 }
 0x187   :  { %v161_v30 = vmul.f32 %v2378_v29, %v2378_v29 }
 0x188   :  { %v160_v38 = vmul.f32 %v2380_v37, %v2380_v37 }
 0x189   :  { %v167_v39 = vsel %vm34_vm0, %v161_v30, 0.0 }
 0x18a   :  { %168 = vadd.xlane.f32.xlu0 %v167_v39  ;;  %v148_v40 = vpop.xlane.xlu0 %147  ;;  %v164_v41 = vsel %vm34_vm0, %v160_v38, 0.0 }
 0x18b   :  { %v154_v42 = vmul.f32 %v148_v40, %v2331_v14  ;;  %v151_v43 = vpop.xlane.xlu2 %150  ;;  %165 = vadd.xlane.f32.xlu2 %v164_v41 }
 0x18c   :  { %v155_v44 = vmul.f32 %v151_v43, %v2331_v14 }
 0x18d   :  { %v2390_v45 = vsub.f32 %v138_v27, %v154_v42 }
 0x18e   :  { %v2392_v46 = vsub.f32 %v139_v28, %v155_v44 }
 0x18f   :  { %v162_v47 = vmul.f32 %v2390_v45, %v2390_v45 }
 0x190   :  { %v163_v48 = vmul.f32 %v2392_v46, %v2392_v46 }
 0x191   :  { %v170_v49 = vsel %vm34_vm0, %v162_v47, 0.0 }
 0x192   :  { %171 = vadd.xlane.f32.xlu1 %v170_v49  ;;  %v173_v50 = vsel %vm34_vm0, %v163_v48, 0.0 }
 0x193   :  { %174 = vadd.xlane.f32.xlu0 %v173_v50 }
 0x19b   :  { %247 = vadd.xlane.f32.xlu0 %v246_v52 }
 0x1fd   :  { %v169_v53 = vpop.xlane.xlu0 %168 }
 0x1fe   :  { %v177_v54 = vmul.f32 %v169_v53, %v2331_v14  ;;  %v166_v55 = vpop.xlane.xlu2 %165 }
 0x1ff   :  { %v176_v57 = vmul.f32 %v166_v55, %v2331_v14 }
 0x200   :  { %v181_v58 = vadd.f32 1e-05, %v177_v54 }
 0x201   :  { %v180_v59 = vadd.f32 1e-05, %v176_v57  ;;  %v241_v57 = vld [vmem:[%s2859_s4 + $0x18] sm:$0xff] }
 0x202   :  { %2169 = vrsqrt.f32 %v181_v58  ;;  %vm200_vm2 = vweird.f32 %v181_v58  ;;  %283 = vmatpush.msra.mxu0 %v241_v57 }
 0x203   :  { %2171 = vrsqrt.f32 %v180_v59  ;;  %vm190_vm4 = vweird.f32 %v180_v59 }
 0x205   :  { %v172_v60 = vpop.xlane.xlu1 %171 }
 0x206   :  { %v175_v61 = vpop.xlane.xlu0 %174  ;;  %v178_v62 = vmul.f32 %v172_v60, %v2331_v14 }
 0x207   :  { %v179_v63 = vmul.f32 %v175_v61, %v2331_v14  ;;  %v239_v61 = vld [vmem:[%s2859_s4 + $0x8] sm:$0xff] }
 0x208   :  { %v2170_v0 = vpop.eup %2169  ;;  %v182_v1 = vadd.f32 1e-05, %v178_v62 }
 0x209   :  { %v2172_v2 = vpop.eup %2171  ;;  %v195_v3 = vmul.f32 %v2170_v0, %v181_v58  ;;  %v183_v4 = vadd.f32 1e-05, %v179_v63  ;;  %vm201_vm15 = vweird.f32 %v2170_v0 }
 0x20a   :  { %v185_v5 = vmul.f32 %v2172_v2, %v180_v59  ;;  %2173 = vrsqrt.f32 %v182_v1  ;;  %vm191_vm1 = vweird.f32 %v2172_v2  ;;  %vm202_vm3 = vmor %vm200_vm2, %vm201_vm15  ;;  %vm210_vm8 = vweird.f32 %v182_v1 }
 0x20b   :  { %v196_v6 = vmul.f32 %v2170_v0, %v195_v3  ;;  %2175 = vrsqrt.f32 %v183_v4  ;;  %vm192_vm5 = vmor %vm190_vm4, %vm191_vm1  ;;  %vm220_vm9 = vweird.f32 %v183_v4 }
 0x20c   :  { %v186_v7 = vmul.f32 %v2172_v2, %v185_v5 }
 0x20d   :  { %v197_v8 = vmul.f32 0.5, %v196_v6 }
 0x20e   :  { %v187_v9 = vmul.f32 0.5, %v186_v7  ;;  %v248_v43 = vpop.xlane.xlu0 %247 }
 0x20f   :  { %v198_v10 = vsub.f32 1.5, %v197_v8  ;;  %v249_v49 = vmul.f32 %v248_v43, %v2331_v14 }
 0x210   :  { %v2174_v11 = vpop.eup %2173  ;;  %v188_v12 = vsub.f32 1.5, %v187_v9 }
 0x211   :  { %v2176_v13 = vpop.eup %2175  ;;  %v199_v15 = vmul.f32 %v2170_v0, %v198_v10  ;;  %v205_v16 = vmul.f32 %v2174_v11, %v182_v1  ;;  %vm211_vm6 = vweird.f32 %v2174_v11  ;;  %v250_v52 = vsub.f32 %v2403_v51, %v249_v49  ;;  %v240_v51 = vld [vmem:[%s2859_s4 + $0x10] sm:$0xff] }
 0x212   :  { %v189_v17 = vmul.f32 %v2172_v2, %v188_v12  ;;  %v215_v18 = vmul.f32 %v2176_v13, %v183_v4  ;;  %vm221_vm7 = vweird.f32 %v2176_v13  ;;  %vm212_vm10 = vmor %vm210_vm8, %vm211_vm6  ;;  %284 = vmatpush.msra.mxu0 %v240_v51 }
 0x213   :  { %v206_v20 = vmul.f32 %v2174_v11, %v205_v16  ;;  %v203_v21 = vsel %vm202_vm3, %v2170_v0, %v199_v15  ;;  %vm222_vm11 = vmor %vm220_vm9, %vm221_vm7  ;;  %v251_v53 = vmul.f32 %v250_v52, %v250_v52  ;;  %v2108_v16 = vpack.i.bf16 %v240_v51, %v241_v57 }
 0x214   :  { %v216_v22 = vmul.f32 %v2176_v13, %v215_v18  ;;  %v225_v23 = vmul.f32 %v203_v21, %v2378_v29  ;;  %v193_v25 = vsel %vm192_vm5, %v2172_v2, %v189_v17  ;;  %285 = vmatpush.msra.mxu0 %v239_v61  ;;  %v238_v2 = vld [vmem:[%s2859_s4] sm:$0xff]  ;;  %s2260_s4 = smov 96  }
 0x215   :  { %v207_v26 = vmul.f32 0.5, %v206_v20  ;;  %v224_v31 = vmul.f32 %v193_v25, %v2380_v37  ;;  %v2113_v21 = vpack.i.bf16 %v238_v2, %v239_v61 }
 0x216   :  { %v217_v27 = vmul.f32 0.5, %v216_v22  ;;  %v230_v28 = vmul.f32 %v228_v19, %v225_v23  ;;  %286 = vmatpush.msra.mxu0 %v238_v2 }
 0x217   :  { %v208_v32 = vsub.f32 1.5, %v207_v26  ;;  %v229_v30 = vmul.f32 %v228_v19, %v224_v31 }
 0x218   :  { %v218_v33 = vsub.f32 1.5, %v217_v27  ;;  %v235_v34 = vadd.f32 %v233_v24, %v230_v28 }
 0x219   :  { %v209_v35 = vmul.f32 %v2174_v11, %v208_v32  ;;  %v234_v37 = vadd.f32 %v233_v24, %v229_v30 }
 0x21a   :  { %v219_v36 = vmul.f32 %v2176_v13, %v218_v33  ;;  %v294_v29 = vsel %vm34_vm0, %v235_v34, 0.0 }
 0x21b   :  { %295 = vadd.xlane.f32.xlu1 %v294_v29  ;;  %v213_v56 = vsel %vm212_vm10, %v2174_v11, %v209_v35  ;;  %v291_v44 = vsel %vm34_vm0, %v234_v37, 0.0 }
 0x21c   :  { %v226_v38 = vmul.f32 %v213_v56, %v2390_v45  ;;  %v223_v39 = vsel %vm222_vm11, %v2176_v13, %v219_v36 }
 0x21d   :  { %v227_v41 = vmul.f32 %v223_v39, %v2392_v46  ;;  %v252_v46 = vsel %vm245_vm14, %v251_v53, 0.0  ;;  %v2158_v53 = vld [vmem:[%s2860_s5] ss:$0 sm:$0xff] }
 0x21e   :  { %v231_v40 = vmul.f32 %v228_v19, %v226_v38 }
 0x21f   :  { %v232_v48 = vmul.f32 %v228_v19, %v227_v41 }
 0x220   :  { %v236_v42 = vadd.f32 %v233_v24, %v231_v40 }
 0x221   :  { %v237_v50 = vadd.f32 %v233_v24, %v232_v48 }
 0x222   :  { %v297_v47 = vsel %vm34_vm0, %v236_v42, 0.0 }
 0x223   :  { %292 = vadd.xlane.f32.xlu1 %v291_v44  ;;  %298 = vadd.xlane.f32.xlu2 %v297_v47  ;;  %v300_v45 = vsel %vm34_vm0, %v237_v50, 0.0 }
 0x22b   :  { %301 = vadd.xlane.f32.xlu2 %v300_v45 }
 0x233   :  { %253 = vadd.xlane.f32.xlu2 %v252_v46 }
 0x28e   :  { %v296_v54 = vpop.xlane.xlu1 %295 }
 0x28f   :  { %v304_v55 = vmul.f32 %v296_v54, %v2331_v14 }
 0x291   :  { %v2428_v58 = vsub.f32 %v235_v34, %v304_v55 }
 0x293   :  { %v312_v59 = vmul.f32 %v2428_v58, %v2428_v58 }
 0x295   :  { %v318_v60 = vsel %vm34_vm0, %v312_v59, 0.0 }
 0x296   :  { %v299_v62 = vpop.xlane.xlu2 %298  ;;  %319 = vadd.xlane.f32.xlu0 %v318_v60  ;;  %v293_v63 = vpop.xlane.xlu1 %292 }
 0x297   :  { %v305_v0 = vmul.f32 %v299_v62, %v2331_v14  ;;  %v303_v1 = vmul.f32 %v293_v63, %v2331_v14 }
 0x299   :  { %v2444_v3 = vsub.f32 %v236_v42, %v305_v0  ;;  %v2446_v4 = vsub.f32 %v234_v37, %v303_v1 }
 0x29b   :  { %v313_v5 = vmul.f32 %v2444_v3, %v2444_v3  ;;  %v311_v6 = vmul.f32 %v2446_v4, %v2446_v4 }
 0x29d   :  { %v321_v7 = vsel %vm34_vm0, %v313_v5, 0.0  ;;  %v315_v8 = vsel %vm34_vm0, %v311_v6, 0.0 }
 0x29e   :  { %322 = vadd.xlane.f32.xlu1 %v321_v7  ;;  %v302_v9 = vpop.xlane.xlu2 %301  ;;  %316 = vadd.xlane.f32.xlu2 %v315_v8 }
 0x29f   :  { %v306_v10 = vmul.f32 %v302_v9, %v2331_v14 }
 0x2a1   :  { %v2455_v11 = vsub.f32 %v237_v50, %v306_v10 }
 0x2a3   :  { %v314_v12 = vmul.f32 %v2455_v11, %v2455_v11 }
 0x2a5   :  { %v324_v13 = vsel %vm34_vm0, %v314_v12, 0.0 }
 0x2a6   :  { %v254_v15 = vpop.xlane.xlu2 %253  ;;  %325 = vadd.xlane.f32.xlu2 %v324_v13 }
 0x2a7   :  { %v255_v17 = vmul.f32 %v254_v15, %v2331_v14 }
 0x2a9   :  { %v256_v18 = vadd.f32 1e-05, %v255_v17 }
 0x2aa   :  { %2109 = vrot.lane.b32.xlu0 %v2108_v16, %s2260_s4 }
 0x2ab   :  { %2177 = vrsqrt.f32 %v256_v18  ;;  %vm263_vm12 = vweird.f32 %v256_v18 }
 0x2b1   :  { %v2178_v19 = vpop.eup %2177 }
 0x2b2   :  { %v258_v20 = vmul.f32 %v2178_v19, %v256_v18  ;;  %vm264_vm13 = vweird.f32 %v2178_v19 }
 0x2b3   :  { %vm265_vm15 = vmor %vm263_vm12, %vm264_vm13  ;;  %vm497_vm13 = vcmask 64512  }
 0x2b4   :  { %v259_v22 = vmul.f32 %v2178_v19, %v258_v20 }
 0x2b6   :  { %v260_v23 = vmul.f32 0.5, %v259_v22 }
 0x2b7   :  { %2114 = vrot.lane.b32.xlu1 %v2113_v21, %s2260_s4 }
 0x2b8   :  { %v261_v24 = vsub.f32 1.5, %v260_v23 }
 0x2ba   :  { %v262_v25 = vmul.f32 %v2178_v19, %v261_v24 }
 0x2bc   :  { %v266_v26 = vsel %vm265_vm15, %v2178_v19, %v262_v25  ;;  %vm597_vm15 = vcmask 57344  }
 0x2bd   :  { %v267_v27 = vmul.f32 %v266_v26, %v250_v52 }
 0x2be   :  { %397 = vrot.lane.b32.xlu2 %v2158_v53, %s2260_s4 }
 0x2bf   :  { %2036 = vmatmul.msk.f32.vlgmr.msra.gmra.mxu0 %vm34_vm0, %v267_v27 }
 0x309   :  { %v320_v28 = vpop.xlane.xlu0 %319 }
 0x30a   :  { %v328_v31 = vmul.f32 %v320_v28, %v2331_v14 }
 0x30c   :  { %v332_v32 = vadd.f32 1e-05, %v328_v31 }
 0x30e   :  { %2179 = vrsqrt.f32 %v332_v32  ;;  %vm351_vm3 = vweird.f32 %v332_v32 }
 0x311   :  { %v317_v33 = vpop.xlane.xlu2 %316  ;;  %v323_v34 = vpop.xlane.xlu1 %322 }
 0x312   :  { %v327_v35 = vmul.f32 %v317_v33, %v2331_v14  ;;  %v329_v36 = vmul.f32 %v323_v34, %v2331_v14 }
 0x314   :  { %v2467_v29 = vpop.eup %2179  ;;  %v331_v30 = vadd.f32 1e-05, %v327_v35  ;;  %v333_v56 = vadd.f32 1e-05, %v329_v36 }
 0x315   :  { %v346_v38 = vmul.f32 %v2467_v29, %v332_v32  ;;  %vm352_vm1 = vweird.f32 %v2467_v29 }
 0x316   :  { %2181 = vrsqrt.f32 %v331_v30  ;;  %vm2484_vm5 = vmor %vm351_vm3, %vm352_vm1  ;;  %vm341_vm6 = vweird.f32 %v331_v30  ;;  %vm361_vm8 = vweird.f32 %v333_v56 }
 0x317   :  { %2183 = vrsqrt.f32 %v333_v56  ;;  %v347_v40 = vmul.f32 %v2467_v29, %v346_v38 }
 0x319   :  { %v326_v39 = vpop.xlane.xlu2 %325  ;;  %v348_v52 = vmul.f32 0.5, %v347_v40 }
 0x31a   :  { %v330_v37 = vmul.f32 %v326_v39, %v2331_v14 }
 0x31b   :  { %v349_v57 = vsub.f32 1.5, %v348_v52 }
 0x31c   :  { %v2182_v41 = vpop.eup %2181  ;;  %v334_v42 = vadd.f32 1e-05, %v330_v37  ;;  %v2110_v43 = vpop.permute.xlu0 %2109 }
 0x31d   :  { %v2472_v44 = vpop.eup %2183  ;;  %v336_v47 = vmul.f32 %v2182_v41, %v331_v30  ;;  %v2112_v48 = vunpack.i.h.bf16 %v2110_v43  ;;  %v2111_v49 = vunpack.i.l.bf16 %v2110_v43  ;;  %vm342_vm2 = vweird.f32 %v2182_v41 }
 0x31e   :  { %v356_v50 = vmul.f32 %v2472_v44, %v333_v56  ;;  %2185 = vrsqrt.f32 %v334_v42  ;;  %v350_v0 = vmul.f32 %v2467_v29, %v349_v57  ;;  %vm362_vm4 = vweird.f32 %v2472_v44  ;;  %vm2488_vm7 = vmor %vm341_vm6, %vm342_vm2 }
 0x31f   :  { %v337_v45 = vmul.f32 %v2182_v41, %v336_v47  ;;  %415 = vmatpush.msra.mxu1 %v2111_v49  ;;  %438 = vmatpush.msra.mxu2 %v2111_v49  ;;  %vm2492_vm9 = vmor %vm361_vm8, %vm362_vm4  ;;  %vm371_vm11 = vweird.f32 %v334_v42 }
 0x320   :  { %v357_v46 = vmul.f32 %v2472_v44, %v356_v50  ;;  %461 = vmatpush.msra.mxu3 %v2111_v49  ;;  %484 = vmatpush.msrb.mxu0 %v2111_v49  ;;  %v354_v13 = vsel %vm2484_vm5, %v2467_v29, %v350_v0 }
 0x321   :  { %v338_v54 = vmul.f32 0.5, %v337_v45  ;;  %416 = vmatpush.msra.mxu1 %v2112_v48  ;;  %439 = vmatpush.msra.mxu2 %v2112_v48  ;;  %v376_v19 = vmul.f32 %v354_v13, %v2428_v58  ;;  %v398_v24 = vpop.permute.xlu2 %397  ;;  %v242_v58 = vld [vmem:[%s2860_s5] sm:$0x1]  ;;  %s2261_s5 = smov 120  }
 0x322   :  { %v358_v55 = vmul.f32 0.5, %v357_v46  ;;  %462 = vmatpush.msra.mxu3 %v2112_v48  ;;  %485 = vmatpush.msrb.mxu0 %v2112_v48 }
 0x323   :  { %v339_v51 = vsub.f32 1.5, %v338_v54 }
 0x324   :  { %v2186_v59 = vpop.eup %2185  ;;  %v359_v60 = vsub.f32 1.5, %v358_v55 }
 0x325   :  { %v366_v61 = vmul.f32 %v2186_v59, %v334_v42  ;;  %v340_v63 = vmul.f32 %v2182_v41, %v339_v51  ;;  %vm372_vm10 = vweird.f32 %v2186_v59 }
 0x326   :  { %v360_v1 = vmul.f32 %v2472_v44, %v359_v60  ;;  %vm373_vm12 = vmor %vm371_vm11, %vm372_vm10 }
 0x327   :  { %v367_v62 = vmul.f32 %v2186_v59, %v366_v61  ;;  %v344_v12 = vsel %vm2488_vm7, %v2182_v41, %v340_v63 }
 0x328   :  { %v364_v16 = vsel %vm2492_vm9, %v2472_v44, %v360_v1  ;;  %v375_v18 = vmul.f32 %v344_v12, %v2446_v4 }
 0x329   :  { %v368_v5 = vmul.f32 0.5, %v367_v62  ;;  %v2115_v6 = vpop.permute.xlu1 %2114  ;;  %v377_v20 = vmul.f32 %v364_v16, %v2444_v3 }
 0x32a   :  { %v2116_v8 = vunpack.i.l.bf16 %v2115_v6  ;;  %v2117_v15 = vunpack.i.h.bf16 %v2115_v6 }
 0x32b   :  { %v369_v10 = vsub.f32 1.5, %v368_v5 }
 0x32c   :  { %417 = vmatpush.msra.mxu1 %v2116_v8  ;;  %440 = vmatpush.msra.mxu2 %v2116_v8 }
 0x32d   :  { %v370_v17 = vmul.f32 %v2186_v59, %v369_v10  ;;  %463 = vmatpush.msra.mxu3 %v2116_v8  ;;  %486 = vmatpush.msrb.mxu0 %v2116_v8 }
 0x32e   :  { %418 = vmatpush.msra.mxu1 %v2117_v15  ;;  %441 = vmatpush.msra.mxu2 %v2117_v15 }
 0x32f   :  { %464 = vmatpush.msra.mxu3 %v2117_v15  ;;  %487 = vmatpush.msrb.mxu0 %v2117_v15  ;;  %v374_v21 = vsel %vm373_vm12, %v2186_v59, %v370_v17 }
 0x330   :  { %2037 = vmatmul.msk.f32.vlgmr.msra.gmra.mxu1 %vm34_vm0, %v375_v18  ;;  %2038 = vmatmul.msk.f32.vlgmr.msra.gmra.mxu2 %vm34_vm0, %v376_v19  ;;  %v378_v22 = vmul.f32 %v374_v21, %v2455_v11 }
 0x331   :  { %2039 = vmatmul.msk.f32.vlgmr.msra.gmra.mxu3 %vm34_vm0, %v377_v20 }
 0x332   :  { %2040 = vmatmul.msk.f32.vlgmr.msrb.gmra.mxu0 %vm34_vm0, %v378_v22 }
 0x33c   :  { %v288_v23 = vpop.f32.mrf.mxu0 }
 0x33d   :  { %v2521_v11 = vadd.f32 %v288_v23, %v242_v58 }
 0x3ad   :  { %v420_v4 = vpop.f32.mrf.mxu1 }
 0x3ae   :  { %v2515_v3 = vadd.f32 %v420_v4, %v398_v24 }
 0x3af   :  { %v489_v25 = vpop.f32.mrf.mxu0 }
 0x3b0   :  { %v2517_v26 = vadd.f32 %v489_v25, %v398_v24  ;;  %2041 = vmatpush.xpose.msk.msrb.mxu1 %vm497_vm13, %v2515_v3 }
 0x3b2   :  { %2047 = vmatpush.xpose.msk.msra.mxu0 %vm497_vm13, %v2517_v26  ;;  %v2571_v6 = vpack.i.bf16 %v2517_v26, %v2515_v3 }
 0x3b3   :  { %v443_v27 = vpop.f32.mrf.mxu2  ;;  %2042 = vmatmul.msk.f32.vlgmr.msrb.gmra.mxu1 %vm497_vm13, %v2521_v11 }
 0x3b4   :  { %v2527_v28 = vadd.f32 %v443_v27, %v398_v24  ;;  %v466_v31 = vpop.f32.mrf.mxu3 }
 0x3b5   :  { %v2529_v32 = vadd.f32 %v466_v31, %v398_v24  ;;  %2048 = vmatmul.msk.f32.vlgmr.msra.gmra.mxu0 %vm497_vm13, %v2521_v11 }
 0x3b6   :  { %2043 = vmatpush.xpose.msk.msrb.mxu2 %vm497_vm13, %v2527_v28 }
 0x3b7   :  { %2045 = vmatpush.xpose.msk.msrb.mxu3 %vm497_vm13, %v2529_v32  ;;  %v2547_v42 = vpack.i.bf16 %v2529_v32, %v2527_v28 }
 0x3b9   :  { %2044 = vmatmul.msk.f32.vlgmr.msrb.gmra.mxu2 %vm497_vm13, %v2521_v11 }
 0x3ba   :  { %2046 = vmatmul.msk.f32.vlgmr.msrb.gmra.mxu3 %vm497_vm13, %v2521_v11 }
 0x430   :  { %v521_v33 = vpop.f32.mrf.mxu1 }
 0x431   :  { %v593_v34 = vmul.f32 0.35355338, %v521_v33 }
 0x432   :  { %v590_v39 = vpop.f32.mrf.mxu0 }
 0x433   :  { %v598_v35 = vsel %vm597_vm15, %v593_v34, -inf  ;;  %v596_v40 = vmul.f32 0.35355338, %v590_v39 }
 0x434   :  { %599 = vmax.xlane.f32.xlu2 %v598_v35 }
 0x435   :  { %v607_v41 = vsel %vm597_vm15, %v596_v40, -inf }
 0x43c   :  { %v544_v36 = vpop.f32.mrf.mxu2 }
 0x43d   :  { %v594_v29 = vmul.f32 0.35355338, %v544_v36  ;;  %v567_v30 = vpop.f32.mrf.mxu3 }
 0x43e   :  { %v595_v56 = vmul.f32 0.35355338, %v567_v30 }
 0x43f   :  { %v601_v38 = vsel %vm597_vm15, %v594_v29, -inf }
 0x440   :  { %v604_v37 = vsel %vm597_vm15, %v595_v56, -inf  ;;  %602 = vmax.xlane.f32.xlu0 %v601_v38 }
 0x441   :  { %605 = vmax.xlane.f32.xlu1 %v604_v37 }
 0x448   :  { %608 = vmax.xlane.f32.xlu0 %v607_v41 }
 0x45a   :  { %2119 = vrot.lane.b32.xlu1 %v2547_v42, %s2260_s4 }
 0x4a7   :  { %v600_v43 = vpop.xlane.xlu2 %599 }
 0x4a8   :  { %v610_v44 = vsub.f32 %v593_v34, %v600_v43 }
 0x4aa   :  { %v614_v47 = vmul.f32 1.442695, %v610_v44 }
 0x4ac   :  { %2187 = vpow2.f32 %v614_v47 }
 0x4b2   :  { %v2551_v48 = vpop.eup %2187 }
 0x4b3   :  { %v603_v49 = vpop.xlane.xlu0 %602  ;;  %v622_v50 = vsel %vm597_vm15, %v2551_v48, 0.0 }
 0x4b4   :  { %v606_v52 = vpop.xlane.xlu1 %605  ;;  %v611_v45 = vsub.f32 %v594_v29, %v603_v49  ;;  %623 = vadd.xlane.f32.xlu0 %v622_v50 }
 0x4b5   :  { %v612_v53 = vsub.f32 %v595_v56, %v606_v52 }
 0x4b6   :  { %v616_v46 = vmul.f32 1.442695, %v611_v45 }
 0x4b7   :  { %v618_v54 = vmul.f32 1.442695, %v612_v53 }
 0x4b8   :  { %2189 = vpow2.f32 %v616_v46 }
 0x4b9   :  { %2191 = vpow2.f32 %v618_v54 }
 0x4bb   :  { %v609_v55 = vpop.xlane.xlu0 %608 }
 0x4bc   :  { %v613_v57 = vsub.f32 %v596_v40, %v609_v55 }
 0x4be   :  { %v2555_v51 = vpop.eup %2189  ;;  %v620_v59 = vmul.f32 1.442695, %v613_v57 }
 0x4bf   :  { %v2557_v60 = vpop.eup %2191  ;;  %v625_v61 = vsel %vm597_vm15, %v2555_v51, 0.0 }
 0x4c0   :  { %2193 = vpow2.f32 %v620_v59  ;;  %626 = vadd.xlane.f32.xlu1 %v625_v61  ;;  %v628_v62 = vsel %vm597_vm15, %v2557_v60, 0.0 }
 0x4c1   :  { %629 = vadd.xlane.f32.xlu0 %v628_v62 }
 0x4c6   :  { %v2563_v63 = vpop.eup %2193 }
 0x4c7   :  { %v631_v0 = vsel %vm597_vm15, %v2563_v63, 0.0 }
 0x4c8   :  { %632 = vadd.xlane.f32.xlu2 %v631_v0 }
 0x4cc   :  { %v2120_v1 = vpop.permute.xlu1 %2119 }
 0x4cd   :  { %v2122_v2 = vunpack.i.h.bf16 %v2120_v1  ;;  %v2121_v5 = vunpack.i.l.bf16 %v2120_v1 }
 0x4cf   :  { %753 = vmatpush.msra.mxu2 %v2121_v5  ;;  %779 = vmatpush.msra.mxu3 %v2122_v2 }
 0x4d5   :  { %842 = vrot.lane.b32.xlu0 %v2527_v28, %s2261_s5 }
 0x4d9   :  { %814 = vrot.lane.b32.xlu1 %v2521_v11, %s2261_s5 }
 0x4dd   :  { %2124 = vrot.lane.b32.xlu0 %v2571_v6, %s2260_s4 }
 0x4e0   :  { %866 = vrot.lane.b32.xlu2 %v2529_v32, %s2261_s5 }
 0x4e1   :  { %816 = vrot.lane.b32.xlu1 %v2515_v3, %s2261_s5 }
 0x4e8   :  { %890 = vrot.lane.b32.xlu2 %v2517_v26, %s2261_s5 }
 0x527   :  { %v624_v7 = vpop.xlane.xlu0 %623 }
 0x528   :  { %v634_v8 = vadd.f32 1e-09, %v624_v7 }
 0x52a   :  { %2195 = vrcp.f32 %v634_v8  ;;  %v647_v58 = vand.u32 2147483647, %v634_v8  ;;  %v649_v25 = vand.u32 2147483648, %v634_v8  ;;  %vm643_vm2 = vweird.f32 %v634_v8 }
 0x52c   :  { %vm2584_vm6 = vcmp.eq.f32.partialorder %v647_v58, 8.507059e+37  ;;  %v650_v37 = vor.u32 1.1754944e-38, %v649_v25 }
 0x530   :  { %v2196_v9 = vpop.eup %2195 }
 0x531   :  { %v639_v10 = vmul.f32 %v2196_v9, %v634_v8  ;;  %vm644_vm1 = vweird.f32 %v2196_v9 }
 0x532   :  { %vm2578_vm3 = vmor %vm643_vm2, %vm644_vm1 }
 0x533   :  { %v627_v12 = vpop.xlane.xlu1 %626  ;;  %v640_v17 = vsub.f32 1.0, %v639_v10 }
 0x534   :  { %v635_v13 = vadd.f32 1e-09, %v627_v12  ;;  %v630_v15 = vpop.xlane.xlu0 %629 }
 0x535   :  { %v636_v16 = vadd.f32 1e-09, %v630_v15  ;;  %v641_v18 = vmul.f32 %v2196_v9, %v640_v17 }
 0x536   :  { %2197 = vrcp.f32 %v635_v13  ;;  %v662_v31 = vand.u32 2147483647, %v635_v13  ;;  %v664_v33 = vand.u32 2147483648, %v635_v13  ;;  %vm658_vm7 = vweird.f32 %v635_v13 }
 0x537   :  { %2199 = vrcp.f32 %v636_v16  ;;  %v642_v24 = vadd.f32 %v2196_v9, %v641_v18  ;;  %v679_v29 = vand.u32 2147483648, %v636_v16  ;;  %v677_v56 = vand.u32 2147483647, %v636_v16 }
 0x538   :  { %vm663_vm9 = vcmp.eq.f32.partialorder %v662_v31, 8.507059e+37  ;;  %v665_v44 = vor.u32 1.1754944e-38, %v664_v33  ;;  %vm673_vm10 = vweird.f32 %v636_v16 }
 0x539   :  { %v646_v38 = vsel %vm2578_vm3, %v2196_v9, %v642_v24  ;;  %v680_v49 = vor.u32 1.1754944e-38, %v679_v29  ;;  %vm678_vm12 = vcmp.eq.f32.partialorder %v677_v56, 8.507059e+37 }
 0x53a   :  { %v651_v45 = vsel %vm2584_vm6, %v650_v37, %v646_v38 }
 0x53b   :  { %v633_v19 = vpop.xlane.xlu2 %632  ;;  %v652_v0 = vmul.f32 %v2551_v48, %v651_v45 }
 0x53c   :  { %v2198_v20 = vpop.eup %2197  ;;  %v637_v21 = vadd.f32 1e-09, %v633_v19 }
 0x53d   :  { %v2200_v22 = vpop.eup %2199  ;;  %v654_v23 = vmul.f32 %v2198_v20, %v635_v13  ;;  %vm659_vm4 = vweird.f32 %v2198_v20  ;;  %v698_v13 = vmax.f32 %v652_v0, 1e-09 }
 0x53e   :  { %v669_v4 = vmul.f32 %v2200_v22, %v636_v16  ;;  %2201 = vrcp.f32 %v637_v21  ;;  %vm674_vm5 = vweird.f32 %v2200_v22  ;;  %vm660_vm8 = vmor %vm658_vm7, %vm659_vm4  ;;  %v694_v61 = vand.u32 2147483648, %v637_v21 }
 0x53f   :  { %v655_v27 = vsub.f32 1.0, %v654_v23  ;;  %vm675_vm11 = vmor %vm673_vm10, %vm674_vm5  ;;  %v692_v2 = vand.u32 2147483647, %v637_v21  ;;  %vm688_vm2 = vweird.f32 %v637_v21  ;;  %v702_v19 = vmin.f32 %v698_v13, 1.0 }
 0x540   :  { %v670_v34 = vsub.f32 1.0, %v669_v4  ;;  %v695_v12 = vor.u32 1.1754944e-38, %v694_v61 }
 0x541   :  { %v656_v36 = vmul.f32 %v2198_v20, %v655_v27  ;;  %vm693_vm4 = vcmp.eq.f32.partialorder %v692_v2, 8.507059e+37 }
 0x542   :  { %v671_v30 = vmul.f32 %v2200_v22, %v670_v34 }
 0x543   :  { %v657_v40 = vadd.f32 %v2198_v20, %v656_v36  ;;  %v867_v41 = vpop.permute.xlu2 %866 }
 0x544   :  { %v2202_v43 = vpop.eup %2201  ;;  %v672_v47 = vadd.f32 %v2200_v22, %v671_v30  ;;  %2057 = vmatpush.xpose.msk.msrb.mxu3 %vm497_vm13, %v867_v41 }
 0x545   :  { %v684_v50 = vmul.f32 %v2202_v43, %v637_v21  ;;  %v661_v52 = vsel %vm660_vm8, %v2198_v20, %v657_v40  ;;  %vm689_vm1 = vweird.f32 %v2202_v43 }
 0x546   :  { %v666_v53 = vsel %vm663_vm9, %v665_v44, %v661_v52  ;;  %v676_v46 = vsel %vm675_vm11, %v2200_v22, %v672_v47  ;;  %vm690_vm3 = vmor %vm688_vm2, %vm689_vm1 }
 0x547   :  { %v685_v54 = vsub.f32 1.0, %v684_v50  ;;  %v843_v55 = vpop.permute.xlu0 %842  ;;  %v667_v57 = vmul.f32 %v2555_v51, %v666_v53  ;;  %v681_v59 = vsel %vm678_vm12, %v680_v49, %v676_v46 }
 0x548   :  { %2055 = vmatpush.xpose.msk.msrb.mxu2 %vm497_vm13, %v843_v55  ;;  %v682_v62 = vmul.f32 %v2557_v60, %v681_v59 }
 0x549   :  { %v686_v1 = vmul.f32 %v2202_v43, %v685_v54  ;;  %v699_v5 = vmax.f32 %v667_v57, 1e-09 }
 0x54a   :  { %v700_v7 = vmax.f32 %v682_v62, 1e-09 }
 0x54b   :  { %v687_v8 = vadd.f32 %v2202_v43, %v686_v1  ;;  %v815_v9 = vpop.permute.xlu1 %814  ;;  %v703_v10 = vmin.f32 %v699_v5, 1.0  ;;  %v891_v21 = vpop.permute.xlu2 %890 }
 0x54c   :  { %v704_v51 = vmin.f32 %v700_v7, 1.0 }
 0x54d   :  { %2050 = vmatmul.msk.f32.vlgmr.msra.gmra.mxu2 %vm497_vm13, %v703_v10  ;;  %v691_v15 = vsel %vm690_vm3, %v2202_v43, %v687_v8 }
 0x54e   :  { %2051 = vmatmul.msk.f32.vlgmr.msra.gmra.mxu3 %vm497_vm13, %v704_v51  ;;  %v696_v48 = vsel %vm693_vm4, %v695_v12, %v691_v15 }
 0x54f   :  { %v2125_v60 = vpop.permute.xlu0 %2124  ;;  %v697_v16 = vmul.f32 %v2563_v63, %v696_v48 }
 0x550   :  { %v2127_v17 = vunpack.i.h.bf16 %v2125_v60  ;;  %v2126_v18 = vunpack.i.l.bf16 %v2125_v60 }
 0x551   :  { %v701_v20 = vmax.f32 %v697_v16, 1e-09 }
 0x552   :  { %727 = vmatpush.msra.mxu1 %v2126_v18  ;;  %805 = vmatpush.msrb.mxu0 %v2127_v17 }
 0x553   :  { %2049 = vmatmul.msk.f32.vlgmr.msra.gmra.mxu1 %vm497_vm13, %v702_v19  ;;  %v817_v22 = vpop.permute.xlu1 %816  ;;  %v705_v23 = vmin.f32 %v701_v20, 1.0 }
 0x554   :  { %2059 = vmatpush.xpose.msk.msra.mxu0 %vm497_vm13, %v891_v21  ;;  %2053 = vmatpush.xpose.msk.msrb.mxu1 %vm497_vm13, %v817_v22 }
 0x555   :  { %2052 = vmatmul.msk.f32.vlgmr.msrb.gmra.mxu0 %vm497_vm13, %v705_v23  ;;  %2056 = vmatmul.msk.f32.vlgmr.msrb.gmra.mxu2 %vm497_vm13, %v815_v9 }
 0x556   :  { %2058 = vmatmul.msk.f32.vlgmr.msrb.gmra.mxu3 %vm497_vm13, %v815_v9 }
 0x55b   :  { %2054 = vmatmul.msk.f32.vlgmr.msrb.gmra.mxu1 %vm497_vm13, %v815_v9 }
 0x55d   :  { %2060 = vmatmul.msk.f32.vlgmr.msra.gmra.mxu0 %vm497_vm13, %v815_v9 }
 0x5d0   :  { %v729_v63 = vpop.f32.mrf.mxu1  ;;  %v755_v24 = vpop.f32.mrf.mxu2 }
 0x5d1   :  { %810 = vst.msk [vmem:[#allocation2] sm:$0x1] %vm597_vm15, %v729_v63  ;;  %v781_v4 = vpop.f32.mrf.mxu3 }
 0x5d2   :  { %811 = vst.msk [vmem:[#allocation2 + $0x1] sm:$0x1] %vm597_vm15, %v755_v24  ;;  %v807_v58 = vpop.f32.mrf.mxu0 }
 0x5d3   :  { %812 = vst.msk [vmem:[#allocation2 + $0x2] sm:$0x1] %vm597_vm15, %v781_v4 }
 0x5d4   :  { %813 = vst.msk [vmem:[#allocation2 + $0x3] sm:$0x1] %vm597_vm15, %v807_v58 }
 0x5d8   :  { %v839_v25 = vpop.f32.mrf.mxu1  ;;  %v863_v27 = vpop.f32.mrf.mxu2 }
 0x5d9   :  { %v914_v31 = vmul.f32 0.35355338, %v839_v25  ;;  %v915_v33 = vmul.f32 0.35355338, %v863_v27  ;;  %v887_v34 = vpop.f32.mrf.mxu3 }
 0x5da   :  { %v916_v35 = vmul.f32 0.35355338, %v887_v34  ;;  %v911_v30 = vpop.f32.mrf.mxu0 }
 0x5db   :  { %v918_v36 = vsel %vm597_vm15, %v914_v31, -inf  ;;  %v921_v29 = vsel %vm597_vm15, %v915_v33, -inf  ;;  %v917_v38 = vmul.f32 0.35355338, %v911_v30 }
 0x5dc   :  { %919 = vmax.xlane.f32.xlu2 %v918_v36  ;;  %922 = vmax.xlane.f32.xlu0 %v921_v29  ;;  %v924_v56 = vsel %vm597_vm15, %v916_v35, -inf }
 0x5dd   :  { %925 = vmax.xlane.f32.xlu1 %v924_v56  ;;  %v927_v39 = vsel %vm597_vm15, %v917_v38, -inf }
 0x5e4   :  { %928 = vmax.xlane.f32.xlu0 %v927_v39 }
 0x64f   :  { %v920_v37 = vpop.xlane.xlu2 %919  ;;  %v923_v40 = vpop.xlane.xlu0 %922 }
 0x650   :  { %v930_v41 = vsub.f32 %v914_v31, %v920_v37  ;;  %v926_v43 = vpop.xlane.xlu1 %925  ;;  %v931_v53 = vsub.f32 %v915_v33, %v923_v40 }
 0x651   :  { %v932_v44 = vsub.f32 %v916_v35, %v926_v43 }
 0x652   :  { %v934_v47 = vmul.f32 1.442695, %v930_v41  ;;  %v936_v59 = vmul.f32 1.442695, %v931_v53 }
 0x653   :  { %v938_v49 = vmul.f32 1.442695, %v932_v44 }
 0x654   :  { %2203 = vpow2.f32 %v934_v47 }
 0x655   :  { %2205 = vpow2.f32 %v938_v49 }
 0x657   :  { %v929_v50 = vpop.xlane.xlu0 %928 }
 0x658   :  { %v933_v52 = vsub.f32 %v917_v38, %v929_v50 }
 0x65a   :  { %v2615_v45 = vpop.eup %2203  ;;  %v940_v46 = vmul.f32 1.442695, %v933_v52 }
 0x65b   :  { %v942_v54 = vsel %vm597_vm15, %v2615_v45, 0.0  ;;  %v2619_v55 = vpop.eup %2205 }
 0x65c   :  { %2207 = vpow2.f32 %v940_v46  ;;  %943 = vadd.xlane.f32.xlu0 %v942_v54  ;;  %v948_v57 = vsel %vm597_vm15, %v2619_v55, 0.0 }
 0x65d   :  { %949 = vadd.xlane.f32.xlu2 %v948_v57  ;;  %2209 = vpow2.f32 %v936_v59 }
 0x662   :  { %v2623_v61 = vpop.eup %2207 }
 0x663   :  { %v951_v62 = vsel %vm597_vm15, %v2623_v61, 0.0  ;;  %v2627_v0 = vpop.eup %2209 }
 0x664   :  { %952 = vadd.xlane.f32.xlu1 %v951_v62  ;;  %v945_v1 = vsel %vm597_vm15, %v2627_v0, 0.0 }
 0x66c   :  { %946 = vadd.xlane.f32.xlu1 %v945_v1 }
 0x670   :  { %1179 = vrot.lane.b32.xlu0 %v2527_v28, %s2262_s26 }
 0x675   :  { %2129 = vrot.lane.b32.xlu2 %v2547_v42, %s2263_s27 }
 0x678   :  { %1151 = vrot.lane.b32.xlu0 %v2521_v11, %s2262_s26 }
 0x67d   :  { %2134 = vrot.lane.b32.xlu2 %v2571_v6, %s2263_s27 }
 0x680   :  { %1227 = vrot.lane.b32.xlu0 %v2517_v26, %s2262_s26 }
 0x685   :  { %1203 = vrot.lane.b32.xlu1 %v2529_v32, %s2262_s26 }
 0x68d   :  { %1153 = vrot.lane.b32.xlu1 %v2515_v3, %s2262_s26 }
 0x6cf   :  { %v944_v2 = vpop.xlane.xlu0 %943 }
 0x6d0   :  { %v954_v5 = vadd.f32 1e-09, %v944_v2  ;;  %v950_v7 = vpop.xlane.xlu2 %949 }
 0x6d1   :  { %v956_v8 = vadd.f32 1e-09, %v950_v7 }
 0x6d2   :  { %2211 = vrcp.f32 %v954_v5  ;;  %v967_v19 = vand.u32 2147483647, %v954_v5  ;;  %v969_v20 = vand.u32 2147483648, %v954_v5  ;;  %vm963_vm6 = vweird.f32 %v954_v5 }
 0x6d3   :  { %2213 = vrcp.f32 %v956_v8  ;;  %v997_v22 = vand.u32 2147483647, %v956_v8  ;;  %v999_v63 = vand.u32 2147483648, %v956_v8  ;;  %vm993_vm10 = vweird.f32 %v956_v8 }
 0x6d4   :  { %vm2642_vm9 = vcmp.eq.f32.partialorder %v967_v19, 8.507059e+37  ;;  %v970_v33 = vor.u32 1.1754944e-38, %v969_v20 }
 0x6d5   :  { %vm2648_vm11 = vcmp.eq.f32.partialorder %v997_v22, 8.507059e+37  ;;  %v1000_v39 = vor.u32 1.1754944e-38, %v999_v63 }
 0x6d7   :  { %v953_v9 = vpop.xlane.xlu1 %952 }
 0x6d8   :  { %v2212_v10 = vpop.eup %2211  ;;  %v957_v12 = vadd.f32 1e-09, %v953_v9  ;;  %v2130_v13 = vpop.permute.xlu2 %2129 }
 0x6d9   :  { %v959_v51 = vmul.f32 %v2212_v10, %v954_v5  ;;  %v2214_v15 = vpop.eup %2213  ;;  %v2132_v60 = vunpack.i.h.bf16 %v2130_v13  ;;  %v2131_v16 = vunpack.i.l.bf16 %v2130_v13  ;;  %vm964_vm5 = vweird.f32 %v2212_v10 }
 0x6da   :  { %2215 = vrcp.f32 %v957_v12  ;;  %v989_v17 = vmul.f32 %v2214_v15, %v956_v8  ;;  %vm2638_vm7 = vmor %vm963_vm6, %vm964_vm5  ;;  %vm994_vm8 = vweird.f32 %v2214_v15  ;;  %v1012_v43 = vand.u32 2147483647, %v957_v12 }
 0x6db   :  { %v960_v48 = vsub.f32 1.0, %v959_v51  ;;  %1073 = vmatpush.msra.mxu2 %v2131_v16  ;;  %1099 = vmatpush.msra.mxu3 %v2132_v60  ;;  %vm2652_vm12 = vmor %vm993_vm10, %vm994_vm8  ;;  %v1014_v44 = vand.u32 2147483648, %v957_v12  ;;  %vm1008_vm2 = vweird.f32 %v957_v12 }
 0x6dc   :  { %v990_v21 = vsub.f32 1.0, %v989_v17  ;;  %vm1013_vm4 = vcmp.eq.f32.partialorder %v1012_v43, 8.507059e+37 }
 0x6dd   :  { %v961_v18 = vmul.f32 %v2212_v10, %v960_v48  ;;  %v1015_v62 = vor.u32 1.1754944e-38, %v1014_v44 }
 0x6de   :  { %v991_v25 = vmul.f32 %v2214_v15, %v990_v21 }
 0x6df   :  { %v962_v23 = vadd.f32 %v2212_v10, %v961_v18  ;;  %v947_v24 = vpop.xlane.xlu1 %946 }
 0x6e0   :  { %v2216_v4 = vpop.eup %2215  ;;  %v955_v27 = vadd.f32 1e-09, %v947_v24  ;;  %v2135_v35 = vpop.permute.xlu2 %2134  ;;  %v992_v29 = vadd.f32 %v2214_v15, %v991_v25 }
 0x6e1   :  { %v1004_v34 = vmul.f32 %v2216_v4, %v957_v12  ;;  %v966_v36 = vsel %vm2638_vm7, %v2212_v10, %v962_v23  ;;  %v2137_v40 = vunpack.i.h.bf16 %v2135_v35  ;;  %v2136_v41 = vunpack.i.l.bf16 %v2135_v35 }
 0x6e2   :  { %2217 = vrcp.f32 %v955_v27  ;;  %v1180_v56 = vpop.permute.xlu0 %1179  ;;  %v971_v47 = vsel %vm2642_vm9, %v970_v33, %v966_v36  ;;  %v996_v49 = vsel %vm2652_vm12, %v2214_v15, %v992_v29  ;;  %vm1009_vm1 = vweird.f32 %v2216_v4 }
 0x6e3   :  { %v1005_v37 = vsub.f32 1.0, %v1004_v34  ;;  %2067 = vmatpush.xpose.msk.msrb.mxu2 %vm497_vm13, %v1180_v56  ;;  %1047 = vmatpush.msra.mxu1 %v2136_v41  ;;  %v972_v52 = vmul.f32 %v2615_v45, %v971_v47  ;;  %v1001_v53 = vsel %vm2648_vm11, %v1000_v39, %v996_v49  ;;  %vm1010_vm3 = vmor %vm1008_vm2, %vm1009_vm1  ;;  %v982_v13 = vand.u32 2147483647, %v955_v27 }
 0x6e4   :  { %1125 = vmatpush.msrb.mxu0 %v2137_v40  ;;  %v1002_v46 = vmul.f32 %v2619_v55, %v1001_v53  ;;  %v984_v55 = vand.u32 2147483648, %v955_v27  ;;  %vm978_vm6 = vweird.f32 %v955_v27 }
 0x6e5   :  { %v1006_v50 = vmul.f32 %v2216_v4, %v1005_v37  ;;  %v1018_v57 = vmax.f32 %v972_v52, 1e-09  ;;  %vm983_vm8 = vcmp.eq.f32.partialorder %v982_v13, 8.507059e+37 }
 0x6e6   :  { %v1020_v1 = vmax.f32 %v1002_v46, 1e-09  ;;  %v985_v16 = vor.u32 1.1754944e-38, %v984_v55 }
 0x6e7   :  { %v1007_v54 = vadd.f32 %v2216_v4, %v1006_v50  ;;  %v1022_v5 = vmin.f32 %v1018_v57, 1.0 }
 0x6e8   :  { %v2218_v59 = vpop.eup %2217  ;;  %v1024_v9 = vmin.f32 %v1020_v1, 1.0 }
 0x6e9   :  { %v974_v2 = vmul.f32 %v2218_v59, %v955_v27  ;;  %v1011_v7 = vsel %vm1010_vm3, %v2216_v4, %v1007_v54  ;;  %2061 = vmatmul.msk.f32.vlgmr.msra.gmra.mxu1 %vm497_vm13, %v1022_v5  ;;  %vm979_vm5 = vweird.f32 %v2218_v59 }
 0x6ea   :  { %v1152_v8 = vpop.permute.xlu0 %1151  ;;  %v1016_v10 = vsel %vm1013_vm4, %v1015_v62, %v1011_v7  ;;  %2063 = vmatmul.msk.f32.vlgmr.msra.gmra.mxu3 %vm497_vm13, %v1024_v9  ;;  %vm980_vm7 = vmor %vm978_vm6, %vm979_vm5 }
 0x6eb   :  { %v975_v45 = vsub.f32 1.0, %v974_v2  ;;  %v1017_v51 = vmul.f32 %v2623_v61, %v1016_v10 }
 0x6ed   :  { %v976_v12 = vmul.f32 %v2218_v59, %v975_v45  ;;  %v1021_v15 = vmax.f32 %v1017_v51, 1e-09 }
 0x6ef   :  { %v977_v48 = vadd.f32 %v2218_v59, %v976_v12  ;;  %v1025_v60 = vmin.f32 %v1021_v15, 1.0 }
 0x6f1   :  { %2064 = vmatmul.msk.f32.vlgmr.msrb.gmra.mxu0 %vm497_vm13, %v1025_v60  ;;  %v981_v17 = vsel %vm980_vm7, %v2218_v59, %v977_v48 }
 0x6f2   :  { %v1228_v18 = vpop.permute.xlu0 %1227  ;;  %v986_v19 = vsel %vm983_vm8, %v985_v16, %v981_v17 }
 0x6f3   :  { %2071 = vmatpush.xpose.msk.msra.mxu0 %vm497_vm13, %v1228_v18  ;;  %v987_v61 = vmul.f32 %v2627_v0, %v986_v19 }
 0x6f5   :  { %v1019_v20 = vmax.f32 %v987_v61, 1e-09 }
 0x6f7   :  { %v1204_v21 = vpop.permute.xlu1 %1203  ;;  %v1023_v22 = vmin.f32 %v1019_v20, 1.0 }
 0x6f8   :  { %2069 = vmatpush.xpose.msk.msrb.mxu3 %vm497_vm13, %v1204_v21 }
 0x6f9   :  { %2062 = vmatmul.msk.f32.vlgmr.msra.gmra.mxu2 %vm497_vm13, %v1023_v22  ;;  %2072 = vmatmul.msk.f32.vlgmr.msra.gmra.mxu0 %vm497_vm13, %v1152_v8 }
 0x6fb   :  { %2070 = vmatmul.msk.f32.vlgmr.msrb.gmra.mxu3 %vm497_vm13, %v1152_v8 }
 0x6ff   :  { %v1154_v23 = vpop.permute.xlu1 %1153 }
 0x700   :  { %2065 = vmatpush.xpose.msk.msrb.mxu1 %vm497_vm13, %v1154_v23 }
 0x701   :  { %2068 = vmatmul.msk.f32.vlgmr.msrb.gmra.mxu2 %vm497_vm13, %v1152_v8 }
 0x703   :  { %2066 = vmatmul.msk.f32.vlgmr.msrb.gmra.mxu1 %vm497_vm13, %v1152_v8 }
 0x766   :  { %v2680_v0 = vpop.f32.mrf.mxu1 }
 0x76d   :  { %v2678_v63 = vpop.f32.mrf.mxu3 }
 0x76e   :  { %v2684_v4 = vpop.f32.mrf.mxu0 }
 0x776   :  { %v1248_v30 = vpop.f32.mrf.mxu0 }
 0x777   :  { %v1254_v56 = vmul.f32 0.35355338, %v1248_v30 }
 0x779   :  { %v1264_v38 = vsel %vm597_vm15, %v1254_v56, -inf }
 0x77c   :  { %v2682_v24 = vpop.f32.mrf.mxu2 }
 0x77e   :  { %v1224_v58 = vpop.f32.mrf.mxu3 }
 0x77f   :  { %v1253_v25 = vmul.f32 0.35355338, %v1224_v58 }
 0x780   :  { %v1176_v27 = vpop.f32.mrf.mxu1 }
 0x781   :  { %v1251_v31 = vmul.f32 0.35355338, %v1176_v27  ;;  %v1261_v33 = vsel %vm597_vm15, %v1253_v25, -inf }
 0x782   :  { %1262 = vmax.xlane.f32.xlu1 %v1261_v33 }
 0x783   :  { %v1255_v34 = vsel %vm597_vm15, %v1251_v31, -inf }
 0x784   :  { %1256 = vmax.xlane.f32.xlu0 %v1255_v34  ;;  %v1200_v35 = vpop.f32.mrf.mxu2 }
 0x785   :  { %v1252_v36 = vmul.f32 0.35355338, %v1200_v35 }
 0x787   :  { %v1258_v29 = vsel %vm597_vm15, %v1252_v36, -inf }
 0x788   :  { %1259 = vmax.xlane.f32.xlu2 %v1258_v29 }
 0x790   :  { %1265 = vmax.xlane.f32.xlu2 %v1264_v38 }
 0x798   :  { %2139 = vrot.lane.b32.xlu0 %v2547_v42, %s2264_s28 }
 0x7a8   :  { %1516 = vrot.lane.b32.xlu2 %v2527_v28, %s2265_s29 }
 0x7f5   :  { %v1263_v39 = vpop.xlane.xlu1 %1262 }
 0x7f6   :  { %v1269_v37 = vsub.f32 %v1253_v25, %v1263_v39 }
 0x7f7   :  { %v1257_v40 = vpop.xlane.xlu0 %1256 }
 0x7f8   :  { %v1275_v41 = vmul.f32 1.442695, %v1269_v37  ;;  %v1267_v43 = vsub.f32 %v1251_v31, %v1257_v40 }
 0x7fa   :  { %2219 = vpow2.f32 %v1275_v41  ;;  %v1271_v44 = vmul.f32 1.442695, %v1267_v43 }
 0x7fb   :  { %v1260_v47 = vpop.xlane.xlu2 %1259 }
 0x7fc   :  { %2221 = vpow2.f32 %v1271_v44  ;;  %v1268_v54 = vsub.f32 %v1252_v36, %v1260_v47 }
 0x7fe   :  { %v1273_v59 = vmul.f32 1.442695, %v1268_v54 }
 0x800   :  { %v2694_v49 = vpop.eup %2219 }
 0x801   :  { %v1285_v50 = vsel %vm597_vm15, %v2694_v49, 0.0 }
 0x802   :  { %v2698_v52 = vpop.eup %2221  ;;  %1286 = vadd.xlane.f32.xlu0 %v1285_v50 }
 0x803   :  { %v1266_v53 = vpop.xlane.xlu2 %1265  ;;  %v1279_v28 = vsel %vm597_vm15, %v2698_v52, 0.0 }
 0x804   :  { %v1270_v46 = vsub.f32 %v1254_v56, %v1266_v53  ;;  %1280 = vadd.xlane.f32.xlu2 %v1279_v28 }
 0x806   :  { %v1277_v57 = vmul.f32 1.442695, %v1270_v46 }
 0x808   :  { %2223 = vpow2.f32 %v1277_v57 }
 0x809   :  { %2225 = vpow2.f32 %v1273_v59 }
 0x80a   :  { %v2140_v62 = vpop.permute.xlu0 %2139 }
 0x80b   :  { %v2142_v1 = vunpack.i.h.bf16 %v2140_v62  ;;  %v2141_v2 = vunpack.i.l.bf16 %v2140_v62  ;;  %v1517_v5 = vpop.permute.xlu2 %1516 }
 0x80d   :  { %1410 = vmatpush.msra.mxu2 %v2141_v2  ;;  %1436 = vmatpush.msra.mxu3 %v2142_v1 }
 0x80e   :  { %v2702_v7 = vpop.eup %2223 }
 0x80f   :  { %2079 = vmatpush.xpose.msk.msrb.mxu2 %vm497_vm13, %v1517_v5  ;;  %v1288_v8 = vsel %vm597_vm15, %v2702_v7, 0.0  ;;  %v2707_v9 = vpop.eup %2225 }
 0x810   :  { %1289 = vadd.xlane.f32.xlu1 %v1288_v8  ;;  %v1282_v10 = vsel %vm597_vm15, %v2707_v9, 0.0 }
 0x816   :  { %1488 = vrot.lane.b32.xlu0 %v2521_v11, %s2265_s29 }
 0x818   :  { %1283 = vadd.xlane.f32.xlu1 %v1282_v10 }
 0x81c   :  { %2144 = vrot.lane.b32.xlu2 %v2571_v6, %s2264_s28 }
 0x81e   :  { %1490 = vrot.lane.b32.xlu0 %v2515_v3, %s2265_s29 }
 0x831   :  { %1540 = vrot.lane.b32.xlu1 %v2529_v32, %s2265_s29 }
 0x839   :  { %1564 = vrot.lane.b32.xlu1 %v2517_v26, %s2265_s29 }
 0x875   :  { %v1287_v45 = vpop.xlane.xlu0 %1286 }
 0x876   :  { %v1293_v51 = vadd.f32 1e-09, %v1287_v45 }
 0x877   :  { %v1281_v55 = vpop.xlane.xlu2 %1280 }
 0x878   :  { %2227 = vrcp.f32 %v1293_v51  ;;  %v1291_v11 = vadd.f32 1e-09, %v1281_v55  ;;  %v1336_v3 = vand.u32 2147483648, %v1293_v51  ;;  %v1334_v26 = vand.u32 2147483647, %v1293_v51 }
 0x879   :  { %vm1330_vm10 = vweird.f32 %v1293_v51 }
 0x87a   :  { %2229 = vrcp.f32 %v1291_v11  ;;  %v1337_v22 = vor.u32 1.1754944e-38, %v1336_v3  ;;  %v1306_v23 = vand.u32 2147483648, %v1291_v11  ;;  %v1304_v25 = vand.u32 2147483647, %v1291_v11 }
 0x87b   :  { %vm1335_vm1 = vcmp.eq.f32.partialorder %v1334_v26, 8.507059e+37  ;;  %vm1300_vm2 = vweird.f32 %v1291_v11 }
 0x87c   :  { %v1307_v35 = vor.u32 1.1754944e-38, %v1306_v23  ;;  %vm1305_vm4 = vcmp.eq.f32.partialorder %v1304_v25, 8.507059e+37 }
 0x87e   :  { %v2228_v12 = vpop.eup %2227 }
 0x87f   :  { %v1326_v13 = vmul.f32 %v2228_v12, %v1293_v51  ;;  %v2145_v15 = vpop.permute.xlu2 %2144  ;;  %vm1331_vm9 = vweird.f32 %v2228_v12 }
 0x880   :  { %v2147_v48 = vunpack.i.h.bf16 %v2145_v15  ;;  %v2146_v60 = vunpack.i.l.bf16 %v2145_v15  ;;  %v2230_v16 = vpop.eup %2229  ;;  %vm1332_vm11 = vmor %vm1330_vm10, %vm1331_vm9 }
 0x881   :  { %v1327_v17 = vsub.f32 1.0, %v1326_v13  ;;  %v1296_v18 = vmul.f32 %v2230_v16, %v1291_v11  ;;  %vm1301_vm12 = vweird.f32 %v2230_v16 }
 0x882   :  { %1384 = vmatpush.msra.mxu1 %v2146_v60  ;;  %1462 = vmatpush.msrb.mxu0 %v2147_v48  ;;  %vm1302_vm3 = vmor %vm1300_vm2, %vm1301_vm12 }
 0x883   :  { %v1328_v32 = vmul.f32 %v2228_v12, %v1327_v17  ;;  %v1290_v19 = vpop.xlane.xlu1 %1289  ;;  %v1297_v61 = vsub.f32 1.0, %v1296_v18 }
 0x884   :  { %v1294_v20 = vadd.f32 1e-09, %v1290_v19 }
 0x885   :  { %v1329_v21 = vadd.f32 %v2228_v12, %v1328_v32  ;;  %v1298_v58 = vmul.f32 %v2230_v16, %v1297_v61 }
 0x886   :  { %2231 = vrcp.f32 %v1294_v20  ;;  %v1351_v50 = vand.u32 2147483648, %v1294_v20  ;;  %vm1345_vm6 = vweird.f32 %v1294_v20 }
 0x887   :  { %v1333_v27 = vsel %vm1332_vm11, %v2228_v12, %v1329_v21  ;;  %v1299_v31 = vadd.f32 %v2230_v16, %v1298_v58 }
 0x888   :  { %v2721_v33 = vpop.permute.xlu0 %1488  ;;  %v1338_v34 = vsel %vm1335_vm1, %v1337_v22, %v1333_v27  ;;  %v1352_v57 = vor.u32 1.1754944e-38, %v1351_v50 }
 0x889   :  { %v1339_v36 = vmul.f32 %v2694_v49, %v1338_v34  ;;  %v1303_v29 = vsel %vm1302_vm3, %v2230_v16, %v1299_v31  ;;  %v1349_v49 = vand.u32 2147483647, %v1294_v20 }
 0x88a   :  { %v1308_v38 = vsel %vm1305_vm4, %v1307_v35, %v1303_v29 }
 0x88b   :  { %v1284_v30 = vpop.xlane.xlu1 %1283  ;;  %v1357_v56 = vmax.f32 %v1339_v36, 1e-09  ;;  %v1309_v40 = vmul.f32 %v2698_v52, %v1308_v38  ;;  %vm1350_vm8 = vcmp.eq.f32.partialorder %v1349_v49, 8.507059e+37 }
 0x88c   :  { %v2232_v39 = vpop.eup %2231  ;;  %v1292_v37 = vadd.f32 1e-09, %v1284_v30 }
 0x88d   :  { %v1341_v41 = vmul.f32 %v2232_v39, %v1294_v20  ;;  %v1361_v43 = vmin.f32 %v1357_v56, 1.0  ;;  %v1355_v47 = vmax.f32 %v1309_v40, 1e-09  ;;  %vm1346_vm5 = vweird.f32 %v2232_v39 }
 0x88e   :  { %2233 = vrcp.f32 %v1292_v37  ;;  %vm1347_vm7 = vmor %vm1345_vm6, %vm1346_vm5  ;;  %v1321_v8 = vand.u32 2147483648, %v1292_v37  ;;  %v1319_v45 = vand.u32 2147483647, %v1292_v37  ;;  %vm1315_vm10 = vweird.f32 %v1292_v37 }
 0x88f   :  { %v1342_v44 = vsub.f32 1.0, %v1341_v41  ;;  %2075 = vmatmul.msk.f32.vlgmr.msra.gmra.mxu3 %vm497_vm13, %v1361_v43  ;;  %v1359_v46 = vmin.f32 %v1355_v47, 1.0 }
 0x890   :  { %v1491_v53 = vpop.permute.xlu0 %1490  ;;  %v1322_v12 = vor.u32 1.1754944e-38, %v1321_v8  ;;  %vm1320_vm12 = vcmp.eq.f32.partialorder %v1319_v45, 8.507059e+37 }
 0x891   :  { %v1343_v28 = vmul.f32 %v2232_v39, %v1342_v44  ;;  %2077 = vmatpush.xpose.msk.msrb.mxu1 %vm497_vm13, %v1491_v53 }
 0x892   :  { %2073 = vmatmul.msk.f32.vlgmr.msra.gmra.mxu1 %vm497_vm13, %v1359_v46 }
 0x893   :  { %v1344_v54 = vadd.f32 %v2232_v39, %v1343_v28 }
 0x894   :  { %v2234_v52 = vpop.eup %2233 }
 0x895   :  { %v1311_v59 = vmul.f32 %v2234_v52, %v1292_v37  ;;  %v1348_v62 = vsel %vm1347_vm7, %v2232_v39, %v1344_v54  ;;  %vm1316_vm9 = vweird.f32 %v2234_v52 }
 0x896   :  { %v1353_v1 = vsel %vm1350_vm8, %v1352_v57, %v1348_v62  ;;  %vm1317_vm11 = vmor %vm1315_vm10, %vm1316_vm9 }
 0x897   :  { %v1312_v2 = vsub.f32 1.0, %v1311_v59  ;;  %v1354_v5 = vmul.f32 %v2702_v7, %v1353_v1 }
 0x899   :  { %v1313_v10 = vmul.f32 %v2234_v52, %v1312_v2  ;;  %v1358_v51 = vmax.f32 %v1354_v5, 1e-09 }
 0x89a   :  { %2078 = vmatmul.msk.f32.vlgmr.msrb.gmra.mxu1 %vm497_vm13, %v2721_v33 }
 0x89b   :  { %v1314_v55 = vadd.f32 %v2234_v52, %v1313_v10  ;;  %v1362_v11 = vmin.f32 %v1358_v51, 1.0 }
 0x89d   :  { %2076 = vmatmul.msk.f32.vlgmr.msrb.gmra.mxu0 %vm497_vm13, %v1362_v11  ;;  %v1318_v13 = vsel %vm1317_vm11, %v2234_v52, %v1314_v55 }
 0x89e   :  { %v1323_v15 = vsel %vm1320_vm12, %v1322_v12, %v1318_v13 }
 0x89f   :  { %v1324_v7 = vmul.f32 %v2707_v9, %v1323_v15 }
 0x8a1   :  { %v1356_v48 = vmax.f32 %v1324_v7, 1e-09 }
 0x8a3   :  { %v1541_v60 = vpop.permute.xlu1 %1540  ;;  %v1360_v16 = vmin.f32 %v1356_v48, 1.0 }
 0x8a4   :  { %2081 = vmatpush.xpose.msk.msrb.mxu3 %vm497_vm13, %v1541_v60 }
 0x8a5   :  { %2074 = vmatmul.msk.f32.vlgmr.msra.gmra.mxu2 %vm497_vm13, %v1360_v16 }
 0x8a7   :  { %2082 = vmatmul.msk.f32.vlgmr.msrb.gmra.mxu3 %vm497_vm13, %v2721_v33 }
 0x8ab   :  { %v1565_v17 = vpop.permute.xlu1 %1564 }
 0x8ac   :  { %2083 = vmatpush.xpose.msk.msra.mxu0 %vm497_vm13, %v1565_v17 }
 0x8ad   :  { %2080 = vmatmul.msk.f32.vlgmr.msrb.gmra.mxu2 %vm497_vm13, %v2721_v33 }
 0x8af   :  { %2084 = vmatmul.msk.f32.vlgmr.msra.gmra.mxu0 %vm497_vm13, %v2721_v33 }
 0x90f   :  { %v1386_v9 = vpop.f32.mrf.mxu1 }
 0x912   :  { %v1438_v26 = vpop.f32.mrf.mxu3 }
 0x917   :  { %v1513_v3 = vpop.f32.mrf.mxu1 }
 0x918   :  { %v1588_v18 = vmul.f32 0.35355338, %v1513_v3 }
 0x91a   :  { %v1592_v32 = vsel %vm597_vm15, %v1588_v18, -inf  ;;  %v1464_v21 = vpop.f32.mrf.mxu0 }
 0x91b   :  { %1593 = vmax.xlane.f32.xlu1 %v1592_v32 }
 0x928   :  { %v1412_v19 = vpop.f32.mrf.mxu2 }
 0x92a   :  { %v1561_v61 = vpop.f32.mrf.mxu3 }
 0x92b   :  { %v1590_v20 = vmul.f32 0.35355338, %v1561_v61 }
 0x92c   :  { %v1585_v27 = vpop.f32.mrf.mxu0 }
 0x92d   :  { %v1598_v22 = vsel %vm597_vm15, %v1590_v20, -inf  ;;  %v1591_v31 = vmul.f32 0.35355338, %v1585_v27 }
 0x92e   :  { %1599 = vmax.xlane.f32.xlu0 %v1598_v22 }
 0x92f   :  { %v1601_v33 = vsel %vm597_vm15, %v1591_v31, -inf }
 0x930   :  { %v1537_v23 = vpop.f32.mrf.mxu2 }
 0x931   :  { %v1589_v58 = vmul.f32 0.35355338, %v1537_v23 }
 0x933   :  { %v1595_v25 = vsel %vm597_vm15, %v1589_v58, -inf }
 0x934   :  { %1596 = vmax.xlane.f32.xlu2 %v1595_v25 }
 0x93c   :  { %1602 = vmax.xlane.f32.xlu2 %v1601_v33 }
 0x98e   :  { %v1594_v34 = vpop.xlane.xlu1 %1593 }
 0x98f   :  { %v1604_v35 = vsub.f32 %v1588_v18, %v1594_v34 }
 0x991   :  { %v1608_v36 = vmul.f32 1.442695, %v1604_v35 }
 0x993   :  { %2235 = vpow2.f32 %v1608_v36 }
 0x999   :  { %v2236_v29 = vpop.eup %2235 }
 0x99a   :  { %v1616_v30 = vsel %vm597_vm15, %v2236_v29, 0.0 }
 0x99b   :  { %1617 = vadd.xlane.f32.xlu2 %v1616_v30 }
 0x9a1   :  { %v1600_v56 = vpop.xlane.xlu0 %1599 }
 0x9a2   :  { %v1606_v38 = vsub.f32 %v1590_v20, %v1600_v56 }
 0x9a4   :  { %v1612_v39 = vmul.f32 1.442695, %v1606_v38 }
 0x9a6   :  { %2237 = vpow2.f32 %v1612_v39 }
 0x9a7   :  { %v1597_v37 = vpop.xlane.xlu2 %1596 }
 0x9a8   :  { %v1605_v40 = vsub.f32 %v1589_v58, %v1597_v37 }
 0x9aa   :  { %v1610_v41 = vmul.f32 1.442695, %v1605_v40 }
 0x9ac   :  { %v2747_v43 = vpop.eup %2237  ;;  %2239 = vpow2.f32 %v1610_v41 }
 0x9ad   :  { %v1622_v44 = vsel %vm597_vm15, %v2747_v43, 0.0 }
 0x9ae   :  { %1623 = vadd.xlane.f32.xlu1 %v1622_v44 }
 0x9af   :  { %v1603_v47 = vpop.xlane.xlu2 %1602 }
 0x9b0   :  { %v1607_v50 = vsub.f32 %v1591_v31, %v1603_v47 }
 0x9b2   :  { %v2751_v53 = vpop.eup %2239  ;;  %v1614_v28 = vmul.f32 1.442695, %v1607_v50 }
 0x9b3   :  { %v1619_v49 = vsel %vm597_vm15, %v2751_v53, 0.0  ;;  %2154 = vrot.lane.b32.xlu2 %v2571_v6, %s2266_s30 }
 0x9b4   :  { %2241 = vpow2.f32 %v1614_v28  ;;  %1620 = vadd.xlane.f32.xlu0 %v1619_v49 }
 0x9ba   :  { %v2756_v46 = vpop.eup %2241 }
 0x9bb   :  { %v1625_v54 = vsel %vm597_vm15, %v2756_v46, 0.0  ;;  %1473 = vrot.lane.b32.xlu2 %v1412_v19, %s2267_s9 }
 0x9bc   :  { %1626 = vadd.xlane.f32.xlu0 %v1625_v54 }
 0x9c3   :  { %1471 = vrot.lane.b32.xlu2 %v1386_v9, %s2267_s9 }
 0x9c7   :  { %2149 = vrot.lane.b32.xlu1 %v2547_v42, %s2266_s30 }
 0x9cf   :  { %1475 = vrot.lane.b32.xlu1 %v1438_v26, %s2267_s9 }
 0x9d0   :  { %1136 = vrot.lane.b32.xlu0 %v2682_v24, %s2268_s10 }
 0x9d7   :  { %1134 = vrot.lane.b32.xlu1 %v2680_v0, %s2268_s10 }
 0x9d8   :  { %1138 = vrot.lane.b32.xlu0 %v2678_v63, %s2268_s10 }
 0x9df   :  { %1477 = vrot.lane.b32.xlu1 %v1464_v21, %s2267_s9 }
 0x9e0   :  { %1140 = vrot.lane.b32.xlu0 %v2684_v4, %s2268_s10 }
 0xa0e   :  { %v1618_v6 = vpop.xlane.xlu2 %1617 }
 0xa0f   :  { %v1628_v52 = vadd.f32 1e-09, %v1618_v6 }
 0xa11   :  { %2243 = vrcp.f32 %v1628_v52  ;;  %v1643_v5 = vand.u32 2147483648, %v1628_v52  ;;  %v1641_v0 = vand.u32 2147483647, %v1628_v52  ;;  %vm1637_vm1 = vweird.f32 %v1628_v52 }
 0xa13   :  { %v1644_v63 = vor.u32 1.1754944e-38, %v1643_v5  ;;  %vm1642_vm3 = vcmp.eq.f32.partialorder %v1641_v0, 8.507059e+37 }
 0xa16   :  { %v2155_v57 = vpop.permute.xlu2 %2154 }
 0xa17   :  { %v2244_v59 = vpop.eup %2243  ;;  %v2157_v62 = vunpack.i.h.bf16 %v2155_v57  ;;  %v2156_v1 = vunpack.i.l.bf16 %v2155_v57 }
 0xa18   :  { %v1633_v2 = vmul.f32 %v2244_v59, %v1628_v52  ;;  %vm1638_vm15 = vweird.f32 %v2244_v59 }
 0xa19   :  { %1721 = vmatpush.msra.mxu1 %v2156_v1  ;;  %1799 = vmatpush.msrb.mxu0 %v2157_v62  ;;  %vm1639_vm2 = vmor %vm1637_vm1, %vm1638_vm15 }
 0xa1a   :  { %v1634_v42 = vsub.f32 1.0, %v1633_v2 }
 0xa1c   :  { %v1635_v24 = vmul.f32 %v2244_v59, %v1634_v42 }
 0xa1e   :  { %v1636_v8 = vadd.f32 %v2244_v59, %v1635_v24  ;;  %v1474_v52 = vpop.permute.xlu2 %1473 }
 0xa20   :  { %v1640_v10 = vsel %vm1639_vm2, %v2244_v59, %v1636_v8  ;;  %vm1146_vm2 = vcmask 122944  }
 0xa21   :  { %v1624_v4 = vpop.xlane.xlu1 %1623  ;;  %v1645_v51 = vsel %vm1642_vm3, %v1644_v63, %v1640_v10 }
 0xa22   :  { %v1630_v45 = vadd.f32 1e-09, %v1624_v4  ;;  %v1646_v55 = vmul.f32 %v2236_v29, %v1645_v51  ;;  %v494_v51 = vld [vmem:[%s2861_s6 + $0x10] sm:$0xff] }
 0xa24   :  { %2245 = vrcp.f32 %v1630_v45  ;;  %v1692_v11 = vmax.f32 %v1646_v55, 1e-09  ;;  %v1673_v16 = vand.u32 2147483648, %v1630_v45  ;;  %v1671_v9 = vand.u32 2147483647, %v1630_v45  ;;  %v493_v55 = vld [vmem:[%s2861_s6 + $0x8] sm:$0xff] }
 0xa25   :  { %vm1667_vm5 = vweird.f32 %v1630_v45 }
 0xa26   :  { %v1696_v13 = vmin.f32 %v1692_v11, 1.0  ;;  %v1674_v61 = vor.u32 1.1754944e-38, %v1673_v16  ;;  %vm1672_vm7 = vcmp.eq.f32.partialorder %v1671_v9, 8.507059e+37  ;;  %v1472_v24 = vpop.permute.xlu2 %1471  ;;  %v492_v11 = vld [vmem:[%s2861_s6] sm:$0xff] }
 0xa27   :  { %v1621_v12 = vpop.xlane.xlu0 %1620  ;;  %v496_v9 = vld [vmem:[%s2862_s7] sm:$0x1] }
 0xa28   :  { %v1629_v15 = vadd.f32 1e-09, %v1621_v12  ;;  %2085 = vmatmul.msk.f32.vlgmr.msra.gmra.mxu1 %vm497_vm13, %v1696_v13 }
 0xa2a   :  { %v2246_v7 = vpop.eup %2245  ;;  %2247 = vrcp.f32 %v1629_v15  ;;  %v1658_v22 = vand.u32 2147483648, %v1629_v15  ;;  %v1656_v25 = vand.u32 2147483647, %v1629_v15  ;;  %vm1652_vm9 = vweird.f32 %v1629_v15 }
 0xa2b   :  { %v1663_v48 = vmul.f32 %v2246_v7, %v1630_v45  ;;  %vm1668_vm4 = vweird.f32 %v2246_v7  ;;  %v495_v45 = vld [vmem:[%s2861_s6 + $0x18] sm:$0xff] }
 0xa2c   :  { %vm1669_vm6 = vmor %vm1667_vm5, %vm1668_vm4  ;;  %v1659_v35 = vor.u32 1.1754944e-38, %v1658_v22  ;;  %vm1657_vm11 = vcmp.eq.f32.partialorder %v1656_v25, 8.507059e+37  ;;  %vm1483_vm4 = vcmask 188544   ;;  %1913 = vmatpush.msra.mxu0 %v495_v45  ;;  %1844 = vmatpush.msrb.mxu1 %v495_v45 }
 0xa2d   :  { %v1664_v60 = vsub.f32 1.0, %v1663_v48 }
 0xa2e   :  { %1914 = vmatpush.msra.mxu0 %v494_v51  ;;  %1845 = vmatpush.msrb.mxu1 %v494_v51 }
 0xa2f   :  { %v1665_v17 = vmul.f32 %v2246_v7, %v1664_v60  ;;  %v1627_v3 = vpop.xlane.xlu0 %1626 }
 0xa30   :  { %v2248_v18 = vpop.eup %2247  ;;  %v1631_v32 = vadd.f32 1e-09, %v1627_v3  ;;  %1915 = vmatpush.msra.mxu0 %v493_v55  ;;  %1846 = vmatpush.msrb.mxu1 %v493_v55 }
 0xa31   :  { %v1666_v26 = vadd.f32 %v2246_v7, %v1665_v17  ;;  %v1648_v19 = vmul.f32 %v2248_v18, %v1629_v15  ;;  %vm1653_vm8 = vweird.f32 %v2248_v18 }
 0xa32   :  { %2249 = vrcp.f32 %v1631_v32  ;;  %vm1654_vm10 = vmor %vm1652_vm9, %vm1653_vm8  ;;  %v1688_v44 = vand.u32 2147483648, %v1631_v32  ;;  %v1686_v47 = vand.u32 2147483647, %v1631_v32  ;;  %vm1682_vm15 = vweird.f32 %v1631_v32  ;;  %1916 = vmatpush.msra.mxu0 %v492_v11  ;;  %1847 = vmatpush.msrb.mxu1 %v492_v11 }
 0xa33   :  { %v1649_v20 = vsub.f32 1.0, %v1648_v19  ;;  %v1670_v21 = vsel %vm1669_vm6, %v2246_v7, %v1666_v26 }
 0xa34   :  { %v1675_v23 = vsel %vm1672_vm7, %v1674_v61, %v1670_v21  ;;  %v1689_v54 = vor.u32 1.1754944e-38, %v1688_v44  ;;  %vm1687_vm3 = vcmp.eq.f32.partialorder %v1686_v47, 8.507059e+37 }
 0xa35   :  { %v1650_v58 = vmul.f32 %v2248_v18, %v1649_v20  ;;  %v1676_v27 = vmul.f32 %v2747_v43, %v1675_v23 }
 0xa37   :  { %v1651_v31 = vadd.f32 %v2248_v18, %v1650_v58  ;;  %v1694_v33 = vmax.f32 %v1676_v27, 1e-09 }
 0xa38   :  { %v2250_v34 = vpop.eup %2249 }
 0xa39   :  { %v1678_v36 = vmul.f32 %v2250_v34, %v1631_v32  ;;  %v2150_v29 = vpop.permute.xlu1 %2149  ;;  %v1655_v30 = vsel %vm1654_vm10, %v2248_v18, %v1651_v31  ;;  %v1698_v40 = vmin.f32 %v1694_v33, 1.0  ;;  %vm1683_vm12 = vweird.f32 %v2250_v34 }
 0xa3a   :  { %v2152_v56 = vunpack.i.h.bf16 %v2150_v29  ;;  %v2151_v38 = vunpack.i.l.bf16 %v2150_v29  ;;  %v1660_v39 = vsel %vm1657_vm11, %v1659_v35, %v1655_v30  ;;  %vm1684_vm1 = vmor %vm1682_vm15, %vm1683_vm12 }
 0xa3b   :  { %v1679_v37 = vsub.f32 1.0, %v1678_v36  ;;  %v1661_v41 = vmul.f32 %v2751_v53, %v1660_v39 }
 0xa3c   :  { %1747 = vmatpush.msra.mxu2 %v2151_v38  ;;  %1773 = vmatpush.msra.mxu3 %v2152_v56 }
 0xa3d   :  { %v1680_v43 = vmul.f32 %v2250_v34, %v1679_v37  ;;  %2087 = vmatmul.msk.f32.vlgmr.msra.gmra.mxu3 %vm497_vm13, %v1698_v40  ;;  %v1693_v50 = vmax.f32 %v1661_v41, 1e-09 }
 0xa3e   :  { %1890 = vmatpush.msrb.mxu3 %v495_v45  ;;  %1867 = vmatpush.msrb.mxu2 %v495_v45 }
 0xa3f   :  { %v1681_v28 = vadd.f32 %v2250_v34, %v1680_v43  ;;  %v1697_v49 = vmin.f32 %v1693_v50, 1.0 }
 0xa40   :  { %1891 = vmatpush.msrb.mxu3 %v494_v51  ;;  %1868 = vmatpush.msrb.mxu2 %v494_v51 }
 0xa41   :  { %v1476_v6 = vpop.permute.xlu1 %1475  ;;  %2086 = vmatmul.msk.f32.vlgmr.msra.gmra.mxu2 %vm497_vm13, %v1697_v49  ;;  %v1685_v53 = vsel %vm1684_vm1, %v2250_v34, %v1681_v28 }
 0xa42   :  { %v1137_v57 = vpop.permute.xlu0 %1136  ;;  %v1690_v59 = vsel %vm1687_vm3, %v1689_v54, %v1685_v53  ;;  %1892 = vmatpush.msrb.mxu3 %v493_v55  ;;  %1869 = vmatpush.msrb.mxu2 %v493_v55 }
 0xa43   :  { %1148 = vst.msk [vmem:[#allocation2 + $0x1] sm:$0x1] %vm1146_vm2, %v1137_v57  ;;  %v1691_v62 = vmul.f32 %v2756_v46, %v1690_v59 }
 0xa44   :  { %1485 = vst.msk [vmem:[#allocation2 + $0x1] sm:$0x1] %vm1483_vm4, %v1474_v52  ;;  %1893 = vmatpush.msrb.mxu3 %v492_v11  ;;  %1870 = vmatpush.msrb.mxu2 %v492_v11 }
 0xa45   :  { %v1695_v1 = vmax.f32 %v1691_v62, 1e-09 }
 0xa47   :  { %v1699_v2 = vmin.f32 %v1695_v1, 1.0 }
 0xa49   :  { %2088 = vmatmul.msk.f32.vlgmr.msrb.gmra.mxu0 %vm497_vm13, %v1699_v2  ;;  %v1135_v42 = vpop.permute.xlu1 %1134  ;;  %vm1820_vm13 = vcmask 254144   ;;  %v2827_v2 = vld [vmem:[%s2863_s3] sm:$0x3] }
 0xa4a   :  { %1147 = vst.msk [vmem:[#allocation2] sm:$0x1] %vm1146_vm2, %v1135_v42  ;;  %v1139_v5 = vpop.permute.xlu0 %1138 }
 0xa4b   :  { %1149 = vst.msk [vmem:[#allocation2 + $0x2] sm:$0x1] %vm1146_vm2, %v1139_v5 }
 0xa4c   :  { %1486 = vst.msk [vmem:[#allocation2 + $0x2] sm:$0x1] %vm1483_vm4, %v1476_v6 }
 0xa4d   :  { %1484 = vst.msk [vmem:[#allocation2] sm:$0x1] %vm1483_vm4, %v1472_v24  ;;  %v2014_v24 = vrot.slane %v2827_v2, 1 }
 0xa51   :  { %v1478_v8 = vpop.permute.xlu1 %1477 }
 0xa52   :  { %v1141_v0 = vpop.permute.xlu0 %1140 }
 0xa53   :  { %1150 = vst.msk [vmem:[#allocation2 + $0x3] sm:$0x1] %vm1146_vm2, %v1141_v0 }
 0xa54   :  { %1487 = vst.msk [vmem:[#allocation2 + $0x3] sm:$0x1] %vm1483_vm4, %v1478_v8 }
 0xaa5   :  { %v1723_v10 = vpop.f32.mrf.mxu1 }
 0xac0   :  { %v1775_v46 = vpop.f32.mrf.mxu3 }
 0xac1   :  { %1812 = vrot.lane.b32.xlu2 %v1775_v46, %s2269_s11 }
 0xac4   :  { %v1749_v63 = vpop.f32.mrf.mxu2 }
 0xac5   :  { %1810 = vrot.lane.b32.xlu0 %v1749_v63, %s2269_s11 }
 0xac6   :  { %v1801_v4 = vpop.f32.mrf.mxu0 }
 0xac9   :  { %1814 = vrot.lane.b32.xlu2 %v1801_v4, %s2269_s11 }
 0xacd   :  { %1808 = vrot.lane.b32.xlu0 %v1723_v10, %s2269_s11 }
 0xb1b   :  { %v1813_v12 = vpop.permute.xlu2 %1812 }
 0xb1c   :  { %1823 = vst.msk [vmem:[#allocation2 + $0x2] sm:$0x1] %vm1820_vm13, %v1813_v12 }
 0xb23   :  { %v1815_v13 = vpop.permute.xlu2 %1814  ;;  %v1827_v15 = vld [vmem:[#allocation2 + $0x2] sm:$0x1] }
 0xb24   :  { %1824 = vst.msk [vmem:[#allocation2 + $0x3] sm:$0x1] %vm1820_vm13, %v1815_v13  ;;  %2091 = vmatmul.msk.f32.vlgmr.msrb.gmra.mxu3 %vm34_vm0, %v1827_v15 }
 0xb2b   :  { %v1828_v7 = vld [vmem:[#allocation2 + $0x3] sm:$0x1] }
 0xb2c   :  { %2092 = vmatmul.msk.f32.vlgmr.msra.gmra.mxu0 %vm34_vm0, %v1828_v7 }
 0xb37   :  { %v1811_v48 = vpop.permute.xlu0 %1810 }
 0xb38   :  { %1822 = vst.msk [vmem:[#allocation2 + $0x1] sm:$0x1] %vm1820_vm13, %v1811_v48 }
 0xb3f   :  { %v1809_v60 = vpop.permute.xlu0 %1808  ;;  %v1826_v16 = vld [vmem:[#allocation2 + $0x1] sm:$0x1] }
 0xb40   :  { %1821 = vst.msk [vmem:[#allocation2] sm:$0x1] %vm1820_vm13, %v1809_v60  ;;  %2090 = vmatmul.msk.f32.vlgmr.msrb.gmra.mxu2 %vm34_vm0, %v1826_v16 }
 0xb47   :  { %v1825_v17 = vld [vmem:[#allocation2] sm:$0x1] }
 0xb48   :  { %2089 = vmatmul.msk.f32.vlgmr.msrb.gmra.mxu1 %vm34_vm0, %v1825_v17 }
 0xba7   :  { %v1895_v3 = vpop.f32.mrf.mxu3 }
 0xba8   :  { %v1896_v18 = vadd.f32 %v1895_v3, %v496_v9 }
 0xba9   :  { %v1918_v23 = vpop.f32.mrf.mxu0 }
 0xbaa   :  { %v1927_v32 = vsel %vm245_vm14, %v1896_v18, 0.0  ;;  %v1919_v58 = vadd.f32 %v1918_v23, %v496_v9 }
 0xbab   :  { %1928 = vadd.xlane.f32.xlu2 %v1927_v32 }
 0xbac   :  { %v1930_v25 = vsel %vm245_vm14, %v1919_v58, 0.0 }
 0xbc3   :  { %v1872_v26 = vpop.f32.mrf.mxu2 }
 0xbc4   :  { %v1873_v19 = vadd.f32 %v1872_v26, %v496_v9 }
 0xbc5   :  { %v1849_v61 = vpop.f32.mrf.mxu1 }
 0xbc6   :  { %v1850_v20 = vadd.f32 %v1849_v61, %v496_v9  ;;  %v1924_v21 = vsel %vm245_vm14, %v1873_v19, 0.0 }
 0xbc7   :  { %1925 = vadd.xlane.f32.xlu0 %v1924_v21 }
 0xbc8   :  { %v1921_v22 = vsel %vm245_vm14, %v1850_v20, 0.0 }
 0xbc9   :  { %1922 = vadd.xlane.f32.xlu1 %v1921_v22 }
 0xbd1   :  { %1931 = vadd.xlane.f32.xlu1 %v1930_v25 }
 0xc1e   :  { %v1929_v27 = vpop.xlane.xlu2 %1928 }
 0xc1f   :  { %v1935_v31 = vmul.f32 %v1929_v27, %v2331_v14 }
 0xc21   :  { %v1939_v33 = vsub.f32 %v1896_v18, %v1935_v31 }
 0xc23   :  { %v1943_v34 = vmul.f32 %v1939_v33, %v1939_v33 }
 0xc25   :  { %v1951_v35 = vsel %vm245_vm14, %v1943_v34, 0.0 }
 0xc26   :  { %1952 = vadd.xlane.f32.xlu1 %v1951_v35 }
 0xc3a   :  { %v1926_v36 = vpop.xlane.xlu0 %1925 }
 0xc3b   :  { %v1934_v29 = vmul.f32 %v1926_v36, %v2331_v14 }
 0xc3c   :  { %v1923_v30 = vpop.xlane.xlu1 %1922 }
 0xc3d   :  { %v2806_v56 = vsub.f32 %v1873_v19, %v1934_v29  ;;  %v1933_v38 = vmul.f32 %v1923_v30, %v2331_v14 }
 0xc3f   :  { %v2809_v39 = vsub.f32 %v1850_v20, %v1933_v38  ;;  %v1942_v37 = vmul.f32 %v2806_v56, %v2806_v56 }
 0xc41   :  { %v1948_v40 = vsel %vm245_vm14, %v1942_v37, 0.0  ;;  %v1941_v41 = vmul.f32 %v2809_v39, %v2809_v39 }
 0xc42   :  { %1949 = vadd.xlane.f32.xlu0 %v1948_v40 }
 0xc43   :  { %v1945_v44 = vsel %vm245_vm14, %v1941_v41, 0.0 }
 0xc44   :  { %1946 = vadd.xlane.f32.xlu2 %v1945_v44  ;;  %v1932_v43 = vpop.xlane.xlu1 %1931 }
 0xc45   :  { %v1936_v47 = vmul.f32 %v1932_v43, %v2331_v14 }
 0xc47   :  { %v2818_v50 = vsub.f32 %v1919_v58, %v1936_v47 }
 0xc49   :  { %v1944_v28 = vmul.f32 %v2818_v50, %v2818_v50 }
 0xc4b   :  { %v1954_v49 = vsel %vm245_vm14, %v1944_v28, 0.0 }
 0xc4c   :  { %1955 = vadd.xlane.f32.xlu2 %v1954_v49 }
 0xc99   :  { %v1953_v54 = vpop.xlane.xlu1 %1952 }
 0xc9a   :  { %v1959_v6 = vmul.f32 %v1953_v54, %v2331_v14 }
 0xc9c   :  { %v1963_v53 = vadd.f32 1e-05, %v1959_v6 }
 0xc9e   :  { %2251 = vrsqrt.f32 %v1963_v53  ;;  %vm1991_vm5 = vweird.f32 %v1963_v53 }
 0xca4   :  { %v2252_v52 = vpop.eup %2251 }
 0xca5   :  { %v1986_v57 = vmul.f32 %v2252_v52, %v1963_v53  ;;  %vm1992_vm0 = vweird.f32 %v2252_v52 }
 0xca6   :  { %vm1993_vm6 = vmor %vm1991_vm5, %vm1992_vm0 }
 0xca7   :  { %v1987_v59 = vmul.f32 %v2252_v52, %v1986_v57 }
 0xca9   :  { %v1988_v62 = vmul.f32 0.5, %v1987_v59 }
 0xcab   :  { %v1989_v1 = vsub.f32 1.5, %v1988_v62 }
 0xcad   :  { %v1990_v42 = vmul.f32 %v2252_v52, %v1989_v1 }
 0xcaf   :  { %v1994_v5 = vsel %vm1993_vm6, %v2252_v52, %v1990_v42 }
 0xcb0   :  { %v2007_v0 = vmul.f32 %v1994_v5, %v1939_v33 }
 0xcb2   :  { %v2011_v8 = vmul.f32 %v2007_v0, %v2827_v2 }
 0xcb4   :  { %v2018_v46 = vadd.f32 %v2014_v24, %v2011_v8 }
 0xcb5   :  { %v1950_v63 = vpop.xlane.xlu0 %1949 }
 0xcb6   :  { %v2095_v4 = vclamps-f32 %v2018_v46, 100.0  ;;  %v1958_v10 = vmul.f32 %v1950_v63, %v2331_v14 }
 0xcb7   :  { %v1947_v45 = vpop.xlane.xlu2 %1946 }
 0xcb8   :  { %2030 = vst.msk [vmem:[%s2864_s8 + $0x2] sm:$0x1] %vm245_vm14, %v2095_v4  ;;  %v1962_v51 = vadd.f32 1e-05, %v1958_v10  ;;  %v1957_v55 = vmul.f32 %v1947_v45, %v2331_v14 }
 0xcba   :  { %2253 = vrsqrt.f32 %v1962_v51  ;;  %v1961_v11 = vadd.f32 1e-05, %v1957_v55  ;;  %vm1981_vm8 = vweird.f32 %v1962_v51 }
 0xcbc   :  { %2255 = vrsqrt.f32 %v1961_v11  ;;  %vm1971_vm11 = vweird.f32 %v1961_v11 }
 0xcbf   :  { %v1956_v12 = vpop.xlane.xlu2 %1955 }
 0xcc0   :  { %v2254_v13 = vpop.eup %2253  ;;  %v1960_v15 = vmul.f32 %v1956_v12, %v2331_v14 }
 0xcc1   :  { %v1976_v7 = vmul.f32 %v2254_v13, %v1962_v51  ;;  %vm1982_vm7 = vweird.f32 %v2254_v13 }
 0xcc2   :  { %v2256_v48 = vpop.eup %2255  ;;  %v1964_v60 = vadd.f32 1e-05, %v1960_v15  ;;  %vm1983_vm10 = vmor %vm1981_vm8, %vm1982_vm7 }
 0xcc3   :  { %v1977_v16 = vmul.f32 %v2254_v13, %v1976_v7  ;;  %v1966_v17 = vmul.f32 %v2256_v48, %v1961_v11  ;;  %vm1972_vm9 = vweird.f32 %v2256_v48 }
 0xcc4   :  { %2257 = vrsqrt.f32 %v1964_v60  ;;  %vm1973_vm12 = vmor %vm1971_vm11, %vm1972_vm9  ;;  %vm2001_vm1 = vweird.f32 %v1964_v60 }
 0xcc5   :  { %v1978_v9 = vmul.f32 0.5, %v1977_v16  ;;  %v1967_v3 = vmul.f32 %v2256_v48, %v1966_v17 }
 0xcc7   :  { %v1979_v18 = vsub.f32 1.5, %v1978_v9  ;;  %v1968_v32 = vmul.f32 0.5, %v1967_v3 }
 0xcc9   :  { %v1980_v26 = vmul.f32 %v2254_v13, %v1979_v18  ;;  %v1969_v19 = vsub.f32 1.5, %v1968_v32 }
 0xcca   :  { %v2258_v61 = vpop.eup %2257 }
 0xccb   :  { %v1984_v20 = vsel %vm1983_vm10, %v2254_v13, %v1980_v26  ;;  %v1970_v21 = vmul.f32 %v2256_v48, %v1969_v19  ;;  %v1996_v14 = vmul.f32 %v2258_v61, %v1964_v60  ;;  %vm2002_vm15 = vweird.f32 %v2258_v61 }
 0xccc   :  { %v2006_v22 = vmul.f32 %v1984_v20, %v2806_v56  ;;  %vm2003_vm2 = vmor %vm2001_vm1, %vm2002_vm15 }
 0xccd   :  { %v1974_v23 = vsel %vm1973_vm12, %v2256_v48, %v1970_v21  ;;  %v1997_v58 = vmul.f32 %v2258_v61, %v1996_v14 }
 0xcce   :  { %v2010_v25 = vmul.f32 %v2006_v22, %v2827_v2  ;;  %v2005_v27 = vmul.f32 %v1974_v23, %v2809_v39 }
 0xccf   :  { %v1998_v31 = vmul.f32 0.5, %v1997_v58 }
 0xcd0   :  { %v2017_v33 = vadd.f32 %v2014_v24, %v2010_v25  ;;  %v2009_v34 = vmul.f32 %v2005_v27, %v2827_v2 }
 0xcd1   :  { %v1999_v35 = vsub.f32 1.5, %v1998_v31 }
 0xcd2   :  { %v2094_v36 = vclamps-f32 %v2017_v33, 100.0  ;;  %v2016_v29 = vadd.f32 %v2014_v24, %v2009_v34 }
 0xcd3   :  { %v2000_v30 = vmul.f32 %v2258_v61, %v1999_v35 }
 0xcd4   :  { %2029 = vst.msk [vmem:[%s2864_s8 + $0x1] sm:$0x1] %vm245_vm14, %v2094_v36  ;;  %v2093_v56 = vclamps-f32 %v2016_v29, 100.0 }
 0xcd5   :  { %v2004_v38 = vsel %vm2003_vm2, %v2258_v61, %v2000_v30 }
 0xcd6   :  { %2028 = vst.msk [vmem:[%s2864_s8] sm:$0x1] %vm245_vm14, %v2093_v56  ;;  %v2008_v39 = vmul.f32 %v2004_v38, %v2818_v50 }
 0xcd8   :  { %v2012_v37 = vmul.f32 %v2008_v39, %v2827_v2 }
 0xcda   :  { %v2019_v40 = vadd.f32 %v2014_v24, %v2012_v37 }
 0xcdc   :  { %v2096_v41 = vclamps-f32 %v2019_v40, 100.0 }
 0xcde   :  { %2031 = vst.msk [vmem:[%s2864_s8 + $0x3] sm:$0x1] %vm245_vm14, %v2096_v41 }

// kernel: hierarchical_transformer_fwd.6
= control target key start
LH: loop header
LB: loop body
LE: loop exit
PB: predicated region body
PF: predicated region fallthrough
CT: control target
= control target key end

     0   :  { %vm40_vm0 = vcmask 261120   ;;  %v2634_v8 = vmov 32.0   ;;  %s2635_s30 = smov 96   ;;  %vm244_vm14 = vcmask 64512   ;;  %s2637_s11 = smov 120   ;;  %s3351_s0 = inlined_call_operand.vmem [shape: f32[4,8,32], index: 0, kind: input, shape index: {}]   ;;  %s3352_s3 = inlined_call_operand.vmem [shape: f32[1,96], index: 3, kind: input, shape index: {}]   ;;  %s3353_s2 = inlined_call_operand.vmem [shape: f32[32,96], index: 2, kind: input, shape index: {}]   ;;  %s3354_s5 = inlined_call_operand.vmem [shape: f32[1,32], index: 5, kind: input, shape index: {}]   ;;  %s3355_s4 = inlined_call_operand.vmem [shape: f32[32,32], index: 4, kind: input, shape index: {}]   ;;  %s3356_s1 = inlined_call_operand.vmem [shape: f32[4,32], index: 1, kind: input, shape index: {}]   ;;  %s3357_s7 = inlined_call_operand.vmem [shape: f32[1,64], index: 7, kind: input, shape index: {}]   ;;  %s3358_s6 = inlined_call_operand.vmem [shape: f32[32,64], index: 6, kind: input, shape index: {}]   ;;  %s3359_s9 = inlined_call_operand.vmem [shape: f32[1,32], index: 9, kind: input, shape index: {}]   ;;  %s3360_s8 = inlined_call_operand.vmem [shape: f32[64,32], index: 8, kind: input, shape index: {}]   ;;  %s3361_s10 = inlined_call_operand.vmem [shape: f32[4,8,32], index: 10, kind: output, shape index: {}]  }
   0x1   :  { %v37_v0 = vld [vmem:[%s3351_s0 + $0x10] sm:$0xff]  ;;  %v35_v1 = vld [vmem:[%s3351_s0] sm:$0xff]  ;;  %v38_v4 = vld [vmem:[%s3351_s0 + $0x18] sm:$0xff]  ;;  %2516 = vrcp.f32 %v2634_v8  ;;  %s2638_s12 = smov 88   ;;  %s2639_s13 = smov 112  }
   0x2   :  { %v47_v2 = vsel %vm40_vm0, %v37_v0, 0.0  ;;  %v41_v3 = vsel %vm40_vm0, %v35_v1, 0.0  ;;  %v36_v5 = vld [vmem:[%s3351_s0 + $0x8] sm:$0xff]  ;;  %v50_v6 = vsel %vm40_vm0, %v38_v4, 0.0  ;;  %v139_v35 = vld [vmem:[%s3353_s2 + $0x18] sm:$0xff]  ;;  %v138_v36 = vld [vmem:[%s3353_s2 + $0x10] sm:$0xff] }
   0x3   :  { %48 = vadd.xlane.f32.xlu0 %v47_v2  ;;  %42 = vadd.xlane.f32.xlu2 %v41_v3  ;;  %v44_v7 = vsel %vm40_vm0, %v36_v5, 0.0  ;;  %v137_v37 = vld [vmem:[%s3353_s2 + $0x8] sm:$0xff]  ;;  %v136_v38 = vld [vmem:[%s3353_s2] sm:$0xff]  ;;  %s2640_s14 = smov 56   ;;  %s2641_s15 = smov 80  }
   0x4   :  { %159 = vmatpush.msra.mxu0 %v139_v35  ;;  %205 = vmatpush.msra.mxu2 %v139_v35  ;;  %s2642_s16 = smov 48   ;;  %s2643_s17 = smov 104  }
   0x5   :  { %228 = vmatpush.msra.mxu3 %v139_v35  ;;  %182 = vmatpush.msra.mxu1 %v139_v35  ;;  %s2644_s18 = smov 72   ;;  %s2645_s19 = smov 40  }
   0x6   :  { %160 = vmatpush.msra.mxu0 %v138_v36  ;;  %206 = vmatpush.msra.mxu2 %v138_v36  ;;  %s2646_s20 = smov 16   ;;  %s2647_s21 = smov 8  }
   0x7   :  { %v2517_v9 = vpop.eup %2516  ;;  %229 = vmatpush.msra.mxu3 %v138_v36  ;;  %183 = vmatpush.msra.mxu1 %v138_v36  ;;  %s2648_s22 = smov 24  }
   0x8   :  { %v54_v10 = vmul.f32 32.0, %v2517_v9  ;;  %vm58_vm1 = vweird.f32 %v2517_v9  ;;  %161 = vmatpush.msra.mxu0 %v137_v37  ;;  %207 = vmatpush.msra.mxu2 %v137_v37 }
   0x9   :  { %230 = vmatpush.msra.mxu3 %v137_v37  ;;  %184 = vmatpush.msra.mxu1 %v137_v37 }
   0xa   :  { %v55_v11 = vsub.f32 1.0, %v54_v10  ;;  %162 = vmatpush.msra.mxu0 %v136_v38  ;;  %208 = vmatpush.msra.mxu2 %v136_v38 }
   0xb   :  { %51 = vadd.xlane.f32.xlu0 %v50_v6  ;;  %45 = vadd.xlane.f32.xlu2 %v44_v7 }
   0xc   :  { %v56_v12 = vmul.f32 %v2517_v9, %v55_v11  ;;  %231 = vmatpush.msra.mxu3 %v136_v38  ;;  %185 = vmatpush.msra.mxu1 %v136_v38 }
   0xe   :  { %v57_v13 = vadd.f32 %v2517_v9, %v56_v12 }
  0x10   :  { %v2720_v14 = vsel %vm58_vm1, %v2517_v9, %v57_v13 }
  0x76   :  { %v49_v15 = vpop.xlane.xlu0 %48  ;;  %v43_v16 = vpop.xlane.xlu2 %42 }
  0x77   :  { %v62_v17 = vmul.f32 %v2720_v14, %v49_v15  ;;  %v60_v18 = vmul.f32 %v2720_v14, %v43_v16 }
  0x79   :  { %v2724_v19 = vsub.f32 %v37_v0, %v62_v17  ;;  %v2726_v20 = vsub.f32 %v35_v1, %v60_v18 }
  0x7b   :  { %v70_v21 = vmul.f32 %v2724_v19, %v2724_v19  ;;  %v68_v22 = vmul.f32 %v2726_v20, %v2726_v20 }
  0x7d   :  { %v78_v23 = vsel %vm40_vm0, %v70_v21, 0.0  ;;  %v72_v24 = vsel %vm40_vm0, %v68_v22, 0.0 }
  0x7e   :  { %79 = vadd.xlane.f32.xlu1 %v78_v23  ;;  %v52_v25 = vpop.xlane.xlu0 %51  ;;  %73 = vadd.xlane.f32.xlu0 %v72_v24  ;;  %v46_v26 = vpop.xlane.xlu2 %45 }
  0x7f   :  { %v63_v27 = vmul.f32 %v2720_v14, %v52_v25  ;;  %v61_v28 = vmul.f32 %v2720_v14, %v46_v26 }
  0x81   :  { %v2736_v29 = vsub.f32 %v38_v4, %v63_v27  ;;  %v2740_v31 = vsub.f32 %v36_v5, %v61_v28 }
  0x83   :  { %v71_v30 = vmul.f32 %v2736_v29, %v2736_v29  ;;  %v69_v33 = vmul.f32 %v2740_v31, %v2740_v31 }
  0x85   :  { %v81_v32 = vsel %vm40_vm0, %v71_v30, 0.0  ;;  %v75_v34 = vsel %vm40_vm0, %v69_v33, 0.0 }
  0x86   :  { %82 = vadd.xlane.f32.xlu1 %v81_v32 }
  0x8e   :  { %76 = vadd.xlane.f32.xlu1 %v75_v34 }
  0xf1   :  { %v80_v39 = vpop.xlane.xlu1 %79  ;;  %v74_v40 = vpop.xlane.xlu0 %73 }
  0xf2   :  { %v86_v41 = vmul.f32 %v80_v39, %v2720_v14  ;;  %v84_v42 = vmul.f32 %v74_v40, %v2720_v14 }
  0xf4   :  { %v90_v43 = vadd.f32 1e-05, %v86_v41  ;;  %v88_v44 = vadd.f32 1e-05, %v84_v42 }
  0xf6   :  { %2518 = vrsqrt.f32 %v90_v43  ;;  %vm98_vm2 = vweird.f32 %v88_v44  ;;  %vm118_vm5 = vweird.f32 %v90_v43 }
  0xf7   :  { %2520 = vrsqrt.f32 %v88_v44 }
  0xf9   :  { %v83_v45 = vpop.xlane.xlu1 %82 }
  0xfa   :  { %v87_v46 = vmul.f32 %v83_v45, %v2720_v14 }
  0xfc   :  { %v2519_v47 = vpop.eup %2518  ;;  %v91_v48 = vadd.f32 1e-05, %v87_v46 }
  0xfd   :  { %v2521_v49 = vpop.eup %2520  ;;  %v113_v50 = vmul.f32 %v2519_v47, %v90_v43  ;;  %vm119_vm4 = vweird.f32 %v2519_v47 }
  0xfe   :  { %v93_v51 = vmul.f32 %v2521_v49, %v88_v44  ;;  %2522 = vrsqrt.f32 %v91_v48  ;;  %vm99_vm3 = vweird.f32 %v2521_v49  ;;  %vm120_vm7 = vmor %vm118_vm5, %vm119_vm4  ;;  %vm128_vm9 = vweird.f32 %v91_v48 }
  0xff   :  { %v114_v52 = vmul.f32 %v2519_v47, %v113_v50  ;;  %vm100_vm6 = vmor %vm98_vm2, %vm99_vm3 }
 0x100   :  { %v94_v53 = vmul.f32 %v2521_v49, %v93_v51 }
 0x101   :  { %v115_v54 = vmul.f32 0.5, %v114_v52  ;;  %v77_v55 = vpop.xlane.xlu1 %76 }
 0x102   :  { %v95_v56 = vmul.f32 0.5, %v94_v53  ;;  %v85_v57 = vmul.f32 %v77_v55, %v2720_v14 }
 0x103   :  { %v116_v58 = vsub.f32 1.5, %v115_v54 }
 0x104   :  { %v2523_v59 = vpop.eup %2522  ;;  %v96_v60 = vsub.f32 1.5, %v95_v56  ;;  %v89_v61 = vadd.f32 1e-05, %v85_v57 }
 0x105   :  { %v123_v62 = vmul.f32 %v2523_v59, %v91_v48  ;;  %v117_v63 = vmul.f32 %v2519_v47, %v116_v58  ;;  %vm129_vm8 = vweird.f32 %v2523_v59 }
 0x106   :  { %2524 = vrsqrt.f32 %v89_v61  ;;  %v97_v0 = vmul.f32 %v2521_v49, %v96_v60  ;;  %vm130_vm10 = vmor %vm128_vm9, %vm129_vm8  ;;  %vm108_vm11 = vweird.f32 %v89_v61 }
 0x107   :  { %v124_v1 = vmul.f32 %v2523_v59, %v123_v62  ;;  %v121_v2 = vsel %vm120_vm7, %v2519_v47, %v117_v63 }
 0x108   :  { %v101_v3 = vsel %vm100_vm6, %v2521_v49, %v97_v0  ;;  %v134_v4 = vmul.f32 %v121_v2, %v2724_v19 }
 0x109   :  { %v125_v5 = vmul.f32 0.5, %v124_v1  ;;  %v132_v6 = vmul.f32 %v101_v3, %v2726_v20  ;;  %v2512_v20 = vld [vmem:[%s3352_s3] ss:$0 sm:$0xff]  ;;  %s2636_s3 = smov 64  }
 0x10a   :  { %2391 = vmatmul.msk.f32.vlgmr.msra.gmra.mxu2 %vm40_vm0, %v134_v4 }
 0x10b   :  { %v126_v7 = vsub.f32 1.5, %v125_v5  ;;  %2389 = vmatmul.msk.f32.vlgmr.msra.gmra.mxu0 %vm40_vm0, %v132_v6 }
 0x10c   :  { %v2525_v8 = vpop.eup %2524 }
 0x10d   :  { %v103_v9 = vmul.f32 %v2525_v8, %v89_v61  ;;  %v127_v10 = vmul.f32 %v2523_v59, %v126_v7  ;;  %vm109_vm12 = vweird.f32 %v2525_v8 }
 0x10e   :  { %vm110_vm13 = vmor %vm108_vm11, %vm109_vm12 }
 0x10f   :  { %v104_v11 = vmul.f32 %v2525_v8, %v103_v9  ;;  %v131_v12 = vsel %vm130_vm10, %v2523_v59, %v127_v10 }
 0x110   :  { %v135_v13 = vmul.f32 %v131_v12, %v2736_v29 }
 0x111   :  { %v105_v15 = vmul.f32 0.5, %v104_v11 }
 0x112   :  { %2392 = vmatmul.msk.f32.vlgmr.msra.gmra.mxu3 %vm40_vm0, %v135_v13 }
 0x113   :  { %v106_v16 = vsub.f32 1.5, %v105_v15 }
 0x115   :  { %v107_v17 = vmul.f32 %v2525_v8, %v106_v16 }
 0x117   :  { %v111_v18 = vsel %vm110_vm13, %v2525_v8, %v107_v17 }
 0x118   :  { %v133_v19 = vmul.f32 %v111_v18, %v2740_v31 }
 0x11a   :  { %2390 = vmatmul.msk.f32.vlgmr.msra.gmra.mxu1 %vm40_vm0, %v133_v19 }
 0x188   :  { %v164_v21 = vpop.f32.mrf.mxu0 }
 0x189   :  { %v2773_v22 = vadd.f32 %v2512_v20, %v164_v21 }
 0x18b   :  { %242 = vrot.lane.b32.xlu1 %v2773_v22, %s2635_s30 }
 0x18d   :  { %v210_v23 = vpop.f32.mrf.mxu2 }
 0x18e   :  { %v2776_v24 = vadd.f32 %v2512_v20, %v210_v23 }
 0x190   :  { %297 = vrot.lane.b32.xlu2 %v2776_v24, %s2635_s30 }
 0x195   :  { %v233_v25 = vpop.f32.mrf.mxu3 }
 0x196   :  { %v2779_v26 = vadd.f32 %v2512_v20, %v233_v25 }
 0x197   :  { %v187_v27 = vpop.f32.mrf.mxu1 }
 0x198   :  { %v2781_v28 = vadd.f32 %v2512_v20, %v187_v27  ;;  %324 = vrot.lane.b32.xlu0 %v2779_v26, %s2635_s30  ;;  %v2802_v42 = vpack.i.bf16 %v2779_v26, %v2776_v24 }
 0x19a   :  { %270 = vrot.lane.b32.xlu2 %v2781_v28, %s2635_s30  ;;  %v2826_v1 = vpack.i.bf16 %v2781_v28, %v2773_v22 }
 0x1ea   :  { %v298_v29 = vpop.permute.xlu2 %297 }
 0x1eb   :  { %2397 = vmatpush.xpose.msk.msrb.mxu2 %vm244_vm14, %v298_v29 }
 0x1ee   :  { %2398 = vmatmul.msk.f32.vlgmr.msrb.gmra.mxu2 %vm244_vm14, %v2776_v24 }
 0x1f4   :  { %v271_v30 = vpop.permute.xlu2 %270 }
 0x1f5   :  { %2395 = vmatpush.xpose.msk.msrb.mxu1 %vm244_vm14, %v271_v30 }
 0x1f8   :  { %2396 = vmatmul.msk.f32.vlgmr.msrb.gmra.mxu1 %vm244_vm14, %v2781_v28 }
 0x1fd   :  { %v243_v31 = vpop.permute.xlu1 %242 }
 0x1fe   :  { %2393 = vmatpush.xpose.msk.msrb.mxu0 %vm244_vm14, %v243_v31 }
 0x201   :  { %2394 = vmatmul.msk.f32.vlgmr.msrb.gmra.mxu0 %vm244_vm14, %v2773_v22 }
 0x20a   :  { %v325_v32 = vpop.permute.xlu0 %324 }
 0x20b   :  { %2399 = vmatpush.xpose.msk.msrb.mxu3 %vm244_vm14, %v325_v32 }
 0x20e   :  { %2400 = vmatmul.msk.f32.vlgmr.msrb.gmra.mxu3 %vm244_vm14, %v2779_v26 }
 0x271   :  { %v320_v33 = vpop.f32.mrf.mxu2 }
 0x272   :  { %v352_v34 = vmul.f32 0.35355338, %v320_v33 }
 0x274   :  { %v360_v35 = vsel %vm244_vm14, %v352_v34, -inf }
 0x275   :  { %361 = vmax.xlane.f32.xlu0 %v360_v35  ;;  %v293_v36 = vpop.f32.mrf.mxu1 }
 0x276   :  { %v351_v37 = vmul.f32 0.35355338, %v293_v36 }
 0x278   :  { %v357_v38 = vsel %vm244_vm14, %v351_v37, -inf }
 0x27d   :  { %358 = vmax.xlane.f32.xlu0 %v357_v38 }
 0x27e   :  { %v266_v39 = vpop.f32.mrf.mxu0 }
 0x27f   :  { %v350_v40 = vmul.f32 0.35355338, %v266_v39 }
 0x281   :  { %v354_v41 = vsel %vm244_vm14, %v350_v40, -inf }
 0x282   :  { %355 = vmax.xlane.f32.xlu1 %v354_v41 }
 0x291   :  { %v347_v43 = vpop.f32.mrf.mxu3  ;;  %2473 = vrot.lane.b32.xlu0 %v2802_v42, %s2636_s3 }
 0x292   :  { %v353_v44 = vmul.f32 0.35355338, %v347_v43 }
 0x294   :  { %v363_v45 = vsel %vm244_vm14, %v353_v44, -inf }
 0x295   :  { %364 = vmax.xlane.f32.xlu2 %v363_v45 }
 0x299   :  { %626 = vrot.lane.b32.xlu0 %v2776_v24, %s2637_s11 }
 0x2ad   :  { %628 = vrot.lane.b32.xlu2 %v2776_v24, %s2638_s12 }
 0x2e8   :  { %v362_v46 = vpop.xlane.xlu0 %361 }
 0x2e9   :  { %v368_v47 = vsub.f32 %v352_v34, %v362_v46 }
 0x2eb   :  { %v374_v48 = vmul.f32 1.442695, %v368_v47 }
 0x2ed   :  { %2526 = vpow2.f32 %v374_v48 }
 0x2f0   :  { %v359_v54 = vpop.xlane.xlu0 %358 }
 0x2f1   :  { %v367_v3 = vsub.f32 %v351_v37, %v359_v54 }
 0x2f3   :  { %v2811_v49 = vpop.eup %2526  ;;  %v372_v4 = vmul.f32 1.442695, %v367_v3 }
 0x2f4   :  { %v384_v50 = vsel %vm244_vm14, %v2811_v49, 0.0 }
 0x2f5   :  { %v356_v51 = vpop.xlane.xlu1 %355  ;;  %385 = vadd.xlane.f32.xlu2 %v384_v50 }
 0x2f6   :  { %v366_v52 = vsub.f32 %v350_v40, %v356_v51 }
 0x2f8   :  { %v370_v53 = vmul.f32 1.442695, %v366_v52 }
 0x2fa   :  { %2528 = vpow2.f32 %v370_v53 }
 0x300   :  { %v2815_v55 = vpop.eup %2528 }
 0x301   :  { %v378_v56 = vsel %vm244_vm14, %v2815_v55, 0.0 }
 0x302   :  { %379 = vadd.xlane.f32.xlu0 %v378_v56 }
 0x303   :  { %v2474_v57 = vpop.permute.xlu0 %2473 }
 0x304   :  { %v2476_v58 = vunpack.i.h.bf16 %v2474_v57  ;;  %v2475_v59 = vunpack.i.l.bf16 %v2474_v57 }
 0x306   :  { %535 = vmatpush.msra.mxu2 %v2475_v59  ;;  %561 = vmatpush.msra.mxu3 %v2476_v58 }
 0x308   :  { %v365_v60 = vpop.xlane.xlu2 %364 }
 0x309   :  { %v369_v61 = vsub.f32 %v353_v44, %v365_v60 }
 0x30b   :  { %v376_v62 = vmul.f32 1.442695, %v369_v61  ;;  %v627_v9 = vpop.permute.xlu0 %626 }
 0x30d   :  { %2530 = vpow2.f32 %v376_v62  ;;  %654 = vrot.lane.b32.xlu2 %v2779_v26, %s2637_s11 }
 0x30e   :  { %2532 = vpow2.f32 %v372_v4 }
 0x310   :  { %v629_v63 = vpop.permute.xlu2 %628 }
 0x311   :  { %2409 = vmatpush.xpose.msk.msrb.mxu2 %vm244_vm14, %v629_v63 }
 0x313   :  { %v2822_v0 = vpop.eup %2530 }
 0x314   :  { %v387_v2 = vsel %vm244_vm14, %v2822_v0, 0.0  ;;  %v2842_v5 = vpop.eup %2532 }
 0x315   :  { %2478 = vrot.lane.b32.xlu2 %v2826_v1, %s2636_s3  ;;  %388 = vadd.xlane.f32.xlu1 %v387_v2  ;;  %v381_v6 = vsel %vm244_vm14, %v2842_v5, 0.0 }
 0x31d   :  { %572 = vrot.lane.b32.xlu2 %v2773_v22, %s2638_s12 }
 0x325   :  { %600 = vrot.lane.b32.xlu2 %v2781_v28, %s2638_s12 }
 0x32d   :  { %570 = vrot.lane.b32.xlu2 %v2773_v22, %s2637_s11 }
 0x32e   :  { %656 = vrot.lane.b32.xlu1 %v2779_v26, %s2638_s12 }
 0x335   :  { %598 = vrot.lane.b32.xlu2 %v2781_v28, %s2637_s11 }
 0x358   :  { %382 = vadd.xlane.f32.xlu1 %v381_v6 }
 0x368   :  { %v386_v7 = vpop.xlane.xlu2 %385 }
 0x369   :  { %v392_v8 = vadd.f32 1e-09, %v386_v7 }
 0x36b   :  { %2534 = vrcp.f32 %v392_v8  ;;  %v435_v15 = vand.u32 2147483648, %v392_v8  ;;  %v433_v18 = vand.u32 2147483647, %v392_v8  ;;  %vm429_vm1 = vweird.f32 %v392_v8 }
 0x36d   :  { %v436_v23 = vor.u32 1.1754944e-38, %v435_v15  ;;  %vm434_vm3 = vcmp.eq.f32.partialorder %v433_v18, 8.507059e+37 }
 0x370   :  { %v2846_v10 = vpop.permute.xlu2 %654 }
 0x371   :  { %v2535_v11 = vpop.eup %2534 }
 0x372   :  { %v425_v12 = vmul.f32 %v2535_v11, %v392_v8  ;;  %vm430_vm15 = vweird.f32 %v2535_v11 }
 0x373   :  { %vm431_vm2 = vmor %vm429_vm1, %vm430_vm15 }
 0x374   :  { %v426_v13 = vsub.f32 1.0, %v425_v12 }
 0x375   :  { %v380_v16 = vpop.xlane.xlu0 %379 }
 0x376   :  { %v427_v17 = vmul.f32 %v2535_v11, %v426_v13  ;;  %v390_v19 = vadd.f32 1e-09, %v380_v16 }
 0x378   :  { %v428_v20 = vadd.f32 %v2535_v11, %v427_v17  ;;  %2536 = vrcp.f32 %v390_v19  ;;  %v2479_v21 = vpop.permute.xlu2 %2478  ;;  %v405_v38 = vand.u32 2147483648, %v390_v19  ;;  %v403_v40 = vand.u32 2147483647, %v390_v19 }
 0x379   :  { %v2481_v25 = vunpack.i.h.bf16 %v2479_v21  ;;  %v2480_v27 = vunpack.i.l.bf16 %v2479_v21  ;;  %vm399_vm5 = vweird.f32 %v390_v19 }
 0x37a   :  { %v432_v29 = vsel %vm431_vm2, %v2535_v11, %v428_v20  ;;  %v406_v43 = vor.u32 1.1754944e-38, %v405_v38  ;;  %vm404_vm7 = vcmp.eq.f32.partialorder %v403_v40, 8.507059e+37 }
 0x37b   :  { %483 = vmatpush.msra.mxu0 %v2480_v27  ;;  %509 = vmatpush.msra.mxu1 %v2481_v25  ;;  %v437_v30 = vsel %vm434_vm3, %v436_v23, %v432_v29 }
 0x37c   :  { %v438_v31 = vmul.f32 %v2811_v49, %v437_v30 }
 0x37e   :  { %v2537_v32 = vpop.eup %2536  ;;  %v456_v33 = vmax.f32 %v438_v31, 1e-09 }
 0x37f   :  { %v395_v34 = vmul.f32 %v2537_v32, %v390_v19  ;;  %vm400_vm4 = vweird.f32 %v2537_v32 }
 0x380   :  { %v573_v35 = vpop.permute.xlu2 %572  ;;  %v460_v36 = vmin.f32 %v456_v33, 1.0  ;;  %vm401_vm6 = vmor %vm399_vm5, %vm400_vm4 }
 0x381   :  { %v396_v37 = vsub.f32 1.0, %v395_v34  ;;  %2405 = vmatpush.xpose.msk.msrb.mxu0 %vm244_vm14, %v573_v35 }
 0x382   :  { %2403 = vmatmul.msk.f32.vlgmr.msra.gmra.mxu2 %vm244_vm14, %v460_v36 }
 0x383   :  { %v397_v39 = vmul.f32 %v2537_v32, %v396_v37 }
 0x385   :  { %v398_v41 = vadd.f32 %v2537_v32, %v397_v39 }
 0x387   :  { %v402_v44 = vsel %vm401_vm6, %v2537_v32, %v398_v41 }
 0x388   :  { %v389_v45 = vpop.xlane.xlu1 %388  ;;  %v601_v46 = vpop.permute.xlu2 %600  ;;  %v407_v47 = vsel %vm404_vm7, %v406_v43, %v402_v44 }
 0x389   :  { %v393_v48 = vadd.f32 1e-09, %v389_v45  ;;  %2407 = vmatpush.xpose.msk.msrb.mxu1 %vm244_vm14, %v601_v46  ;;  %v408_v49 = vmul.f32 %v2815_v55, %v407_v47 }
 0x38a   :  { %2410 = vmatmul.msk.f32.vlgmr.msrb.gmra.mxu2 %vm244_vm14, %v627_v9 }
 0x38b   :  { %2538 = vrcp.f32 %v393_v48  ;;  %v454_v50 = vmax.f32 %v408_v49, 1e-09  ;;  %v450_v56 = vand.u32 2147483648, %v393_v48  ;;  %v448_v58 = vand.u32 2147483647, %v393_v48 }
 0x38c   :  { %vm444_vm9 = vweird.f32 %v393_v48 }
 0x38d   :  { %v458_v51 = vmin.f32 %v454_v50, 1.0  ;;  %v451_v55 = vor.u32 1.1754944e-38, %v450_v56  ;;  %vm449_vm11 = vcmp.eq.f32.partialorder %v448_v58, 8.507059e+37 }
 0x38f   :  { %2401 = vmatmul.msk.f32.vlgmr.msra.gmra.mxu0 %vm244_vm14, %v458_v51 }
 0x390   :  { %v571_v59 = vpop.permute.xlu2 %570 }
 0x391   :  { %v2539_v52 = vpop.eup %2538 }
 0x392   :  { %v440_v53 = vmul.f32 %v2539_v52, %v393_v48  ;;  %vm445_vm8 = vweird.f32 %v2539_v52 }
 0x393   :  { %vm446_vm10 = vmor %vm444_vm9, %vm445_vm8 }
 0x394   :  { %v441_v54 = vsub.f32 1.0, %v440_v53 }
 0x396   :  { %v442_v57 = vmul.f32 %v2539_v52, %v441_v54 }
 0x397   :  { %2406 = vmatmul.msk.f32.vlgmr.msrb.gmra.mxu0 %vm244_vm14, %v571_v59 }
 0x398   :  { %v443_v60 = vadd.f32 %v2539_v52, %v442_v57  ;;  %v599_v21 = vpop.permute.xlu2 %598 }
 0x39a   :  { %v447_v61 = vsel %vm446_vm10, %v2539_v52, %v443_v60 }
 0x39b   :  { %v452_v62 = vsel %vm449_vm11, %v451_v55, %v447_v61 }
 0x39c   :  { %v453_v63 = vmul.f32 %v2822_v0, %v452_v62 }
 0x39e   :  { %v457_v2 = vmax.f32 %v453_v63, 1e-09 }
 0x3a0   :  { %v657_v3 = vpop.permute.xlu1 %656  ;;  %v461_v4 = vmin.f32 %v457_v2, 1.0 }
 0x3a1   :  { %2411 = vmatpush.xpose.msk.msrb.mxu3 %vm244_vm14, %v657_v3 }
 0x3a2   :  { %2404 = vmatmul.msk.f32.vlgmr.msra.gmra.mxu3 %vm244_vm14, %v461_v4 }
 0x3aa   :  { %2412 = vmatmul.msk.f32.vlgmr.msrb.gmra.mxu3 %vm244_vm14, %v2846_v10 }
 0x3cb   :  { %v383_v6 = vpop.xlane.xlu1 %382 }
 0x3cc   :  { %v391_v7 = vadd.f32 1e-09, %v383_v6 }
 0x3ce   :  { %2540 = vrcp.f32 %v391_v7  ;;  %v420_v12 = vand.u32 2147483648, %v391_v7  ;;  %v418_v0 = vand.u32 2147483647, %v391_v7  ;;  %vm414_vm13 = vweird.f32 %v391_v7 }
 0x3d0   :  { %v421_v16 = vor.u32 1.1754944e-38, %v420_v12  ;;  %vm419_vm1 = vcmp.eq.f32.partialorder %v418_v0, 8.507059e+37 }
 0x3d4   :  { %v2541_v8 = vpop.eup %2540 }
 0x3d5   :  { %v410_v9 = vmul.f32 %v2541_v8, %v391_v7  ;;  %vm415_vm12 = vweird.f32 %v2541_v8 }
 0x3d6   :  { %vm416_vm15 = vmor %vm414_vm13, %vm415_vm12 }
 0x3d7   :  { %v411_v11 = vsub.f32 1.0, %v410_v9 }
 0x3d9   :  { %v412_v13 = vmul.f32 %v2541_v8, %v411_v11 }
 0x3db   :  { %v413_v15 = vadd.f32 %v2541_v8, %v412_v13 }
 0x3dd   :  { %v417_v17 = vsel %vm416_vm15, %v2541_v8, %v413_v15 }
 0x3de   :  { %v422_v18 = vsel %vm419_vm1, %v421_v16, %v417_v17 }
 0x3df   :  { %v423_v19 = vmul.f32 %v2842_v5, %v422_v18 }
 0x3e1   :  { %v455_v10 = vmax.f32 %v423_v19, 1e-09 }
 0x3e3   :  { %v459_v20 = vmin.f32 %v455_v10, 1.0 }
 0x3e5   :  { %2402 = vmatmul.msk.f32.vlgmr.msra.gmra.mxu1 %vm244_vm14, %v459_v20 }
 0x3ed   :  { %2408 = vmatmul.msk.f32.vlgmr.msrb.gmra.mxu1 %vm244_vm14, %v599_v21 }
 0x405   :  { %v537_v23 = vpop.f32.mrf.mxu2 }
 0x406   :  { %568 = vst.msk [vmem:[#allocation2 + $0x10] sm:$0xff] %vm244_vm14, %v537_v23 }
 0x40c   :  { %v485_v25 = vpop.f32.mrf.mxu0 }
 0x40d   :  { %566 = vst.msk [vmem:[#allocation2] sm:$0xff] %vm244_vm14, %v485_v25  ;;  %v651_v38 = vpop.f32.mrf.mxu2 }
 0x40e   :  { %v684_v39 = vmul.f32 0.35355338, %v651_v38 }
 0x410   :  { %v692_v40 = vsel %vm244_vm14, %v684_v39, -inf }
 0x414   :  { %v595_v27 = vpop.f32.mrf.mxu0 }
 0x415   :  { %v2866_v29 = vmul.f32 0.35355338, %v595_v27 }
 0x417   :  { %v686_v30 = vsel %vm244_vm14, %v2866_v29, -inf }
 0x418   :  { %687 = vmax.xlane.f32.xlu2 %v686_v30 }
 0x425   :  { %v563_v5 = vpop.f32.mrf.mxu3 }
 0x426   :  { %569 = vst.msk [vmem:[#allocation2 + $0x18] sm:$0xff] %vm244_vm14, %v563_v5 }
 0x42d   :  { %v679_v31 = vpop.f32.mrf.mxu3 }
 0x42e   :  { %v685_v32 = vmul.f32 0.35355338, %v679_v31 }
 0x430   :  { %v695_v33 = vsel %vm244_vm14, %v685_v32, -inf  ;;  %1003 = vrot.lane.b32.xlu2 %v2779_v26, %s2639_s13 }
 0x431   :  { %696 = vmax.xlane.f32.xlu1 %v695_v33 }
 0x438   :  { %2488 = vrot.lane.b32.xlu2 %v2826_v1, %s2640_s14 }
 0x440   :  { %921 = vrot.lane.b32.xlu2 %v2773_v22, %s2641_s15 }
 0x448   :  { %949 = vrot.lane.b32.xlu2 %v2781_v28, %s2641_s15 }
 0x44a   :  { %2483 = vrot.lane.b32.xlu1 %v2802_v42, %s2640_s14 }
 0x462   :  { %v511_v34 = vpop.f32.mrf.mxu1 }
 0x463   :  { %567 = vst.msk [vmem:[#allocation2 + $0x8] sm:$0xff] %vm244_vm14, %v511_v34 }
 0x46a   :  { %v623_v35 = vpop.f32.mrf.mxu1 }
 0x46b   :  { %v683_v36 = vmul.f32 0.35355338, %v623_v35 }
 0x46d   :  { %v689_v37 = vsel %vm244_vm14, %v683_v36, -inf }
 0x46e   :  { %690 = vmax.xlane.f32.xlu0 %v689_v37 }
 0x476   :  { %693 = vmax.xlane.f32.xlu0 %v692_v40 }
 0x48a   :  { %977 = vrot.lane.b32.xlu0 %v2776_v24, %s2641_s15 }
 0x48b   :  { %v688_v41 = vpop.xlane.xlu2 %687 }
 0x48c   :  { %v698_v7 = vsub.f32 %v2866_v29, %v688_v41 }
 0x48e   :  { %v702_v11 = vmul.f32 1.442695, %v698_v7 }
 0x493   :  { %v2885_v43 = vpop.permute.xlu2 %1003 }
 0x49b   :  { %v2489_v44 = vpop.permute.xlu2 %2488 }
 0x49c   :  { %v2491_v45 = vunpack.i.h.bf16 %v2489_v44  ;;  %v2490_v46 = vunpack.i.l.bf16 %v2489_v44 }
 0x49e   :  { %815 = vmatpush.msra.mxu0 %v2490_v46  ;;  %841 = vmatpush.msra.mxu1 %v2491_v45 }
 0x4a3   :  { %v922_v47 = vpop.permute.xlu2 %921 }
 0x4a4   :  { %v697_v48 = vpop.xlane.xlu1 %696  ;;  %2417 = vmatpush.xpose.msk.msrb.mxu0 %vm244_vm14, %v922_v47 }
 0x4a5   :  { %v701_v49 = vsub.f32 %v685_v32, %v697_v48 }
 0x4a7   :  { %v708_v50 = vmul.f32 1.442695, %v701_v49 }
 0x4a9   :  { %2542 = vpow2.f32 %v708_v50 }
 0x4ab   :  { %v950_v51 = vpop.permute.xlu2 %949 }
 0x4ac   :  { %2419 = vmatpush.xpose.msk.msrb.mxu1 %vm244_vm14, %v950_v51 }
 0x4af   :  { %v2543_v52 = vpop.eup %2542 }
 0x4b0   :  { %v719_v53 = vsel %vm244_vm14, %v2543_v52, 0.0 }
 0x4b4   :  { %720 = vadd.xlane.f32.xlu0 %v719_v53 }
 0x4bc   :  { %v2484_v54 = vpop.permute.xlu1 %2483 }
 0x4bd   :  { %v2486_v56 = vunpack.i.h.bf16 %v2484_v54  ;;  %v2485_v57 = vunpack.i.l.bf16 %v2484_v54 }
 0x4bf   :  { %867 = vmatpush.msra.mxu2 %v2485_v57  ;;  %893 = vmatpush.msra.mxu3 %v2486_v56 }
 0x4c8   :  { %975 = vrot.lane.b32.xlu0 %v2776_v24, %s2639_s13 }
 0x4e1   :  { %v691_v58 = vpop.xlane.xlu0 %690 }
 0x4e2   :  { %v699_v59 = vsub.f32 %v683_v36, %v691_v58 }
 0x4e4   :  { %v704_v60 = vmul.f32 1.442695, %v699_v59 }
 0x4e6   :  { %2544 = vpow2.f32 %v704_v60 }
 0x4e9   :  { %v694_v55 = vpop.xlane.xlu0 %693 }
 0x4ea   :  { %v700_v61 = vsub.f32 %v684_v39, %v694_v55 }
 0x4ec   :  { %v706_v62 = vmul.f32 1.442695, %v700_v61  ;;  %v2892_v63 = vpop.eup %2544 }
 0x4ed   :  { %v713_v2 = vsel %vm244_vm14, %v2892_v63, 0.0 }
 0x4ee   :  { %2546 = vpow2.f32 %v706_v62 }
 0x4f2   :  { %714 = vadd.xlane.f32.xlu0 %v713_v2 }
 0x4f4   :  { %v2896_v3 = vpop.eup %2546 }
 0x4f5   :  { %v716_v4 = vsel %vm244_vm14, %v2896_v3, 0.0 }
 0x4f6   :  { %717 = vadd.xlane.f32.xlu1 %v716_v4 }
 0x4fc   :  { %v978_v6 = vpop.permute.xlu0 %977 }
 0x4fd   :  { %2421 = vmatpush.xpose.msk.msrb.mxu2 %vm244_vm14, %v978_v6 }
 0x506   :  { %947 = vrot.lane.b32.xlu0 %v2781_v28, %s2639_s13 }
 0x50f   :  { %1005 = vrot.lane.b32.xlu1 %v2779_v26, %s2641_s15 }
 0x527   :  { %v721_v8 = vpop.xlane.xlu0 %720 }
 0x528   :  { %v725_v9 = vadd.f32 1e-09, %v721_v8 }
 0x52a   :  { %2548 = vrcp.f32 %v725_v9  ;;  %v782_v15 = vand.u32 2147483648, %v725_v9  ;;  %v780_v18 = vand.u32 2147483647, %v725_v9  ;;  %vm776_vm3 = vweird.f32 %v725_v9 }
 0x52b   :  { %2550 = vpow2.f32 %v702_v11 }
 0x52c   :  { %v783_v10 = vor.u32 1.1754944e-38, %v782_v15  ;;  %vm781_vm5 = vcmp.eq.f32.partialorder %v780_v18, 8.507059e+37 }
 0x530   :  { %v2549_v12 = vpop.eup %2548 }
 0x531   :  { %v772_v13 = vmul.f32 %v2549_v12, %v725_v9  ;;  %v2906_v16 = vpop.eup %2550  ;;  %vm777_vm2 = vweird.f32 %v2549_v12 }
 0x532   :  { %vm778_vm4 = vmor %vm776_vm3, %vm777_vm2  ;;  %v710_v20 = vsel %vm244_vm14, %v2906_v16, 0.0 }
 0x533   :  { %v773_v0 = vsub.f32 1.0, %v772_v13 }
 0x535   :  { %v774_v17 = vmul.f32 %v2549_v12, %v773_v0 }
 0x537   :  { %v775_v19 = vadd.f32 %v2549_v12, %v774_v17 }
 0x539   :  { %711 = vadd.xlane.f32.xlu1 %v710_v20  ;;  %v779_v21 = vsel %vm778_vm4, %v2549_v12, %v775_v19 }
 0x53a   :  { %v784_v23 = vsel %vm781_vm5, %v783_v10, %v779_v21  ;;  %v976_v30 = vpop.permute.xlu0 %975 }
 0x53b   :  { %v785_v25 = vmul.f32 %v2543_v52, %v784_v23 }
 0x53d   :  { %v789_v27 = vmax.f32 %v785_v25, 1e-09 }
 0x53f   :  { %v793_v29 = vmin.f32 %v789_v27, 1.0 }
 0x541   :  { %2416 = vmatmul.msk.f32.vlgmr.msra.gmra.mxu3 %vm244_vm14, %v793_v29 }
 0x552   :  { %919 = vrot.lane.b32.xlu1 %v2773_v22, %s2639_s13 }
 0x565   :  { %v715_v5 = vpop.xlane.xlu0 %714 }
 0x566   :  { %v723_v31 = vadd.f32 1e-09, %v715_v5 }
 0x568   :  { %2552 = vrcp.f32 %v723_v31  ;;  %v750_v38 = vand.u32 2147483647, %v723_v31  ;;  %v752_v39 = vand.u32 2147483648, %v723_v31  ;;  %vm746_vm7 = vweird.f32 %v723_v31 }
 0x569   :  { %v718_v32 = vpop.xlane.xlu1 %717 }
 0x56a   :  { %v724_v33 = vadd.f32 1e-09, %v718_v32  ;;  %vm751_vm9 = vcmp.eq.f32.partialorder %v750_v38, 8.507059e+37  ;;  %v753_v46 = vor.u32 1.1754944e-38, %v752_v39 }
 0x56c   :  { %2554 = vrcp.f32 %v724_v33  ;;  %v767_v47 = vand.u32 2147483648, %v724_v33  ;;  %v765_v49 = vand.u32 2147483647, %v724_v33  ;;  %vm761_vm11 = vweird.f32 %v724_v33 }
 0x56e   :  { %v2553_v34 = vpop.eup %2552  ;;  %v768_v54 = vor.u32 1.1754944e-38, %v767_v47  ;;  %vm766_vm13 = vcmp.eq.f32.partialorder %v765_v49, 8.507059e+37 }
 0x56f   :  { %v742_v35 = vmul.f32 %v2553_v34, %v723_v31  ;;  %vm747_vm6 = vweird.f32 %v2553_v34 }
 0x570   :  { %vm748_vm8 = vmor %vm746_vm7, %vm747_vm6 }
 0x571   :  { %v743_v36 = vsub.f32 1.0, %v742_v35 }
 0x572   :  { %v2555_v37 = vpop.eup %2554 }
 0x573   :  { %v744_v40 = vmul.f32 %v2553_v34, %v743_v36  ;;  %v757_v41 = vmul.f32 %v2555_v37, %v724_v33  ;;  %vm762_vm10 = vweird.f32 %v2555_v37 }
 0x574   :  { %vm763_vm12 = vmor %vm761_vm11, %vm762_vm10 }
 0x575   :  { %v745_v44 = vadd.f32 %v2553_v34, %v744_v40  ;;  %v758_v45 = vsub.f32 1.0, %v757_v41 }
 0x577   :  { %v759_v48 = vmul.f32 %v2555_v37, %v758_v45  ;;  %v749_v50 = vsel %vm748_vm8, %v2553_v34, %v745_v44 }
 0x578   :  { %v754_v51 = vsel %vm751_vm9, %v753_v46, %v749_v50 }
 0x579   :  { %v760_v52 = vadd.f32 %v2555_v37, %v759_v48  ;;  %v755_v53 = vmul.f32 %v2892_v63, %v754_v51  ;;  %v948_v63 = vpop.permute.xlu0 %947 }
 0x57b   :  { %v787_v56 = vmax.f32 %v755_v53, 1e-09  ;;  %v764_v57 = vsel %vm763_vm12, %v2555_v37, %v760_v52 }
 0x57c   :  { %v769_v58 = vsel %vm766_vm13, %v768_v54, %v764_v57 }
 0x57d   :  { %v791_v59 = vmin.f32 %v787_v56, 1.0  ;;  %v770_v60 = vmul.f32 %v2896_v3, %v769_v58 }
 0x57f   :  { %2414 = vmatmul.msk.f32.vlgmr.msra.gmra.mxu1 %vm244_vm14, %v791_v59  ;;  %v788_v55 = vmax.f32 %v770_v60, 1e-09 }
 0x581   :  { %v1006_v61 = vpop.permute.xlu1 %1005  ;;  %v792_v62 = vmin.f32 %v788_v55, 1.0 }
 0x582   :  { %2423 = vmatpush.xpose.msk.msrb.mxu3 %vm244_vm14, %v1006_v61 }
 0x583   :  { %2415 = vmatmul.msk.f32.vlgmr.msra.gmra.mxu2 %vm244_vm14, %v792_v62 }
 0x585   :  { %2424 = vmatmul.msk.f32.vlgmr.msrb.gmra.mxu3 %vm244_vm14, %v2885_v43 }
 0x587   :  { %2420 = vmatmul.msk.f32.vlgmr.msrb.gmra.mxu1 %vm244_vm14, %v948_v63 }
 0x58b   :  { %2422 = vmatmul.msk.f32.vlgmr.msrb.gmra.mxu2 %vm244_vm14, %v976_v30 }
 0x5ac   :  { %v712_v2 = vpop.xlane.xlu1 %711 }
 0x5ad   :  { %v722_v4 = vadd.f32 1e-09, %v712_v2 }
 0x5af   :  { %2556 = vrcp.f32 %v722_v4  ;;  %v737_v8 = vand.u32 2147483648, %v722_v4  ;;  %v735_v11 = vand.u32 2147483647, %v722_v4  ;;  %vm731_vm1 = vweird.f32 %v722_v4 }
 0x5b1   :  { %v738_v13 = vor.u32 1.1754944e-38, %v737_v8  ;;  %vm736_vm3 = vcmp.eq.f32.partialorder %v735_v11, 8.507059e+37 }
 0x5b5   :  { %v2557_v3 = vpop.eup %2556 }
 0x5b6   :  { %v727_v6 = vmul.f32 %v2557_v3, %v722_v4  ;;  %vm732_vm15 = vweird.f32 %v2557_v3 }
 0x5b7   :  { %vm733_vm2 = vmor %vm731_vm1, %vm732_vm15 }
 0x5b8   :  { %v728_v7 = vsub.f32 1.0, %v727_v6 }
 0x5ba   :  { %v729_v9 = vmul.f32 %v2557_v3, %v728_v7 }
 0x5bc   :  { %v730_v12 = vadd.f32 %v2557_v3, %v729_v9 }
 0x5be   :  { %v734_v43 = vsel %vm733_vm2, %v2557_v3, %v730_v12 }
 0x5bf   :  { %v739_v0 = vsel %vm736_vm3, %v738_v13, %v734_v43 }
 0x5c0   :  { %v740_v15 = vmul.f32 %v2906_v16, %v739_v0 }
 0x5c2   :  { %v786_v17 = vmax.f32 %v740_v15, 1e-09 }
 0x5c4   :  { %v790_v18 = vmin.f32 %v786_v17, 1.0  ;;  %v920_v19 = vpop.permute.xlu1 %919  ;;  %v2925_v10 = vpop.f32.mrf.mxu3 }
 0x5c6   :  { %2413 = vmatmul.msk.f32.vlgmr.msra.gmra.mxu0 %vm244_vm14, %v790_v18 }
 0x5ce   :  { %2418 = vmatmul.msk.f32.vlgmr.msrb.gmra.mxu0 %vm244_vm14, %v920_v19 }
 0x5fc   :  { %v2929_v21 = vpop.f32.mrf.mxu1 }
 0x604   :  { %v972_v5 = vpop.f32.mrf.mxu1 }
 0x605   :  { %v1032_v31 = vmul.f32 0.35355338, %v972_v5 }
 0x606   :  { %v2927_v20 = vpop.f32.mrf.mxu2 }
 0x607   :  { %v1038_v32 = vsel %vm244_vm14, %v1032_v31, -inf }
 0x608   :  { %v1028_v23 = vpop.f32.mrf.mxu3 }
 0x609   :  { %v1034_v25 = vmul.f32 0.35355338, %v1028_v23 }
 0x60b   :  { %v1044_v27 = vsel %vm244_vm14, %v1034_v25, -inf }
 0x60c   :  { %1045 = vmax.xlane.f32.xlu0 %v1044_v27 }
 0x60e   :  { %v1000_v29 = vpop.f32.mrf.mxu2 }
 0x60f   :  { %v1033_v16 = vmul.f32 0.35355338, %v1000_v29 }
 0x611   :  { %v1041_v30 = vsel %vm244_vm14, %v1033_v16, -inf }
 0x612   :  { %1042 = vmax.xlane.f32.xlu2 %v1041_v30 }
 0x61a   :  { %1039 = vmax.xlane.f32.xlu2 %v1038_v32 }
 0x620   :  { %2493 = vrot.lane.b32.xlu0 %v2802_v42, %s2642_s16 }
 0x628   :  { %1324 = vrot.lane.b32.xlu0 %v2776_v24, %s2643_s17 }
 0x630   :  { %1352 = vrot.lane.b32.xlu0 %v2779_v26, %s2643_s17 }
 0x638   :  { %1270 = vrot.lane.b32.xlu0 %v2773_v22, %s2644_s18 }
 0x640   :  { %1296 = vrot.lane.b32.xlu0 %v2781_v28, %s2643_s17 }
 0x643   :  { %v2944_v33 = vpop.f32.mrf.mxu0 }
 0x64b   :  { %v944_v34 = vpop.f32.mrf.mxu0 }
 0x64c   :  { %v1031_v35 = vmul.f32 0.35355338, %v944_v34 }
 0x64e   :  { %v1035_v36 = vsel %vm244_vm14, %v1031_v35, -inf }
 0x64f   :  { %1036 = vmax.xlane.f32.xlu1 %v1035_v36 }
 0x67f   :  { %v1046_v38 = vpop.xlane.xlu0 %1045 }
 0x680   :  { %v1050_v56 = vsub.f32 %v1034_v25, %v1046_v38 }
 0x682   :  { %v1057_v58 = vmul.f32 1.442695, %v1050_v56 }
 0x685   :  { %v1043_v37 = vpop.xlane.xlu2 %1042 }
 0x686   :  { %v1049_v51 = vsub.f32 %v1033_v16, %v1043_v37 }
 0x688   :  { %v1055_v53 = vmul.f32 1.442695, %v1049_v51 }
 0x68d   :  { %v1040_v39 = vpop.xlane.xlu2 %1039 }
 0x68e   :  { %v1048_v40 = vsub.f32 %v1032_v31, %v1040_v39 }
 0x690   :  { %v1053_v41 = vmul.f32 1.442695, %v1048_v40 }
 0x692   :  { %2558 = vpow2.f32 %v1053_v41  ;;  %v2494_v44 = vpop.permute.xlu0 %2493 }
 0x693   :  { %v2496_v45 = vunpack.i.h.bf16 %v2494_v44  ;;  %v2495_v46 = vunpack.i.l.bf16 %v2494_v44 }
 0x695   :  { %1216 = vmatpush.msra.mxu2 %v2495_v46  ;;  %1242 = vmatpush.msra.mxu3 %v2496_v45 }
 0x698   :  { %v2947_v47 = vpop.eup %2558 }
 0x699   :  { %v1062_v48 = vsel %vm244_vm14, %v2947_v47, 0.0 }
 0x69a   :  { %1063 = vadd.xlane.f32.xlu1 %v1062_v48 }
 0x6b3   :  { %1354 = vrot.lane.b32.xlu1 %v2779_v26, %s2644_s18 }
 0x6bb   :  { %1298 = vrot.lane.b32.xlu1 %v2781_v28, %s2644_s18 }
 0x6c2   :  { %v1037_v49 = vpop.xlane.xlu1 %1036 }
 0x6c3   :  { %v1047_v50 = vsub.f32 %v1031_v35, %v1037_v49 }
 0x6c5   :  { %v1051_v52 = vmul.f32 1.442695, %v1047_v50 }
 0x6c7   :  { %2560 = vpow2.f32 %v1051_v52 }
 0x6c8   :  { %2562 = vpow2.f32 %v1055_v53 }
 0x6c9   :  { %2564 = vpow2.f32 %v1057_v58 }
 0x6cd   :  { %v2955_v54 = vpop.eup %2560 }
 0x6ce   :  { %v1059_v57 = vsel %vm244_vm14, %v2955_v54, 0.0  ;;  %v2959_v59 = vpop.eup %2562 }
 0x6cf   :  { %1060 = vadd.xlane.f32.xlu2 %v1059_v57  ;;  %v1065_v26 = vsel %vm244_vm14, %v2959_v59, 0.0  ;;  %v2963_v28 = vpop.eup %2564 }
 0x6d0   :  { %v1068_v60 = vsel %vm244_vm14, %v2963_v28, 0.0 }
 0x6d7   :  { %1066 = vadd.xlane.f32.xlu2 %v1065_v26 }
 0x6df   :  { %1069 = vadd.xlane.f32.xlu2 %v1068_v60 }
 0x6f7   :  { %1326 = vrot.lane.b32.xlu2 %v2776_v24, %s2644_s18 }
 0x6ff   :  { %2498 = vrot.lane.b32.xlu2 %v2826_v1, %s2642_s16 }
 0x707   :  { %1268 = vrot.lane.b32.xlu2 %v2773_v22, %s2643_s17  ;;  %v2974_v22 = vpop.permute.xlu0 %1324 }
 0x70d   :  { %v1064_v55 = vpop.xlane.xlu1 %1063 }
 0x70e   :  { %v1072_v62 = vadd.f32 1e-09, %v1064_v55 }
 0x70f   :  { %v1353_v39 = vpop.permute.xlu0 %1352 }
 0x710   :  { %2566 = vrcp.f32 %v1072_v62  ;;  %v1101_v0 = vand.u32 2147483648, %v1072_v62  ;;  %vm1095_vm5 = vweird.f32 %v1072_v62  ;;  %v1099_v15 = vand.u32 2147483647, %v1072_v62 }
 0x712   :  { %v1102_v5 = vor.u32 1.1754944e-38, %v1101_v0  ;;  %vm1100_vm10 = vcmp.eq.f32.partialorder %v1099_v15, 8.507059e+37 }
 0x716   :  { %v2567_v63 = vpop.eup %2566 }
 0x717   :  { %v1091_v3 = vmul.f32 %v2567_v63, %v1072_v62  ;;  %vm1096_vm4 = vweird.f32 %v2567_v63 }
 0x718   :  { %vm2976_vm7 = vmor %vm1095_vm5, %vm1096_vm4 }
 0x719   :  { %v1092_v6 = vsub.f32 1.0, %v1091_v3 }
 0x71b   :  { %v1093_v9 = vmul.f32 %v2567_v63, %v1092_v6 }
 0x71d   :  { %v1094_v13 = vadd.f32 %v2567_v63, %v1093_v9 }
 0x71f   :  { %v1098_v30 = vsel %vm2976_vm7, %v2567_v63, %v1094_v13 }
 0x720   :  { %v1103_v36 = vsel %vm1100_vm10, %v1102_v5, %v1098_v30 }
 0x721   :  { %v1104_v48 = vmul.f32 %v2947_v47, %v1103_v36 }
 0x723   :  { %v1136_v26 = vmax.f32 %v1104_v48, 1e-09 }
 0x725   :  { %v1355_v61 = vpop.permute.xlu1 %1354  ;;  %v1140_v6 = vmin.f32 %v1136_v26, 1.0 }
 0x726   :  { %2435 = vmatpush.xpose.msk.msrb.mxu3 %vm244_vm14, %v1355_v61 }
 0x742   :  { %v1061_v2 = vpop.xlane.xlu2 %1060 }
 0x743   :  { %v1071_v4 = vadd.f32 1e-09, %v1061_v2  ;;  %v1271_v2 = vpop.permute.xlu0 %1270 }
 0x745   :  { %2568 = vrcp.f32 %v1071_v4  ;;  %v1086_v25 = vand.u32 2147483648, %v1071_v4  ;;  %vm1080_vm8 = vweird.f32 %v1071_v4  ;;  %v1084_v29 = vand.u32 2147483647, %v1071_v4 }
 0x747   :  { %v1087_v34 = vor.u32 1.1754944e-38, %v1086_v25  ;;  %vm1085_vm11 = vcmp.eq.f32.partialorder %v1084_v29, 8.507059e+37 }
 0x74a   :  { %v1067_v7 = vpop.xlane.xlu2 %1066 }
 0x74b   :  { %v2569_v24 = vpop.eup %2568  ;;  %v1073_v8 = vadd.f32 1e-09, %v1067_v7  ;;  %v1297_v13 = vpop.permute.xlu0 %1296 }
 0x74c   :  { %v1076_v11 = vmul.f32 %v2569_v24, %v1071_v4  ;;  %vm1081_vm6 = vweird.f32 %v2569_v24 }
 0x74d   :  { %2570 = vrcp.f32 %v1073_v8  ;;  %vm1082_vm9 = vmor %vm1080_vm8, %vm1081_vm6  ;;  %v1116_v35 = vand.u32 2147483648, %v1073_v8  ;;  %v1114_v38 = vand.u32 2147483647, %v1073_v8  ;;  %vm1110_vm13 = vweird.f32 %v1073_v8 }
 0x74e   :  { %v1077_v12 = vsub.f32 1.0, %v1076_v11 }
 0x74f   :  { %v1117_v46 = vor.u32 1.1754944e-38, %v1116_v35  ;;  %vm1115_vm1 = vcmp.eq.f32.partialorder %v1114_v38, 8.507059e+37 }
 0x750   :  { %v1078_v43 = vmul.f32 %v2569_v24, %v1077_v12 }
 0x752   :  { %v1079_v17 = vadd.f32 %v2569_v24, %v1078_v43  ;;  %v1070_v18 = vpop.xlane.xlu2 %1069 }
 0x753   :  { %v2571_v19 = vpop.eup %2570  ;;  %v1074_v27 = vadd.f32 1e-09, %v1070_v18 }
 0x754   :  { %v1106_v16 = vmul.f32 %v2571_v19, %v1073_v8  ;;  %v1083_v32 = vsel %vm1082_vm9, %v2569_v24, %v1079_v17  ;;  %vm1111_vm12 = vweird.f32 %v2571_v19  ;;  %v1299_v8 = vpop.permute.xlu1 %1298 }
 0x755   :  { %2572 = vrcp.f32 %v1074_v27  ;;  %v1088_v40 = vsel %vm1085_vm11, %v1087_v34, %v1083_v32  ;;  %vm1112_vm15 = vmor %vm1110_vm13, %vm1111_vm12  ;;  %v1129_v57 = vand.u32 2147483647, %v1074_v27  ;;  %v1131_v58 = vand.u32 2147483648, %v1074_v27 }
 0x756   :  { %v1107_v31 = vsub.f32 1.0, %v1106_v16  ;;  %v1089_v51 = vmul.f32 %v2955_v54, %v1088_v40  ;;  %vm1125_vm3 = vweird.f32 %v1074_v27  ;;  %vm914_vm11 = vcmask 130112  }
 0x757   :  { %v1132_v4 = vor.u32 1.1754944e-38, %v1131_v58  ;;  %vm1130_vm5 = vcmp.eq.f32.partialorder %v1129_v57, 8.507059e+37 }
 0x758   :  { %v1108_v37 = vmul.f32 %v2571_v19, %v1107_v31  ;;  %v1135_v61 = vmax.f32 %v1089_v51, 1e-09 }
 0x75a   :  { %v1109_v41 = vadd.f32 %v2571_v19, %v1108_v37  ;;  %v1327_v44 = vpop.permute.xlu2 %1326 }
 0x75b   :  { %v2573_v45 = vpop.eup %2572  ;;  %2433 = vmatpush.xpose.msk.msrb.mxu2 %vm244_vm14, %v1327_v44 }
 0x75c   :  { %v1121_v49 = vmul.f32 %v2573_v45, %v1074_v27  ;;  %v1113_v50 = vsel %vm1112_vm15, %v2571_v19, %v1109_v41  ;;  %vm1126_vm2 = vweird.f32 %v2573_v45 }
 0x75d   :  { %v1118_v52 = vsel %vm1115_vm1, %v1117_v46, %v1113_v50  ;;  %vm1127_vm4 = vmor %vm1125_vm3, %vm1126_vm2 }
 0x75e   :  { %v1122_v53 = vsub.f32 1.0, %v1121_v49  ;;  %v1119_v56 = vmul.f32 %v2959_v59, %v1118_v52  ;;  %v1139_v59 = vmin.f32 %v1135_v61, 1.0 }
 0x760   :  { %v1123_v60 = vmul.f32 %v2573_v45, %v1122_v53  ;;  %v1137_v55 = vmax.f32 %v1119_v56, 1e-09 }
 0x762   :  { %v1124_v62 = vadd.f32 %v2573_v45, %v1123_v60  ;;  %v2499_v63 = vpop.permute.xlu2 %2498  ;;  %v1141_v47 = vmin.f32 %v1137_v55, 1.0 }
 0x763   :  { %v2501_v3 = vunpack.i.h.bf16 %v2499_v63  ;;  %v2500_v54 = vunpack.i.l.bf16 %v2499_v63 }
 0x764   :  { %2427 = vmatmul.msk.f32.vlgmr.msra.gmra.mxu2 %vm244_vm14, %v1141_v47  ;;  %v1128_v7 = vsel %vm1127_vm4, %v2573_v45, %v1124_v62 }
 0x765   :  { %1164 = vmatpush.msra.mxu0 %v2500_v54  ;;  %1190 = vmatpush.msra.mxu1 %v2501_v3  ;;  %v1133_v24 = vsel %vm1130_vm5, %v1132_v4, %v1128_v7 }
 0x766   :  { %2425 = vmatmul.msk.f32.vlgmr.msra.gmra.mxu0 %vm244_vm14, %v1139_v59  ;;  %2426 = vmatmul.msk.f32.vlgmr.msra.gmra.mxu1 %vm244_vm14, %v1140_v6  ;;  %v1134_v9 = vmul.f32 %v2963_v28, %v1133_v24 }
 0x767   :  { %2429 = vmatpush.xpose.msk.msrb.mxu0 %vm244_vm14, %v1271_v2  ;;  %2431 = vmatpush.xpose.msk.msrb.mxu1 %vm244_vm14, %v1299_v8 }
 0x768   :  { %v1138_v11 = vmax.f32 %v1134_v9, 1e-09 }
 0x76a   :  { %v1142_v12 = vmin.f32 %v1138_v11, 1.0  ;;  %v1269_v43 = vpop.permute.xlu2 %1268 }
 0x76c   :  { %2428 = vmatmul.msk.f32.vlgmr.msra.gmra.mxu3 %vm244_vm14, %v1142_v12  ;;  %2434 = vmatmul.msk.f32.vlgmr.msrb.gmra.mxu2 %vm244_vm14, %v2974_v22 }
 0x76e   :  { %2430 = vmatmul.msk.f32.vlgmr.msrb.gmra.mxu0 %vm244_vm14, %v1269_v43  ;;  %2432 = vmatmul.msk.f32.vlgmr.msrb.gmra.mxu1 %vm244_vm14, %v1297_v13 }
 0x774   :  { %2436 = vmatmul.msk.f32.vlgmr.msrb.gmra.mxu3 %vm244_vm14, %v1353_v39 }
 0x7e3   :  { %v2998_v28 = vpop.f32.mrf.mxu0  ;;  %v1192_v15 = vpop.f32.mrf.mxu1 }
 0x7e7   :  { %v1218_v0 = vpop.f32.mrf.mxu2 }
 0x7eb   :  { %v1293_v17 = vpop.f32.mrf.mxu0  ;;  %v1321_v29 = vpop.f32.mrf.mxu1 }
 0x7ec   :  { %v1380_v18 = vmul.f32 0.35355338, %v1293_v17  ;;  %v1381_v16 = vmul.f32 0.35355338, %v1321_v29 }
 0x7ee   :  { %v1384_v19 = vsel %vm244_vm14, %v1380_v18, -inf  ;;  %v1387_v32 = vsel %vm244_vm14, %v1381_v16, -inf }
 0x7ef   :  { %v1244_v23 = vpop.f32.mrf.mxu3  ;;  %v1349_v25 = vpop.f32.mrf.mxu2  ;;  %1385 = vmax.xlane.f32.xlu0 %v1384_v19 }
 0x7f0   :  { %v1382_v22 = vmul.f32 0.35355338, %v1349_v25 }
 0x7f2   :  { %v1390_v27 = vsel %vm244_vm14, %v1382_v22, -inf }
 0x7f3   :  { %1391 = vmax.xlane.f32.xlu1 %v1390_v27 }
 0x7f7   :  { %v1377_v30 = vpop.f32.mrf.mxu3 }
 0x7f8   :  { %v1383_v5 = vmul.f32 0.35355338, %v1377_v30 }
 0x7fa   :  { %v1393_v31 = vsel %vm244_vm14, %v1383_v5, -inf }
 0x7fb   :  { %1394 = vmax.xlane.f32.xlu2 %v1393_v31  ;;  %1388 = vmax.xlane.f32.xlu1 %v1387_v32 }
 0x862   :  { %v1386_v34 = vpop.xlane.xlu0 %1385 }
 0x863   :  { %v1396_v35 = vsub.f32 %v1380_v18, %v1386_v34 }
 0x865   :  { %v1400_v36 = vmul.f32 1.442695, %v1396_v35 }
 0x866   :  { %v1392_v37 = vpop.xlane.xlu1 %1391 }
 0x867   :  { %2574 = vpow2.f32 %v1400_v36  ;;  %v1398_v38 = vsub.f32 %v1382_v22, %v1392_v37 }
 0x869   :  { %v1404_v39 = vmul.f32 1.442695, %v1398_v38 }
 0x86b   :  { %2576 = vpow2.f32 %v1404_v39 }
 0x86d   :  { %v3004_v40 = vpop.eup %2574 }
 0x86e   :  { %v1395_v41 = vpop.xlane.xlu2 %1394  ;;  %v1389_v44 = vpop.xlane.xlu1 %1388  ;;  %v1408_v45 = vsel %vm244_vm14, %v3004_v40, 0.0 }
 0x86f   :  { %v1399_v46 = vsub.f32 %v1383_v5, %v1395_v41  ;;  %v1397_v48 = vsub.f32 %v1381_v16, %v1389_v44  ;;  %1409 = vadd.xlane.f32.xlu1 %v1408_v45 }
 0x871   :  { %v3008_v49 = vpop.eup %2576  ;;  %v1406_v50 = vmul.f32 1.442695, %v1399_v46  ;;  %v1402_v51 = vmul.f32 1.442695, %v1397_v48 }
 0x872   :  { %v1414_v52 = vsel %vm244_vm14, %v3008_v49, 0.0 }
 0x873   :  { %2578 = vpow2.f32 %v1406_v50  ;;  %1415 = vadd.xlane.f32.xlu2 %v1414_v52 }
 0x874   :  { %2580 = vpow2.f32 %v1402_v51 }
 0x879   :  { %v3012_v53 = vpop.eup %2578 }
 0x87a   :  { %v3014_v56 = vpop.eup %2580  ;;  %v1417_v57 = vsel %vm244_vm14, %v3012_v53, 0.0 }
 0x87b   :  { %1418 = vadd.xlane.f32.xlu0 %v1417_v57  ;;  %v1411_v58 = vsel %vm244_vm14, %v3014_v56, 0.0 }
 0x87c   :  { %1412 = vadd.xlane.f32.xlu2 %v1411_v58 }
 0x888   :  { %2508 = vrot.lane.b32.xlu1 %v2826_v1, %s2645_s19 }
 0x88f   :  { %2503 = vrot.lane.b32.xlu0 %v2802_v42, %s2645_s19 }
 0x890   :  { %1255 = vrot.lane.b32.xlu1 %v1218_v0, %s2646_s20 }
 0x894   :  { %906 = vrot.lane.b32.xlu2 %v2927_v20, %s2647_s21 }
 0x897   :  { %908 = vrot.lane.b32.xlu0 %v2925_v10, %s2647_s21 }
 0x89f   :  { %1257 = vrot.lane.b32.xlu0 %v1244_v23, %s2646_s20 }
 0x8a7   :  { %902 = vrot.lane.b32.xlu0 %v2944_v33, %s2647_s21 }
 0x8af   :  { %1253 = vrot.lane.b32.xlu0 %v1192_v15, %s2646_s20 }
 0x8e2   :  { %v1410_v1 = vpop.xlane.xlu1 %1409 }
 0x8e3   :  { %v1420_v26 = vadd.f32 1e-09, %v1410_v1 }
 0x8e5   :  { %2582 = vrcp.f32 %v1420_v26  ;;  %v1433_v47 = vand.u32 2147483647, %v1420_v26  ;;  %v1435_v10 = vand.u32 2147483648, %v1420_v26  ;;  %vm1429_vm7 = vweird.f32 %v1420_v26 }
 0x8e6   :  { %v1416_v42 = vpop.xlane.xlu2 %1415 }
 0x8e7   :  { %v1422_v60 = vadd.f32 1e-09, %v1416_v42  ;;  %vm1434_vm9 = vcmp.eq.f32.partialorder %v1433_v47, 8.507059e+37  ;;  %v1436_v7 = vor.u32 1.1754944e-38, %v1435_v10 }
 0x8e9   :  { %2584 = vrcp.f32 %v1422_v60  ;;  %v1465_v24 = vand.u32 2147483648, %v1422_v60  ;;  %v1463_v9 = vand.u32 2147483647, %v1422_v60  ;;  %vm1459_vm12 = vweird.f32 %v1422_v60 }
 0x8eb   :  { %v2583_v55 = vpop.eup %2582  ;;  %v1466_v15 = vor.u32 1.1754944e-38, %v1465_v24  ;;  %vm1464_vm15 = vcmp.eq.f32.partialorder %v1463_v9, 8.507059e+37 }
 0x8ec   :  { %v1425_v61 = vmul.f32 %v2583_v55, %v1420_v26  ;;  %vm1430_vm6 = vweird.f32 %v2583_v55 }
 0x8ed   :  { %vm1431_vm8 = vmor %vm1429_vm7, %vm1430_vm6 }
 0x8ee   :  { %v1426_v62 = vsub.f32 1.0, %v1425_v61  ;;  %v1419_v20 = vpop.xlane.xlu0 %1418 }
 0x8ef   :  { %v2585_v63 = vpop.eup %2584  ;;  %v1423_v2 = vadd.f32 1e-09, %v1419_v20  ;;  %v1413_v4 = vpop.xlane.xlu2 %1412 }
 0x8f0   :  { %v1427_v3 = vmul.f32 %v2583_v55, %v1426_v62  ;;  %v1455_v33 = vmul.f32 %v2585_v63, %v1422_v60  ;;  %v1421_v54 = vadd.f32 1e-09, %v1413_v4  ;;  %vm1460_vm10 = vweird.f32 %v2585_v63 }
 0x8f1   :  { %2586 = vrcp.f32 %v1423_v2  ;;  %vm1461_vm13 = vmor %vm1459_vm12, %vm1460_vm10  ;;  %v1478_v16 = vand.u32 2147483647, %v1423_v2  ;;  %v1480_v30 = vand.u32 2147483648, %v1423_v2  ;;  %vm1474_vm3 = vweird.f32 %v1423_v2 }
 0x8f2   :  { %v1428_v59 = vadd.f32 %v2583_v55, %v1427_v3  ;;  %v1456_v6 = vsub.f32 1.0, %v1455_v33  ;;  %2588 = vrcp.f32 %v1421_v54  ;;  %v1450_v37 = vand.u32 2147483648, %v1421_v54  ;;  %v239_v33 = vld [vmem:[%s3355_s4 + $0x18] sm:$0xff] }
 0x8f3   :  { %v1481_v44 = vor.u32 1.1754944e-38, %v1480_v30  ;;  %vm1444_vm5 = vweird.f32 %v1421_v54  ;;  %vm1479_vm6 = vcmp.eq.f32.partialorder %v1478_v16, 8.507059e+37 }
 0x8f4   :  { %v1457_v8 = vmul.f32 %v2585_v63, %v1456_v6  ;;  %v1432_v11 = vsel %vm1431_vm8, %v2583_v55, %v1428_v59  ;;  %v1451_v48 = vor.u32 1.1754944e-38, %v1450_v37  ;;  %vm1263_vm8 = vcmask 195712  }
 0x8f5   :  { %v1437_v12 = vsel %vm1434_vm9, %v1436_v7, %v1432_v11 }
 0x8f6   :  { %v1458_v13 = vadd.f32 %v2585_v63, %v1457_v8  ;;  %v1438_v43 = vmul.f32 %v3004_v40, %v1437_v12  ;;  %v1448_v40 = vand.u32 2147483647, %v1421_v54 }
 0x8f7   :  { %v2587_v0 = vpop.eup %2586  ;;  %v907_v17 = vpop.permute.xlu2 %906 }
 0x8f8   :  { %v2589_v18 = vpop.eup %2588  ;;  %v1470_v19 = vmul.f32 %v2587_v0, %v1423_v2  ;;  %917 = vst.msk [vmem:[#allocation2 + $0x10] sm:$0xff] %vm914_vm11, %v907_v17  ;;  %v1484_v23 = vmax.f32 %v1438_v43, 1e-09  ;;  %v1462_v25 = vsel %vm1461_vm13, %v2585_v63, %v1458_v13  ;;  %vm1475_vm1 = vweird.f32 %v2587_v0 }
 0x8f9   :  { %v1440_v22 = vmul.f32 %v2589_v18, %v1421_v54  ;;  %v1467_v27 = vsel %vm1464_vm15, %v1466_v15, %v1462_v25  ;;  %vm1445_vm2 = vweird.f32 %v2589_v18  ;;  %vm1476_vm4 = vmor %vm1474_vm3, %vm1475_vm1  ;;  %vm1449_vm9 = vcmp.eq.f32.partialorder %v1448_v40, 8.507059e+37  ;;  %v238_v54 = vld [vmem:[%s3355_s4 + $0x10] sm:$0xff]  ;;  %v2513_v15 = vld [vmem:[%s3354_s5] ss:$0 sm:$0xff] }
 0x8fa   :  { %v1471_v29 = vsub.f32 1.0, %v1470_v19  ;;  %v2509_v5 = vpop.permute.xlu1 %2508  ;;  %v1468_v35 = vmul.f32 %v3008_v49, %v1467_v27  ;;  %v1488_v38 = vmin.f32 %v1484_v23, 1.0  ;;  %vm1446_vm7 = vmor %vm1444_vm5, %vm1445_vm2 }
 0x8fb   :  { %v1441_v31 = vsub.f32 1.0, %v1440_v22  ;;  %v2511_v32 = vunpack.i.h.bf16 %v2509_v5  ;;  %v2510_v34 = vunpack.i.l.bf16 %v2509_v5 }
 0x8fc   :  { %v1472_v36 = vmul.f32 %v2587_v0, %v1471_v29  ;;  %v1486_v46 = vmax.f32 %v1468_v35, 1e-09 }
 0x8fd   :  { %v1442_v39 = vmul.f32 %v2589_v18, %v1441_v31  ;;  %1513 = vmatpush.msra.mxu0 %v2510_v34  ;;  %1539 = vmatpush.msra.mxu1 %v2511_v32 }
 0x8fe   :  { %v1473_v41 = vadd.f32 %v2587_v0, %v1472_v36  ;;  %2437 = vmatmul.msk.f32.vlgmr.msra.gmra.mxu0 %vm244_vm14, %v1488_v38  ;;  %v1490_v60 = vmin.f32 %v1486_v46, 1.0 }
 0x8ff   :  { %v1443_v45 = vadd.f32 %v2589_v18, %v1442_v39  ;;  %1639 = vmatpush.msrb.mxu0 %v239_v33  ;;  %1662 = vmatpush.msrb.mxu1 %v239_v33 }
 0x900   :  { %v1477_v49 = vsel %vm1476_vm4, %v2587_v0, %v1473_v41 }
 0x901   :  { %v2504_v50 = vpop.permute.xlu0 %2503  ;;  %v1447_v51 = vsel %vm1446_vm7, %v2589_v18, %v1443_v45  ;;  %v1482_v52 = vsel %vm1479_vm6, %v1481_v44, %v1477_v49  ;;  %1640 = vmatpush.msrb.mxu0 %v238_v54  ;;  %1663 = vmatpush.msrb.mxu1 %v238_v54 }
 0x902   :  { %v2506_v57 = vunpack.i.h.bf16 %v2504_v50  ;;  %v2505_v58 = vunpack.i.l.bf16 %v2504_v50  ;;  %v1256_v1 = vpop.permute.xlu1 %1255  ;;  %v1452_v26 = vsel %vm1449_vm9, %v1451_v48, %v1447_v51  ;;  %v1483_v42 = vmul.f32 %v3012_v53, %v1482_v52 }
 0x903   :  { %1266 = vst.msk [vmem:[#allocation2 + $0x10] sm:$0xff] %vm1263_vm8, %v1256_v1  ;;  %v1453_v55 = vmul.f32 %v3014_v56, %v1452_v26 }
 0x904   :  { %1565 = vmatpush.msra.mxu2 %v2505_v58  ;;  %1591 = vmatpush.msra.mxu3 %v2506_v57  ;;  %v1487_v61 = vmax.f32 %v1483_v42, 1e-09 }
 0x905   :  { %2439 = vmatmul.msk.f32.vlgmr.msra.gmra.mxu2 %vm244_vm14, %v1490_v60  ;;  %v1485_v62 = vmax.f32 %v1453_v55, 1e-09 }
 0x906   :  { %v1491_v20 = vmin.f32 %v1487_v61, 1.0  ;;  %1685 = vmatpush.msrb.mxu2 %v239_v33  ;;  %1708 = vmatpush.msrb.mxu3 %v239_v33 }
 0x907   :  { %v1489_v63 = vmin.f32 %v1485_v62, 1.0 }
 0x908   :  { %2440 = vmatmul.msk.f32.vlgmr.msra.gmra.mxu3 %vm244_vm14, %v1491_v20  ;;  %1686 = vmatpush.msrb.mxu2 %v238_v54 }
 0x909   :  { %2438 = vmatmul.msk.f32.vlgmr.msra.gmra.mxu1 %vm244_vm14, %v1489_v63  ;;  %v909_v47 = vpop.permute.xlu0 %908  ;;  %1709 = vmatpush.msrb.mxu3 %v238_v54  ;;  %vm1612_vm14 = vcmask 261312  }
 0x90a   :  { %918 = vst.msk [vmem:[#allocation2 + $0x18] sm:$0xff] %vm914_vm11, %v909_v47  ;;  %v3102_v47 = vld [vmem:[%s3356_s1] sm:$0xf] }
 0x911   :  { %v1258_v53 = vpop.permute.xlu0 %1257 }
 0x912   :  { %1267 = vst.msk [vmem:[#allocation2 + $0x18] sm:$0xff] %vm1263_vm8, %v1258_v53 }
 0x919   :  { %v903_v10 = vpop.permute.xlu0 %902 }
 0x91a   :  { %915 = vst.msk [vmem:[#allocation2] sm:$0xff] %vm914_vm11, %v903_v10  ;;  %v3105_v10 = vperm.slane %v3102_v47, 0 }
 0x921   :  { %v1254_v24 = vpop.permute.xlu0 %1253 }
 0x97b   :  { %v1515_v4 = vpop.f32.mrf.mxu0 }
 0x986   :  { %v1541_v3 = vpop.f32.mrf.mxu1 }
 0x988   :  { %v1567_v56 = vpop.f32.mrf.mxu2 }
 0x989   :  { %1604 = vrot.lane.b32.xlu2 %v1567_v56, %s2648_s22 }
 0x98b   :  { %v1593_v2 = vpop.f32.mrf.mxu3 }
 0x98c   :  { %1606 = vrot.lane.b32.xlu1 %v1593_v2, %s2648_s22 }
 0x991   :  { %904 = vrot.lane.b32.xlu2 %v2929_v21, %s2647_s21  ;;  %v237_v21 = vld [vmem:[%s3355_s4 + $0x8] sm:$0xff] }
 0x992   :  { %1687 = vmatpush.msrb.mxu2 %v237_v21  ;;  %1710 = vmatpush.msrb.mxu3 %v237_v21 }
 0x993   :  { %1641 = vmatpush.msrb.mxu0 %v237_v21  ;;  %1664 = vmatpush.msrb.mxu1 %v237_v21 }
 0x994   :  { %1251 = vrot.lane.b32.xlu1 %v2998_v28, %s2646_s20  ;;  %v236_v28 = vld [vmem:[%s3355_s4] sm:$0xff] }
 0x995   :  { %1688 = vmatpush.msrb.mxu2 %v236_v28  ;;  %1711 = vmatpush.msrb.mxu3 %v236_v28 }
 0x996   :  { %1642 = vmatpush.msrb.mxu0 %v236_v28  ;;  %1665 = vmatpush.msrb.mxu1 %v236_v28  ;;  %v2630_v28 = vld [vmem:[%s3351_s0 + $0x10] sm:$0xff] }
 0x999   :  { %1600 = vrot.lane.b32.xlu2 %v1515_v4, %s2648_s22  ;;  %v3108_v4 = vperm.slane %v3102_v47, 1 }
 0x99c   :  { %1602 = vrot.lane.b32.xlu1 %v1541_v3, %s2648_s22 }
 0x9e3   :  { %v1605_v59 = vpop.permute.xlu2 %1604 }
 0x9e4   :  { %1615 = vst.msk [vmem:[#allocation2 + $0x10] sm:$0xff] %vm1612_vm14, %v1605_v59 }
 0x9eb   :  { %v905_v6 = vpop.permute.xlu2 %904  ;;  %v1619_v7 = vld [vmem:[#allocation2 + $0x10] sm:$0xff] }
 0x9ec   :  { %916 = vst.msk [vmem:[#allocation2 + $0x8] sm:$0xff] %vm914_vm11, %v905_v6  ;;  %2443 = vmatmul.msk.f32.vlgmr.msrb.gmra.mxu2 %vm40_vm0, %v1619_v7 }
 0x9ed   :  { %1265 = vst.msk [vmem:[#allocation2 + $0x8] sm:$0xff] %vm1263_vm8, %v1254_v24 }
 0x9f3   :  { %v1601_v12 = vpop.permute.xlu2 %1600 }
 0x9fe   :  { %v1607_v8 = vpop.permute.xlu1 %1606 }
 0x9ff   :  { %1616 = vst.msk [vmem:[#allocation2 + $0x18] sm:$0xff] %vm1612_vm14, %v1607_v8 }
 0xa06   :  { %v1252_v9 = vpop.permute.xlu1 %1251  ;;  %v1620_v11 = vld [vmem:[#allocation2 + $0x18] sm:$0xff] }
 0xa07   :  { %1264 = vst.msk [vmem:[#allocation2] sm:$0xff] %vm1263_vm8, %v1252_v9  ;;  %2444 = vmatmul.msk.f32.vlgmr.msrb.gmra.mxu3 %vm40_vm0, %v1620_v11 }
 0xa08   :  { %1613 = vst.msk [vmem:[#allocation2] sm:$0xff] %vm1612_vm14, %v1601_v12 }
 0xa0e   :  { %v1603_v13 = vpop.permute.xlu1 %1602 }
 0xa0f   :  { %1614 = vst.msk [vmem:[#allocation2 + $0x8] sm:$0xff] %vm1612_vm14, %v1603_v13  ;;  %v1617_v43 = vld [vmem:[#allocation2] sm:$0xff] }
 0xa10   :  { %2441 = vmatmul.msk.f32.vlgmr.msrb.gmra.mxu0 %vm40_vm0, %v1617_v43 }
 0xa16   :  { %v1618_v0 = vld [vmem:[#allocation2 + $0x8] sm:$0xff] }
 0xa17   :  { %2442 = vmatmul.msk.f32.vlgmr.msrb.gmra.mxu1 %vm40_vm0, %v1618_v0 }
 0xa6f   :  { %v1690_v17 = vpop.f32.mrf.mxu2 }
 0xa70   :  { %v1691_v18 = vadd.f32 %v2513_v15, %v1690_v17 }
 0xa72   :  { %v1722_v19 = vsel %vm40_vm0, %v1691_v18, 0.0 }
 0xa73   :  { %1723 = vadd.xlane.f32.xlu0 %v1722_v19 }
 0xa8a   :  { %v1713_v23 = vpop.f32.mrf.mxu3 }
 0xa8b   :  { %v1714_v25 = vadd.f32 %v2513_v15, %v1713_v23 }
 0xa8d   :  { %v1644_v22 = vpop.f32.mrf.mxu0  ;;  %v1725_v27 = vsel %vm40_vm0, %v1714_v25, 0.0 }
 0xa8e   :  { %v1645_v29 = vadd.f32 %v2513_v15, %v1644_v22  ;;  %1726 = vadd.xlane.f32.xlu2 %v1725_v27 }
 0xa90   :  { %v1716_v16 = vsel %vm40_vm0, %v1645_v29, 0.0 }
 0xa91   :  { %1717 = vadd.xlane.f32.xlu1 %v1716_v16 }
 0xa94   :  { %v1667_v30 = vpop.f32.mrf.mxu1 }
 0xa95   :  { %v1668_v5 = vadd.f32 %v2513_v15, %v1667_v30 }
 0xa97   :  { %v1719_v31 = vsel %vm40_vm0, %v1668_v5, 0.0 }
 0xa98   :  { %1720 = vadd.xlane.f32.xlu0 %v1719_v31 }
 0xae6   :  { %v1724_v32 = vpop.xlane.xlu0 %1723 }
 0xae7   :  { %v1730_v34 = vmul.f32 %v1724_v32, %v2720_v14 }
 0xae9   :  { %v1734_v35 = vsub.f32 %v1691_v18, %v1730_v34 }
 0xaeb   :  { %v1738_v36 = vmul.f32 %v1734_v35, %v1734_v35 }
 0xaed   :  { %v1746_v37 = vsel %vm40_vm0, %v1738_v36, 0.0 }
 0xaee   :  { %1747 = vadd.xlane.f32.xlu2 %v1746_v37 }
 0xb01   :  { %v1727_v38 = vpop.xlane.xlu2 %1726 }
 0xb02   :  { %v1731_v39 = vmul.f32 %v1727_v38, %v2720_v14 }
 0xb04   :  { %v3081_v40 = vsub.f32 %v1714_v25, %v1731_v39  ;;  %v1718_v41 = vpop.xlane.xlu1 %1717 }
 0xb05   :  { %v1728_v44 = vmul.f32 %v1718_v41, %v2720_v14 }
 0xb06   :  { %v1739_v45 = vmul.f32 %v3081_v40, %v3081_v40 }
 0xb07   :  { %v3086_v46 = vsub.f32 %v1645_v29, %v1728_v44 }
 0xb08   :  { %v1749_v48 = vsel %vm40_vm0, %v1739_v45, 0.0 }
 0xb09   :  { %1750 = vadd.xlane.f32.xlu1 %v1749_v48  ;;  %v1736_v49 = vmul.f32 %v3086_v46, %v3086_v46 }
 0xb0b   :  { %v1721_v50 = vpop.xlane.xlu0 %1720  ;;  %v1740_v51 = vsel %vm40_vm0, %v1736_v49, 0.0 }
 0xb0c   :  { %v1729_v52 = vmul.f32 %v1721_v50, %v2720_v14  ;;  %1741 = vadd.xlane.f32.xlu0 %v1740_v51  ;;  %v2632_v51 = vld [vmem:[%s3351_s0] sm:$0xff] }
 0xb0e   :  { %v3093_v57 = vsub.f32 %v1668_v5, %v1729_v52 }
 0xb10   :  { %v1737_v58 = vmul.f32 %v3093_v57, %v3093_v57 }
 0xb12   :  { %v1743_v1 = vsel %vm40_vm0, %v1737_v58, 0.0 }
 0xb13   :  { %1744 = vadd.xlane.f32.xlu2 %v1743_v1 }
 0xb61   :  { %v1748_v26 = vpop.xlane.xlu2 %1747 }
 0xb62   :  { %v1754_v42 = vmul.f32 %v1748_v26, %v2720_v14 }
 0xb64   :  { %v1758_v60 = vadd.f32 1e-05, %v1754_v42 }
 0xb66   :  { %2590 = vrsqrt.f32 %v1758_v60  ;;  %vm1786_vm11 = vweird.f32 %v1758_v60 }
 0xb6c   :  { %v2591_v55 = vpop.eup %2590 }
 0xb6d   :  { %v1781_v61 = vmul.f32 %v2591_v55, %v1758_v60  ;;  %vm1787_vm10 = vweird.f32 %v2591_v55  ;;  %v2633_v60 = vld [vmem:[%s3351_s0 + $0x8] sm:$0xff] }
 0xb6e   :  { %vm1788_vm12 = vmor %vm1786_vm11, %vm1787_vm10 }
 0xb6f   :  { %v1782_v62 = vmul.f32 %v2591_v55, %v1781_v61 }
 0xb71   :  { %v1783_v20 = vmul.f32 0.5, %v1782_v62 }
 0xb73   :  { %v1784_v63 = vsub.f32 1.5, %v1783_v20 }
 0xb75   :  { %v1785_v53 = vmul.f32 %v2591_v55, %v1784_v63 }
 0xb77   :  { %v1789_v56 = vsel %vm1788_vm12, %v2591_v55, %v1785_v53 }
 0xb78   :  { %v1802_v2 = vmul.f32 %v1789_v56, %v1734_v35 }
 0xb7a   :  { %v1807_v3 = vmul.f32 %v3105_v10, %v1802_v2 }
 0xb7c   :  { %v1751_v33 = vpop.xlane.xlu1 %1750  ;;  %v1812_v54 = vadd.f32 %v3108_v4, %v1807_v3 }
 0xb7d   :  { %v1755_v21 = vmul.f32 %v1751_v33, %v2720_v14 }
 0xb7e   :  { %v3116_v59 = vadd.f32 %v2630_v28, %v1812_v54 }
 0xb7f   :  { %v1759_v6 = vadd.f32 1e-05, %v1755_v21  ;;  %v1742_v7 = vpop.xlane.xlu0 %1741 }
 0xb80   :  { %v1752_v24 = vmul.f32 %v1742_v7, %v2720_v14  ;;  %v1824_v8 = vsel %vm40_vm0, %v3116_v59, 0.0 }
 0xb81   :  { %2592 = vrsqrt.f32 %v1759_v6  ;;  %1825 = vadd.xlane.f32.xlu1 %v1824_v8  ;;  %vm1796_vm15 = vweird.f32 %v1759_v6 }
 0xb82   :  { %v1756_v9 = vadd.f32 1e-05, %v1752_v24 }
 0xb84   :  { %2594 = vrsqrt.f32 %v1756_v9  ;;  %vm1766_vm3 = vweird.f32 %v1756_v9 }
 0xb86   :  { %v1745_v11 = vpop.xlane.xlu2 %1744 }
 0xb87   :  { %v2593_v12 = vpop.eup %2592  ;;  %v1753_v13 = vmul.f32 %v1745_v11, %v2720_v14 }
 0xb88   :  { %v1791_v43 = vmul.f32 %v2593_v12, %v1759_v6  ;;  %vm1797_vm13 = vweird.f32 %v2593_v12 }
 0xb89   :  { %v1757_v0 = vadd.f32 1e-05, %v1753_v13  ;;  %vm1798_vm1 = vmor %vm1796_vm15, %vm1797_vm13  ;;  %v1908_v13 = vld [vmem:[%s3358_s6 + $0x10] sm:$0xff] }
 0xb8a   :  { %v2595_v15 = vpop.eup %2594  ;;  %v1792_v17 = vmul.f32 %v2593_v12, %v1791_v43  ;;  %v1907_v43 = vld [vmem:[%s3358_s6 + $0x8] sm:$0xff] }
 0xb8b   :  { %v1761_v18 = vmul.f32 %v2595_v15, %v1756_v9  ;;  %2596 = vrsqrt.f32 %v1757_v0  ;;  %vm1767_vm2 = vweird.f32 %v2595_v15  ;;  %vm1776_vm6 = vweird.f32 %v1757_v0 }
 0xb8c   :  { %v1793_v19 = vmul.f32 0.5, %v1792_v17  ;;  %vm1768_vm4 = vmor %vm1766_vm3, %vm1767_vm2 }
 0xb8d   :  { %v1762_v23 = vmul.f32 %v2595_v15, %v1761_v18 }
 0xb8e   :  { %v1794_v25 = vsub.f32 1.5, %v1793_v19 }
 0xb8f   :  { %v1763_v22 = vmul.f32 0.5, %v1762_v23 }
 0xb90   :  { %v1795_v27 = vmul.f32 %v2593_v12, %v1794_v25 }
 0xb91   :  { %v2597_v29 = vpop.eup %2596  ;;  %v1764_v16 = vsub.f32 1.5, %v1763_v22 }
 0xb92   :  { %v1799_v30 = vsel %vm1798_vm1, %v2593_v12, %v1795_v27  ;;  %v1771_v5 = vmul.f32 %v2597_v29, %v1757_v0  ;;  %vm1777_vm5 = vweird.f32 %v2597_v29  ;;  %v1909_v12 = vld [vmem:[%s3358_s6 + $0x18] sm:$0xff]  ;;  %v1906_v0 = vld [vmem:[%s3358_s6] sm:$0xff] }
 0xb93   :  { %v1803_v31 = vmul.f32 %v1799_v30, %v3081_v40  ;;  %v1765_v32 = vmul.f32 %v2595_v15, %v1764_v16  ;;  %v2631_v40 = vld [vmem:[%s3351_s0 + $0x18] sm:$0xff]  ;;  %vm1778_vm7 = vmor %vm1776_vm6, %vm1777_vm5  ;;  %1975 = vmatpush.msra.mxu2 %v1909_v12  ;;  %1998 = vmatpush.msra.mxu3 %v1909_v12 }
 0xb94   :  { %v1772_v34 = vmul.f32 %v2597_v29, %v1771_v5  ;;  %1929 = vmatpush.msra.mxu0 %v1909_v12  ;;  %1952 = vmatpush.msra.mxu1 %v1909_v12 }
 0xb95   :  { %v1769_v35 = vsel %vm1768_vm4, %v2595_v15, %v1765_v32  ;;  %v1808_v36 = vmul.f32 %v3105_v10, %v1803_v31  ;;  %1976 = vmatpush.msra.mxu2 %v1908_v13  ;;  %1999 = vmatpush.msra.mxu3 %v1908_v13 }
 0xb96   :  { %v1800_v37 = vmul.f32 %v1769_v35, %v3086_v46  ;;  %v1773_v38 = vmul.f32 0.5, %v1772_v34  ;;  %1930 = vmatpush.msra.mxu0 %v1908_v13  ;;  %1953 = vmatpush.msra.mxu1 %v1908_v13  ;;  %v2171_v13 = vld [vmem:[%s3360_s8 + $0x28] sm:$0xff] }
 0xb97   :  { %v1813_v39 = vadd.f32 %v3108_v4, %v1808_v36  ;;  %1977 = vmatpush.msra.mxu2 %v1907_v43  ;;  %2000 = vmatpush.msra.mxu3 %v1907_v43 }
 0xb98   :  { %v1774_v41 = vsub.f32 1.5, %v1773_v38  ;;  %v1805_v44 = vmul.f32 %v3105_v10, %v1800_v37  ;;  %1931 = vmatpush.msra.mxu0 %v1907_v43  ;;  %1954 = vmatpush.msra.mxu1 %v1907_v43 }
 0xb99   :  { %v3130_v45 = vadd.f32 %v2631_v40, %v1813_v39  ;;  %1978 = vmatpush.msra.mxu2 %v1906_v0  ;;  %2001 = vmatpush.msra.mxu3 %v1906_v0 }
 0xb9a   :  { %v1775_v48 = vmul.f32 %v2597_v29, %v1774_v41  ;;  %v1810_v49 = vadd.f32 %v3108_v4, %v1805_v44  ;;  %1932 = vmatpush.msra.mxu0 %v1906_v0  ;;  %1955 = vmatpush.msra.mxu1 %v1906_v0  ;;  %v2170_v0 = vld [vmem:[%s3360_s8 + $0x20] sm:$0xff] }
 0xb9b   :  { %v1827_v46 = vsel %vm40_vm0, %v3130_v45, 0.0 }
 0xb9c   :  { %v1779_v50 = vsel %vm1778_vm7, %v2597_v29, %v1775_v48  ;;  %1828 = vadd.xlane.f32.xlu0 %v1827_v46  ;;  %v3138_v52 = vadd.f32 %v2632_v51, %v1810_v49 }
 0xb9d   :  { %v1801_v58 = vmul.f32 %v1779_v50, %v3093_v57 }
 0xb9e   :  { %v1818_v1 = vsel %vm40_vm0, %v3138_v52, 0.0 }
 0xb9f   :  { %1819 = vadd.xlane.f32.xlu2 %v1818_v1  ;;  %v1806_v26 = vmul.f32 %v3105_v10, %v1801_v58 }
 0xba1   :  { %v1811_v42 = vadd.f32 %v3108_v4, %v1806_v26 }
 0xba3   :  { %v3148_v55 = vadd.f32 %v2633_v60, %v1811_v42 }
 0xba5   :  { %v1821_v61 = vsel %vm40_vm0, %v3148_v55, 0.0 }
 0xba6   :  { %1822 = vadd.xlane.f32.xlu1 %v1821_v61 }
 0xbf4   :  { %v1826_v62 = vpop.xlane.xlu1 %1825 }
 0xbf5   :  { %v1832_v57 = vmul.f32 %v1826_v62, %v2720_v14 }
 0xbf7   :  { %v1836_v20 = vsub.f32 %v3116_v59, %v1832_v57 }
 0xbf9   :  { %v1840_v63 = vmul.f32 %v1836_v20, %v1836_v20 }
 0xbfb   :  { %v1848_v53 = vsel %vm40_vm0, %v1840_v63, 0.0 }
 0xbfc   :  { %1849 = vadd.xlane.f32.xlu0 %v1848_v53 }
 0xc0f   :  { %v1829_v10 = vpop.xlane.xlu0 %1828 }
 0xc10   :  { %v1833_v56 = vmul.f32 %v1829_v10, %v2720_v14 }
 0xc12   :  { %v3157_v2 = vsub.f32 %v3130_v45, %v1833_v56  ;;  %v1820_v4 = vpop.xlane.xlu2 %1819 }
 0xc13   :  { %v1830_v3 = vmul.f32 %v1820_v4, %v2720_v14 }
 0xc14   :  { %v1841_v33 = vmul.f32 %v3157_v2, %v3157_v2 }
 0xc15   :  { %v3163_v54 = vsub.f32 %v3138_v52, %v1830_v3 }
 0xc16   :  { %v1851_v21 = vsel %vm40_vm0, %v1841_v33, 0.0  ;;  %v3202_v33 = vld [vmem:[%s3357_s7] ss:$0 sm:$0xff] }
 0xc17   :  { %1852 = vadd.xlane.f32.xlu2 %v1851_v21  ;;  %v1838_v28 = vmul.f32 %v3163_v54, %v3163_v54 }
 0xc19   :  { %v1823_v6 = vpop.xlane.xlu1 %1822  ;;  %v1842_v7 = vsel %vm40_vm0, %v1838_v28, 0.0 }
 0xc1a   :  { %v1831_v24 = vmul.f32 %v1823_v6, %v2720_v14  ;;  %1843 = vadd.xlane.f32.xlu1 %v1842_v7 }
 0xc1c   :  { %v3171_v8 = vsub.f32 %v3148_v55, %v1831_v24 }
 0xc1e   :  { %v1839_v9 = vmul.f32 %v3171_v8, %v3171_v8 }
 0xc20   :  { %v1845_v11 = vsel %vm40_vm0, %v1839_v9, 0.0  ;;  %v2172_v9 = vld [vmem:[%s3360_s8 + $0x30] sm:$0xff] }
 0xc21   :  { %1846 = vadd.xlane.f32.xlu0 %v1845_v11 }
 0xc6f   :  { %v1850_v15 = vpop.xlane.xlu0 %1849 }
 0xc70   :  { %v1856_v17 = vmul.f32 %v1850_v15, %v2720_v14 }
 0xc72   :  { %v1860_v18 = vadd.f32 1e-05, %v1856_v17 }
 0xc74   :  { %2598 = vrsqrt.f32 %v1860_v18  ;;  %vm1888_vm9 = vweird.f32 %v1860_v18 }
 0xc7a   :  { %v2599_v19 = vpop.eup %2598 }
 0xc7b   :  { %v1883_v23 = vmul.f32 %v2599_v19, %v1860_v18  ;;  %vm1889_vm8 = vweird.f32 %v2599_v19 }
 0xc7c   :  { %vm1890_vm14 = vmor %vm1888_vm9, %vm1889_vm8 }
 0xc7d   :  { %v1884_v25 = vmul.f32 %v2599_v19, %v1883_v23 }
 0xc7f   :  { %v1885_v22 = vmul.f32 0.5, %v1884_v25 }
 0xc81   :  { %v1886_v27 = vsub.f32 1.5, %v1885_v22  ;;  %v2168_v22 = vld [vmem:[%s3360_s8 + $0x10] sm:$0xff] }
 0xc83   :  { %v1887_v29 = vmul.f32 %v2599_v19, %v1886_v27 }
 0xc85   :  { %v1891_v16 = vsel %vm1890_vm14, %v2599_v19, %v1887_v29  ;;  %v2169_v19 = vld [vmem:[%s3360_s8 + $0x18] sm:$0xff] }
 0xc86   :  { %v1904_v30 = vmul.f32 %v1891_v16, %v1836_v20 }
 0xc88   :  { %2447 = vmatmul.msk.f32.vlgmr.msra.gmra.mxu2 %vm40_vm0, %v1904_v30 }
 0xc8a   :  { %v1853_v5 = vpop.xlane.xlu2 %1852 }
 0xc8b   :  { %v1857_v31 = vmul.f32 %v1853_v5, %v2720_v14  ;;  %v2167_v5 = vld [vmem:[%s3360_s8 + $0x8] sm:$0xff] }
 0xc8d   :  { %v1861_v32 = vadd.f32 1e-05, %v1857_v31  ;;  %v1844_v34 = vpop.xlane.xlu1 %1843 }
 0xc8e   :  { %v1854_v35 = vmul.f32 %v1844_v34, %v2720_v14 }
 0xc8f   :  { %2600 = vrsqrt.f32 %v1861_v32  ;;  %vm1898_vm11 = vweird.f32 %v1861_v32 }
 0xc90   :  { %v1858_v36 = vadd.f32 1e-05, %v1854_v35 }
 0xc92   :  { %2602 = vrsqrt.f32 %v1858_v36  ;;  %vm1868_vm15 = vweird.f32 %v1858_v36 }
 0xc94   :  { %v1847_v37 = vpop.xlane.xlu0 %1846 }
 0xc95   :  { %v2601_v38 = vpop.eup %2600  ;;  %v1855_v39 = vmul.f32 %v1847_v37, %v2720_v14  ;;  %v2166_v37 = vld [vmem:[%s3360_s8] sm:$0xff] }
 0xc96   :  { %v1893_v41 = vmul.f32 %v2601_v38, %v1861_v32  ;;  %vm1899_vm10 = vweird.f32 %v2601_v38 }
 0xc97   :  { %v1859_v44 = vadd.f32 1e-05, %v1855_v39  ;;  %vm1900_vm12 = vmor %vm1898_vm11, %vm1899_vm10 }
 0xc98   :  { %v2603_v40 = vpop.eup %2602  ;;  %v1894_v48 = vmul.f32 %v2601_v38, %v1893_v41 }
 0xc99   :  { %v1863_v49 = vmul.f32 %v2603_v40, %v1858_v36  ;;  %2604 = vrsqrt.f32 %v1859_v44  ;;  %vm1869_vm13 = vweird.f32 %v2603_v40  ;;  %vm1878_vm3 = vweird.f32 %v1859_v44 }
 0xc9a   :  { %v1895_v46 = vmul.f32 0.5, %v1894_v48  ;;  %vm1870_vm1 = vmor %vm1868_vm15, %vm1869_vm13 }
 0xc9b   :  { %v1864_v50 = vmul.f32 %v2603_v40, %v1863_v49 }
 0xc9c   :  { %v1896_v51 = vsub.f32 1.5, %v1895_v46 }
 0xc9d   :  { %v1865_v58 = vmul.f32 0.5, %v1864_v50 }
 0xc9e   :  { %v1897_v1 = vmul.f32 %v2601_v38, %v1896_v51 }
 0xc9f   :  { %v2605_v26 = vpop.eup %2604  ;;  %v1866_v42 = vsub.f32 1.5, %v1865_v58 }
 0xca0   :  { %v1901_v60 = vsel %vm1900_vm12, %v2601_v38, %v1897_v1  ;;  %v1873_v61 = vmul.f32 %v2605_v26, %v1859_v44  ;;  %vm1879_vm2 = vweird.f32 %v2605_v26 }
 0xca1   :  { %v1905_v62 = vmul.f32 %v1901_v60, %v3157_v2  ;;  %v1867_v57 = vmul.f32 %v2603_v40, %v1866_v42  ;;  %vm1880_vm4 = vmor %vm1878_vm3, %vm1879_vm2 }
 0xca2   :  { %v1874_v20 = vmul.f32 %v2605_v26, %v1873_v61 }
 0xca3   :  { %v1871_v63 = vsel %vm1870_vm1, %v2603_v40, %v1867_v57  ;;  %2448 = vmatmul.msk.f32.vlgmr.msra.gmra.mxu3 %vm40_vm0, %v1905_v62  ;;  %vm2178_vm1 = vcmask 523264  }
 0xca4   :  { %v1902_v53 = vmul.f32 %v1871_v63, %v3163_v54  ;;  %v1875_v10 = vmul.f32 0.5, %v1874_v20 }
 0xca6   :  { %v1876_v56 = vsub.f32 1.5, %v1875_v10  ;;  %2445 = vmatmul.msk.f32.vlgmr.msra.gmra.mxu0 %vm40_vm0, %v1902_v53 }
 0xca8   :  { %v1877_v4 = vmul.f32 %v2605_v26, %v1876_v56 }
 0xcaa   :  { %v1881_v3 = vsel %vm1880_vm4, %v2605_v26, %v1877_v4 }
 0xcab   :  { %v1903_v2 = vmul.f32 %v1881_v3, %v3171_v8  ;;  %v2173_v8 = vld [vmem:[%s3360_s8 + $0x38] sm:$0xff] }
 0xcac   :  { %2236 = vmatpush.msrb.mxu2 %v2173_v8  ;;  %2190 = vmatpush.msrb.mxu0 %v2173_v8 }
 0xcad   :  { %2446 = vmatmul.msk.f32.vlgmr.msra.gmra.mxu1 %vm40_vm0, %v1903_v2  ;;  %2259 = vmatpush.msrb.mxu3 %v2173_v8 }
 0xcae   :  { %2213 = vmatpush.msrb.mxu1 %v2173_v8  ;;  %2237 = vmatpush.msrb.mxu2 %v2172_v9 }
 0xcaf   :  { %2191 = vmatpush.msrb.mxu0 %v2172_v9  ;;  %2260 = vmatpush.msrb.mxu3 %v2172_v9 }
 0xcb0   :  { %2214 = vmatpush.msrb.mxu1 %v2172_v9  ;;  %2238 = vmatpush.msrb.mxu2 %v2171_v13 }
 0xcb1   :  { %2192 = vmatpush.msrb.mxu0 %v2171_v13  ;;  %2261 = vmatpush.msrb.mxu3 %v2171_v13 }
 0xcb2   :  { %2215 = vmatpush.msrb.mxu1 %v2171_v13  ;;  %2239 = vmatpush.msrb.mxu2 %v2170_v0 }
 0xcb3   :  { %2193 = vmatpush.msrb.mxu0 %v2170_v0  ;;  %2262 = vmatpush.msrb.mxu3 %v2170_v0 }
 0xcb4   :  { %2216 = vmatpush.msrb.mxu1 %v2170_v0  ;;  %2240 = vmatpush.msrb.mxu2 %v2169_v19 }
 0xcb5   :  { %2194 = vmatpush.msrb.mxu0 %v2169_v19  ;;  %2263 = vmatpush.msrb.mxu3 %v2169_v19 }
 0xcb6   :  { %2217 = vmatpush.msrb.mxu1 %v2169_v19  ;;  %2241 = vmatpush.msrb.mxu2 %v2168_v22 }
 0xcb7   :  { %2195 = vmatpush.msrb.mxu0 %v2168_v22  ;;  %2264 = vmatpush.msrb.mxu3 %v2168_v22 }
 0xcb8   :  { %2218 = vmatpush.msrb.mxu1 %v2168_v22  ;;  %2242 = vmatpush.msrb.mxu2 %v2167_v5 }
 0xcb9   :  { %2196 = vmatpush.msrb.mxu0 %v2167_v5  ;;  %2265 = vmatpush.msrb.mxu3 %v2167_v5 }
 0xcba   :  { %2219 = vmatpush.msrb.mxu1 %v2167_v5  ;;  %2243 = vmatpush.msrb.mxu2 %v2166_v37 }
 0xcbb   :  { %2197 = vmatpush.msrb.mxu0 %v2166_v37  ;;  %2266 = vmatpush.msrb.mxu3 %v2166_v37 }
 0xcbc   :  { %2220 = vmatpush.msrb.mxu1 %v2166_v37 }
 0xd0b   :  { %v1980_v21 = vpop.f32.mrf.mxu2 }
 0xd0c   :  { %v3205_v54 = vadd.f32 %v3202_v33, %v1980_v21 }
 0xd0e   :  { %v3208_v28 = vmul.f32 0.70710677, %v3205_v54 }
 0xd10   :  { %v3211_v6 = vand.u32 2147483647, %v3208_v28  ;;  %vm2148_vm13 = vcmp.ge.f32.partialorder %v3208_v28, 0.0 }
 0xd12   :  { %v2020_v7 = vmul.f32 0.3275911, %v3211_v6  ;;  %v2124_v30 = vsub.f32 0.0, %v3211_v6 }
 0xd14   :  { %v2024_v24 = vadd.f32 1.0, %v2020_v7  ;;  %v2128_v41 = vmul.f32 %v2124_v30, %v3211_v6 }
 0xd16   :  { %2606 = vrcp.f32 %v2024_v24  ;;  %v2067_v15 = vand.u32 2147483648, %v2024_v24  ;;  %v2065_v18 = vand.u32 2147483647, %v2024_v24  ;;  %vm2061_vm6 = vweird.f32 %v2024_v24 }
 0xd17   :  { %v2134_v1 = vmul.f32 1.442695, %v2128_v41 }
 0xd18   :  { %v2068_v27 = vor.u32 1.1754944e-38, %v2067_v15  ;;  %vm2066_vm8 = vcmp.eq.f32.partialorder %v2065_v18, 8.507059e+37 }
 0xd1c   :  { %v2607_v11 = vpop.eup %2606 }
 0xd1d   :  { %v2057_v12 = vmul.f32 %v2607_v11, %v2024_v24  ;;  %vm2062_vm5 = vweird.f32 %v2607_v11 }
 0xd1e   :  { %vm2063_vm7 = vmor %vm2061_vm6, %vm2062_vm5 }
 0xd1f   :  { %v2058_v43 = vsub.f32 1.0, %v2057_v12 }
 0xd21   :  { %v2059_v17 = vmul.f32 %v2607_v11, %v2058_v43 }
 0xd23   :  { %v2060_v23 = vadd.f32 %v2607_v11, %v2059_v17  ;;  %v1934_v25 = vpop.f32.mrf.mxu0 }
 0xd24   :  { %v3233_v29 = vadd.f32 %v3202_v33, %v1934_v25 }
 0xd25   :  { %v2064_v16 = vsel %vm2063_vm7, %v2607_v11, %v2060_v23  ;;  %v2008_v11 = vmul.f32 0.5, %v3205_v54 }
 0xd26   :  { %v2069_v31 = vsel %vm2066_vm8, %v2068_v27, %v2064_v16  ;;  %v3240_v32 = vmul.f32 0.70710677, %v3233_v29  ;;  %v2003_v34 = vpop.f32.mrf.mxu3 }
 0xd27   :  { %v2088_v35 = vmul.f32 1.0614054, %v2069_v31  ;;  %v3243_v36 = vadd.f32 %v3202_v33, %v2003_v34 }
 0xd28   :  { %v3249_v38 = vand.u32 2147483647, %v3240_v32  ;;  %vm2146_vm8 = vcmp.ge.f32.partialorder %v3240_v32, 0.0 }
 0xd29   :  { %v2092_v39 = vadd.f32 -1.4531521, %v2088_v35  ;;  %v3253_v44 = vmul.f32 0.70710677, %v3243_v36 }
 0xd2a   :  { %v2018_v40 = vmul.f32 0.3275911, %v3249_v38  ;;  %v1957_v48 = vpop.f32.mrf.mxu1  ;;  %v2122_v12 = vsub.f32 0.0, %v3249_v38 }
 0xd2b   :  { %v2096_v49 = vmul.f32 %v2092_v39, %v2069_v31  ;;  %v3257_v46 = vand.u32 2147483647, %v3253_v44  ;;  %v3260_v51 = vadd.f32 %v3202_v33, %v1957_v48 }
 0xd2c   :  { %v2022_v50 = vadd.f32 1.0, %v2018_v40  ;;  %v2126_v34 = vmul.f32 %v2122_v12, %v3249_v38 }
 0xd2d   :  { %v2100_v58 = vadd.f32 1.4214138, %v2096_v49  ;;  %v2021_v26 = vmul.f32 0.3275911, %v3257_v46  ;;  %v3264_v61 = vmul.f32 0.70710677, %v3260_v51 }
 0xd2e   :  { %2608 = vrcp.f32 %v2022_v50  ;;  %v2035_v6 = vand.u32 2147483647, %v2022_v50  ;;  %v2037_v7 = vand.u32 2147483648, %v2022_v50  ;;  %vm2031_vm14 = vweird.f32 %v2022_v50 }
 0xd2f   :  { %v2104_v42 = vmul.f32 %v2100_v58, %v2069_v31  ;;  %v2025_v60 = vadd.f32 1.0, %v2021_v26  ;;  %2610 = vpow2.f32 %v2134_v1  ;;  %v3267_v57 = vand.u32 2147483647, %v3264_v61 }
 0xd30   :  { %vm2036_vm11 = vcmp.eq.f32.partialorder %v2035_v6, 8.507059e+37  ;;  %v2038_v15 = vor.u32 1.1754944e-38, %v2037_v7  ;;  %v2125_v37 = vsub.f32 0.0, %v3257_v46 }
 0xd31   :  { %v2108_v62 = vadd.f32 -0.28449672, %v2104_v42  ;;  %2612 = vrcp.f32 %v2025_v60  ;;  %v2019_v53 = vmul.f32 0.3275911, %v3267_v57  ;;  %v2080_v17 = vand.u32 2147483647, %v2025_v60 }
 0xd32   :  { %v2082_v18 = vand.u32 2147483648, %v2025_v60  ;;  %vm2076_vm15 = vweird.f32 %v2025_v60 }
 0xd33   :  { %v2112_v20 = vmul.f32 %v2108_v62, %v2069_v31  ;;  %v3270_v4 = vadd.f32 1.0, %v2019_v53  ;;  %vm2081_vm3 = vcmp.eq.f32.partialorder %v2080_v17, 8.507059e+37  ;;  %v2130_v62 = vmul.f32 1.442695, %v2126_v34 }
 0xd34   :  { %v2609_v63 = vpop.eup %2608  ;;  %v2083_v35 = vor.u32 1.1754944e-38, %v2082_v18 }
 0xd35   :  { %v2116_v10 = vadd.f32 0.2548296, %v2112_v20  ;;  %v2027_v56 = vmul.f32 %v2609_v63, %v2022_v50  ;;  %v2611_v3 = vpop.eup %2610  ;;  %2614 = vrcp.f32 %v3270_v4  ;;  %vm2032_vm9 = vweird.f32 %v2609_v63 }
 0xd36   :  { %vm2033_vm10 = vmor %vm2031_vm14, %vm2032_vm9  ;;  %v2050_v49 = vand.u32 2147483647, %v3270_v4  ;;  %v2052_v50 = vand.u32 2147483648, %v3270_v4  ;;  %vm2046_vm5 = vweird.f32 %v3270_v4  ;;  %v2129_v20 = vmul.f32 %v2125_v37, %v3257_v46 }
 0xd37   :  { %v2120_v2 = vmul.f32 %v2116_v10, %v2069_v31  ;;  %v2028_v33 = vsub.f32 1.0, %v2027_v56  ;;  %v2613_v21 = vpop.eup %2612  ;;  %2616 = vpow2.f32 %v2130_v62  ;;  %vm2149_vm9 = vcmp.ge.f32.partialorder %v3253_v44, 0.0 }
 0xd38   :  { %v2072_v9 = vmul.f32 %v2613_v21, %v2025_v60  ;;  %vm2077_vm12 = vweird.f32 %v2613_v21  ;;  %vm2051_vm7 = vcmp.eq.f32.partialorder %v2050_v49, 8.507059e+37  ;;  %v2136_v7 = vmul.f32 1.442695, %v2129_v20 }
 0xd39   :  { %v2140_v24 = vmul.f32 %v2611_v3, %v2120_v2  ;;  %v2029_v8 = vmul.f32 %v2609_v63, %v2028_v33  ;;  %vm2078_vm2 = vmor %vm2076_vm15, %vm2077_vm12  ;;  %v2123_v2 = vsub.f32 0.0, %v3267_v57  ;;  %vm2147_vm14 = vcmp.ge.f32.partialorder %v3264_v61, 0.0 }
 0xd3a   :  { %v2073_v0 = vsub.f32 1.0, %v2072_v9  ;;  %2618 = vpow2.f32 %v2136_v7 }
 0xd3b   :  { %v2144_v13 = vsub.f32 1.0, %v2140_v24  ;;  %v2030_v43 = vadd.f32 %v2609_v63, %v2029_v8  ;;  %v2615_v22 = vpop.eup %2614  ;;  %v2127_v9 = vmul.f32 %v2123_v2, %v3267_v57 }
 0xd3c   :  { %v2074_v25 = vmul.f32 %v2613_v21, %v2073_v0  ;;  %v2042_v5 = vmul.f32 %v2615_v22, %v3270_v4  ;;  %vm2047_vm4 = vweird.f32 %v2615_v22 }
 0xd3d   :  { %v2152_v19 = vsub.f32 0.0, %v2144_v13  ;;  %v2034_v23 = vsel %vm2033_vm10, %v2609_v63, %v2030_v43  ;;  %vm2048_vm6 = vmor %vm2046_vm5, %vm2047_vm4  ;;  %v2053_v63 = vor.u32 1.1754944e-38, %v2052_v50  ;;  %v2132_v17 = vmul.f32 1.442695, %v2127_v9 }
 0xd3e   :  { %v2039_v27 = vsel %vm2036_vm11, %v2038_v15, %v2034_v23  ;;  %v2075_v30 = vadd.f32 %v2613_v21, %v2074_v25  ;;  %v2043_v40 = vsub.f32 1.0, %v2042_v5  ;;  %v2617_v15 = vpop.eup %2616  ;;  %v2009_v50 = vmul.f32 0.5, %v3243_v36  ;;  %v2515_v36 = vld [vmem:[%s3359_s9] ss:$0 sm:$0xff] }
 0xd3f   :  { %v2156_v54 = vsel %vm2148_vm13, %v2144_v13, %v2152_v19  ;;  %v2086_v16 = vmul.f32 1.0614054, %v2039_v27  ;;  %2620 = vpow2.f32 %v2132_v17 }
 0xd40   :  { %v2160_v31 = vadd.f32 1.0, %v2156_v54  ;;  %v2079_v41 = vsel %vm2078_vm2, %v2613_v21, %v2075_v30  ;;  %v2044_v26 = vmul.f32 %v2615_v22, %v2043_v40 }
 0xd41   :  { %v2090_v39 = vadd.f32 -1.4531521, %v2086_v16  ;;  %v2084_v48 = vsel %vm2081_vm3, %v2083_v35, %v2079_v41  ;;  %v2619_v16 = vpop.eup %2618  ;;  %v2006_v35 = vmul.f32 0.5, %v3233_v29 }
 0xd42   :  { %v2164_v28 = vmul.f32 %v2160_v31, %v2008_v11  ;;  %v2089_v1 = vmul.f32 1.0614054, %v2084_v48  ;;  %v2045_v60 = vadd.f32 %v2615_v22, %v2044_v26 }
 0xd43   :  { %v2094_v58 = vmul.f32 %v2090_v39, %v2039_v27 }
 0xd44   :  { %2451 = vmatmul.msk.f32.vlgmr.msrb.gmra.mxu2 %vm2178_vm1, %v2164_v28  ;;  %v2093_v42 = vadd.f32 -1.4531521, %v2089_v1  ;;  %v2049_v56 = vsel %vm2048_vm6, %v2615_v22, %v2045_v60 }
 0xd45   :  { %v2098_v38 = vadd.f32 1.4214138, %v2094_v58  ;;  %v2054_v3 = vsel %vm2051_vm7, %v2053_v63, %v2049_v56  ;;  %v2621_v40 = vpop.eup %2620 }
 0xd46   :  { %v2097_v10 = vmul.f32 %v2093_v42, %v2084_v48  ;;  %v2087_v6 = vmul.f32 1.0614054, %v2054_v3 }
 0xd47   :  { %v2102_v53 = vmul.f32 %v2098_v38, %v2039_v27  ;;  %v2007_v38 = vmul.f32 0.5, %v3260_v51 }
 0xd48   :  { %v2101_v21 = vadd.f32 1.4214138, %v2097_v10  ;;  %v2091_v4 = vadd.f32 -1.4531521, %v2087_v6 }
 0xd49   :  { %v2106_v33 = vadd.f32 -0.28449672, %v2102_v53 }
 0xd4a   :  { %v2105_v8 = vmul.f32 %v2101_v21, %v2084_v48  ;;  %v2095_v12 = vmul.f32 %v2091_v4, %v2054_v3 }
 0xd4b   :  { %v2110_v24 = vmul.f32 %v2106_v33, %v2039_v27 }
 0xd4c   :  { %v2109_v11 = vadd.f32 -0.28449672, %v2105_v8  ;;  %v2099_v0 = vadd.f32 1.4214138, %v2095_v12 }
 0xd4d   :  { %v2114_v46 = vadd.f32 0.2548296, %v2110_v24 }
 0xd4e   :  { %v2113_v43 = vmul.f32 %v2109_v11, %v2084_v48  ;;  %v2103_v23 = vmul.f32 %v2099_v0, %v2054_v3 }
 0xd4f   :  { %v2118_v13 = vmul.f32 %v2114_v46, %v2039_v27 }
 0xd50   :  { %v2117_v19 = vadd.f32 0.2548296, %v2113_v43  ;;  %v2107_v54 = vadd.f32 -0.28449672, %v2103_v23 }
 0xd51   :  { %v2138_v18 = vmul.f32 %v2617_v15, %v2118_v13 }
 0xd52   :  { %v2121_v22 = vmul.f32 %v2117_v19, %v2084_v48  ;;  %v2111_v57 = vmul.f32 %v2107_v54, %v2054_v3 }
 0xd53   :  { %v2142_v25 = vsub.f32 1.0, %v2138_v18 }
 0xd54   :  { %v2141_v5 = vmul.f32 %v2619_v16, %v2121_v22  ;;  %v2115_v27 = vadd.f32 0.2548296, %v2111_v57 }
 0xd55   :  { %v2150_v30 = vsub.f32 0.0, %v2142_v25 }
 0xd56   :  { %v2145_v34 = vsub.f32 1.0, %v2141_v5  ;;  %v2119_v41 = vmul.f32 %v2115_v27, %v2054_v3 }
 0xd57   :  { %v2154_v31 = vsel %vm2146_vm8, %v2142_v25, %v2150_v30 }
 0xd58   :  { %v2158_v37 = vadd.f32 1.0, %v2154_v31  ;;  %v2153_v39 = vsub.f32 0.0, %v2145_v34  ;;  %v2139_v49 = vmul.f32 %v2621_v40, %v2119_v41  ;;  %v2363_v41 = vperm.slane %v3102_v47, 2 }
 0xd5a   :  { %v2162_v28 = vmul.f32 %v2158_v37, %v2006_v35  ;;  %v2157_v48 = vsel %vm2149_vm9, %v2145_v34, %v2153_v39  ;;  %v2143_v32 = vsub.f32 1.0, %v2139_v49 }
 0xd5b   :  { %v2161_v58 = vadd.f32 1.0, %v2157_v48  ;;  %v2368_v48 = vperm.slane %v3102_v47, 3 }
 0xd5c   :  { %2449 = vmatmul.msk.f32.vlgmr.msrb.gmra.mxu0 %vm2178_vm1, %v2162_v28  ;;  %v2151_v26 = vsub.f32 0.0, %v2143_v32 }
 0xd5d   :  { %v2165_v1 = vmul.f32 %v2161_v58, %v2009_v50 }
 0xd5e   :  { %v2155_v29 = vsel %vm2147_vm14, %v2143_v32, %v2151_v26 }
 0xd5f   :  { %2452 = vmatmul.msk.f32.vlgmr.msrb.gmra.mxu3 %vm2178_vm1, %v2165_v1  ;;  %v2159_v42 = vadd.f32 1.0, %v2155_v29 }
 0xd61   :  { %v2163_v60 = vmul.f32 %v2159_v42, %v2007_v38 }
 0xd63   :  { %2450 = vmatmul.msk.f32.vlgmr.msrb.gmra.mxu1 %vm2178_vm1, %v2163_v60 }
 0xdc7   :  { %v2245_v44 = vpop.f32.mrf.mxu2 }
 0xdc8   :  { %v2246_v62 = vadd.f32 %v2515_v36, %v2245_v44 }
 0xdca   :  { %v2273_v20 = vadd.f32 %v2246_v62, %v3116_v59 }
 0xdcc   :  { %v2281_v63 = vsel %vm40_vm0, %v2273_v20, 0.0 }
 0xdcd   :  { %2282 = vadd.xlane.f32.xlu0 %v2281_v63 }
 0xdd9   :  { %v2199_v61 = vpop.f32.mrf.mxu0 }
 0xdda   :  { %v2200_v53 = vadd.f32 %v2515_v36, %v2199_v61 }
 0xddc   :  { %v2271_v10 = vadd.f32 %v2200_v53, %v3138_v52 }
 0xdde   :  { %v2275_v51 = vsel %vm40_vm0, %v2271_v10, 0.0 }
 0xddf   :  { %2276 = vadd.xlane.f32.xlu2 %v2275_v51 }
 0xde0   :  { %v2222_v56 = vpop.f32.mrf.mxu1 }
 0xde1   :  { %v2223_v2 = vadd.f32 %v2515_v36, %v2222_v56 }
 0xde2   :  { %v2268_v3 = vpop.f32.mrf.mxu3 }
 0xde3   :  { %v2269_v33 = vadd.f32 %v2515_v36, %v2268_v3  ;;  %v2272_v21 = vadd.f32 %v2223_v2, %v3148_v55 }
 0xde5   :  { %v2274_v6 = vadd.f32 %v2269_v33, %v3130_v45  ;;  %v2278_v59 = vsel %vm40_vm0, %v2272_v21, 0.0 }
 0xde6   :  { %2279 = vadd.xlane.f32.xlu1 %v2278_v59 }
 0xde7   :  { %v2284_v7 = vsel %vm40_vm0, %v2274_v6, 0.0 }
 0xde8   :  { %2285 = vadd.xlane.f32.xlu2 %v2284_v7 }
 0xe40   :  { %v2283_v24 = vpop.xlane.xlu0 %2282 }
 0xe41   :  { %v2289_v52 = vmul.f32 %v2283_v24, %v2720_v14 }
 0xe43   :  { %v2293_v8 = vsub.f32 %v2273_v20, %v2289_v52 }
 0xe45   :  { %v2297_v4 = vmul.f32 %v2293_v8, %v2293_v8 }
 0xe47   :  { %v2305_v9 = vsel %vm40_vm0, %v2297_v4, 0.0 }
 0xe48   :  { %2306 = vadd.xlane.f32.xlu2 %v2305_v9 }
 0xe52   :  { %v2277_v46 = vpop.xlane.xlu2 %2276 }
 0xe53   :  { %v2287_v11 = vmul.f32 %v2277_v46, %v2720_v14 }
 0xe55   :  { %v3309_v55 = vsub.f32 %v2271_v10, %v2287_v11 }
 0xe57   :  { %v2295_v45 = vmul.f32 %v3309_v55, %v3309_v55 }
 0xe59   :  { %v2299_v12 = vsel %vm40_vm0, %v2295_v45, 0.0  ;;  %v2280_v13 = vpop.xlane.xlu1 %2279 }
 0xe5a   :  { %2300 = vadd.xlane.f32.xlu1 %v2299_v12  ;;  %v2288_v0 = vmul.f32 %v2280_v13, %v2720_v14 }
 0xe5b   :  { %v2286_v43 = vpop.xlane.xlu2 %2285 }
 0xe5c   :  { %v2290_v15 = vmul.f32 %v2286_v43, %v2720_v14  ;;  %v3316_v17 = vsub.f32 %v2272_v21, %v2288_v0 }
 0xe5e   :  { %v3318_v18 = vsub.f32 %v2274_v6, %v2290_v15  ;;  %v2296_v19 = vmul.f32 %v3316_v17, %v3316_v17 }
 0xe60   :  { %v2298_v23 = vmul.f32 %v3318_v18, %v3318_v18  ;;  %v2302_v25 = vsel %vm40_vm0, %v2296_v19, 0.0 }
 0xe61   :  { %2303 = vadd.xlane.f32.xlu0 %v2302_v25 }
 0xe62   :  { %v2308_v22 = vsel %vm40_vm0, %v2298_v23, 0.0 }
 0xe63   :  { %2309 = vadd.xlane.f32.xlu1 %v2308_v22 }
 0xebb   :  { %v2307_v54 = vpop.xlane.xlu2 %2306 }
 0xebc   :  { %v2313_v16 = vmul.f32 %v2307_v54, %v2720_v14 }
 0xebe   :  { %v2317_v30 = vadd.f32 1e-05, %v2313_v16 }
 0xec0   :  { %2622 = vrsqrt.f32 %v2317_v30  ;;  %vm2345_vm11 = vweird.f32 %v2317_v30 }
 0xec6   :  { %v2623_v5 = vpop.eup %2622 }
 0xec7   :  { %v2340_v57 = vmul.f32 %v2623_v5, %v2317_v30  ;;  %vm2346_vm10 = vweird.f32 %v2623_v5 }
 0xec8   :  { %vm2347_vm12 = vmor %vm2345_vm11, %vm2346_vm10 }
 0xec9   :  { %v2341_v31 = vmul.f32 %v2623_v5, %v2340_v57 }
 0xecb   :  { %v2342_v34 = vmul.f32 0.5, %v2341_v31 }
 0xecd   :  { %v2343_v27 = vsub.f32 1.5, %v2342_v34  ;;  %v2301_v35 = vpop.xlane.xlu1 %2300 }
 0xece   :  { %v2311_v37 = vmul.f32 %v2301_v35, %v2720_v14 }
 0xecf   :  { %v2344_v39 = vmul.f32 %v2623_v5, %v2343_v27 }
 0xed0   :  { %v2315_v40 = vadd.f32 1e-05, %v2311_v37 }
 0xed1   :  { %v2348_v28 = vsel %vm2347_vm12, %v2623_v5, %v2344_v39 }
 0xed2   :  { %v2361_v49 = vmul.f32 %v2348_v28, %v2293_v8  ;;  %2624 = vrsqrt.f32 %v2315_v40  ;;  %vm2325_vm15 = vweird.f32 %v2315_v40 }
 0xed4   :  { %v2366_v50 = vmul.f32 %v2363_v41, %v2361_v49  ;;  %v2304_v32 = vpop.xlane.xlu0 %2303 }
 0xed5   :  { %v2312_v38 = vmul.f32 %v2304_v32, %v2720_v14 }
 0xed6   :  { %v2371_v58 = vadd.f32 %v2368_v48, %v2366_v50  ;;  %v2310_v1 = vpop.xlane.xlu1 %2309 }
 0xed7   :  { %v2314_v42 = vmul.f32 %v2310_v1, %v2720_v14  ;;  %v2316_v36 = vadd.f32 1e-05, %v2312_v38 }
 0xed8   :  { %v2625_v26 = vpop.eup %2624  ;;  %v2455_v29 = vclamps-f32 %v2371_v58, 100.0 }
 0xed9   :  { %v2320_v60 = vmul.f32 %v2625_v26, %v2315_v40  ;;  %v2318_v47 = vadd.f32 1e-05, %v2314_v42  ;;  %2626 = vrsqrt.f32 %v2316_v36  ;;  %vm2326_vm13 = vweird.f32 %v2625_v26 }
 0xeda   :  { %2383 = vst.msk [vmem:[%s3361_s10 + $0x10] sm:$0xff] %vm40_vm0, %v2455_v29  ;;  %vm2327_vm1 = vmor %vm2325_vm15, %vm2326_vm13  ;;  %vm2335_vm4 = vweird.f32 %v2316_v36 }
 0xedb   :  { %v2321_v44 = vmul.f32 %v2625_v26, %v2320_v60  ;;  %2628 = vrsqrt.f32 %v2318_v47  ;;  %vm2355_vm6 = vweird.f32 %v2318_v47 }
 0xedd   :  { %v2322_v62 = vmul.f32 0.5, %v2321_v44 }
 0xedf   :  { %v2323_v20 = vsub.f32 1.5, %v2322_v62  ;;  %v2627_v61 = vpop.eup %2626 }
 0xee0   :  { %v2330_v10 = vmul.f32 %v2627_v61, %v2316_v36  ;;  %vm2336_vm2 = vweird.f32 %v2627_v61 }
 0xee1   :  { %v2324_v63 = vmul.f32 %v2625_v26, %v2323_v20  ;;  %v2629_v53 = vpop.eup %2628  ;;  %vm2337_vm5 = vmor %vm2335_vm4, %vm2336_vm2 }
 0xee2   :  { %v2350_v56 = vmul.f32 %v2629_v53, %v2318_v47  ;;  %v2331_v3 = vmul.f32 %v2627_v61, %v2330_v10  ;;  %vm2356_vm3 = vweird.f32 %v2629_v53 }
 0xee3   :  { %v2328_v14 = vsel %vm2327_vm1, %v2625_v26, %v2324_v63  ;;  %vm2357_vm7 = vmor %vm2355_vm6, %vm2356_vm3 }
 0xee4   :  { %v2359_v51 = vmul.f32 %v2328_v14, %v3309_v55  ;;  %v2351_v33 = vmul.f32 %v2629_v53, %v2350_v56  ;;  %v2332_v21 = vmul.f32 0.5, %v2331_v3 }
 0xee6   :  { %v2364_v2 = vmul.f32 %v2363_v41, %v2359_v51  ;;  %v2352_v59 = vmul.f32 0.5, %v2351_v33  ;;  %v2333_v7 = vsub.f32 1.5, %v2332_v21 }
 0xee8   :  { %v2369_v6 = vadd.f32 %v2368_v48, %v2364_v2  ;;  %v2353_v52 = vsub.f32 1.5, %v2352_v59  ;;  %v2334_v8 = vmul.f32 %v2627_v61, %v2333_v7 }
 0xeea   :  { %v2453_v24 = vclamps-f32 %v2369_v6, 100.0  ;;  %v2354_v4 = vmul.f32 %v2629_v53, %v2353_v52  ;;  %v2338_v9 = vsel %vm2337_vm5, %v2627_v61, %v2334_v8 }
 0xeeb   :  { %v2360_v46 = vmul.f32 %v2338_v9, %v3316_v17 }
 0xeec   :  { %2381 = vst.msk [vmem:[%s3361_s10] sm:$0xff] %vm40_vm0, %v2453_v24  ;;  %v2358_v11 = vsel %vm2357_vm7, %v2629_v53, %v2354_v4 }
 0xeed   :  { %v2362_v55 = vmul.f32 %v2358_v11, %v3318_v18  ;;  %v2365_v45 = vmul.f32 %v2363_v41, %v2360_v46 }
 0xeef   :  { %v2367_v12 = vmul.f32 %v2363_v41, %v2362_v55  ;;  %v2370_v13 = vadd.f32 %v2368_v48, %v2365_v45 }
 0xef1   :  { %v2372_v43 = vadd.f32 %v2368_v48, %v2367_v12  ;;  %v2454_v0 = vclamps-f32 %v2370_v13, 100.0 }
 0xef3   :  { %v2456_v15 = vclamps-f32 %v2372_v43, 100.0  ;;  %2382 = vst.msk [vmem:[%s3361_s10 + $0x8] sm:$0xff] %vm40_vm0, %v2454_v0 }
 0xef5   :  { %2384 = vst.msk [vmem:[%s3361_s10 + $0x18] sm:$0xff] %vm40_vm0, %v2456_v15 }

// kernel: hierarchical_transformer_fwd.9
= control target key start
LH: loop header
LB: loop body
LE: loop exit
PB: predicated region body
PF: predicated region fallthrough
CT: control target
= control target key end

     0   :  { %vm15_vm0 = vcmask 257024   ;;  %v92_v2 = vmov 32.0   ;;  %vm53_vm5 = vcmask 261120   ;;  %s136_s0 = inlined_call_operand.vmem [shape: f32[4,32], index: 0, kind: input, shape index: {}]   ;;  %s137_s2 = inlined_call_operand.vmem [shape: f32[1,128], index: 2, kind: input, shape index: {}]   ;;  %s138_s1 = inlined_call_operand.vmem [shape: f32[32,128], index: 1, kind: input, shape index: {}]   ;;  %s139_s3 = inlined_call_operand.vmem [shape: f32[4,128], index: 3, kind: output, shape index: {}]  }
   0x1   :  { %v14_v0 = vld [vmem:[%s136_s0] sm:$0xf]  ;;  %88 = vrcp.f32 %v92_v2  ;;  %v48_v14 = vld [vmem:[%s138_s1 + $0x18] sm:$0xff]  ;;  %v47_v15 = vld [vmem:[%s138_s1 + $0x10] sm:$0xff] }
   0x2   :  { %v16_v1 = vsel %vm15_vm0, %v14_v0, 0.0  ;;  %69 = vmatpush.msra.mxu0 %v48_v14  ;;  %v46_v16 = vld [vmem:[%s138_s1 + $0x8] sm:$0xff]  ;;  %v45_v17 = vld [vmem:[%s138_s1] sm:$0xff] }
   0x3   :  { %17 = vadd.xlane.f32.xlu0 %v16_v1  ;;  %v87_v29 = vld [vmem:[%s137_s2] ss:$0 sm:$0xff] }
   0x4   :  { %70 = vmatpush.msra.mxu0 %v47_v15 }
   0x6   :  { %71 = vmatpush.msra.mxu0 %v46_v16 }
   0x7   :  { %v89_v3 = vpop.eup %88 }
   0x8   :  { %v20_v4 = vmul.f32 32.0, %v89_v3  ;;  %vm24_vm1 = vweird.f32 %v89_v3  ;;  %72 = vmatpush.msra.mxu0 %v45_v17 }
   0xa   :  { %v21_v5 = vsub.f32 1.0, %v20_v4 }
   0xc   :  { %v22_v6 = vmul.f32 %v89_v3, %v21_v5 }
   0xe   :  { %v23_v7 = vadd.f32 %v89_v3, %v22_v6 }
  0x10   :  { %v25_v8 = vsel %vm24_vm1, %v89_v3, %v23_v7 }
  0x76   :  { %v18_v9 = vpop.xlane.xlu0 %17 }
  0x77   :  { %v26_v10 = vmul.f32 %v25_v8, %v18_v9 }
  0x79   :  { %v27_v11 = vsub.f32 %v14_v0, %v26_v10 }
  0x7b   :  { %v28_v12 = vmul.f32 %v27_v11, %v27_v11 }
  0x7d   :  { %v29_v13 = vsel %vm15_vm0, %v28_v12, 0.0 }
  0x7e   :  { %30 = vadd.xlane.f32.xlu0 %v29_v13 }
  0xf1   :  { %v31_v18 = vpop.xlane.xlu0 %30 }
  0xf2   :  { %v32_v19 = vmul.f32 %v31_v18, %v25_v8 }
  0xf4   :  { %v33_v20 = vadd.f32 1e-05, %v32_v19 }
  0xf6   :  { %90 = vrsqrt.f32 %v33_v20  ;;  %vm40_vm3 = vweird.f32 %v33_v20 }
  0xfc   :  { %v91_v21 = vpop.eup %90 }
  0xfd   :  { %v35_v22 = vmul.f32 %v91_v21, %v33_v20  ;;  %vm41_vm2 = vweird.f32 %v91_v21 }
  0xfe   :  { %vm42_vm4 = vmor %vm40_vm3, %vm41_vm2 }
  0xff   :  { %v36_v23 = vmul.f32 %v91_v21, %v35_v22 }
 0x101   :  { %v37_v24 = vmul.f32 0.5, %v36_v23 }
 0x103   :  { %v38_v25 = vsub.f32 1.5, %v37_v24 }
 0x105   :  { %v39_v26 = vmul.f32 %v91_v21, %v38_v25 }
 0x107   :  { %v43_v27 = vsel %vm42_vm4, %v91_v21, %v39_v26 }
 0x108   :  { %v44_v28 = vmul.f32 %v43_v27, %v27_v11 }
 0x10a   :  { %84 = vmatmul.msk.f32.vlgmr.msra.gmra.mxu0 %vm53_vm5, %v44_v28 }
 0x187   :  { %v74_v30 = vpop.f32.mrf.mxu0 }
 0x188   :  { %v75_v31 = vadd.f32 %v87_v29, %v74_v30 }
 0x18a   :  { %v85_v32 = vclamps-f32 %v75_v31, 100.0 }
 0x18c   :  { %79 = vst [vmem:[%s139_s3] sm:$0xf] %v85_v32 }

</bundles_post_ra>
